<compile_context>
chip_gen: v7x
topology: tpu7x:2x2x1
jax: 0.10.0
libtpu: 0.0.40
codegen_flags: <defaults>
</compile_context>

<pallas_src>
import functools

import jax
import jax.numpy as jnp
from jax import lax
from jax.experimental import pallas as pl
from jax.experimental.pallas import tpu as pltpu


LANE = 128
NEG_SLOPE = 0.01          # nn.LeakyReLU default
BN_EPS = 1e-5             # nn.BatchNorm2d default

# row-tile caps (rows of the output / flattened pixels per grid step)
CONVT_TM_CAP = 256
CONV_TH_CAP = 16
BN_TM_CAP = 512


def _round_up(x, m):
    return (x + m - 1) // m * m


def _pick_row_tile(total, cap, multiple):
    """Largest divisor of `total` that is a multiple of `multiple` and <= cap.

    Falls back to `total` (full-extent block is always a legal block shape)."""
    best = None
    t = multiple
    while t <= min(cap, total):
        if total % t == 0:
            best = t
        t += multiple
    return best if best is not None else total


# ----------------------------------------------------------------------------
# Kernel 1: ConvTranspose2d(k=2, s=2) as a tiled matmul + bias.
#   x:(tm, Cp) @ w:(Cp, 4*Cp) + bias -> (tm, 4*Cp)   (4 = the 2x2 taps)
# ----------------------------------------------------------------------------
def _convt_kernel(x_ref, w_ref, b_ref, o_ref):
    acc = jnp.dot(x_ref[...], w_ref[...], preferred_element_type=jnp.float32)
    o_ref[...] = (acc + b_ref[...]).astype(o_ref.dtype)


def convtranspose_2x2(x_flat, w_mat, bias_row, *, tm):
    m, cin = x_flat.shape
    n = w_mat.shape[1]
    return pl.pallas_call(
        _convt_kernel,
        out_shape=jax.ShapeDtypeStruct((m, n), jnp.float32),
        grid=(m // tm,),
        in_specs=[
            pl.BlockSpec((tm, cin), lambda i: (i, 0)),
            pl.BlockSpec((cin, n), lambda i: (0, 0)),
            pl.BlockSpec((1, n), lambda i: (0, 0)),
        ],
        out_specs=pl.BlockSpec((tm, n), lambda i: (i, 0)),
        compiler_params=pltpu.CompilerParams(
            dimension_semantics=("parallel",)),
    )(x_flat, w_mat, bias_row)


# ----------------------------------------------------------------------------
# Kernel 2: fused 3x3 conv (+ optional input affine+LeakyReLU = previous BN)
#           + per-tile BatchNorm statistics (sum / sum of squares).
#
#   Inputs are the zero-padded feature map (B, H2+2, W2+2, Cin_p), read twice:
#   a (th)-row main block and a 2-row halo block (the first two rows of the
#   next tile), so each grid step sees the full th+2 window it needs.
# ----------------------------------------------------------------------------
def _conv3x3_kernel(*refs, th, h2, w2, cin, fuse_in_act, neg_slope):
    if fuse_in_act:
        (xm_ref, xh_ref, w_ref, a_ref, b_ref,
         o_ref, ssum_ref, ssq_ref) = refs
    else:
        (xm_ref, xh_ref, w_ref,
         o_ref, ssum_ref, ssq_ref) = refs

    i = pl.program_id(1)           # row-tile index
    w2p = w2 + 2

    xm = xm_ref[0].astype(jnp.float32)     # (th, W2+2, Cin_p)
    xh = xh_ref[0].astype(jnp.float32)     # (2,  W2+2, Cin_p)

    if fuse_in_act:
        # Fold the previous layer's BN (per-channel affine) + LeakyReLU into
        # the input read.  Zero-padded border positions must stay exactly 0,
        # so mask them by global (padded) row / col index.
        a = a_ref[...].reshape(1, 1, cin)
        b = b_ref[...].reshape(1, 1, cin)

        def transform(t, row0):
            rows = t.shape[0]
            rg = row0 + lax.broadcasted_iota(jnp.int32, (rows, w2p, cin), 0)
            cg = lax.broadcasted_iota(jnp.int32, (rows, w2p, cin), 1)
            valid = (rg >= 1) & (rg <= h2) & (cg >= 1) & (cg <= w2)
            y = t * a + b
            y = jnp.where(y >= 0, y, y * neg_slope)
            return jnp.where(valid, y, 0.0)

        xm = transform(xm, i * th)
        xh = transform(xh, (i + 1) * th)

    tco = o_ref.shape[-1]
    acc = jnp.zeros((th * w2, tco), jnp.float32)
    for ky in range(3):
        if ky == 0:
            win = xm                                         # rows [0, th)
        else:
            win = jnp.concatenate([xm[ky:], xh[:ky]], axis=0)  # rows [ky, ky+th)
        for kx in range(3):
            xs = win[:, kx:kx + w2, :].reshape(th * w2, cin)
            acc = acc + jnp.dot(xs, w_ref[ky * 3 + kx],
                                preferred_element_type=jnp.float32)

    o_ref[0] = acc.reshape(th, w2, tco).astype(o_ref.dtype)
    # per-tile partial BN statistics (two-level accumulation; f32)
    ssum_ref[0] = jnp.sum(acc, axis=0, keepdims=True)
    ssq_ref[0] = jnp.sum(acc * acc, axis=0, keepdims=True)


def conv3x3_bn_stats(xp, w_taps, *, th, tco, fuse_in_act,
                     a_in=None, b_in=None):
    bsz, h2p, w2p, cin = xp.shape
    h2, w2 = h2p - 2, w2p - 2
    cout = w_taps.shape[-1]
    nh = h2 // th
    nco = cout // tco

    kern = functools.partial(_conv3x3_kernel, th=th, h2=h2, w2=w2, cin=cin,
                             fuse_in_act=fuse_in_act, neg_slope=NEG_SLOPE)

    in_specs = [
        # main row-tile: padded rows [i*th, i*th + th)
        pl.BlockSpec((1, th, w2p, cin), lambda b, i, j: (b, i, 0, 0)),
        # 2-row halo: padded rows [(i+1)*th, (i+1)*th + 2)
        pl.BlockSpec((1, 2, w2p, cin),
                     lambda b, i, j: (b, (i + 1) * (th // 2), 0, 0)),
        # 9 tap weights for output-channel tile j
        pl.BlockSpec((9, cin, tco), lambda b, i, j: (0, 0, j)),
    ]
    args = [xp, xp, w_taps]
    if fuse_in_act:
        in_specs += [pl.BlockSpec((1, cin), lambda b, i, j: (0, 0)),
                     pl.BlockSpec((1, cin), lambda b, i, j: (0, 0))]
        args += [a_in, b_in]

    out_shape = (
        jax.ShapeDtypeStruct((bsz, h2, w2, cout), jnp.float32),
        jax.ShapeDtypeStruct((bsz * nh, 1, cout), jnp.float32),
        jax.ShapeDtypeStruct((bsz * nh, 1, cout), jnp.float32),
    )
    out_specs = (
        pl.BlockSpec((1, th, w2, tco), lambda b, i, j: (b, i, 0, j)),
        pl.BlockSpec((1, 1, tco), lambda b, i, j: (b * nh + i, 0, j)),
        pl.BlockSpec((1, 1, tco), lambda b, i, j: (b * nh + i, 0, j)),
    )

    return pl.pallas_call(
        kern,
        out_shape=out_shape,
        grid=(bsz, nh, nco),
        in_specs=in_specs,
        out_specs=out_specs,
        compiler_params=pltpu.CompilerParams(
            dimension_semantics=("parallel", "parallel", "arbitrary"),
            vmem_limit_bytes=32 * 1024 * 1024),
    )(*args)


# ----------------------------------------------------------------------------
# Kernel 3: tiled BN-apply (per-channel affine) + LeakyReLU for the last layer.
# ----------------------------------------------------------------------------
def _bn_act_kernel(x_ref, a_ref, b_ref, o_ref, *, neg_slope):
    y = x_ref[...].astype(jnp.float32) * a_ref[...] + b_ref[...]
    o_ref[...] = jnp.where(y >= 0, y, y * neg_slope).astype(o_ref.dtype)


def bn_act_apply(x_flat, a, b, *, tm):
    m, c = x_flat.shape
    return pl.pallas_call(
        functools.partial(_bn_act_kernel, neg_slope=NEG_SLOPE),
        out_shape=jax.ShapeDtypeStruct((m, c), jnp.float32),
        grid=(m // tm,),
        in_specs=[pl.BlockSpec((tm, c), lambda i: (i, 0)),
                  pl.BlockSpec((1, c), lambda i: (0, 0)),
                  pl.BlockSpec((1, c), lambda i: (0, 0))],
        out_specs=pl.BlockSpec((tm, c), lambda i: (i, 0)),
        compiler_params=pltpu.CompilerParams(
            dimension_semantics=("parallel",)),
    )(x_flat, a, b)


# ----------------------------------------------------------------------------
# Full Up.forward
# ----------------------------------------------------------------------------
def up_forward(x_nchw, params):
    """Up.forward: (B, iC, H, W) -> (B, oC, 2H, 2W).  BN uses batch statistics
    (training-mode forward of a fresh nn.Module)."""
    b, c_in, h, w = x_nchw.shape
    h2, w2 = 2 * h, 2 * w
    cin_p = _round_up(c_in, LANE)
    mid = params["w1"].shape[0]
    out_c = params["w2"].shape[0]
    mid_p = _round_up(mid, LANE)
    out_p = _round_up(out_c, LANE)

    # ---- layout prep: NCHW -> NHWC, pad channels to lane-dense multiples ----
    x = jnp.transpose(x_nchw, (0, 2, 3, 1)).astype(jnp.float32)
    x = jnp.pad(x, ((0, 0), (0, 0), (0, 0), (0, cin_p - c_in)))

    # ---- pack (zero-padded) weights; trace-time, tiny ------------------------
    wt = params["wt"]                               # (in, out, 2, 2)
    wt_mat = jnp.zeros((cin_p, 4 * cin_p), jnp.float32)
    bt_row = jnp.zeros((1, 4 * cin_p), jnp.float32)
    for t, (ky, kx) in enumerate([(0, 0), (0, 1), (1, 0), (1, 1)]):
        wt_mat = wt_mat.at[:c_in, t * cin_p:t * cin_p + c_in].set(
            wt[:, :, ky, kx])
        bt_row = bt_row.at[0, t * cin_p:t * cin_p + c_in].set(params["bt"])

    def pack_conv_w(wc, ci, ci_p, co, co_p):        # wc: (co, ci, 3, 3)
        taps = jnp.zeros((9, ci_p, co_p), jnp.float32)
        for ky in range(3):
            for kx in range(3):
                taps = taps.at[ky * 3 + kx, :ci, :co].set(wc[:, :, ky, kx].T)
        return taps

    w1_taps = pack_conv_w(params["w1"], c_in, cin_p, mid, mid_p)
    w2_taps = pack_conv_w(params["w2"], mid, mid_p, out_c, out_p)

    g1 = jnp.zeros((1, mid_p), jnp.float32).at[0, :mid].set(params["g1"])
    be1 = jnp.zeros((1, mid_p), jnp.float32).at[0, :mid].set(params["b1"])
    g2 = jnp.zeros((1, out_p), jnp.float32).at[0, :out_c].set(params["g2"])
    be2 = jnp.zeros((1, out_p), jnp.float32).at[0, :out_c].set(params["b2"])

    # ---- stage 1: ConvTranspose2d(k=2, s=2) + bias ---------------------------
    m0 = b * h * w
    tm0 = _pick_row_tile(m0, CONVT_TM_CAP, 8)
    t_out = convtranspose_2x2(x.reshape(m0, cin_p), wt_mat, bt_row, tm=tm0)
    # pixel-shuffle + zero-pad of the conv1 input, fused by XLA into the copy
    # that the padding requires anyway (no standalone relayout pass).
    y = (t_out.reshape(b, h, w, 2, 2, cin_p)
              .transpose(0, 1, 3, 2, 4, 5)
              .reshape(b, h2, w2, cin_p))
    yp = jnp.pad(y, ((0, 0), (1, 1), (1, 1), (0, 0)))

    n_pix = float(b * h2 * w2)
    th = _pick_row_tile(h2, CONV_TH_CAP, 2)

    # ---- stage 2: conv1 (3x3, no bias) + per-tile BN stats -------------------
    c1, s1, q1 = conv3x3_bn_stats(yp, w1_taps, th=th,
                                  tco=min(mid_p, LANE), fuse_in_act=False)
    mean1 = jnp.sum(s1, axis=0) / n_pix
    var1 = jnp.maximum(jnp.sum(q1, axis=0) / n_pix - mean1 * mean1, 0.0)
    a1 = g1 * lax.rsqrt(var1 + BN_EPS)
    sh1 = be1 - mean1 * a1

    # ---- stage 3: conv2 with BN1 + LeakyReLU folded into its input read ------
    c1p = jnp.pad(c1, ((0, 0), (1, 1), (1, 1), (0, 0)))
    c2, s2, q2 = conv3x3_bn_stats(c1p, w2_taps, th=th,
                                  tco=min(out_p, LANE), fuse_in_act=True,
                                  a_in=a1, b_in=sh1)
    mean2 = jnp.sum(s2, axis=0) / n_pix
    var2 = jnp.maximum(jnp.sum(q2, axis=0) / n_pix - mean2 * mean2, 0.0)
    a2 = g2 * lax.rsqrt(var2 + BN_EPS)
    sh2 = be2 - mean2 * a2

    # ---- stage 4: BN2 + LeakyReLU (tiled elementwise) ------------------------
    m2 = b * h2 * w2
    tm2 = _pick_row_tile(m2, BN_TM_CAP, 8)
    o = bn_act_apply(c2.reshape(m2, out_p), a2, sh2, tm=tm2)
    o = o.reshape(b, h2, w2, out_p)[:, :, :, :out_c]
    return jnp.transpose(o, (0, 3, 1, 2))           # back to NCHW


# ----------------------------------------------------------------------------
# Pure-JAX reference (independent path)
# ----------------------------------------------------------------------------
def _bn_lrelu_ref(x_nchw, gamma, beta, eps=BN_EPS, slope=NEG_SLOPE):
    mean = x_nchw.mean(axis=(0, 2, 3), keepdims=True)
    var = x_nchw.var(axis=(0, 2, 3), keepdims=True)
    y = (x_nchw - mean) * lax.rsqrt(var + eps)
    y = y * gamma[None, :, None, None] + beta[None, :, None, None]
    return jnp.where(y >= 0, y, slope * y)


def up_forward_ref(x_nchw, params):
    b, c, h, w = x_nchw.shape
    y = jnp.einsum("bcij,codk->boidjk", x_nchw, params["wt"])
    y = y.reshape(b, c, 2 * h, 2 * w) + params["bt"][None, :, None, None]
    dn = ("NCHW", "OIHW", "NCHW")
    h1 = lax.conv_general_dilated(y, params["w1"], (1, 1), ((1, 1), (1, 1)),
                                  dimension_numbers=dn)
    h1 = _bn_lrelu_ref(h1, params["g1"], params["b1"])
    h2 = lax.conv_general_dilated(h1, params["w2"], (1, 1), ((1, 1), (1, 1)),
                                  dimension_numbers=dn)
    return _bn_lrelu_ref(h2, params["g2"], params["b2"])


# ----------------------------------------------------------------------------
def make_params(key, in_channels, out_channels):
    mid = out_channels  # DoubleConv default: mid_channels = out_channels
    ks = jax.random.split(key, 8)
    s = 0.1
    return {
        "wt": s * jax.random.normal(ks[0], (in_channels, in_channels, 2, 2), jnp.float32),
        "bt": s * jax.random.normal(ks[1], (in_channels,), jnp.float32),
        "w1": s * jax.random.normal(ks[2], (mid, in_channels, 3, 3), jnp.float32),
        "g1": 1.0 + s * jax.random.normal(ks[3], (mid,), jnp.float32),
        "b1": s * jax.random.normal(ks[4], (mid,), jnp.float32),
        "w2": s * jax.random.normal(ks[5], (out_channels, mid, 3, 3), jnp.float32),
        "g2": 1.0 + s * jax.random.normal(ks[6], (out_channels,), jnp.float32),
        "b2": s * jax.random.normal(ks[7], (out_channels,), jnp.float32),
    }


if __name__ == "__main__":
    B, IC, OC, H, W = 2, 4, 8, 16, 16
    key = jax.random.PRNGKey(0)
    kx, kp = jax.random.split(key)
    x = jax.random.normal(kx, (B, IC, H, W), jnp.float32)
    params = make_params(kp, IC, OC)

    out = jax.jit(up_forward)(x, params)
    out = jax.block_until_ready(out)
    assert out.shape == (B, OC, 2 * H, 2 * W), out.shape

    ref = up_forward_ref(x, params)
    err = float(jnp.max(jnp.abs(out - ref)))
    assert jnp.allclose(out, ref, atol=2e-3, rtol=2e-3), err

    print("KERNEL_OK")
</pallas_src>

<mosaic_0001>
module attributes {stable_mosaic.version = 11 : i64} {
  func.func @_convt_kernel(%arg0: i32, %arg1: memref<256x128xf32, #tpu.memory_space<vmem>>, %arg2: memref<128x512xf32, #tpu.memory_space<vmem>>, %arg3: memref<1x512xf32, #tpu.memory_space<vmem>>, %arg4: memref<256x512xf32, #tpu.memory_space<vmem>>) attributes {dimension_semantics = [#tpu.dimension_semantics<parallel>], iteration_bounds = array<i64: 2>, scalar_prefetch = 0 : i64, scratch_operands = 0 : i64, tpu.core_type = #tpu.core_type<tc>, window_params = [{transform_indices = @transform_0, window_bounds = array<i64: 256, 128>}, {pipeline_mode = #tpu.pipeline_mode<synchronous>, transform_indices = @transform_1, window_bounds = array<i64: 128, 512>}, {pipeline_mode = #tpu.pipeline_mode<synchronous>, transform_indices = @transform_2, window_bounds = array<i64: 1, 512>}, {transform_indices = @transform_3, window_bounds = array<i64: 256, 512>}]} {
    %c0 = arith.constant 0 : index
    %c0_0 = arith.constant 0 : index
    %0 = vector.load %arg1[%c0, %c0_0] : memref<256x128xf32, #tpu.memory_space<vmem>>, vector<256x128xf32>
    %c0_1 = arith.constant 0 : index
    %c0_2 = arith.constant 0 : index
    %1 = vector.load %arg2[%c0_1, %c0_2] : memref<128x512xf32, #tpu.memory_space<vmem>>, vector<128x512xf32>
    %cst = arith.constant dense<0.000000e+00> : vector<256x512xf32>
    %2 = tpu.matmul %0, %1, %cst {dimension_numbers = #tpu.dot_dimension_numbers<[1], [0], [0], [1], [0, 0, 1, 1], [], []>} : vector<256x128xf32>, vector<128x512xf32>, vector<256x512xf32> -> vector<256x512xf32>
    %c0_3 = arith.constant 0 : index
    %c0_4 = arith.constant 0 : index
    %3 = vector.load %arg3[%c0_3, %c0_4] : memref<1x512xf32, #tpu.memory_space<vmem>>, vector<1x512xf32>
    %4 = vector.broadcast %3 : vector<1x512xf32> to vector<256x512xf32>
    %5 = arith.addf %2, %4 : vector<256x512xf32>
    %c0_5 = arith.constant 0 : index
    %c0_6 = arith.constant 0 : index
    %6 = vector.load %arg4[%c0_5, %c0_6] : memref<256x512xf32, #tpu.memory_space<vmem>>, vector<256x512xf32>
    tpu.vector_store %arg4[%c0_5, %c0_6], %5 {strides = array<i32>} : memref<256x512xf32, #tpu.memory_space<vmem>>, vector<256x512xf32>,
    return
  }
  func.func @transform_0(%arg0: i32) -> (i32, i32) {
    %c0_i32 = arith.constant 0 : i32
    %c0_i32_0 = arith.constant 0 : i32
    return %arg0, %c0_i32 : i32, i32
  }
  func.func @transform_1(%arg0: i32) -> (i32, i32) {
    %c0_i32 = arith.constant 0 : i32
    %c0_i32_0 = arith.constant 0 : i32
    %c0_i32_1 = arith.constant 0 : i32
    return %c0_i32, %c0_i32_0 : i32, i32
  }
  func.func @transform_2(%arg0: i32) -> (i32, i32) {
    %c0_i32 = arith.constant 0 : i32
    %c0_i32_0 = arith.constant 0 : i32
    %c0_i32_1 = arith.constant 0 : i32
    return %c0_i32, %c0_i32_0 : i32, i32
  }
  func.func @transform_3(%arg0: i32) -> (i32, i32) {
    %c0_i32 = arith.constant 0 : i32
    %c0_i32_0 = arith.constant 0 : i32
    return %arg0, %c0_i32 : i32, i32
  }
}

module attributes {stable_mosaic.version = 11 : i64} {
  func.func @_conv3x3_kernel(%arg0: i32, %arg1: i32, %arg2: i32, %arg3: memref<1x16x34x128xf32, #tpu.memory_space<vmem>>, %arg4: memref<1x2x34x128xf32, #tpu.memory_space<vmem>>, %arg5: memref<9x128x128xf32, #tpu.memory_space<vmem>>, %arg6: memref<1x16x32x128xf32, #tpu.memory_space<vmem>>, %arg7: memref<1x1x128xf32, #tpu.memory_space<vmem>>, %arg8: memref<1x1x128xf32, #tpu.memory_space<vmem>>) attributes {dimension_semantics = [#tpu.dimension_semantics<parallel>, #tpu.dimension_semantics<parallel>, #tpu.dimension_semantics<arbitrary>], iteration_bounds = array<i64: 2, 2, 1>, scalar_prefetch = 0 : i64, scratch_operands = 0 : i64, tpu.core_type = #tpu.core_type<tc>, window_params = [{transform_indices = @transform_0, window_bounds = array<i64: 1, 16, 34, 128>}, {transform_indices = @transform_1, window_bounds = array<i64: 1, 2, 34, 128>}, {transform_indices = @transform_2, window_bounds = array<i64: 9, 128, 128>}, {transform_indices = @transform_3, window_bounds = array<i64: 1, 16, 32, 128>}, {transform_indices = @transform_4, window_bounds = array<i64: 1, 1, 128>}, {transform_indices = @transform_5, window_bounds = array<i64: 1, 1, 128>}]} {
    %c0 = arith.constant 0 : index
    %c0_0 = arith.constant 0 : index
    %c0_1 = arith.constant 0 : index
    %c0_2 = arith.constant 0 : index
    %0 = vector.load %arg3[%c0, %c0_0, %c0_1, %c0_2] : memref<1x16x34x128xf32, #tpu.memory_space<vmem>>, vector<1x16x34x128xf32>
    %1 = vector.shape_cast %0 : vector<1x16x34x128xf32> to vector<16x34x128xf32>
    %c0_3 = arith.constant 0 : index
    %c0_4 = arith.constant 0 : index
    %c0_5 = arith.constant 0 : index
    %c0_6 = arith.constant 0 : index
    %2 = vector.load %arg4[%c0_3, %c0_4, %c0_5, %c0_6] : memref<1x2x34x128xf32, #tpu.memory_space<vmem>>, vector<1x2x34x128xf32>
    %3 = vector.shape_cast %2 : vector<1x2x34x128xf32> to vector<2x34x128xf32>
    %cst = arith.constant 0.000000e+00 : f32
    %4 = vector.broadcast %cst : f32 to vector<512x128xf32>
    %5 = vector.extract_strided_slice %1 {offsets = [0, 0, 0], sizes = [16, 32, 128], strides = [1, 1, 1]} : vector<16x34x128xf32> to vector<16x32x128xf32>
    %6 = vector.shape_cast %5 : vector<16x32x128xf32> to vector<512x128xf32>
    %c0_7 = arith.constant 0 : index
    %c0_8 = arith.constant 0 : index
    %c0_9 = arith.constant 0 : index
    %7 = vector.load %arg5[%c0_7, %c0_8, %c0_9] : memref<9x128x128xf32, #tpu.memory_space<vmem>>, vector<1x128x128xf32>
    %8 = vector.shape_cast %7 : vector<1x128x128xf32> to vector<128x128xf32>
    %cst_10 = arith.constant dense<0.000000e+00> : vector<512x128xf32>
    %9 = tpu.matmul %6, %8, %cst_10 {dimension_numbers = #tpu.dot_dimension_numbers<[1], [0], [0], [1], [0, 0, 1, 1], [], []>} : vector<512x128xf32>, vector<128x128xf32>, vector<512x128xf32> -> vector<512x128xf32>
    %10 = arith.addf %4, %9 : vector<512x128xf32>
    %11 = vector.extract_strided_slice %1 {offsets = [0, 1, 0], sizes = [16, 32, 128], strides = [1, 1, 1]} : vector<16x34x128xf32> to vector<16x32x128xf32>
    %12 = vector.shape_cast %11 : vector<16x32x128xf32> to vector<512x128xf32>
    %c1 = arith.constant 1 : index
    %c0_11 = arith.constant 0 : index
    %c0_12 = arith.constant 0 : index
    %13 = vector.load %arg5[%c1, %c0_11, %c0_12] : memref<9x128x128xf32, #tpu.memory_space<vmem>>, vector<1x128x128xf32>
    %14 = vector.shape_cast %13 : vector<1x128x128xf32> to vector<128x128xf32>
    %cst_13 = arith.constant dense<0.000000e+00> : vector<512x128xf32>
    %15 = tpu.matmul %12, %14, %cst_13 {dimension_numbers = #tpu.dot_dimension_numbers<[1], [0], [0], [1], [0, 0, 1, 1], [], []>} : vector<512x128xf32>, vector<128x128xf32>, vector<512x128xf32> -> vector<512x128xf32>
    %16 = arith.addf %10, %15 : vector<512x128xf32>
    %17 = vector.extract_strided_slice %1 {offsets = [0, 2, 0], sizes = [16, 32, 128], strides = [1, 1, 1]} : vector<16x34x128xf32> to vector<16x32x128xf32>
    %18 = vector.shape_cast %17 : vector<16x32x128xf32> to vector<512x128xf32>
    %c2 = arith.constant 2 : index
    %c0_14 = arith.constant 0 : index
    %c0_15 = arith.constant 0 : index
    %19 = vector.load %arg5[%c2, %c0_14, %c0_15] : memref<9x128x128xf32, #tpu.memory_space<vmem>>, vector<1x128x128xf32>
    %20 = vector.shape_cast %19 : vector<1x128x128xf32> to vector<128x128xf32>
    %cst_16 = arith.constant dense<0.000000e+00> : vector<512x128xf32>
    %21 = tpu.matmul %18, %20, %cst_16 {dimension_numbers = #tpu.dot_dimension_numbers<[1], [0], [0], [1], [0, 0, 1, 1], [], []>} : vector<512x128xf32>, vector<128x128xf32>, vector<512x128xf32> -> vector<512x128xf32>
    %22 = arith.addf %16, %21 : vector<512x128xf32>
    %23 = vector.extract_strided_slice %1 {offsets = [1, 0, 0], sizes = [15, 34, 128], strides = [1, 1, 1]} : vector<16x34x128xf32> to vector<15x34x128xf32>
    %24 = vector.extract_strided_slice %3 {offsets = [0, 0, 0], sizes = [1, 34, 128], strides = [1, 1, 1]} : vector<2x34x128xf32> to vector<1x34x128xf32>
    %25 = tpu.concatenate %23, %24 in 0 : vector<15x34x128xf32>, vector<1x34x128xf32> -> vector<16x34x128xf32>
    %26 = vector.extract_strided_slice %25 {offsets = [0, 0, 0], sizes = [16, 32, 128], strides = [1, 1, 1]} : vector<16x34x128xf32> to vector<16x32x128xf32>
    %27 = vector.shape_cast %26 : vector<16x32x128xf32> to vector<512x128xf32>
    %c3 = arith.constant 3 : index
    %c0_17 = arith.constant 0 : index
    %c0_18 = arith.constant 0 : index
    %28 = vector.load %arg5[%c3, %c0_17, %c0_18] : memref<9x128x128xf32, #tpu.memory_space<vmem>>, vector<1x128x128xf32>
    %29 = vector.shape_cast %28 : vector<1x128x128xf32> to vector<128x128xf32>
    %cst_19 = arith.constant dense<0.000000e+00> : vector<512x128xf32>
    %30 = tpu.matmul %27, %29, %cst_19 {dimension_numbers = #tpu.dot_dimension_numbers<[1], [0], [0], [1], [0, 0, 1, 1], [], []>} : vector<512x128xf32>, vector<128x128xf32>, vector<512x128xf32> -> vector<512x128xf32>
    %31 = arith.addf %22, %30 : vector<512x128xf32>
    %32 = vector.extract_strided_slice %25 {offsets = [0, 1, 0], sizes = [16, 32, 128], strides = [1, 1, 1]} : vector<16x34x128xf32> to vector<16x32x128xf32>
    %33 = vector.shape_cast %32 : vector<16x32x128xf32> to vector<512x128xf32>
    %c4 = arith.constant 4 : index
    %c0_20 = arith.constant 0 : index
    %c0_21 = arith.constant 0 : index
    %34 = vector.load %arg5[%c4, %c0_20, %c0_21] : memref<9x128x128xf32, #tpu.memory_space<vmem>>, vector<1x128x128xf32>
    %35 = vector.shape_cast %34 : vector<1x128x128xf32> to vector<128x128xf32>
    %cst_22 = arith.constant dense<0.000000e+00> : vector<512x128xf32>
    %36 = tpu.matmul %33, %35, %cst_22 {dimension_numbers = #tpu.dot_dimension_numbers<[1], [0], [0], [1], [0, 0, 1, 1], [], []>} : vector<512x128xf32>, vector<128x128xf32>, vector<512x128xf32> -> vector<512x128xf32>
    %37 = arith.addf %31, %36 : vector<512x128xf32>
    %38 = vector.extract_strided_slice %25 {offsets = [0, 2, 0], sizes = [16, 32, 128], strides = [1, 1, 1]} : vector<16x34x128xf32> to vector<16x32x128xf32>
    %39 = vector.shape_cast %38 : vector<16x32x128xf32> to vector<512x128xf32>
    %c5 = arith.constant 5 : index
    %c0_23 = arith.constant 0 : index
    %c0_24 = arith.constant 0 : index
    %40 = vector.load %arg5[%c5, %c0_23, %c0_24] : memref<9x128x128xf32, #tpu.memory_space<vmem>>, vector<1x128x128xf32>
    %41 = vector.shape_cast %40 : vector<1x128x128xf32> to vector<128x128xf32>
    %cst_25 = arith.constant dense<0.000000e+00> : vector<512x128xf32>
    %42 = tpu.matmul %39, %41, %cst_25 {dimension_numbers = #tpu.dot_dimension_numbers<[1], [0], [0], [1], [0, 0, 1, 1], [], []>} : vector<512x128xf32>, vector<128x128xf32>, vector<512x128xf32> -> vector<512x128xf32>
    %43 = arith.addf %37, %42 : vector<512x128xf32>
    %44 = vector.extract_strided_slice %1 {offsets = [2, 0, 0], sizes = [14, 34, 128], strides = [1, 1, 1]} : vector<16x34x128xf32> to vector<14x34x128xf32>
    %45 = tpu.concatenate %44, %3 in 0 : vector<14x34x128xf32>, vector<2x34x128xf32> -> vector<16x34x128xf32>
    %46 = vector.extract_strided_slice %45 {offsets = [0, 0, 0], sizes = [16, 32, 128], strides = [1, 1, 1]} : vector<16x34x128xf32> to vector<16x32x128xf32>
    %47 = vector.shape_cast %46 : vector<16x32x128xf32> to vector<512x128xf32>
    %c6 = arith.constant 6 : index
    %c0_26 = arith.constant 0 : index
    %c0_27 = arith.constant 0 : index
    %48 = vector.load %arg5[%c6, %c0_26, %c0_27] : memref<9x128x128xf32, #tpu.memory_space<vmem>>, vector<1x128x128xf32>
    %49 = vector.shape_cast %48 : vector<1x128x128xf32> to vector<128x128xf32>
    %cst_28 = arith.constant dense<0.000000e+00> : vector<512x128xf32>
    %50 = tpu.matmul %47, %49, %cst_28 {dimension_numbers = #tpu.dot_dimension_numbers<[1], [0], [0], [1], [0, 0, 1, 1], [], []>} : vector<512x128xf32>, vector<128x128xf32>, vector<512x128xf32> -> vector<512x128xf32>
    %51 = arith.addf %43, %50 : vector<512x128xf32>
    %52 = vector.extract_strided_slice %45 {offsets = [0, 1, 0], sizes = [16, 32, 128], strides = [1, 1, 1]} : vector<16x34x128xf32> to vector<16x32x128xf32>
    %53 = vector.shape_cast %52 : vector<16x32x128xf32> to vector<512x128xf32>
    %c7 = arith.constant 7 : index
    %c0_29 = arith.constant 0 : index
    %c0_30 = arith.constant 0 : index
    %54 = vector.load %arg5[%c7, %c0_29, %c0_30] : memref<9x128x128xf32, #tpu.memory_space<vmem>>, vector<1x128x128xf32>
    %55 = vector.shape_cast %54 : vector<1x128x128xf32> to vector<128x128xf32>
    %cst_31 = arith.constant dense<0.000000e+00> : vector<512x128xf32>
    %56 = tpu.matmul %53, %55, %cst_31 {dimension_numbers = #tpu.dot_dimension_numbers<[1], [0], [0], [1], [0, 0, 1, 1], [], []>} : vector<512x128xf32>, vector<128x128xf32>, vector<512x128xf32> -> vector<512x128xf32>
    %57 = arith.addf %51, %56 : vector<512x128xf32>
    %58 = vector.extract_strided_slice %45 {offsets = [0, 2, 0], sizes = [16, 32, 128], strides = [1, 1, 1]} : vector<16x34x128xf32> to vector<16x32x128xf32>
    %59 = vector.shape_cast %58 : vector<16x32x128xf32> to vector<512x128xf32>
    %c8 = arith.constant 8 : index
    %c0_32 = arith.constant 0 : index
    %c0_33 = arith.constant 0 : index
    %60 = vector.load %arg5[%c8, %c0_32, %c0_33] : memref<9x128x128xf32, #tpu.memory_space<vmem>>, vector<1x128x128xf32>
    %61 = vector.shape_cast %60 : vector<1x128x128xf32> to vector<128x128xf32>
    %cst_34 = arith.constant dense<0.000000e+00> : vector<512x128xf32>
    %62 = tpu.matmul %59, %61, %cst_34 {dimension_numbers = #tpu.dot_dimension_numbers<[1], [0], [0], [1], [0, 0, 1, 1], [], []>} : vector<512x128xf32>, vector<128x128xf32>, vector<512x128xf32> -> vector<512x128xf32>
    %63 = arith.addf %57, %62 : vector<512x128xf32>
    %64 = vector.shape_cast %63 : vector<512x128xf32> to vector<16x32x128xf32>
    %c0_35 = arith.constant 0 : index
    %c0_36 = arith.constant 0 : index
    %c0_37 = arith.constant 0 : index
    %c0_38 = arith.constant 0 : index
    %65 = vector.load %arg6[%c0_35, %c0_36, %c0_37, %c0_38] : memref<1x16x32x128xf32, #tpu.memory_space<vmem>>, vector<1x16x32x128xf32>
    %66 = vector.shape_cast %65 : vector<1x16x32x128xf32> to vector<16x32x128xf32>
    %67 = vector.shape_cast %64 : vector<16x32x128xf32> to vector<1x16x32x128xf32>
    tpu.vector_store %arg6[%c0_35, %c0_36, %c0_37, %c0_38], %67 {strides = array<i32>} : memref<1x16x32x128xf32, #tpu.memory_space<vmem>>, vector<1x16x32x128xf32>,
    %cst_39 = arith.constant dense<0.000000e+00> : vector<128xf32>
    %68 = vector.multi_reduction <add>, %63, %cst_39 [0] : vector<512x128xf32> to vector<128xf32>
    %69 = vector.shape_cast %68 : vector<128xf32> to vector<1x128xf32>
    %c0_40 = arith.constant 0 : index
    %c0_41 = arith.constant 0 : index
    %c0_42 = arith.constant 0 : index
    %70 = vector.load %arg7[%c0_40, %c0_41, %c0_42] : memref<1x1x128xf32, #tpu.memory_space<vmem>>, vector<1x1x128xf32>
    %71 = vector.shape_cast %70 : vector<1x1x128xf32> to vector<1x128xf32>
    %72 = vector.shape_cast %69 : vector<1x128xf32> to vector<1x1x128xf32>
    tpu.vector_store %arg7[%c0_40, %c0_41, %c0_42], %72 {strides = array<i32>} : memref<1x1x128xf32, #tpu.memory_space<vmem>>, vector<1x1x128xf32>,
    %73 = arith.mulf %63, %63 : vector<512x128xf32>
    %cst_43 = arith.constant dense<0.000000e+00> : vector<128xf32>
    %74 = vector.multi_reduction <add>, %73, %cst_43 [0] : vector<512x128xf32> to vector<128xf32>
    %75 = vector.shape_cast %74 : vector<128xf32> to vector<1x128xf32>
    %c0_44 = arith.constant 0 : index
    %c0_45 = arith.constant 0 : index
    %c0_46 = arith.constant 0 : index
    %76 = vector.load %arg8[%c0_44, %c0_45, %c0_46] : memref<1x1x128xf32, #tpu.memory_space<vmem>>, vector<1x1x128xf32>
    %77 = vector.shape_cast %76 : vector<1x1x128xf32> to vector<1x128xf32>
    %78 = vector.shape_cast %75 : vector<1x128xf32> to vector<1x1x128xf32>
    tpu.vector_store %arg8[%c0_44, %c0_45, %c0_46], %78 {strides = array<i32>} : memref<1x1x128xf32, #tpu.memory_space<vmem>>, vector<1x1x128xf32>,
    return
  }
  func.func @transform_0(%arg0: i32, %arg1: i32, %arg2: i32) -> (i32, i32, i32, i32) {
    %c0_i32 = arith.constant 0 : i32
    %c0_i32_0 = arith.constant 0 : i32
    %c0_i32_1 = arith.constant 0 : i32
    return %arg0, %arg1, %c0_i32, %c0_i32_0 : i32, i32, i32, i32
  }
  func.func @transform_1(%arg0: i32, %arg1: i32, %arg2: i32) -> (i32, i32, i32, i32) {
    %c1_i32 = arith.constant 1 : i32
    %0 = arith.addi %arg1, %c1_i32 : i32
    %c8_i32 = arith.constant 8 : i32
    %1 = arith.muli %0, %c8_i32 : i32
    %c0_i32 = arith.constant 0 : i32
    %c0_i32_0 = arith.constant 0 : i32
    %c0_i32_1 = arith.constant 0 : i32
    return %arg0, %1, %c0_i32, %c0_i32_0 : i32, i32, i32, i32
  }
  func.func @transform_2(%arg0: i32, %arg1: i32, %arg2: i32) -> (i32, i32, i32) {
    %c0_i32 = arith.constant 0 : i32
    %c0_i32_0 = arith.constant 0 : i32
    %c0_i32_1 = arith.constant 0 : i32
    return %c0_i32, %c0_i32_0, %arg2 : i32, i32, i32
  }
  func.func @transform_3(%arg0: i32, %arg1: i32, %arg2: i32) -> (i32, i32, i32, i32) {
    %c0_i32 = arith.constant 0 : i32
    %c0_i32_0 = arith.constant 0 : i32
    return %arg0, %arg1, %c0_i32, %arg2 : i32, i32, i32, i32
  }
  func.func @transform_4(%arg0: i32, %arg1: i32, %arg2: i32) -> (i32, i32, i32) {
    %c2_i32 = arith.constant 2 : i32
    %0 = arith.muli %arg0, %c2_i32 : i32
    %1 = arith.addi %0, %arg1 : i32
    %c0_i32 = arith.constant 0 : i32
    %c0_i32_0 = arith.constant 0 : i32
    return %1, %c0_i32, %arg2 : i32, i32, i32
  }
  func.func @transform_5(%arg0: i32, %arg1: i32, %arg2: i32) -> (i32, i32, i32) {
    %c2_i32 = arith.constant 2 : i32
    %0 = arith.muli %arg0, %c2_i32 : i32
    %1 = arith.addi %0, %arg1 : i32
    %c0_i32 = arith.constant 0 : i32
    %c0_i32_0 = arith.constant 0 : i32
    return %1, %c0_i32, %arg2 : i32, i32, i32
  }
}

module attributes {stable_mosaic.version = 11 : i64} {
  func.func @_bn_act_kernel(%arg0: i32, %arg1: memref<512x128xf32, #tpu.memory_space<vmem>>, %arg2: memref<1x128xf32, #tpu.memory_space<vmem>>, %arg3: memref<1x128xf32, #tpu.memory_space<vmem>>, %arg4: memref<512x128xf32, #tpu.memory_space<vmem>>) attributes {dimension_semantics = [#tpu.dimension_semantics<parallel>], iteration_bounds = array<i64: 4>, scalar_prefetch = 0 : i64, scratch_operands = 0 : i64, tpu.core_type = #tpu.core_type<tc>, window_params = [{transform_indices = @transform_0, window_bounds = array<i64: 512, 128>}, {pipeline_mode = #tpu.pipeline_mode<synchronous>, transform_indices = @transform_1, window_bounds = array<i64: 1, 128>}, {pipeline_mode = #tpu.pipeline_mode<synchronous>, transform_indices = @transform_2, window_bounds = array<i64: 1, 128>}, {transform_indices = @transform_3, window_bounds = array<i64: 512, 128>}]} {
    %c0 = arith.constant 0 : index
    %c0_0 = arith.constant 0 : index
    %0 = vector.load %arg1[%c0, %c0_0] : memref<512x128xf32, #tpu.memory_space<vmem>>, vector<512x128xf32>
    %c0_1 = arith.constant 0 : index
    %c0_2 = arith.constant 0 : index
    %1 = vector.load %arg2[%c0_1, %c0_2] : memref<1x128xf32, #tpu.memory_space<vmem>>, vector<1x128xf32>
    %2 = vector.broadcast %1 : vector<1x128xf32> to vector<512x128xf32>
    %3 = arith.mulf %0, %2 : vector<512x128xf32>
    %c0_3 = arith.constant 0 : index
    %c0_4 = arith.constant 0 : index
    %4 = vector.load %arg3[%c0_3, %c0_4] : memref<1x128xf32, #tpu.memory_space<vmem>>, vector<1x128xf32>
    %5 = vector.broadcast %4 : vector<1x128xf32> to vector<512x128xf32>
    %6 = arith.addf %3, %5 : vector<512x128xf32>
    %cst = arith.constant 0.000000e+00 : f32
    %7 = vector.broadcast %cst : f32 to vector<512x128xf32>
    %8 = arith.cmpf oge, %6, %7 : vector<512x128xf32>
    %cst_5 = arith.constant 0.00999999977 : f32
    %9 = vector.broadcast %cst_5 : f32 to vector<512x128xf32>
    %10 = arith.mulf %6, %9 : vector<512x128xf32>
    %11 = arith.select %8, %6, %10 : vector<512x128xi1>, vector<512x128xf32>
    %c0_6 = arith.constant 0 : index
    %c0_7 = arith.constant 0 : index
    %12 = vector.load %arg4[%c0_6, %c0_7] : memref<512x128xf32, #tpu.memory_space<vmem>>, vector<512x128xf32>
    tpu.vector_store %arg4[%c0_6, %c0_7], %11 {strides = array<i32>} : memref<512x128xf32, #tpu.memory_space<vmem>>, vector<512x128xf32>,
    return
  }
  func.func @transform_0(%arg0: i32) -> (i32, i32) {
    %c0_i32 = arith.constant 0 : i32
    %c0_i32_0 = arith.constant 0 : i32
    return %arg0, %c0_i32 : i32, i32
  }
  func.func @transform_1(%arg0: i32) -> (i32, i32) {
    %c0_i32 = arith.constant 0 : i32
    %c0_i32_0 = arith.constant 0 : i32
    %c0_i32_1 = arith.constant 0 : i32
    return %c0_i32, %c0_i32_0 : i32, i32
  }
  func.func @transform_2(%arg0: i32) -> (i32, i32) {
    %c0_i32 = arith.constant 0 : i32
    %c0_i32_0 = arith.constant 0 : i32
    %c0_i32_1 = arith.constant 0 : i32
    return %c0_i32, %c0_i32_0 : i32, i32
  }
  func.func @transform_3(%arg0: i32) -> (i32, i32) {
    %c0_i32 = arith.constant 0 : i32
    %c0_i32_0 = arith.constant 0 : i32
    return %arg0, %c0_i32 : i32, i32
  }
}

module attributes {stable_mosaic.version = 11 : i64} {
  func.func @_conv3x3_kernel(%arg0: i32, %arg1: i32, %arg2: i32, %arg3: memref<1x16x34x128xf32, #tpu.memory_space<vmem>>, %arg4: memref<1x2x34x128xf32, #tpu.memory_space<vmem>>, %arg5: memref<9x128x128xf32, #tpu.memory_space<vmem>>, %arg6: memref<1x128xf32, #tpu.memory_space<vmem>>, %arg7: memref<1x128xf32, #tpu.memory_space<vmem>>, %arg8: memref<1x16x32x128xf32, #tpu.memory_space<vmem>>, %arg9: memref<1x1x128xf32, #tpu.memory_space<vmem>>, %arg10: memref<1x1x128xf32, #tpu.memory_space<vmem>>) attributes {dimension_semantics = [#tpu.dimension_semantics<parallel>, #tpu.dimension_semantics<parallel>, #tpu.dimension_semantics<arbitrary>], iteration_bounds = array<i64: 2, 2, 1>, scalar_prefetch = 0 : i64, scratch_operands = 0 : i64, tpu.core_type = #tpu.core_type<tc>, window_params = [{transform_indices = @transform_0, window_bounds = array<i64: 1, 16, 34, 128>}, {transform_indices = @transform_1, window_bounds = array<i64: 1, 2, 34, 128>}, {transform_indices = @transform_2, window_bounds = array<i64: 9, 128, 128>}, {pipeline_mode = #tpu.pipeline_mode<synchronous>, transform_indices = @transform_3, window_bounds = array<i64: 1, 128>}, {pipeline_mode = #tpu.pipeline_mode<synchronous>, transform_indices = @transform_4, window_bounds = array<i64: 1, 128>}, {transform_indices = @transform_5, window_bounds = array<i64: 1, 16, 32, 128>}, {transform_indices = @transform_6, window_bounds = array<i64: 1, 1, 128>}, {transform_indices = @transform_7, window_bounds = array<i64: 1, 1, 128>}]} {
    %c0 = arith.constant 0 : index
    %c0_0 = arith.constant 0 : index
    %c0_1 = arith.constant 0 : index
    %c0_2 = arith.constant 0 : index
    %0 = vector.load %arg3[%c0, %c0_0, %c0_1, %c0_2] : memref<1x16x34x128xf32, #tpu.memory_space<vmem>>, vector<1x16x34x128xf32>
    %1 = vector.shape_cast %0 : vector<1x16x34x128xf32> to vector<16x34x128xf32>
    %c0_3 = arith.constant 0 : index
    %c0_4 = arith.constant 0 : index
    %c0_5 = arith.constant 0 : index
    %c0_6 = arith.constant 0 : index
    %2 = vector.load %arg4[%c0_3, %c0_4, %c0_5, %c0_6] : memref<1x2x34x128xf32, #tpu.memory_space<vmem>>, vector<1x2x34x128xf32>
    %3 = vector.shape_cast %2 : vector<1x2x34x128xf32> to vector<2x34x128xf32>
    %c0_7 = arith.constant 0 : index
    %c0_8 = arith.constant 0 : index
    %4 = vector.load %arg6[%c0_7, %c0_8] : memref<1x128xf32, #tpu.memory_space<vmem>>, vector<1x128xf32>
    %5 = vector.shape_cast %4 : vector<1x128xf32> to vector<1x1x128xf32>
    %c0_9 = arith.constant 0 : index
    %c0_10 = arith.constant 0 : index
    %6 = vector.load %arg7[%c0_9, %c0_10] : memref<1x128xf32, #tpu.memory_space<vmem>>, vector<1x128xf32>
    %7 = vector.shape_cast %6 : vector<1x128xf32> to vector<1x1x128xf32>
    %c16_i32 = arith.constant 16 : i32
    %8 = arith.muli %arg1, %c16_i32 : i32
    %9 = tpu.iota {dimensions = array<i32: 0>} : vector<16x34x128xi32>
    %10 = vector.broadcast %8 : i32 to vector<16x34x128xi32>
    %11 = arith.addi %10, %9 : vector<16x34x128xi32>
    %12 = tpu.iota {dimensions = array<i32: 1>} : vector<16x34x128xi32>
    %c1_i32 = arith.constant 1 : i32
    %13 = vector.broadcast %c1_i32 : i32 to vector<16x34x128xi32>
    %14 = arith.cmpi sge, %11, %13 : vector<16x34x128xi32>
    %c32_i32 = arith.constant 32 : i32
    %15 = vector.broadcast %c32_i32 : i32 to vector<16x34x128xi32>
    %16 = arith.cmpi sle, %11, %15 : vector<16x34x128xi32>
    %17 = arith.andi %14, %16 : vector<16x34x128xi1>
    %c1_i32_11 = arith.constant 1 : i32
    %18 = vector.broadcast %c1_i32_11 : i32 to vector<16x34x128xi32>
    %19 = arith.cmpi sge, %12, %18 : vector<16x34x128xi32>
    %20 = arith.andi %17, %19 : vector<16x34x128xi1>
    %c32_i32_12 = arith.constant 32 : i32
    %21 = vector.broadcast %c32_i32_12 : i32 to vector<16x34x128xi32>
    %22 = arith.cmpi sle, %12, %21 : vector<16x34x128xi32>
    %23 = arith.andi %20, %22 : vector<16x34x128xi1>
    %24 = vector.broadcast %5 : vector<1x1x128xf32> to vector<16x34x128xf32>
    %25 = arith.mulf %1, %24 : vector<16x34x128xf32>
    %26 = vector.broadcast %7 : vector<1x1x128xf32> to vector<16x34x128xf32>
    %27 = arith.addf %25, %26 : vector<16x34x128xf32>
    %cst = arith.constant 0.000000e+00 : f32
    %28 = vector.broadcast %cst : f32 to vector<16x34x128xf32>
    %29 = arith.cmpf oge, %27, %28 : vector<16x34x128xf32>
    %cst_13 = arith.constant 0.00999999977 : f32
    %30 = vector.broadcast %cst_13 : f32 to vector<16x34x128xf32>
    %31 = arith.mulf %27, %30 : vector<16x34x128xf32>
    %32 = arith.select %29, %27, %31 : vector<16x34x128xi1>, vector<16x34x128xf32>
    %cst_14 = arith.constant 0.000000e+00 : f32
    %33 = vector.broadcast %cst_14 : f32 to vector<16x34x128xf32>
    %34 = arith.select %23, %32, %33 : vector<16x34x128xi1>, vector<16x34x128xf32>
    %c1_i32_15 = arith.constant 1 : i32
    %35 = arith.addi %arg1, %c1_i32_15 : i32
    %c16_i32_16 = arith.constant 16 : i32
    %36 = arith.muli %35, %c16_i32_16 : i32
    %37 = tpu.iota {dimensions = array<i32: 0>} : vector<2x34x128xi32>
    %38 = vector.broadcast %36 : i32 to vector<2x34x128xi32>
    %39 = arith.addi %38, %37 : vector<2x34x128xi32>
    %40 = tpu.iota {dimensions = array<i32: 1>} : vector<2x34x128xi32>
    %c1_i32_17 = arith.constant 1 : i32
    %41 = vector.broadcast %c1_i32_17 : i32 to vector<2x34x128xi32>
    %42 = arith.cmpi sge, %39, %41 : vector<2x34x128xi32>
    %c32_i32_18 = arith.constant 32 : i32
    %43 = vector.broadcast %c32_i32_18 : i32 to vector<2x34x128xi32>
    %44 = arith.cmpi sle, %39, %43 : vector<2x34x128xi32>
    %45 = arith.andi %42, %44 : vector<2x34x128xi1>
    %c1_i32_19 = arith.constant 1 : i32
    %46 = vector.broadcast %c1_i32_19 : i32 to vector<2x34x128xi32>
    %47 = arith.cmpi sge, %40, %46 : vector<2x34x128xi32>
    %48 = arith.andi %45, %47 : vector<2x34x128xi1>
    %c32_i32_20 = arith.constant 32 : i32
    %49 = vector.broadcast %c32_i32_20 : i32 to vector<2x34x128xi32>
    %50 = arith.cmpi sle, %40, %49 : vector<2x34x128xi32>
    %51 = arith.andi %48, %50 : vector<2x34x128xi1>
    %52 = vector.broadcast %5 : vector<1x1x128xf32> to vector<2x34x128xf32>
    %53 = arith.mulf %3, %52 : vector<2x34x128xf32>
    %54 = vector.broadcast %7 : vector<1x1x128xf32> to vector<2x34x128xf32>
    %55 = arith.addf %53, %54 : vector<2x34x128xf32>
    %cst_21 = arith.constant 0.000000e+00 : f32
    %56 = vector.broadcast %cst_21 : f32 to vector<2x34x128xf32>
    %57 = arith.cmpf oge, %55, %56 : vector<2x34x128xf32>
    %cst_22 = arith.constant 0.00999999977 : f32
    %58 = vector.broadcast %cst_22 : f32 to vector<2x34x128xf32>
    %59 = arith.mulf %55, %58 : vector<2x34x128xf32>
    %60 = arith.select %57, %55, %59 : vector<2x34x128xi1>, vector<2x34x128xf32>
    %cst_23 = arith.constant 0.000000e+00 : f32
    %61 = vector.broadcast %cst_23 : f32 to vector<2x34x128xf32>
    %62 = arith.select %51, %60, %61 : vector<2x34x128xi1>, vector<2x34x128xf32>
    %cst_24 = arith.constant 0.000000e+00 : f32
    %63 = vector.broadcast %cst_24 : f32 to vector<512x128xf32>
    %64 = vector.extract_strided_slice %34 {offsets = [0, 0, 0], sizes = [16, 32, 128], strides = [1, 1, 1]} : vector<16x34x128xf32> to vector<16x32x128xf32>
    %65 = vector.shape_cast %64 : vector<16x32x128xf32> to vector<512x128xf32>
    %c0_25 = arith.constant 0 : index
    %c0_26 = arith.constant 0 : index
    %c0_27 = arith.constant 0 : index
    %66 = vector.load %arg5[%c0_25, %c0_26, %c0_27] : memref<9x128x128xf32, #tpu.memory_space<vmem>>, vector<1x128x128xf32>
    %67 = vector.shape_cast %66 : vector<1x128x128xf32> to vector<128x128xf32>
    %cst_28 = arith.constant dense<0.000000e+00> : vector<512x128xf32>
    %68 = tpu.matmul %65, %67, %cst_28 {dimension_numbers = #tpu.dot_dimension_numbers<[1], [0], [0], [1], [0, 0, 1, 1], [], []>} : vector<512x128xf32>, vector<128x128xf32>, vector<512x128xf32> -> vector<512x128xf32>
    %69 = arith.addf %63, %68 : vector<512x128xf32>
    %70 = vector.extract_strided_slice %34 {offsets = [0, 1, 0], sizes = [16, 32, 128], strides = [1, 1, 1]} : vector<16x34x128xf32> to vector<16x32x128xf32>
    %71 = vector.shape_cast %70 : vector<16x32x128xf32> to vector<512x128xf32>
    %c1 = arith.constant 1 : index
    %c0_29 = arith.constant 0 : index
    %c0_30 = arith.constant 0 : index
    %72 = vector.load %arg5[%c1, %c0_29, %c0_30] : memref<9x128x128xf32, #tpu.memory_space<vmem>>, vector<1x128x128xf32>
    %73 = vector.shape_cast %72 : vector<1x128x128xf32> to vector<128x128xf32>
    %cst_31 = arith.constant dense<0.000000e+00> : vector<512x128xf32>
    %74 = tpu.matmul %71, %73, %cst_31 {dimension_numbers = #tpu.dot_dimension_numbers<[1], [0], [0], [1], [0, 0, 1, 1], [], []>} : vector<512x128xf32>, vector<128x128xf32>, vector<512x128xf32> -> vector<512x128xf32>
    %75 = arith.addf %69, %74 : vector<512x128xf32>
    %76 = vector.extract_strided_slice %34 {offsets = [0, 2, 0], sizes = [16, 32, 128], strides = [1, 1, 1]} : vector<16x34x128xf32> to vector<16x32x128xf32>
    %77 = vector.shape_cast %76 : vector<16x32x128xf32> to vector<512x128xf32>
    %c2 = arith.constant 2 : index
    %c0_32 = arith.constant 0 : index
    %c0_33 = arith.constant 0 : index
    %78 = vector.load %arg5[%c2, %c0_32, %c0_33] : memref<9x128x128xf32, #tpu.memory_space<vmem>>, vector<1x128x128xf32>
    %79 = vector.shape_cast %78 : vector<1x128x128xf32> to vector<128x128xf32>
    %cst_34 = arith.constant dense<0.000000e+00> : vector<512x128xf32>
    %80 = tpu.matmul %77, %79, %cst_34 {dimension_numbers = #tpu.dot_dimension_numbers<[1], [0], [0], [1], [0, 0, 1, 1], [], []>} : vector<512x128xf32>, vector<128x128xf32>, vector<512x128xf32> -> vector<512x128xf32>
    %81 = arith.addf %75, %80 : vector<512x128xf32>
    %82 = vector.extract_strided_slice %34 {offsets = [1, 0, 0], sizes = [15, 34, 128], strides = [1, 1, 1]} : vector<16x34x128xf32> to vector<15x34x128xf32>
    %83 = vector.extract_strided_slice %62 {offsets = [0, 0, 0], sizes = [1, 34, 128], strides = [1, 1, 1]} : vector<2x34x128xf32> to vector<1x34x128xf32>
    %84 = tpu.concatenate %82, %83 in 0 : vector<15x34x128xf32>, vector<1x34x128xf32> -> vector<16x34x128xf32>
    %85 = vector.extract_strided_slice %84 {offsets = [0, 0, 0], sizes = [16, 32, 128], strides = [1, 1, 1]} : vector<16x34x128xf32> to vector<16x32x128xf32>
    %86 = vector.shape_cast %85 : vector<16x32x128xf32> to vector<512x128xf32>
    %c3 = arith.constant 3 : index
    %c0_35 = arith.constant 0 : index
    %c0_36 = arith.constant 0 : index
    %87 = vector.load %arg5[%c3, %c0_35, %c0_36] : memref<9x128x128xf32, #tpu.memory_space<vmem>>, vector<1x128x128xf32>
    %88 = vector.shape_cast %87 : vector<1x128x128xf32> to vector<128x128xf32>
    %cst_37 = arith.constant dense<0.000000e+00> : vector<512x128xf32>
    %89 = tpu.matmul %86, %88, %cst_37 {dimension_numbers = #tpu.dot_dimension_numbers<[1], [0], [0], [1], [0, 0, 1, 1], [], []>} : vector<512x128xf32>, vector<128x128xf32>, vector<512x128xf32> -> vector<512x128xf32>
    %90 = arith.addf %81, %89 : vector<512x128xf32>
    %91 = vector.extract_strided_slice %84 {offsets = [0, 1, 0], sizes = [16, 32, 128], strides = [1, 1, 1]} : vector<16x34x128xf32> to vector<16x32x128xf32>
    %92 = vector.shape_cast %91 : vector<16x32x128xf32> to vector<512x128xf32>
    %c4 = arith.constant 4 : index
    %c0_38 = arith.constant 0 : index
    %c0_39 = arith.constant 0 : index
    %93 = vector.load %arg5[%c4, %c0_38, %c0_39] : memref<9x128x128xf32, #tpu.memory_space<vmem>>, vector<1x128x128xf32>
    %94 = vector.shape_cast %93 : vector<1x128x128xf32> to vector<128x128xf32>
    %cst_40 = arith.constant dense<0.000000e+00> : vector<512x128xf32>
    %95 = tpu.matmul %92, %94, %cst_40 {dimension_numbers = #tpu.dot_dimension_numbers<[1], [0], [0], [1], [0, 0, 1, 1], [], []>} : vector<512x128xf32>, vector<128x128xf32>, vector<512x128xf32> -> vector<512x128xf32>
    %96 = arith.addf %90, %95 : vector<512x128xf32>
    %97 = vector.extract_strided_slice %84 {offsets = [0, 2, 0], sizes = [16, 32, 128], strides = [1, 1, 1]} : vector<16x34x128xf32> to vector<16x32x128xf32>
    %98 = vector.shape_cast %97 : vector<16x32x128xf32> to vector<512x128xf32>
    %c5 = arith.constant 5 : index
    %c0_41 = arith.constant 0 : index
    %c0_42 = arith.constant 0 : index
    %99 = vector.load %arg5[%c5, %c0_41, %c0_42] : memref<9x128x128xf32, #tpu.memory_space<vmem>>, vector<1x128x128xf32>
    %100 = vector.shape_cast %99 : vector<1x128x128xf32> to vector<128x128xf32>
    %cst_43 = arith.constant dense<0.000000e+00> : vector<512x128xf32>
    %101 = tpu.matmul %98, %100, %cst_43 {dimension_numbers = #tpu.dot_dimension_numbers<[1], [0], [0], [1], [0, 0, 1, 1], [], []>} : vector<512x128xf32>, vector<128x128xf32>, vector<512x128xf32> -> vector<512x128xf32>
    %102 = arith.addf %96, %101 : vector<512x128xf32>
    %103 = vector.extract_strided_slice %34 {offsets = [2, 0, 0], sizes = [14, 34, 128], strides = [1, 1, 1]} : vector<16x34x128xf32> to vector<14x34x128xf32>
    %104 = tpu.concatenate %103, %62 in 0 : vector<14x34x128xf32>, vector<2x34x128xf32> -> vector<16x34x128xf32>
    %105 = vector.extract_strided_slice %104 {offsets = [0, 0, 0], sizes = [16, 32, 128], strides = [1, 1, 1]} : vector<16x34x128xf32> to vector<16x32x128xf32>
    %106 = vector.shape_cast %105 : vector<16x32x128xf32> to vector<512x128xf32>
    %c6 = arith.constant 6 : index
    %c0_44 = arith.constant 0 : index
    %c0_45 = arith.constant 0 : index
    %107 = vector.load %arg5[%c6, %c0_44, %c0_45] : memref<9x128x128xf32, #tpu.memory_space<vmem>>, vector<1x128x128xf32>
    %108 = vector.shape_cast %107 : vector<1x128x128xf32> to vector<128x128xf32>
    %cst_46 = arith.constant dense<0.000000e+00> : vector<512x128xf32>
    %109 = tpu.matmul %106, %108, %cst_46 {dimension_numbers = #tpu.dot_dimension_numbers<[1], [0], [0], [1], [0, 0, 1, 1], [], []>} : vector<512x128xf32>, vector<128x128xf32>, vector<512x128xf32> -> vector<512x128xf32>
    %110 = arith.addf %102, %109 : vector<512x128xf32>
    %111 = vector.extract_strided_slice %104 {offsets = [0, 1, 0], sizes = [16, 32, 128], strides = [1, 1, 1]} : vector<16x34x128xf32> to vector<16x32x128xf32>
    %112 = vector.shape_cast %111 : vector<16x32x128xf32> to vector<512x128xf32>
    %c7 = arith.constant 7 : index
    %c0_47 = arith.constant 0 : index
    %c0_48 = arith.constant 0 : index
    %113 = vector.load %arg5[%c7, %c0_47, %c0_48] : memref<9x128x128xf32, #tpu.memory_space<vmem>>, vector<1x128x128xf32>
    %114 = vector.shape_cast %113 : vector<1x128x128xf32> to vector<128x128xf32>
    %cst_49 = arith.constant dense<0.000000e+00> : vector<512x128xf32>
    %115 = tpu.matmul %112, %114, %cst_49 {dimension_numbers = #tpu.dot_dimension_numbers<[1], [0], [0], [1], [0, 0, 1, 1], [], []>} : vector<512x128xf32>, vector<128x128xf32>, vector<512x128xf32> -> vector<512x128xf32>
    %116 = arith.addf %110, %115 : vector<512x128xf32>
    %117 = vector.extract_strided_slice %104 {offsets = [0, 2, 0], sizes = [16, 32, 128], strides = [1, 1, 1]} : vector<16x34x128xf32> to vector<16x32x128xf32>
    %118 = vector.shape_cast %117 : vector<16x32x128xf32> to vector<512x128xf32>
    %c8 = arith.constant 8 : index
    %c0_50 = arith.constant 0 : index
    %c0_51 = arith.constant 0 : index
    %119 = vector.load %arg5[%c8, %c0_50, %c0_51] : memref<9x128x128xf32, #tpu.memory_space<vmem>>, vector<1x128x128xf32>
    %120 = vector.shape_cast %119 : vector<1x128x128xf32> to vector<128x128xf32>
    %cst_52 = arith.constant dense<0.000000e+00> : vector<512x128xf32>
    %121 = tpu.matmul %118, %120, %cst_52 {dimension_numbers = #tpu.dot_dimension_numbers<[1], [0], [0], [1], [0, 0, 1, 1], [], []>} : vector<512x128xf32>, vector<128x128xf32>, vector<512x128xf32> -> vector<512x128xf32>
    %122 = arith.addf %116, %121 : vector<512x128xf32>
    %123 = vector.shape_cast %122 : vector<512x128xf32> to vector<16x32x128xf32>
    %c0_53 = arith.constant 0 : index
    %c0_54 = arith.constant 0 : index
    %c0_55 = arith.constant 0 : index
    %c0_56 = arith.constant 0 : index
    %124 = vector.load %arg8[%c0_53, %c0_54, %c0_55, %c0_56] : memref<1x16x32x128xf32, #tpu.memory_space<vmem>>, vector<1x16x32x128xf32>
    %125 = vector.shape_cast %124 : vector<1x16x32x128xf32> to vector<16x32x128xf32>
    %126 = vector.shape_cast %123 : vector<16x32x128xf32> to vector<1x16x32x128xf32>
    tpu.vector_store %arg8[%c0_53, %c0_54, %c0_55, %c0_56], %126 {strides = array<i32>} : memref<1x16x32x128xf32, #tpu.memory_space<vmem>>, vector<1x16x32x128xf32>,
    %cst_57 = arith.constant dense<0.000000e+00> : vector<128xf32>
    %127 = vector.multi_reduction <add>, %122, %cst_57 [0] : vector<512x128xf32> to vector<128xf32>
    %128 = vector.shape_cast %127 : vector<128xf32> to vector<1x128xf32>
    %c0_58 = arith.constant 0 : index
    %c0_59 = arith.constant 0 : index
    %c0_60 = arith.constant 0 : index
    %129 = vector.load %arg9[%c0_58, %c0_59, %c0_60] : memref<1x1x128xf32, #tpu.memory_space<vmem>>, vector<1x1x128xf32>
    %130 = vector.shape_cast %129 : vector<1x1x128xf32> to vector<1x128xf32>
    %131 = vector.shape_cast %128 : vector<1x128xf32> to vector<1x1x128xf32>
    tpu.vector_store %arg9[%c0_58, %c0_59, %c0_60], %131 {strides = array<i32>} : memref<1x1x128xf32, #tpu.memory_space<vmem>>, vector<1x1x128xf32>,
    %132 = arith.mulf %122, %122 : vector<512x128xf32>
    %cst_61 = arith.constant dense<0.000000e+00> : vector<128xf32>
    %133 = vector.multi_reduction <add>, %132, %cst_61 [0] : vector<512x128xf32> to vector<128xf32>
    %134 = vector.shape_cast %133 : vector<128xf32> to vector<1x128xf32>
    %c0_62 = arith.constant 0 : index
    %c0_63 = arith.constant 0 : index
    %c0_64 = arith.constant 0 : index
    %135 = vector.load %arg10[%c0_62, %c0_63, %c0_64] : memref<1x1x128xf32, #tpu.memory_space<vmem>>, vector<1x1x128xf32>
    %136 = vector.shape_cast %135 : vector<1x1x128xf32> to vector<1x128xf32>
    %137 = vector.shape_cast %134 : vector<1x128xf32> to vector<1x1x128xf32>
    tpu.vector_store %arg10[%c0_62, %c0_63, %c0_64], %137 {strides = array<i32>} : memref<1x1x128xf32, #tpu.memory_space<vmem>>, vector<1x1x128xf32>,
    return
  }
  func.func @transform_0(%arg0: i32, %arg1: i32, %arg2: i32) -> (i32, i32, i32, i32) {
    %c0_i32 = arith.constant 0 : i32
    %c0_i32_0 = arith.constant 0 : i32
    %c0_i32_1 = arith.constant 0 : i32
    return %arg0, %arg1, %c0_i32, %c0_i32_0 : i32, i32, i32, i32
  }
  func.func @transform_1(%arg0: i32, %arg1: i32, %arg2: i32) -> (i32, i32, i32, i32) {
    %c1_i32 = arith.constant 1 : i32
    %0 = arith.addi %arg1, %c1_i32 : i32
    %c8_i32 = arith.constant 8 : i32
    %1 = arith.muli %0, %c8_i32 : i32
    %c0_i32 = arith.constant 0 : i32
    %c0_i32_0 = arith.constant 0 : i32
    %c0_i32_1 = arith.constant 0 : i32
    return %arg0, %1, %c0_i32, %c0_i32_0 : i32, i32, i32, i32
  }
  func.func @transform_2(%arg0: i32, %arg1: i32, %arg2: i32) -> (i32, i32, i32) {
    %c0_i32 = arith.constant 0 : i32
    %c0_i32_0 = arith.constant 0 : i32
    %c0_i32_1 = arith.constant 0 : i32
    return %c0_i32, %c0_i32_0, %arg2 : i32, i32, i32
  }
  func.func @transform_3(%arg0: i32, %arg1: i32, %arg2: i32) -> (i32, i32) {
    %c0_i32 = arith.constant 0 : i32
    %c0_i32_0 = arith.constant 0 : i32
    %c0_i32_1 = arith.constant 0 : i32
    return %c0_i32, %c0_i32_0 : i32, i32
  }
  func.func @transform_4(%arg0: i32, %arg1: i32, %arg2: i32) -> (i32, i32) {
    %c0_i32 = arith.constant 0 : i32
    %c0_i32_0 = arith.constant 0 : i32
    %c0_i32_1 = arith.constant 0 : i32
    return %c0_i32, %c0_i32_0 : i32, i32
  }
  func.func @transform_5(%arg0: i32, %arg1: i32, %arg2: i32) -> (i32, i32, i32, i32) {
    %c0_i32 = arith.constant 0 : i32
    %c0_i32_0 = arith.constant 0 : i32
    return %arg0, %arg1, %c0_i32, %arg2 : i32, i32, i32, i32
  }
  func.func @transform_6(%arg0: i32, %arg1: i32, %arg2: i32) -> (i32, i32, i32) {
    %c2_i32 = arith.constant 2 : i32
    %0 = arith.muli %arg0, %c2_i32 : i32
    %1 = arith.addi %0, %arg1 : i32
    %c0_i32 = arith.constant 0 : i32
    %c0_i32_0 = arith.constant 0 : i32
    return %1, %c0_i32, %arg2 : i32, i32, i32
  }
  func.func @transform_7(%arg0: i32, %arg1: i32, %arg2: i32) -> (i32, i32, i32) {
    %c2_i32 = arith.constant 2 : i32
    %0 = arith.muli %arg0, %c2_i32 : i32
    %1 = arith.addi %0, %arg1 : i32
    %c0_i32 = arith.constant 0 : i32
    %c0_i32_0 = arith.constant 0 : i32
    return %1, %c0_i32, %arg2 : i32, i32, i32
  }
}

</mosaic_0001>

<bundles_post_ra>
// kernel: up_forward.4
= control target key start
LH: loop header
LB: loop body
LE: loop exit
PB: predicated region body
PF: predicated region fallthrough
CT: control target
= control target key end

     0   :  { %s1109_s12 = smov 0   ;;  %s1697_s0 = inlined_call_operand.vmem [shape: f32[512,128], index: 0, kind: input, shape index: {}]   ;;  %s1698_s1 = inlined_call_operand.vmem [shape: f32[128,512], index: 1, kind: input, shape index: {}]   ;;  %s1699_s2 = inlined_call_operand.vmem [shape: f32[1,512], index: 2, kind: input, shape index: {}]   ;;  %s1700_s3 = inlined_call_operand.vmem [shape: f32[512,512], index: 3, kind: output, shape index: {}]  }
   0x1 LB: > { %s994_s13 = sadd.s32 4294967295, %s1086_s12   ;;  %p998_p0 = scmp.ge.s32.totalorder %s1086_s12, 1  ;;  %s1086_s12 = sphi %s1109_s12, %s13_s12  }
   0x2   : > { %p138_p1 = scmp.lt.s32.totalorder %s1086_s12, 3 }
   0x4   : > { %p139_p2 = pnand %p998_p0, %p138_p1 }
   0x5   : > { %v209_v0 = vld [vmem:[%s1698_s1 + $0x8] sm:$0xff] (!%p139_p2)  ;;  %v211_v2 = vld [vmem:[%s1698_s1 + $0x18] sm:$0xff] (!%p139_p2)  ;;  %v208_v5 = vld [vmem:[%s1698_s1] sm:$0xff] (!%p139_p2)  ;;  %v1088_v7 = vmov (!%p139_p2), 0.0   ;;  %s1253_s27 = sshll.u32 (!%p139_p2), %s994_s13, 5 }
   0x6   : > { %142 = sbr.rel (%p139_p2) target bundleno = 382 (0x17e), region = 32  ;;  %v213_v1 = vld [vmem:[%s1698_s1 + $0x28] sm:$0xff] (!%p139_p2)  ;;  %v215_v4 = vld [vmem:[%s1698_s1 + $0x38] sm:$0xff] (!%p139_p2)  ;;  %v212_v6 = vld [vmem:[%s1698_s1 + $0x20] sm:$0xff] (!%p139_p2)  ;;  %358 = vmatprep.mubr.f32.mxu0 (!%p139_p2), %v1088_v7  ;;  %615 = vmatprep.mubr.f32.mxu1 (!%p139_p2), %v1088_v7  ;;  %p164_p3 = scmp.lt.s32.totalorder (!%p139_p2), %s1253_s27, 63 }
   0x7   : > { %v1007_v3 = vpack.c.bf16 (!%p139_p2), %v213_v1, %v209_v0  ;;  %v1039_v8 = vpack.c.bf16 (!%p139_p2), %v215_v4, %v211_v2  ;;  %v1009_v9 = vpack.c.bf16 (!%p139_p2), %v212_v6, %v208_v5  ;;  %v210_v10 = vld [vmem:[%s1698_s1 + $0x10] sm:$0xff] (!%p139_p2)  ;;  %v217_v12 = vld [vmem:[%s1698_s1 + $0x48] sm:$0xff] (!%p139_p2)  ;;  %v219_v15 = vld [vmem:[%s1698_s1 + $0x58] sm:$0xff] (!%p139_p2) }
   0x8   : > { %v214_v11 = vld [vmem:[%s1698_s1 + $0x30] sm:$0xff] (!%p139_p2)  ;;  %v221_v14 = vld [vmem:[%s1698_s1 + $0x68] sm:$0xff] (!%p139_p2)  ;;  %v223_v16 = vld [vmem:[%s1698_s1 + $0x78] sm:$0xff] (!%p139_p2) }
   0x9   : > { %1008 = vmatprep.subr.bf16.mxu0 (!%p139_p2), %v1007_v3  ;;  %v1041_v13 = vpack.c.bf16 (!%p139_p2), %v214_v11, %v210_v10  ;;  %1040 = vmatprep.subr.bf16.mxu1 (!%p139_p2), %v1039_v8  ;;  %v1011_v17 = vpack.c.bf16 (!%p139_p2), %v221_v14, %v217_v12  ;;  %v1043_v18 = vpack.c.bf16 (!%p139_p2), %v223_v16, %v219_v15  ;;  %v216_v19 = vld [vmem:[%s1698_s1 + $0x40] sm:$0xff] (!%p139_p2)  ;;  %v218_v21 = vld [vmem:[%s1698_s1 + $0x50] sm:$0xff] (!%p139_p2)  ;;  %v225_v24 = vld [vmem:[%s1698_s1 + $0x88] sm:$0xff] (!%p139_p2) }
   0xa   : > { %1010 = vmatpush1.bf16.msra.mxu0 (!%p139_p2), %v1009_v9  ;;  %v220_v20 = vld [vmem:[%s1698_s1 + $0x60] sm:$0xff] (!%p139_p2)  ;;  %v222_v23 = vld [vmem:[%s1698_s1 + $0x70] sm:$0xff] (!%p139_p2)  ;;  %v229_v25 = vld [vmem:[%s1698_s1 + $0xa8] sm:$0xff] (!%p139_p2) }
   0xb   : > { %1042 = vmatpush1.bf16.msra.mxu1 (!%p139_p2), %v1041_v13  ;;  %v1013_v22 = vpack.c.bf16 (!%p139_p2), %v220_v20, %v216_v19  ;;  %1012 = vmatprep.subr.bf16.mxu0 (!%p139_p2), %v1011_v17  ;;  %v1045_v26 = vpack.c.bf16 (!%p139_p2), %v222_v23, %v218_v21  ;;  %v1015_v27 = vpack.c.bf16 (!%p139_p2), %v229_v25, %v225_v24  ;;  %v227_v28 = vld [vmem:[%s1698_s1 + $0x98] sm:$0xff] (!%p139_p2)  ;;  %v224_v30 = vld [vmem:[%s1698_s1 + $0x80] sm:$0xff] (!%p139_p2)  ;;  %v226_v33 = vld [vmem:[%s1698_s1 + $0x90] sm:$0xff] (!%p139_p2) }
   0xc   : > { %1044 = vmatprep.subr.bf16.mxu1 (!%p139_p2), %v1043_v18  ;;  %v231_v29 = vld [vmem:[%s1698_s1 + $0xb8] sm:$0xff] (!%p139_p2)  ;;  %v228_v32 = vld [vmem:[%s1698_s1 + $0xa0] sm:$0xff] (!%p139_p2)  ;;  %v230_v34 = vld [vmem:[%s1698_s1 + $0xb0] sm:$0xff] (!%p139_p2) }
   0xd   : > { %v1047_v31 = vpack.c.bf16 %v231_v29, %v227_v28  ;;  %v1017_v35 = vpack.c.bf16 %v228_v32, %v224_v30  ;;  %v233_v36 = vld [vmem:[%s1698_s1 + $0xc8] sm:$0xff]  ;;  %v235_v38 = vld [vmem:[%s1698_s1 + $0xd8] sm:$0xff]  ;;  %v1049_v39 = vpack.c.bf16 %v230_v34, %v226_v33  ;;  %v232_v42 = vld [vmem:[%s1698_s1 + $0xc0] sm:$0xff]  ;;  %s1702_s27 = smov (!%p164_p3, %s1253_s27), 63 }
   0xe   : > { %1014 = vmatpush1.bf16.msra.mxu0 %v1013_v22  ;;  %v237_v37 = vld [vmem:[%s1698_s1 + $0xe8] sm:$0xff]  ;;  %v239_v41 = vld [vmem:[%s1698_s1 + $0xf8] sm:$0xff]  ;;  %v236_v43 = vld [vmem:[%s1698_s1 + $0xe0] sm:$0xff]  ;;  %s1000_s17 = sshll.u32 %s1702_s27, 3  ;;  %s1006_s23 = sshll.u32 %s1702_s27, 5 }
   0xf   : > { %1046 = vmatpush1.bf16.msra.mxu1 %v1045_v26  ;;  %1016 = vmatprep.subr.bf16.mxu0 %v1015_v27  ;;  %v1019_v40 = vpack.c.bf16 %v237_v37, %v233_v36  ;;  %v1051_v44 = vpack.c.bf16 %v239_v41, %v235_v38  ;;  %v234_v45 = vld [vmem:[%s1698_s1 + $0xd0] sm:$0xff]  ;;  %v241_v47 = vld [vmem:[%s1698_s1 + $0x108] sm:$0xff]  ;;  %v243_v49 = vld [vmem:[%s1698_s1 + $0x118] sm:$0xff]  ;;  %v1021_v51 = vpack.c.bf16 %v236_v43, %v232_v42  ;;  %s1325_s20 = scalar_lea.vmem %s1697_s0, %s1000_s17  ;;  %s1436_s26 = scalar_lea.vmem %s1700_s3, %s1006_s23 }
  0x10   : > { %1048 = vmatprep.subr.bf16.mxu1 %v1047_v31  ;;  %v238_v46 = vld [vmem:[%s1698_s1 + $0xf0] sm:$0xff]  ;;  %v245_v48 = vld [vmem:[%s1698_s1 + $0x128] sm:$0xff]  ;;  %v247_v50 = vld [vmem:[%s1698_s1 + $0x138] sm:$0xff] }
  0x11   : > { %v1053_v52 = vpack.c.bf16 %v238_v46, %v234_v45  ;;  %v1023_v53 = vpack.c.bf16 %v245_v48, %v241_v47  ;;  %v240_v54 = vld [vmem:[%s1698_s1 + $0x100] sm:$0xff]  ;;  %v242_v56 = vld [vmem:[%s1698_s1 + $0x110] sm:$0xff]  ;;  %v1055_v57 = vpack.c.bf16 %v247_v50, %v243_v49  ;;  %v249_v59 = vld [vmem:[%s1698_s1 + $0x148] sm:$0xff] }
  0x12   : > { %1018 = vmatpush1.bf16.msra.mxu0 %v1017_v35  ;;  %v244_v55 = vld [vmem:[%s1698_s1 + $0x120] sm:$0xff]  ;;  %v246_v58 = vld [vmem:[%s1698_s1 + $0x130] sm:$0xff]  ;;  %v253_v60 = vld [vmem:[%s1698_s1 + $0x168] sm:$0xff] }
  0x13   : > { %1050 = vmatpush1.bf16.msra.mxu1 %v1049_v39  ;;  %1020 = vmatprep.subr.bf16.mxu0 %v1019_v40  ;;  %v251_v61 = vld [vmem:[%s1698_s1 + $0x158] sm:$0xff]  ;;  %v1025_v63 = vpack.c.bf16 %v244_v55, %v240_v54  ;;  %v1057_v0 = vpack.c.bf16 %v246_v58, %v242_v56  ;;  %v1027_v1 = vpack.c.bf16 %v253_v60, %v249_v59  ;;  %v248_v2 = vld [vmem:[%s1698_s1 + $0x140] sm:$0xff]  ;;  %v250_v4 = vld [vmem:[%s1698_s1 + $0x150] sm:$0xff] }
  0x14   : > { %1052 = vmatprep.subr.bf16.mxu1 %v1051_v44  ;;  %v255_v62 = vld [vmem:[%s1698_s1 + $0x178] sm:$0xff]  ;;  %v252_v3 = vld [vmem:[%s1698_s1 + $0x160] sm:$0xff]  ;;  %v254_v6 = vld [vmem:[%s1698_s1 + $0x170] sm:$0xff] }
  0x15   : > { %v1059_v5 = vpack.c.bf16 %v255_v62, %v251_v61  ;;  %v257_v8 = vld [vmem:[%s1698_s1 + $0x188] sm:$0xff]  ;;  %v259_v10 = vld [vmem:[%s1698_s1 + $0x198] sm:$0xff]  ;;  %v1029_v12 = vpack.c.bf16 %v252_v3, %v248_v2  ;;  %v1061_v13 = vpack.c.bf16 %v254_v6, %v250_v4  ;;  %v256_v15 = vld [vmem:[%s1698_s1 + $0x180] sm:$0xff]  ;;  %v274_v2 = vlaneseq }
  0x16   : > { %1022 = vmatpush1.bf16.msra.mxu0 %v1021_v51  ;;  %v261_v9 = vld [vmem:[%s1698_s1 + $0x1a8] sm:$0xff]  ;;  %v263_v11 = vld [vmem:[%s1698_s1 + $0x1b8] sm:$0xff]  ;;  %v260_v16 = vld [vmem:[%s1698_s1 + $0x1a0] sm:$0xff] }
  0x17   : > { %1054 = vmatpush1.bf16.msra.mxu1 %v1053_v52  ;;  %1024 = vmatprep.subr.bf16.mxu0 %v1023_v53  ;;  %v1031_v14 = vpack.c.bf16 %v261_v9, %v257_v8  ;;  %v258_v17 = vld [vmem:[%s1698_s1 + $0x190] sm:$0xff]  ;;  %v1063_v18 = vpack.c.bf16 %v263_v11, %v259_v10  ;;  %v265_v20 = vld [vmem:[%s1698_s1 + $0x1c8] sm:$0xff]  ;;  %v267_v22 = vld [vmem:[%s1698_s1 + $0x1d8] sm:$0xff]  ;;  %v1033_v24 = vpack.c.bf16 %v260_v16, %v256_v15  ;;  %v275_v3 = vshrl.u32 %v274_v2, 7 }
  0x18   : > { %1056 = vmatprep.subr.bf16.mxu1 %v1055_v57  ;;  %v262_v19 = vld [vmem:[%s1698_s1 + $0x1b0] sm:$0xff]  ;;  %v269_v21 = vld [vmem:[%s1698_s1 + $0x1e8] sm:$0xff]  ;;  %v271_v23 = vld [vmem:[%s1698_s1 + $0x1f8] sm:$0xff] }
  0x19   : > { %v1065_v25 = vpack.c.bf16 %v262_v19, %v258_v17  ;;  %v1035_v26 = vpack.c.bf16 %v269_v21, %v265_v20  ;;  %v264_v27 = vld [vmem:[%s1698_s1 + $0x1c0] sm:$0xff]  ;;  %v1067_v29 = vpack.c.bf16 %v271_v23, %v267_v22  ;;  %v266_v30 = vld [vmem:[%s1698_s1 + $0x1d0] sm:$0xff]  ;;  %v177_v35 = vld [vmem:[%s1325_s20 + $0x8] sm:$0xff]  ;;  %v276_v4 = vsub.s32 0, %v275_v3 }
  0x1a   : > { %1026 = vmatpush1.bf16.msra.mxu0 %v1025_v63  ;;  %v268_v28 = vld [vmem:[%s1698_s1 + $0x1e0] sm:$0xff]  ;;  %v270_v31 = vld [vmem:[%s1698_s1 + $0x1f0] sm:$0xff]  ;;  %v179_v37 = vld [vmem:[%s1325_s20 + $0x18] sm:$0xff]  ;;  %v284_v6 = vsub.s32 2, %v275_v3  ;;  %v280_v8 = vsub.s32 1, %v275_v3  ;;  %v288_v9 = vsub.s32 3, %v275_v3 }
  0x1b   : > { %1058 = vmatpush1.bf16.msra.mxu1 %v1057_v0  ;;  %1028 = vmatprep.subr.bf16.mxu0 %v1027_v1  ;;  %v1037_v32 = vpack.c.bf16 %v268_v28, %v264_v27  ;;  %v1069_v33 = vpack.c.bf16 %v270_v31, %v266_v30  ;;  %v176_v34 = vld [vmem:[%s1325_s20] sm:$0xff]  ;;  %v178_v36 = vld [vmem:[%s1325_s20 + $0x10] sm:$0xff]  ;;  %v181_v39 = vld [vmem:[%s1325_s20 + $0x28] sm:$0xff] }
  0x1c   : > { %1060 = vmatprep.subr.bf16.mxu1 %v1059_v5  ;;  %v180_v38 = vld [vmem:[%s1325_s20 + $0x20] sm:$0xff]  ;;  %v182_v40 = vld [vmem:[%s1325_s20 + $0x30] sm:$0xff]  ;;  %v183_v41 = vld [vmem:[%s1325_s20 + $0x38] sm:$0xff] }
  0x1d   : > { %v184_v42 = vld [vmem:[%s1325_s20 + $0x40] sm:$0xff]  ;;  %v185_v43 = vld [vmem:[%s1325_s20 + $0x48] sm:$0xff]  ;;  %v186_v44 = vld [vmem:[%s1325_s20 + $0x50] sm:$0xff] }
  0x1e   : > { %1030 = vmatpush1.bf16.msra.mxu0 %v1029_v12  ;;  %v187_v45 = vld [vmem:[%s1325_s20 + $0x58] sm:$0xff]  ;;  %v188_v46 = vld [vmem:[%s1325_s20 + $0x60] sm:$0xff]  ;;  %v189_v47 = vld [vmem:[%s1325_s20 + $0x68] sm:$0xff] }
  0x1f   : > { %1062 = vmatpush1.bf16.msra.mxu1 %v1061_v13  ;;  %1032 = vmatprep.subr.bf16.mxu0 %v1031_v14  ;;  %v190_v48 = vld [vmem:[%s1325_s20 + $0x70] sm:$0xff]  ;;  %v191_v49 = vld [vmem:[%s1325_s20 + $0x78] sm:$0xff]  ;;  %v192_v50 = vld [vmem:[%s1325_s20 + $0x80] sm:$0xff] }
  0x20   : > { %1064 = vmatprep.subr.bf16.mxu1 %v1063_v18  ;;  %v193_v51 = vld [vmem:[%s1325_s20 + $0x88] sm:$0xff]  ;;  %v194_v52 = vld [vmem:[%s1325_s20 + $0x90] sm:$0xff]  ;;  %v195_v53 = vld [vmem:[%s1325_s20 + $0x98] sm:$0xff] }
  0x21   : > { %v196_v54 = vld [vmem:[%s1325_s20 + $0xa0] sm:$0xff]  ;;  %v197_v55 = vld [vmem:[%s1325_s20 + $0xa8] sm:$0xff]  ;;  %v198_v56 = vld [vmem:[%s1325_s20 + $0xb0] sm:$0xff] }
  0x22   : > { %1034 = vmatpush1.bf16.msra.mxu0 %v1033_v24  ;;  %v199_v57 = vld [vmem:[%s1325_s20 + $0xb8] sm:$0xff]  ;;  %v200_v58 = vld [vmem:[%s1325_s20 + $0xc0] sm:$0xff]  ;;  %v201_v59 = vld [vmem:[%s1325_s20 + $0xc8] sm:$0xff] }
  0x23   : > { %1066 = vmatpush1.bf16.msra.mxu1 %v1065_v25  ;;  %1036 = vmatprep.subr.bf16.mxu0 %v1035_v26  ;;  %v202_v60 = vld [vmem:[%s1325_s20 + $0xd0] sm:$0xff]  ;;  %v203_v61 = vld [vmem:[%s1325_s20 + $0xd8] sm:$0xff]  ;;  %v204_v62 = vld [vmem:[%s1325_s20 + $0xe0] sm:$0xff] }
  0x24   : > { %1068 = vmatprep.subr.bf16.mxu1 %v1067_v29  ;;  %v205_v63 = vld [vmem:[%s1325_s20 + $0xe8] sm:$0xff]  ;;  %v206_v0 = vld [vmem:[%s1325_s20 + $0xf0] sm:$0xff]  ;;  %v207_v1 = vld [vmem:[%s1325_s20 + $0xf8] sm:$0xff] }
  0x25   : > { %v272_v5 = vld [vmem:[%s1699_s2] sm:$0xf] }
  0x26   : > { %1038 = vmatpush1.bf16.msra.mxu0 %v1037_v32  ;;  %v1425_v10 = vrot.slane %v272_v5, %v276_v4  ;;  %v1427_v11 = vrot.slane %v272_v5, %v284_v6  ;;  %v1429_v12 = vrot.slane %v272_v5, %v280_v8 }
  0x27   : > { %1070 = vmatpush1.bf16.msra.mxu1 %v1069_v33 }
  0x29   : > { %359 = vmatmul.mubr.f32.vlgmr.msra.gmra.mrb[0].mxu0 %v176_v34 }
  0x2a   : > { %616 = vmatmul.mubr.f32.vlgmr.msra.gmra.mrb[0].mxu1 %v176_v34  ;;  %364 = vmatprep.mubr.f32.mxu0 %v1088_v7 }
  0x2b   : > { %621 = vmatprep.mubr.f32.mxu1 %v1088_v7 }
  0x2d   : > { %365 = vmatmul.mubr.f32.gmra.mrb[2].mxu0 %v177_v35 }
  0x2e   : > { %622 = vmatmul.mubr.f32.gmra.mrb[2].mxu1 %v177_v35  ;;  %370 = vmatprep.mubr.f32.mxu0 %v1088_v7 }
  0x2f   : > { %627 = vmatprep.mubr.f32.mxu1 %v1088_v7 }
  0x31   : > { %371 = vmatmul.mubr.f32.gmra.mrb[4].mxu0 %v178_v36 }
  0x32   : > { %628 = vmatmul.mubr.f32.gmra.mrb[4].mxu1 %v178_v36  ;;  %376 = vmatprep.mubr.f32.mxu0 %v1088_v7 }
  0x33   : > { %633 = vmatprep.mubr.f32.mxu1 %v1088_v7 }
  0x35   : > { %377 = vmatmul.mubr.f32.gmra.mrb[6].mxu0 %v179_v37 }
  0x36   : > { %634 = vmatmul.mubr.f32.gmra.mrb[6].mxu1 %v179_v37  ;;  %382 = vmatprep.mubr.f32.mxu0 %v1088_v7 }
  0x37   : > { %639 = vmatprep.mubr.f32.mxu1 %v1088_v7 }
  0x39   : > { %383 = vmatmul.mubr.f32.gmra.mrb[8].mxu0 %v180_v38 }
  0x3a   : > { %640 = vmatmul.mubr.f32.gmra.mrb[8].mxu1 %v180_v38  ;;  %388 = vmatprep.mubr.f32.mxu0 %v1088_v7 }
  0x3b   : > { %645 = vmatprep.mubr.f32.mxu1 %v1088_v7 }
  0x3d   : > { %389 = vmatmul.mubr.f32.gmra.mrb[10].mxu0 %v181_v39 }
  0x3e   : > { %646 = vmatmul.mubr.f32.gmra.mrb[10].mxu1 %v181_v39  ;;  %394 = vmatprep.mubr.f32.mxu0 %v1088_v7 }
  0x3f   : > { %651 = vmatprep.mubr.f32.mxu1 %v1088_v7 }
  0x41   : > { %395 = vmatmul.mubr.f32.gmra.mrb[12].mxu0 %v182_v40 }
  0x42   : > { %652 = vmatmul.mubr.f32.gmra.mrb[12].mxu1 %v182_v40  ;;  %400 = vmatprep.mubr.f32.mxu0 %v1088_v7 }
  0x43   : > { %657 = vmatprep.mubr.f32.mxu1 %v1088_v7 }
  0x45   : > { %401 = vmatmul.mubr.f32.gmra.mrb[14].mxu0 %v183_v41 }
  0x46   : > { %658 = vmatmul.mubr.f32.gmra.mrb[14].mxu1 %v183_v41  ;;  %406 = vmatprep.mubr.f32.mxu0 %v1088_v7 }
  0x47   : > { %663 = vmatprep.mubr.f32.mxu1 %v1088_v7 }
  0x49   : > { %407 = vmatmul.mubr.f32.gmra.mrb[16].mxu0 %v184_v42 }
  0x4a   : > { %664 = vmatmul.mubr.f32.gmra.mrb[16].mxu1 %v184_v42  ;;  %412 = vmatprep.mubr.f32.mxu0 %v1088_v7 }
  0x4b   : > { %669 = vmatprep.mubr.f32.mxu1 %v1088_v7 }
  0x4d   : > { %413 = vmatmul.mubr.f32.gmra.mrb[18].mxu0 %v185_v43 }
  0x4e   : > { %670 = vmatmul.mubr.f32.gmra.mrb[18].mxu1 %v185_v43  ;;  %418 = vmatprep.mubr.f32.mxu0 %v1088_v7 }
  0x4f   : > { %675 = vmatprep.mubr.f32.mxu1 %v1088_v7 }
  0x51   : > { %419 = vmatmul.mubr.f32.gmra.mrb[20].mxu0 %v186_v44 }
  0x52   : > { %676 = vmatmul.mubr.f32.gmra.mrb[20].mxu1 %v186_v44  ;;  %424 = vmatprep.mubr.f32.mxu0 %v1088_v7 }
  0x53   : > { %681 = vmatprep.mubr.f32.mxu1 %v1088_v7 }
  0x55   : > { %425 = vmatmul.mubr.f32.gmra.mrb[22].mxu0 %v187_v45 }
  0x56   : > { %682 = vmatmul.mubr.f32.gmra.mrb[22].mxu1 %v187_v45  ;;  %430 = vmatprep.mubr.f32.mxu0 %v1088_v7 }
  0x57   : > { %687 = vmatprep.mubr.f32.mxu1 %v1088_v7 }
  0x59   : > { %431 = vmatmul.mubr.f32.gmra.mrb[24].mxu0 %v188_v46 }
  0x5a   : > { %688 = vmatmul.mubr.f32.gmra.mrb[24].mxu1 %v188_v46  ;;  %436 = vmatprep.mubr.f32.mxu0 %v1088_v7 }
  0x5b   : > { %693 = vmatprep.mubr.f32.mxu1 %v1088_v7 }
  0x5d   : > { %437 = vmatmul.mubr.f32.gmra.mrb[26].mxu0 %v189_v47 }
  0x5e   : > { %694 = vmatmul.mubr.f32.gmra.mrb[26].mxu1 %v189_v47  ;;  %442 = vmatprep.mubr.f32.mxu0 %v1088_v7 }
  0x5f   : > { %699 = vmatprep.mubr.f32.mxu1 %v1088_v7 }
  0x61   : > { %443 = vmatmul.mubr.f32.gmra.mrb[28].mxu0 %v190_v48 }
  0x62   : > { %700 = vmatmul.mubr.f32.gmra.mrb[28].mxu1 %v190_v48  ;;  %448 = vmatprep.mubr.f32.mxu0 %v1088_v7 }
  0x63   : > { %705 = vmatprep.mubr.f32.mxu1 %v1088_v7 }
  0x65   : > { %449 = vmatmul.mubr.f32.gmra.mrb[30].mxu0 %v191_v49 }
  0x66   : > { %706 = vmatmul.mubr.f32.gmra.mrb[30].mxu1 %v191_v49  ;;  %454 = vmatprep.mubr.f32.mxu0 %v1088_v7 }
  0x67   : > { %711 = vmatprep.mubr.f32.mxu1 %v1088_v7 }
  0x69   : > { %455 = vmatmul.mubr.f32.gmra.mrb[32].mxu0 %v192_v50 }
  0x6a   : > { %712 = vmatmul.mubr.f32.gmra.mrb[32].mxu1 %v192_v50  ;;  %460 = vmatprep.mubr.f32.mxu0 %v1088_v7 }
  0x6b   : > { %717 = vmatprep.mubr.f32.mxu1 %v1088_v7 }
  0x6d   : > { %461 = vmatmul.mubr.f32.gmra.mrb[34].mxu0 %v193_v51 }
  0x6e   : > { %718 = vmatmul.mubr.f32.gmra.mrb[34].mxu1 %v193_v51  ;;  %466 = vmatprep.mubr.f32.mxu0 %v1088_v7 }
  0x6f   : > { %723 = vmatprep.mubr.f32.mxu1 %v1088_v7 }
  0x71   : > { %467 = vmatmul.mubr.f32.gmra.mrb[36].mxu0 %v194_v52 }
  0x72   : > { %724 = vmatmul.mubr.f32.gmra.mrb[36].mxu1 %v194_v52  ;;  %472 = vmatprep.mubr.f32.mxu0 %v1088_v7 }
  0x73   : > { %729 = vmatprep.mubr.f32.mxu1 %v1088_v7 }
  0x75   : > { %473 = vmatmul.mubr.f32.gmra.mrb[38].mxu0 %v195_v53 }
  0x76   : > { %730 = vmatmul.mubr.f32.gmra.mrb[38].mxu1 %v195_v53  ;;  %478 = vmatprep.mubr.f32.mxu0 %v1088_v7 }
  0x77   : > { %735 = vmatprep.mubr.f32.mxu1 %v1088_v7 }
  0x79   : > { %479 = vmatmul.mubr.f32.gmra.mrb[40].mxu0 %v196_v54 }
  0x7a   : > { %736 = vmatmul.mubr.f32.gmra.mrb[40].mxu1 %v196_v54  ;;  %484 = vmatprep.mubr.f32.mxu0 %v1088_v7 }
  0x7b   : > { %741 = vmatprep.mubr.f32.mxu1 %v1088_v7 }
  0x7d   : > { %485 = vmatmul.mubr.f32.gmra.mrb[42].mxu0 %v197_v55 }
  0x7e   : > { %742 = vmatmul.mubr.f32.gmra.mrb[42].mxu1 %v197_v55  ;;  %490 = vmatprep.mubr.f32.mxu0 %v1088_v7 }
  0x7f   : > { %747 = vmatprep.mubr.f32.mxu1 %v1088_v7 }
  0x81   : > { %491 = vmatmul.mubr.f32.gmra.mrb[44].mxu0 %v198_v56 }
  0x82   : > { %748 = vmatmul.mubr.f32.gmra.mrb[44].mxu1 %v198_v56  ;;  %496 = vmatprep.mubr.f32.mxu0 %v1088_v7 }
  0x83   : > { %753 = vmatprep.mubr.f32.mxu1 %v1088_v7 }
  0x85   : > { %497 = vmatmul.mubr.f32.gmra.mrb[46].mxu0 %v199_v57 }
  0x86   : > { %754 = vmatmul.mubr.f32.gmra.mrb[46].mxu1 %v199_v57  ;;  %502 = vmatprep.mubr.f32.mxu0 %v1088_v7 }
  0x87   : > { %759 = vmatprep.mubr.f32.mxu1 %v1088_v7 }
  0x89   : > { %503 = vmatmul.mubr.f32.gmra.mrb[48].mxu0 %v200_v58 }
  0x8a   : > { %760 = vmatmul.mubr.f32.gmra.mrb[48].mxu1 %v200_v58  ;;  %508 = vmatprep.mubr.f32.mxu0 %v1088_v7 }
  0x8b   : > { %765 = vmatprep.mubr.f32.mxu1 %v1088_v7 }
  0x8d   : > { %509 = vmatmul.mubr.f32.gmra.mrb[50].mxu0 %v201_v59 }
  0x8e   : > { %766 = vmatmul.mubr.f32.gmra.mrb[50].mxu1 %v201_v59  ;;  %514 = vmatprep.mubr.f32.mxu0 %v1088_v7 }
  0x8f   : > { %771 = vmatprep.mubr.f32.mxu1 %v1088_v7 }
  0x91   : > { %515 = vmatmul.mubr.f32.gmra.mrb[52].mxu0 %v202_v60 }
  0x92   : > { %772 = vmatmul.mubr.f32.gmra.mrb[52].mxu1 %v202_v60  ;;  %520 = vmatprep.mubr.f32.mxu0 %v1088_v7 }
  0x93   : > { %777 = vmatprep.mubr.f32.mxu1 %v1088_v7 }
  0x95   : > { %521 = vmatmul.mubr.f32.gmra.mrb[54].mxu0 %v203_v61 }
  0x96   : > { %778 = vmatmul.mubr.f32.gmra.mrb[54].mxu1 %v203_v61  ;;  %526 = vmatprep.mubr.f32.mxu0 %v1088_v7 }
  0x97   : > { %783 = vmatprep.mubr.f32.mxu1 %v1088_v7 }
  0x99   : > { %527 = vmatmul.mubr.f32.gmra.mrb[56].mxu0 %v204_v62 }
  0x9a   : > { %784 = vmatmul.mubr.f32.gmra.mrb[56].mxu1 %v204_v62  ;;  %532 = vmatprep.mubr.f32.mxu0 %v1088_v7 }
  0x9b   : > { %789 = vmatprep.mubr.f32.mxu1 %v1088_v7 }
  0x9d   : > { %533 = vmatmul.mubr.f32.gmra.mrb[58].mxu0 %v205_v63 }
  0x9e   : > { %790 = vmatmul.mubr.f32.gmra.mrb[58].mxu1 %v205_v63  ;;  %538 = vmatprep.mubr.f32.mxu0 %v1088_v7 }
  0x9f   : > { %795 = vmatprep.mubr.f32.mxu1 %v1088_v7 }
  0xa1   : > { %539 = vmatmul.mubr.f32.gmra.mrb[60].mxu0 %v206_v0 }
  0xa2   : > { %796 = vmatmul.mubr.f32.gmra.mrb[60].mxu1 %v206_v0  ;;  %544 = vmatprep.mubr.f32.mxu0 %v1088_v7 }
  0xa3   : > { %801 = vmatprep.mubr.f32.mxu1 %v1088_v7  ;;  %v1431_v7 = vrot.slane %v272_v5, %v288_v9 }
  0xa5   : > { %545 = vmatmul.mubr.f32.gmra.mrb[62].mxu0 %v207_v1 }
  0xa6   : > { %802 = vmatmul.mubr.f32.gmra.mrb[62].mxu1 %v207_v1 }
  0xfc   : > { %v360_v13 = vpop.f32.mrb[0].mxu0 }
  0xfd   : > { %v361_v14 = vadd.f32 %v360_v13, %v1425_v10  ;;  %v617_v15 = vpop.f32.mrb[0].mxu1  ;;  %v362_v16 = vpop.f32.mrb[1].mxu0 }
  0xfe   : > { %v618_v17 = vadd.f32 %v617_v15, %v1427_v11  ;;  %v363_v18 = vadd.f32 %v362_v16, %v1429_v12  ;;  %v619_v19 = vpop.f32.mrb[1].mxu1 }
  0xff   : > { %808 = vst [vmem:[%s1436_s26] sm:$0xff] %v361_v14  ;;  %v620_v20 = vadd.f32 %v619_v19, %v1431_v7 }
 0x100   : > { %810 = vst [vmem:[%s1436_s26 + $0x10] sm:$0xff] %v618_v17  ;;  %809 = vst [vmem:[%s1436_s26 + $0x8] sm:$0xff] %v363_v18  ;;  %v366_v21 = vpop.f32.mrb[2].mxu0 }
 0x101   : > { %811 = vst [vmem:[%s1436_s26 + $0x18] sm:$0xff] %v620_v20  ;;  %v367_v22 = vadd.f32 %v366_v21, %v1425_v10  ;;  %v623_v23 = vpop.f32.mrb[2].mxu1  ;;  %v368_v24 = vpop.f32.mrb[3].mxu0 }
 0x102   : > { %v624_v25 = vadd.f32 %v623_v23, %v1427_v11  ;;  %v369_v26 = vadd.f32 %v368_v24, %v1429_v12  ;;  %v625_v27 = vpop.f32.mrb[3].mxu1 }
 0x103   : > { %812 = vst [vmem:[%s1436_s26 + $0x20] sm:$0xff] %v367_v22  ;;  %v626_v28 = vadd.f32 %v625_v27, %v1431_v7 }
 0x104   : > { %814 = vst [vmem:[%s1436_s26 + $0x30] sm:$0xff] %v624_v25  ;;  %813 = vst [vmem:[%s1436_s26 + $0x28] sm:$0xff] %v369_v26  ;;  %v372_v29 = vpop.f32.mrb[4].mxu0 }
 0x105   : > { %815 = vst [vmem:[%s1436_s26 + $0x38] sm:$0xff] %v626_v28  ;;  %v373_v30 = vadd.f32 %v372_v29, %v1425_v10  ;;  %v629_v31 = vpop.f32.mrb[4].mxu1  ;;  %v374_v32 = vpop.f32.mrb[5].mxu0 }
 0x106   : > { %v630_v33 = vadd.f32 %v629_v31, %v1427_v11  ;;  %v375_v34 = vadd.f32 %v374_v32, %v1429_v12  ;;  %v631_v35 = vpop.f32.mrb[5].mxu1 }
 0x107   : > { %816 = vst [vmem:[%s1436_s26 + $0x40] sm:$0xff] %v373_v30  ;;  %v632_v36 = vadd.f32 %v631_v35, %v1431_v7 }
 0x108   : > { %818 = vst [vmem:[%s1436_s26 + $0x50] sm:$0xff] %v630_v33  ;;  %817 = vst [vmem:[%s1436_s26 + $0x48] sm:$0xff] %v375_v34  ;;  %v378_v37 = vpop.f32.mrb[6].mxu0 }
 0x109   : > { %819 = vst [vmem:[%s1436_s26 + $0x58] sm:$0xff] %v632_v36  ;;  %v379_v38 = vadd.f32 %v378_v37, %v1425_v10  ;;  %v635_v39 = vpop.f32.mrb[6].mxu1  ;;  %v380_v40 = vpop.f32.mrb[7].mxu0 }
 0x10a   : > { %v636_v41 = vadd.f32 %v635_v39, %v1427_v11  ;;  %v381_v42 = vadd.f32 %v380_v40, %v1429_v12  ;;  %v637_v43 = vpop.f32.mrb[7].mxu1 }
 0x10b   : > { %820 = vst [vmem:[%s1436_s26 + $0x60] sm:$0xff] %v379_v38  ;;  %v638_v44 = vadd.f32 %v637_v43, %v1431_v7 }
 0x10c   : > { %822 = vst [vmem:[%s1436_s26 + $0x70] sm:$0xff] %v636_v41  ;;  %821 = vst [vmem:[%s1436_s26 + $0x68] sm:$0xff] %v381_v42  ;;  %v384_v45 = vpop.f32.mrb[8].mxu0 }
 0x10d   : > { %823 = vst [vmem:[%s1436_s26 + $0x78] sm:$0xff] %v638_v44  ;;  %v385_v46 = vadd.f32 %v384_v45, %v1425_v10  ;;  %v641_v47 = vpop.f32.mrb[8].mxu1  ;;  %v386_v48 = vpop.f32.mrb[9].mxu0 }
 0x10e   : > { %v642_v49 = vadd.f32 %v641_v47, %v1427_v11  ;;  %v387_v50 = vadd.f32 %v386_v48, %v1429_v12  ;;  %v643_v51 = vpop.f32.mrb[9].mxu1 }
 0x10f   : > { %824 = vst [vmem:[%s1436_s26 + $0x80] sm:$0xff] %v385_v46  ;;  %v644_v52 = vadd.f32 %v643_v51, %v1431_v7 }
 0x110   : > { %826 = vst [vmem:[%s1436_s26 + $0x90] sm:$0xff] %v642_v49  ;;  %825 = vst [vmem:[%s1436_s26 + $0x88] sm:$0xff] %v387_v50  ;;  %v390_v53 = vpop.f32.mrb[10].mxu0 }
 0x111   : > { %827 = vst [vmem:[%s1436_s26 + $0x98] sm:$0xff] %v644_v52  ;;  %v391_v54 = vadd.f32 %v390_v53, %v1425_v10  ;;  %v647_v55 = vpop.f32.mrb[10].mxu1  ;;  %v392_v56 = vpop.f32.mrb[11].mxu0 }
 0x112   : > { %v648_v57 = vadd.f32 %v647_v55, %v1427_v11  ;;  %v393_v58 = vadd.f32 %v392_v56, %v1429_v12  ;;  %v649_v59 = vpop.f32.mrb[11].mxu1 }
 0x113   : > { %828 = vst [vmem:[%s1436_s26 + $0xa0] sm:$0xff] %v391_v54  ;;  %v650_v60 = vadd.f32 %v649_v59, %v1431_v7 }
 0x114   : > { %830 = vst [vmem:[%s1436_s26 + $0xb0] sm:$0xff] %v648_v57  ;;  %829 = vst [vmem:[%s1436_s26 + $0xa8] sm:$0xff] %v393_v58  ;;  %v396_v61 = vpop.f32.mrb[12].mxu0 }
 0x115   : > { %831 = vst [vmem:[%s1436_s26 + $0xb8] sm:$0xff] %v650_v60  ;;  %v397_v62 = vadd.f32 %v396_v61, %v1425_v10  ;;  %v653_v63 = vpop.f32.mrb[12].mxu1  ;;  %v398_v0 = vpop.f32.mrb[13].mxu0 }
 0x116   : > { %v654_v1 = vadd.f32 %v653_v63, %v1427_v11  ;;  %v399_v2 = vadd.f32 %v398_v0, %v1429_v12  ;;  %v655_v3 = vpop.f32.mrb[13].mxu1 }
 0x117   : > { %832 = vst [vmem:[%s1436_s26 + $0xc0] sm:$0xff] %v397_v62  ;;  %v656_v4 = vadd.f32 %v655_v3, %v1431_v7 }
 0x118   : > { %834 = vst [vmem:[%s1436_s26 + $0xd0] sm:$0xff] %v654_v1  ;;  %833 = vst [vmem:[%s1436_s26 + $0xc8] sm:$0xff] %v399_v2  ;;  %v402_v5 = vpop.f32.mrb[14].mxu0 }
 0x119   : > { %835 = vst [vmem:[%s1436_s26 + $0xd8] sm:$0xff] %v656_v4  ;;  %v403_v6 = vadd.f32 %v402_v5, %v1425_v10  ;;  %v659_v8 = vpop.f32.mrb[14].mxu1  ;;  %v404_v9 = vpop.f32.mrb[15].mxu0 }
 0x11a   : > { %v660_v13 = vadd.f32 %v659_v8, %v1427_v11  ;;  %v405_v14 = vadd.f32 %v404_v9, %v1429_v12  ;;  %v661_v15 = vpop.f32.mrb[15].mxu1 }
 0x11b   : > { %836 = vst [vmem:[%s1436_s26 + $0xe0] sm:$0xff] %v403_v6  ;;  %v662_v16 = vadd.f32 %v661_v15, %v1431_v7 }
 0x11c   : > { %838 = vst [vmem:[%s1436_s26 + $0xf0] sm:$0xff] %v660_v13  ;;  %837 = vst [vmem:[%s1436_s26 + $0xe8] sm:$0xff] %v405_v14  ;;  %v408_v17 = vpop.f32.mrb[16].mxu0 }
 0x11d   : > { %839 = vst [vmem:[%s1436_s26 + $0xf8] sm:$0xff] %v662_v16  ;;  %v409_v18 = vadd.f32 %v408_v17, %v1425_v10  ;;  %v665_v19 = vpop.f32.mrb[16].mxu1  ;;  %v410_v20 = vpop.f32.mrb[17].mxu0 }
 0x11e   : > { %v666_v21 = vadd.f32 %v665_v19, %v1427_v11  ;;  %v411_v22 = vadd.f32 %v410_v20, %v1429_v12  ;;  %v667_v23 = vpop.f32.mrb[17].mxu1 }
 0x11f   : > { %840 = vst [vmem:[%s1436_s26 + $0x100] sm:$0xff] %v409_v18  ;;  %v668_v24 = vadd.f32 %v667_v23, %v1431_v7 }
 0x120   : > { %842 = vst [vmem:[%s1436_s26 + $0x110] sm:$0xff] %v666_v21  ;;  %841 = vst [vmem:[%s1436_s26 + $0x108] sm:$0xff] %v411_v22  ;;  %v414_v25 = vpop.f32.mrb[18].mxu0 }
 0x121   : > { %843 = vst [vmem:[%s1436_s26 + $0x118] sm:$0xff] %v668_v24  ;;  %v415_v26 = vadd.f32 %v414_v25, %v1425_v10  ;;  %v671_v27 = vpop.f32.mrb[18].mxu1  ;;  %v416_v28 = vpop.f32.mrb[19].mxu0 }
 0x122   : > { %v672_v29 = vadd.f32 %v671_v27, %v1427_v11  ;;  %v417_v30 = vadd.f32 %v416_v28, %v1429_v12  ;;  %v673_v31 = vpop.f32.mrb[19].mxu1 }
 0x123   : > { %844 = vst [vmem:[%s1436_s26 + $0x120] sm:$0xff] %v415_v26  ;;  %v674_v32 = vadd.f32 %v673_v31, %v1431_v7 }
 0x124   : > { %846 = vst [vmem:[%s1436_s26 + $0x130] sm:$0xff] %v672_v29  ;;  %845 = vst [vmem:[%s1436_s26 + $0x128] sm:$0xff] %v417_v30  ;;  %v420_v33 = vpop.f32.mrb[20].mxu0 }
 0x125   : > { %847 = vst [vmem:[%s1436_s26 + $0x138] sm:$0xff] %v674_v32  ;;  %v421_v34 = vadd.f32 %v420_v33, %v1425_v10  ;;  %v677_v35 = vpop.f32.mrb[20].mxu1  ;;  %v422_v36 = vpop.f32.mrb[21].mxu0 }
 0x126   : > { %v678_v37 = vadd.f32 %v677_v35, %v1427_v11  ;;  %v423_v38 = vadd.f32 %v422_v36, %v1429_v12  ;;  %v679_v39 = vpop.f32.mrb[21].mxu1 }
 0x127   : > { %848 = vst [vmem:[%s1436_s26 + $0x140] sm:$0xff] %v421_v34  ;;  %v680_v40 = vadd.f32 %v679_v39, %v1431_v7 }
 0x128   : > { %850 = vst [vmem:[%s1436_s26 + $0x150] sm:$0xff] %v678_v37  ;;  %849 = vst [vmem:[%s1436_s26 + $0x148] sm:$0xff] %v423_v38  ;;  %v426_v41 = vpop.f32.mrb[22].mxu0 }
 0x129   : > { %851 = vst [vmem:[%s1436_s26 + $0x158] sm:$0xff] %v680_v40  ;;  %v427_v42 = vadd.f32 %v426_v41, %v1425_v10  ;;  %v683_v43 = vpop.f32.mrb[22].mxu1  ;;  %v428_v44 = vpop.f32.mrb[23].mxu0 }
 0x12a   : > { %v684_v45 = vadd.f32 %v683_v43, %v1427_v11  ;;  %v429_v46 = vadd.f32 %v428_v44, %v1429_v12  ;;  %v685_v47 = vpop.f32.mrb[23].mxu1 }
 0x12b   : > { %852 = vst [vmem:[%s1436_s26 + $0x160] sm:$0xff] %v427_v42  ;;  %v686_v48 = vadd.f32 %v685_v47, %v1431_v7 }
 0x12c   : > { %854 = vst [vmem:[%s1436_s26 + $0x170] sm:$0xff] %v684_v45  ;;  %853 = vst [vmem:[%s1436_s26 + $0x168] sm:$0xff] %v429_v46  ;;  %v432_v49 = vpop.f32.mrb[24].mxu0 }
 0x12d   : > { %855 = vst [vmem:[%s1436_s26 + $0x178] sm:$0xff] %v686_v48  ;;  %v433_v50 = vadd.f32 %v432_v49, %v1425_v10  ;;  %v689_v51 = vpop.f32.mrb[24].mxu1  ;;  %v434_v52 = vpop.f32.mrb[25].mxu0 }
 0x12e   : > { %v690_v53 = vadd.f32 %v689_v51, %v1427_v11  ;;  %v435_v54 = vadd.f32 %v434_v52, %v1429_v12  ;;  %v691_v55 = vpop.f32.mrb[25].mxu1 }
 0x12f   : > { %856 = vst [vmem:[%s1436_s26 + $0x180] sm:$0xff] %v433_v50  ;;  %v692_v56 = vadd.f32 %v691_v55, %v1431_v7 }
 0x130   : > { %858 = vst [vmem:[%s1436_s26 + $0x190] sm:$0xff] %v690_v53  ;;  %857 = vst [vmem:[%s1436_s26 + $0x188] sm:$0xff] %v435_v54  ;;  %v438_v57 = vpop.f32.mrb[26].mxu0 }
 0x131   : > { %859 = vst [vmem:[%s1436_s26 + $0x198] sm:$0xff] %v692_v56  ;;  %v439_v58 = vadd.f32 %v438_v57, %v1425_v10  ;;  %v695_v59 = vpop.f32.mrb[26].mxu1  ;;  %v440_v60 = vpop.f32.mrb[27].mxu0 }
 0x132   : > { %v696_v61 = vadd.f32 %v695_v59, %v1427_v11  ;;  %v441_v62 = vadd.f32 %v440_v60, %v1429_v12  ;;  %v697_v63 = vpop.f32.mrb[27].mxu1 }
 0x133   : > { %860 = vst [vmem:[%s1436_s26 + $0x1a0] sm:$0xff] %v439_v58  ;;  %v698_v0 = vadd.f32 %v697_v63, %v1431_v7 }
 0x134   : > { %862 = vst [vmem:[%s1436_s26 + $0x1b0] sm:$0xff] %v696_v61  ;;  %861 = vst [vmem:[%s1436_s26 + $0x1a8] sm:$0xff] %v441_v62  ;;  %v444_v1 = vpop.f32.mrb[28].mxu0 }
 0x135   : > { %863 = vst [vmem:[%s1436_s26 + $0x1b8] sm:$0xff] %v698_v0  ;;  %v445_v2 = vadd.f32 %v444_v1, %v1425_v10  ;;  %v701_v3 = vpop.f32.mrb[28].mxu1  ;;  %v446_v4 = vpop.f32.mrb[29].mxu0 }
 0x136   : > { %v702_v5 = vadd.f32 %v701_v3, %v1427_v11  ;;  %v447_v6 = vadd.f32 %v446_v4, %v1429_v12  ;;  %v703_v8 = vpop.f32.mrb[29].mxu1 }
 0x137   : > { %864 = vst [vmem:[%s1436_s26 + $0x1c0] sm:$0xff] %v445_v2  ;;  %v704_v9 = vadd.f32 %v703_v8, %v1431_v7 }
 0x138   : > { %866 = vst [vmem:[%s1436_s26 + $0x1d0] sm:$0xff] %v702_v5  ;;  %865 = vst [vmem:[%s1436_s26 + $0x1c8] sm:$0xff] %v447_v6  ;;  %v450_v13 = vpop.f32.mrb[30].mxu0 }
 0x139   : > { %867 = vst [vmem:[%s1436_s26 + $0x1d8] sm:$0xff] %v704_v9  ;;  %v451_v14 = vadd.f32 %v450_v13, %v1425_v10  ;;  %v707_v15 = vpop.f32.mrb[30].mxu1  ;;  %v452_v16 = vpop.f32.mrb[31].mxu0 }
 0x13a   : > { %v708_v17 = vadd.f32 %v707_v15, %v1427_v11  ;;  %v453_v18 = vadd.f32 %v452_v16, %v1429_v12  ;;  %v709_v19 = vpop.f32.mrb[31].mxu1 }
 0x13b   : > { %868 = vst [vmem:[%s1436_s26 + $0x1e0] sm:$0xff] %v451_v14  ;;  %v710_v20 = vadd.f32 %v709_v19, %v1431_v7 }
 0x13c   : > { %870 = vst [vmem:[%s1436_s26 + $0x1f0] sm:$0xff] %v708_v17  ;;  %869 = vst [vmem:[%s1436_s26 + $0x1e8] sm:$0xff] %v453_v18  ;;  %v456_v21 = vpop.f32.mrb[32].mxu0 }
 0x13d   : > { %871 = vst [vmem:[%s1436_s26 + $0x1f8] sm:$0xff] %v710_v20  ;;  %v457_v22 = vadd.f32 %v456_v21, %v1425_v10  ;;  %v713_v23 = vpop.f32.mrb[32].mxu1  ;;  %v458_v24 = vpop.f32.mrb[33].mxu0 }
 0x13e   : > { %v714_v25 = vadd.f32 %v713_v23, %v1427_v11  ;;  %v459_v26 = vadd.f32 %v458_v24, %v1429_v12  ;;  %v715_v27 = vpop.f32.mrb[33].mxu1 }
 0x13f   : > { %872 = vst [vmem:[%s1436_s26 + $0x200] sm:$0xff] %v457_v22  ;;  %v716_v28 = vadd.f32 %v715_v27, %v1431_v7 }
 0x140   : > { %874 = vst [vmem:[%s1436_s26 + $0x210] sm:$0xff] %v714_v25  ;;  %873 = vst [vmem:[%s1436_s26 + $0x208] sm:$0xff] %v459_v26  ;;  %v462_v29 = vpop.f32.mrb[34].mxu0 }
 0x141   : > { %875 = vst [vmem:[%s1436_s26 + $0x218] sm:$0xff] %v716_v28  ;;  %v463_v30 = vadd.f32 %v462_v29, %v1425_v10  ;;  %v719_v31 = vpop.f32.mrb[34].mxu1  ;;  %v464_v32 = vpop.f32.mrb[35].mxu0 }
 0x142   : > { %v720_v33 = vadd.f32 %v719_v31, %v1427_v11  ;;  %v465_v34 = vadd.f32 %v464_v32, %v1429_v12  ;;  %v721_v35 = vpop.f32.mrb[35].mxu1 }
 0x143   : > { %876 = vst [vmem:[%s1436_s26 + $0x220] sm:$0xff] %v463_v30  ;;  %v722_v36 = vadd.f32 %v721_v35, %v1431_v7 }
 0x144   : > { %878 = vst [vmem:[%s1436_s26 + $0x230] sm:$0xff] %v720_v33  ;;  %877 = vst [vmem:[%s1436_s26 + $0x228] sm:$0xff] %v465_v34  ;;  %v468_v37 = vpop.f32.mrb[36].mxu0 }
 0x145   : > { %879 = vst [vmem:[%s1436_s26 + $0x238] sm:$0xff] %v722_v36  ;;  %v469_v38 = vadd.f32 %v468_v37, %v1425_v10  ;;  %v725_v39 = vpop.f32.mrb[36].mxu1  ;;  %v470_v40 = vpop.f32.mrb[37].mxu0 }
 0x146   : > { %v726_v41 = vadd.f32 %v725_v39, %v1427_v11  ;;  %v471_v42 = vadd.f32 %v470_v40, %v1429_v12  ;;  %v727_v43 = vpop.f32.mrb[37].mxu1 }
 0x147   : > { %880 = vst [vmem:[%s1436_s26 + $0x240] sm:$0xff] %v469_v38  ;;  %v728_v44 = vadd.f32 %v727_v43, %v1431_v7 }
 0x148   : > { %882 = vst [vmem:[%s1436_s26 + $0x250] sm:$0xff] %v726_v41  ;;  %881 = vst [vmem:[%s1436_s26 + $0x248] sm:$0xff] %v471_v42  ;;  %v474_v45 = vpop.f32.mrb[38].mxu0 }
 0x149   : > { %883 = vst [vmem:[%s1436_s26 + $0x258] sm:$0xff] %v728_v44  ;;  %v475_v46 = vadd.f32 %v474_v45, %v1425_v10  ;;  %v731_v47 = vpop.f32.mrb[38].mxu1  ;;  %v476_v48 = vpop.f32.mrb[39].mxu0 }
 0x14a   : > { %v732_v49 = vadd.f32 %v731_v47, %v1427_v11  ;;  %v477_v50 = vadd.f32 %v476_v48, %v1429_v12  ;;  %v733_v51 = vpop.f32.mrb[39].mxu1 }
 0x14b   : > { %884 = vst [vmem:[%s1436_s26 + $0x260] sm:$0xff] %v475_v46  ;;  %v734_v52 = vadd.f32 %v733_v51, %v1431_v7 }
 0x14c   : > { %886 = vst [vmem:[%s1436_s26 + $0x270] sm:$0xff] %v732_v49  ;;  %885 = vst [vmem:[%s1436_s26 + $0x268] sm:$0xff] %v477_v50  ;;  %v480_v53 = vpop.f32.mrb[40].mxu0 }
 0x14d   : > { %887 = vst [vmem:[%s1436_s26 + $0x278] sm:$0xff] %v734_v52  ;;  %v481_v54 = vadd.f32 %v480_v53, %v1425_v10  ;;  %v737_v55 = vpop.f32.mrb[40].mxu1  ;;  %v482_v56 = vpop.f32.mrb[41].mxu0 }
 0x14e   : > { %v738_v57 = vadd.f32 %v737_v55, %v1427_v11  ;;  %v483_v58 = vadd.f32 %v482_v56, %v1429_v12  ;;  %v739_v59 = vpop.f32.mrb[41].mxu1 }
 0x14f   : > { %888 = vst [vmem:[%s1436_s26 + $0x280] sm:$0xff] %v481_v54  ;;  %v740_v60 = vadd.f32 %v739_v59, %v1431_v7 }
 0x150   : > { %890 = vst [vmem:[%s1436_s26 + $0x290] sm:$0xff] %v738_v57  ;;  %889 = vst [vmem:[%s1436_s26 + $0x288] sm:$0xff] %v483_v58  ;;  %v486_v61 = vpop.f32.mrb[42].mxu0 }
 0x151   : > { %891 = vst [vmem:[%s1436_s26 + $0x298] sm:$0xff] %v740_v60  ;;  %v487_v62 = vadd.f32 %v486_v61, %v1425_v10  ;;  %v743_v63 = vpop.f32.mrb[42].mxu1  ;;  %v488_v0 = vpop.f32.mrb[43].mxu0 }
 0x152   : > { %v744_v1 = vadd.f32 %v743_v63, %v1427_v11  ;;  %v489_v2 = vadd.f32 %v488_v0, %v1429_v12  ;;  %v745_v3 = vpop.f32.mrb[43].mxu1 }
 0x153   : > { %892 = vst [vmem:[%s1436_s26 + $0x2a0] sm:$0xff] %v487_v62  ;;  %v746_v4 = vadd.f32 %v745_v3, %v1431_v7 }
 0x154   : > { %894 = vst [vmem:[%s1436_s26 + $0x2b0] sm:$0xff] %v744_v1  ;;  %893 = vst [vmem:[%s1436_s26 + $0x2a8] sm:$0xff] %v489_v2  ;;  %v492_v5 = vpop.f32.mrb[44].mxu0 }
 0x155   : > { %895 = vst [vmem:[%s1436_s26 + $0x2b8] sm:$0xff] %v746_v4  ;;  %v493_v6 = vadd.f32 %v492_v5, %v1425_v10  ;;  %v749_v8 = vpop.f32.mrb[44].mxu1  ;;  %v494_v9 = vpop.f32.mrb[45].mxu0 }
 0x156   : > { %v750_v13 = vadd.f32 %v749_v8, %v1427_v11  ;;  %v495_v14 = vadd.f32 %v494_v9, %v1429_v12  ;;  %v751_v15 = vpop.f32.mrb[45].mxu1 }
 0x157   : > { %896 = vst [vmem:[%s1436_s26 + $0x2c0] sm:$0xff] %v493_v6  ;;  %v752_v16 = vadd.f32 %v751_v15, %v1431_v7 }
 0x158   : > { %898 = vst [vmem:[%s1436_s26 + $0x2d0] sm:$0xff] %v750_v13  ;;  %897 = vst [vmem:[%s1436_s26 + $0x2c8] sm:$0xff] %v495_v14  ;;  %v498_v17 = vpop.f32.mrb[46].mxu0 }
 0x159   : > { %899 = vst [vmem:[%s1436_s26 + $0x2d8] sm:$0xff] %v752_v16  ;;  %v499_v18 = vadd.f32 %v498_v17, %v1425_v10  ;;  %v755_v19 = vpop.f32.mrb[46].mxu1  ;;  %v500_v20 = vpop.f32.mrb[47].mxu0 }
 0x15a   : > { %v756_v21 = vadd.f32 %v755_v19, %v1427_v11  ;;  %v501_v22 = vadd.f32 %v500_v20, %v1429_v12  ;;  %v757_v23 = vpop.f32.mrb[47].mxu1 }
 0x15b   : > { %900 = vst [vmem:[%s1436_s26 + $0x2e0] sm:$0xff] %v499_v18  ;;  %v758_v24 = vadd.f32 %v757_v23, %v1431_v7 }
 0x15c   : > { %902 = vst [vmem:[%s1436_s26 + $0x2f0] sm:$0xff] %v756_v21  ;;  %901 = vst [vmem:[%s1436_s26 + $0x2e8] sm:$0xff] %v501_v22  ;;  %v504_v25 = vpop.f32.mrb[48].mxu0 }
 0x15d   : > { %903 = vst [vmem:[%s1436_s26 + $0x2f8] sm:$0xff] %v758_v24  ;;  %v505_v26 = vadd.f32 %v504_v25, %v1425_v10  ;;  %v761_v27 = vpop.f32.mrb[48].mxu1  ;;  %v506_v28 = vpop.f32.mrb[49].mxu0 }
 0x15e   : > { %v762_v29 = vadd.f32 %v761_v27, %v1427_v11  ;;  %v507_v30 = vadd.f32 %v506_v28, %v1429_v12  ;;  %v763_v31 = vpop.f32.mrb[49].mxu1 }
 0x15f   : > { %904 = vst [vmem:[%s1436_s26 + $0x300] sm:$0xff] %v505_v26  ;;  %v764_v32 = vadd.f32 %v763_v31, %v1431_v7 }
 0x160   : > { %906 = vst [vmem:[%s1436_s26 + $0x310] sm:$0xff] %v762_v29  ;;  %905 = vst [vmem:[%s1436_s26 + $0x308] sm:$0xff] %v507_v30  ;;  %v510_v33 = vpop.f32.mrb[50].mxu0 }
 0x161   : > { %907 = vst [vmem:[%s1436_s26 + $0x318] sm:$0xff] %v764_v32  ;;  %v511_v34 = vadd.f32 %v510_v33, %v1425_v10  ;;  %v767_v35 = vpop.f32.mrb[50].mxu1  ;;  %v512_v36 = vpop.f32.mrb[51].mxu0 }
 0x162   : > { %v768_v37 = vadd.f32 %v767_v35, %v1427_v11  ;;  %v513_v38 = vadd.f32 %v512_v36, %v1429_v12  ;;  %v769_v39 = vpop.f32.mrb[51].mxu1 }
 0x163   : > { %908 = vst [vmem:[%s1436_s26 + $0x320] sm:$0xff] %v511_v34  ;;  %v770_v40 = vadd.f32 %v769_v39, %v1431_v7 }
 0x164   : > { %910 = vst [vmem:[%s1436_s26 + $0x330] sm:$0xff] %v768_v37  ;;  %909 = vst [vmem:[%s1436_s26 + $0x328] sm:$0xff] %v513_v38  ;;  %v516_v41 = vpop.f32.mrb[52].mxu0 }
 0x165   : > { %911 = vst [vmem:[%s1436_s26 + $0x338] sm:$0xff] %v770_v40  ;;  %v517_v42 = vadd.f32 %v516_v41, %v1425_v10  ;;  %v773_v43 = vpop.f32.mrb[52].mxu1  ;;  %v518_v44 = vpop.f32.mrb[53].mxu0 }
 0x166   : > { %v774_v45 = vadd.f32 %v773_v43, %v1427_v11  ;;  %v519_v46 = vadd.f32 %v518_v44, %v1429_v12  ;;  %v775_v47 = vpop.f32.mrb[53].mxu1 }
 0x167   : > { %912 = vst [vmem:[%s1436_s26 + $0x340] sm:$0xff] %v517_v42  ;;  %v776_v48 = vadd.f32 %v775_v47, %v1431_v7 }
 0x168   : > { %914 = vst [vmem:[%s1436_s26 + $0x350] sm:$0xff] %v774_v45  ;;  %913 = vst [vmem:[%s1436_s26 + $0x348] sm:$0xff] %v519_v46  ;;  %v522_v49 = vpop.f32.mrb[54].mxu0 }
 0x169   : > { %915 = vst [vmem:[%s1436_s26 + $0x358] sm:$0xff] %v776_v48  ;;  %v523_v50 = vadd.f32 %v522_v49, %v1425_v10  ;;  %v779_v51 = vpop.f32.mrb[54].mxu1  ;;  %v524_v52 = vpop.f32.mrb[55].mxu0 }
 0x16a   : > { %v780_v53 = vadd.f32 %v779_v51, %v1427_v11  ;;  %v525_v54 = vadd.f32 %v524_v52, %v1429_v12  ;;  %v781_v55 = vpop.f32.mrb[55].mxu1 }
 0x16b   : > { %916 = vst [vmem:[%s1436_s26 + $0x360] sm:$0xff] %v523_v50  ;;  %v782_v56 = vadd.f32 %v781_v55, %v1431_v7 }
 0x16c   : > { %918 = vst [vmem:[%s1436_s26 + $0x370] sm:$0xff] %v780_v53  ;;  %917 = vst [vmem:[%s1436_s26 + $0x368] sm:$0xff] %v525_v54  ;;  %v528_v57 = vpop.f32.mrb[56].mxu0 }
 0x16d   : > { %919 = vst [vmem:[%s1436_s26 + $0x378] sm:$0xff] %v782_v56  ;;  %v529_v58 = vadd.f32 %v528_v57, %v1425_v10  ;;  %v785_v59 = vpop.f32.mrb[56].mxu1  ;;  %v530_v60 = vpop.f32.mrb[57].mxu0 }
 0x16e   : > { %v786_v61 = vadd.f32 %v785_v59, %v1427_v11  ;;  %v531_v62 = vadd.f32 %v530_v60, %v1429_v12  ;;  %v787_v63 = vpop.f32.mrb[57].mxu1 }
 0x16f   : > { %920 = vst [vmem:[%s1436_s26 + $0x380] sm:$0xff] %v529_v58  ;;  %v788_v0 = vadd.f32 %v787_v63, %v1431_v7 }
 0x170   : > { %922 = vst [vmem:[%s1436_s26 + $0x390] sm:$0xff] %v786_v61  ;;  %921 = vst [vmem:[%s1436_s26 + $0x388] sm:$0xff] %v531_v62  ;;  %v534_v1 = vpop.f32.mrb[58].mxu0 }
 0x171   : > { %923 = vst [vmem:[%s1436_s26 + $0x398] sm:$0xff] %v788_v0  ;;  %v535_v2 = vadd.f32 %v534_v1, %v1425_v10  ;;  %v791_v3 = vpop.f32.mrb[58].mxu1  ;;  %v536_v4 = vpop.f32.mrb[59].mxu0 }
 0x172   : > { %v792_v5 = vadd.f32 %v791_v3, %v1427_v11  ;;  %v537_v6 = vadd.f32 %v536_v4, %v1429_v12  ;;  %v793_v8 = vpop.f32.mrb[59].mxu1 }
 0x173   : > { %924 = vst [vmem:[%s1436_s26 + $0x3a0] sm:$0xff] %v535_v2  ;;  %v794_v9 = vadd.f32 %v793_v8, %v1431_v7 }
 0x174   : > { %926 = vst [vmem:[%s1436_s26 + $0x3b0] sm:$0xff] %v792_v5  ;;  %925 = vst [vmem:[%s1436_s26 + $0x3a8] sm:$0xff] %v537_v6  ;;  %v540_v13 = vpop.f32.mrb[60].mxu0 }
 0x175   : > { %927 = vst [vmem:[%s1436_s26 + $0x3b8] sm:$0xff] %v794_v9  ;;  %v541_v14 = vadd.f32 %v540_v13, %v1425_v10  ;;  %v797_v15 = vpop.f32.mrb[60].mxu1  ;;  %v542_v16 = vpop.f32.mrb[61].mxu0 }
 0x176   : > { %v798_v17 = vadd.f32 %v797_v15, %v1427_v11  ;;  %v543_v18 = vadd.f32 %v542_v16, %v1429_v12  ;;  %v799_v19 = vpop.f32.mrb[61].mxu1 }
 0x177   : > { %928 = vst [vmem:[%s1436_s26 + $0x3c0] sm:$0xff] %v541_v14  ;;  %v800_v20 = vadd.f32 %v799_v19, %v1431_v7 }
 0x178   : > { %930 = vst [vmem:[%s1436_s26 + $0x3d0] sm:$0xff] %v798_v17  ;;  %929 = vst [vmem:[%s1436_s26 + $0x3c8] sm:$0xff] %v543_v18  ;;  %v546_v21 = vpop.f32.mrb[62].mxu0 }
 0x179   : > { %931 = vst [vmem:[%s1436_s26 + $0x3d8] sm:$0xff] %v800_v20  ;;  %v547_v22 = vadd.f32 %v546_v21, %v1425_v10  ;;  %v803_v23 = vpop.f32.mrb[62].mxu1  ;;  %v548_v24 = vpop.f32.mrb[63].mxu0 }
 0x17a   : > { %v804_v25 = vadd.f32 %v803_v23, %v1427_v11  ;;  %v549_v26 = vadd.f32 %v548_v24, %v1429_v12  ;;  %v805_v27 = vpop.f32.mrb[63].mxu1 }
 0x17b   : > { %932 = vst [vmem:[%s1436_s26 + $0x3e0] sm:$0xff] %v547_v22  ;;  %v806_v28 = vadd.f32 %v805_v27, %v1431_v7 }
 0x17c   : > { %934 = vst [vmem:[%s1436_s26 + $0x3f0] sm:$0xff] %v804_v25  ;;  %933 = vst [vmem:[%s1436_s26 + $0x3e8] sm:$0xff] %v549_v26 }
 0x17d   : > { %935 = vst [vmem:[%s1436_s26 + $0x3f8] sm:$0xff] %v806_v28 }
 0x17e PF: > { %s13_s12 = sadd.s32 1, %s1086_s12  }
 0x17f   : > { %p10_p4 = scmp.ge.s32.totalorder %s13_s12, 4  }
 0x181   :  { %12 = sbr.rel (!%p10_p4) target bundleno = 1 (0x1), region = 62 }

// kernel: up_forward.5
= control target key start
LH: loop header
LB: loop body
LE: loop exit
PB: predicated region body
PF: predicated region fallthrough
CT: control target
= control target key end

     0   :  { %s8673_s18 = smov 0   ;;  %s8675_s19 = smov 0   ;;  %s10943_s0 = inlined_call_operand.vmem [shape: f32[2,34,34,128], index: 0, kind: input, shape index: {}, may-alias: {0,1}]   ;;  %s10944_s1 = inlined_call_operand.vmem [shape: f32[2,34,34,128], index: 1, kind: input, shape index: {}, may-alias: {0,1}]   ;;  %s10945_s2 = inlined_call_operand.vmem [shape: f32[9,128,128], index: 2, kind: input, shape index: {}]   ;;  %s10946_s3 = inlined_call_operand.vmem [shape: f32[2,32,32,128], index: 3, kind: output, shape index: {0}]   ;;  %s10947_s4 = inlined_call_operand.vmem [shape: f32[4,1,128], index: 4, kind: output, shape index: {1}]   ;;  %s10948_s5 = inlined_call_operand.vmem [shape: f32[4,1,128], index: 5, kind: output, shape index: {2}]  }
   0x1   :  { %s8677_s20 = smov 0   ;;  %s8679_s21 = smov 0  }
   0x2   :  { %s8681_s22 = smov 0  }
   0x3 LB: > { %s31_s23 = sadd.s32 1, %s8633_s20  ;;  %s35_s24 = sadd.s32 1, %s8637_s21  ;;  %s8641_s22 = sphi %s8681_s22, %s16_s22   ;;  %s8637_s21 = sphi %s8679_s21, %s11552_s21   ;;  %s8633_s20 = sphi %s8677_s20, %s11551_s20   ;;  %s8629_s19 = sphi %s8675_s19, %s11550_s19   ;;  %s8625_s18 = sphi %s8673_s18, %s11549_s18  }
   0x4   : > { %p33_p0 = scmp.ge.s32.totalorder %s31_s23, 2  ;;  %p5656_p1 = scmp.ge.s32.totalorder %s8641_s22, 1 }
   0x5   : > { %p280_p2 = scmp.lt.s32.totalorder %s8641_s22, 5 }
   0x6   : > { %s11554_s23 = smov (%p33_p0, %s31_s23), 0  ;;  %s11556_s24 = smov (!%p33_p0, %s35_s24), %s8637_s21 }
   0x7   : > { %p281_p3 = pnand %p5656_p1, %p280_p2  ;;  %p37_p4 = scmp.ge.s32.totalorder %s11556_s24, 2 }
   0x9   : > { %s11558_s24 = smov (%p37_p4, %s11556_s24), 0  ;;  %284 = sbr.rel (%p281_p3) target bundleno = 858 (0x35a), region = 32 }
  0x10   : > { %v5668_v0 = vld [vmem:[%s10945_s2 + $0x80] sm:$0xff]  ;;  %v5669_v1 = vld [vmem:[%s10945_s2 + $0x88] sm:$0xff]  ;;  %s8717_s6 = sshll.u32 %s8625_s18, 4  ;;  %p364_p5 = scmp.lt.s32.totalorder %s8629_s19, 1  ;;  %v5670_v5 = vld [vmem:[%s10945_s2 + $0x90] sm:$0xff]  ;;  %vm618_vm0 = vcmask 1046528  }
  0x11   : > { %v5716_v2 = vld [vmem:[%s10945_s2 + $0x200] sm:$0xff]  ;;  %v7679_v3 = vpack.c.bf16 %v5669_v1, %v5668_v0  ;;  %v5717_v4 = vld [vmem:[%s10945_s2 + $0x208] sm:$0xff]  ;;  %v5671_v6 = vld [vmem:[%s10945_s2 + $0x98] sm:$0xff]  ;;  %p366_p6 = scmp.lt.s32.totalorder %s8717_s6, 33  ;;  %vm1614_vm1 = vcmask 1045504   ;;  %s5806_s16 = sadd.s32 16, %s8717_s6 }
  0x12   : > { %v8730_v7 = vpack.c.bf16 %v5717_v4, %v5716_v2  ;;  %v7683_v8 = vpack.c.bf16 %v5671_v6, %v5670_v5  ;;  %v5718_v9 = vld [vmem:[%s10945_s2 + $0x210] sm:$0xff]  ;;  %v5719_v10 = vld [vmem:[%s10945_s2 + $0x218] sm:$0xff]  ;;  %v5672_v11 = vld [vmem:[%s10945_s2 + $0xa0] sm:$0xff]  ;;  %s8742_s26 = scalar_select %p364_p5, %s8629_s19, 1 }
  0x13   : > { %7680 = vmatprep.subr.bf16.mxu1 %v7679_v3  ;;  %v8744_v12 = vpack.c.bf16 %v5719_v10, %v5718_v9  ;;  %v5673_v13 = vld [vmem:[%s10945_s2 + $0xa8] sm:$0xff]  ;;  %v5720_v14 = vld [vmem:[%s10945_s2 + $0x220] sm:$0xff]  ;;  %s367_s9 = scalar_select %p366_p6, %s8717_s6, 33  ;;  %v5674_v18 = vld [vmem:[%s10945_s2 + $0xb0] sm:$0xff] }
  0x14   : > { %11197 = vst [vmem:[#allocation2_spill] sm:$0xff] %v8730_v7  ;;  %v5721_v15 = vld [vmem:[%s10945_s2 + $0x228] sm:$0xff]  ;;  %7808 = vmatprep.subr.bf16.mxu0 %v8730_v7  ;;  %7682 = vmatpush3.bf16.msra.mxu1 %v7679_v3  ;;  %s8496_s10 = smul.u32 170, %s8742_s26  ;;  %v7687_v16 = vpack.c.bf16 %v5673_v13, %v5672_v11  ;;  %v5675_v19 = vld [vmem:[%s10945_s2 + $0xb8] sm:$0xff]  ;;  %v5722_v20 = vld [vmem:[%s10945_s2 + $0x230] sm:$0xff]  ;;  %p9942_p7 = scmp.lt.s32.totalorder %s5806_s16, 33 }
  0x15   : > { %11198 = vst [vmem:[#allocation3_spill] sm:$0xff] %v8744_v12  ;;  %7810 = vmatpush3.bf16.msra.mxu0 %v8730_v7  ;;  %7684 = vmatprep.subr.bf16.mxu1 %v7683_v8  ;;  %s8495_s11 = smul.u32 5, %s367_s9  ;;  %v8760_v17 = vpack.c.bf16 %v5721_v15, %v5720_v14  ;;  %v5723_v21 = vld [vmem:[%s10945_s2 + $0x238] sm:$0xff]  ;;  %v7691_v22 = vpack.c.bf16 %v5675_v19, %v5674_v18  ;;  %v5676_v23 = vld [vmem:[%s10945_s2 + $0xc0] sm:$0xff]  ;;  %v5677_v24 = vld [vmem:[%s10945_s2 + $0xc8] sm:$0xff]  ;;  %p401_p8 = scmp.lt.s32.totalorder %s8717_s6, 31 }
  0x16   : > { %7812 = vmatprep.subr.bf16.mxu0 %v8744_v12  ;;  %v8789_v25 = vpack.c.bf16 %v5723_v21, %v5722_v20  ;;  %v5724_v26 = vld [vmem:[%s10945_s2 + $0x240] sm:$0xff]  ;;  %v5725_v27 = vld [vmem:[%s10945_s2 + $0x248] sm:$0xff]  ;;  %v7695_v36 = vpack.c.bf16 %v5677_v24, %v5676_v23  ;;  %v5678_v38 = vld [vmem:[%s10945_s2 + $0xd0] sm:$0xff]  ;;  %s11560_s16 = smov (!%p9942_p7, %s5806_s16), 33 }
  0x17   : > { %11199 = vst [vmem:[#allocation4_spill] sm:$0xff] %v8760_v17  ;;  %s370_s28 = sadd.s32 %s8496_s10, %s8495_s11  ;;  %v8812_v37 = vpack.c.bf16 %v5725_v27, %v5724_v26  ;;  %v5679_v39 = vld [vmem:[%s10945_s2 + $0xd8] sm:$0xff]  ;;  %v5726_v42 = vld [vmem:[%s10945_s2 + $0x250] sm:$0xff]  ;;  %v5680_v46 = vld [vmem:[%s10945_s2 + $0xe0] sm:$0xff]  ;;  %s8497_s12 = smul.u32 5, %s11560_s16 }
  0x18   : > { %7686 = vmatpush3.bf16.msra.mxu1 %v7683_v8  ;;  %s5658_s29 = sshll.u32 %s370_s28, 3  ;;  %11200 = vst [vmem:[#allocation5_spill] sm:$0xff] %v8789_v25  ;;  %v5727_v43 = vld [vmem:[%s10945_s2 + $0x258] sm:$0xff]  ;;  %v7699_v44 = vpack.c.bf16 %v5679_v39, %v5678_v38  ;;  %v5681_v47 = vld [vmem:[%s10945_s2 + $0xe8] sm:$0xff]  ;;  %v5728_v48 = vld [vmem:[%s10945_s2 + $0x260] sm:$0xff]  ;;  %s11562_s6 = smov (!%p401_p8, %s8717_s6), 31 }
  0x19   : > { %7814 = vmatpush3.bf16.msra.mxu0 %v8744_v12  ;;  %7688 = vmatprep.subr.bf16.mxu1 %v7687_v16  ;;  %s8786_s14 = scalar_lea.vmem %s10943_s0, %s5658_s29  ;;  %11201 = vst [vmem:[#allocation6_spill] sm:$0xff] %v8812_v37  ;;  %v8837_v45 = vpack.c.bf16 %v5727_v43, %v5726_v42  ;;  %v5729_v49 = vld [vmem:[%s10945_s2 + $0x268] sm:$0xff]  ;;  %v7703_v50 = vpack.c.bf16 %v5681_v47, %v5680_v46  ;;  %v5682_v52 = vld [vmem:[%s10945_s2 + $0xf0] sm:$0xff]  ;;  %v5683_v53 = vld [vmem:[%s10945_s2 + $0xf8] sm:$0xff]  ;;  %s388_s13 = sadd.s32 %s8497_s12, %s8496_s10 }
  0x1a   : > { %7816 = vmatprep.subr.bf16.mxu0 %v8760_v17  ;;  %v432_v28 = vld [vmem:[%s8786_s14] sm:$0xff]  ;;  %v8799_v29 = vld [vmem:[%s8786_s14 + $0x8] sm:$0xff]  ;;  %v8805_v32 = vld [vmem:[%s8786_s14 + $0x30] sm:$0xff]  ;;  %v8853_v51 = vpack.c.bf16 %v5729_v49, %v5728_v48  ;;  %v7707_v56 = vpack.c.bf16 %v5683_v53, %v5682_v52  ;;  %s5661_s10 = sshll.u32 %s388_s13, 3 }
  0x1b   : > { %v619_v30 = vrot.slane %v432_v28, 1  ;;  %v8802_v31 = vld [vmem:[%s8786_s14 + $0x28] sm:$0xff]  ;;  %v620_v33 = vrot.slane %v8799_v29, 1  ;;  %v629_v35 = vrot.slane %v8805_v32, 1  ;;  %11202 = vst [vmem:[#allocation7_spill] sm:$0xff] %v8837_v45  ;;  %v5730_v54 = vld [vmem:[%s10945_s2 + $0x270] sm:$0xff]  ;;  %s10045_s16 = scalar_lea.vmem %s10944_s1, %s5661_s10 }
  0x1c   : > { %7690 = vmatpush3.bf16.msra.mxu1 %v7687_v16  ;;  %v628_v34 = vrot.slane %v8802_v31, 1  ;;  %11203 = vst [vmem:[#allocation8_spill] sm:$0xff] %v8853_v51  ;;  %v5731_v55 = vld [vmem:[%s10945_s2 + $0x278] sm:$0xff]  ;;  %v434_v57 = vld [vmem:[%s8786_s14 + $0x10] sm:$0xff]  ;;  %v522_v59 = vld [vmem:[%s10945_s2] sm:$0xff] }
  0x1d   : > { %7818 = vmatpush3.bf16.msra.mxu0 %v8760_v17  ;;  %7692 = vmatprep.subr.bf16.mxu1 %v7691_v22  ;;  %v621_v40 = vsel %vm618_vm0, %v619_v30, %v620_v33  ;;  %v8870_v58 = vpack.c.bf16 %v5731_v55, %v5730_v54  ;;  %v523_v60 = vld [vmem:[%s10945_s2 + $0x8] sm:$0xff]  ;;  %v8879_v61 = vld [vmem:[%s8786_s14 + $0x38] sm:$0xff]  ;;  %v5732_v62 = vld [vmem:[%s10945_s2 + $0x280] sm:$0xff]  ;;  %v622_v1 = vrot.slane %v434_v57, 1 }
  0x1e   : > { %7820 = vmatprep.subr.bf16.mxu0 %v8789_v25  ;;  %v8826_v41 = vsel %vm618_vm0, %v628_v34, %v629_v35  ;;  %6559 = vmatprep.mubr.f32.mxu1 %v621_v40  ;;  %v5733_v63 = vld [vmem:[%s10945_s2 + $0x288] sm:$0xff]  ;;  %v435_v0 = vld [vmem:[%s8786_s14 + $0x18] sm:$0xff]  ;;  %v8889_v2 = vld [vmem:[%s8786_s14 + $0x40] sm:$0xff]  ;;  %v7711_v3 = vpack.c.bf16 %v523_v60, %v522_v59  ;;  %v631_v4 = vrot.slane %v8879_v61, 1 }
  0x1f   : > { %7071 = vmatprep.mubr.f32.mxu0 %v8826_v41  ;;  %11204 = vst [vmem:[#allocation9_spill] sm:$0xff] %v8870_v58  ;;  %v436_v5 = vld [vmem:[%s8786_s14 + $0x20] sm:$0x3]  ;;  %v7839_v6 = vpack.c.bf16 %v5733_v63, %v5732_v62  ;;  %v624_v8 = vrot.slane %v435_v0, 1  ;;  %v8896_v9 = vld [vmem:[%s8786_s14 + $0x48] sm:$0x3]  ;;  %v623_v16 = vsel %vm618_vm0, %v620_v33, %v622_v1 }
  0x20   : > { %7694 = vmatpush3.bf16.msra.mxu1 %v7691_v22  ;;  %v8899_v10 = vld [vmem:[%s8786_s14 + $0x50] sm:$0xff]  ;;  %v633_v11 = vrot.slane %v8889_v2, 1  ;;  %v8903_v13 = vld [vmem:[%s8786_s14 + $0x58] sm:$0xff]  ;;  %v626_v18 = vrot.slane %v436_v5, 1  ;;  %v632_v21 = vsel %vm618_vm0, %v629_v35, %v631_v4  ;;  %v635_v22 = vrot.slane %v8896_v9, 1  ;;  %v8929_v27 = vld [vmem:[%s8786_s14 + $0x60] sm:$0xff] }
  0x21   : > { %7822 = vmatpush3.bf16.msra.mxu0 %v8789_v25  ;;  %7696 = vmatprep.subr.bf16.mxu1 %v7695_v36  ;;  %v5734_v14 = vld [vmem:[%s10945_s2 + $0x290] sm:$0xff]  ;;  %v5735_v15 = vld [vmem:[%s10945_s2 + $0x298] sm:$0xff]  ;;  %v625_v23 = vsel %vm618_vm0, %v622_v1, %v624_v8  ;;  %v637_v24 = vrot.slane %v8899_v10, 1  ;;  %v638_v26 = vrot.slane %v8903_v13, 1  ;;  %v8933_v30 = vld [vmem:[%s8786_s14 + $0x68] sm:$0xff]  ;;  %v640_v42 = vrot.slane %v8929_v27, 1 }
  0x22   : > { %7824 = vmatprep.subr.bf16.mxu0 %v8812_v37  ;;  %v524_v19 = vld [vmem:[%s10945_s2 + $0x10] sm:$0xff]  ;;  %v525_v20 = vld [vmem:[%s10945_s2 + $0x18] sm:$0xff]  ;;  %v7843_v28 = vpack.c.bf16 %v5735_v15, %v5734_v14  ;;  %v634_v29 = vsel %vm618_vm0, %v631_v4, %v633_v11  ;;  %v5736_v34 = vld [vmem:[%s10945_s2 + $0x2a0] sm:$0xff]  ;;  %v636_v40 = vsel %vm618_vm0, %v633_v11, %v635_v22 }
  0x23   : > { %v7715_v33 = vpack.c.bf16 %v525_v20, %v524_v19  ;;  %v5737_v35 = vld [vmem:[%s10945_s2 + $0x2a8] sm:$0xff]  ;;  %v526_v38 = vld [vmem:[%s10945_s2 + $0x20] sm:$0xff]  ;;  %v8951_v43 = vsel %vm618_vm0, %v637_v24, %v638_v26  ;;  %v8955_v46 = vld [vmem:[%s8786_s14 + $0x70] sm:$0x3] }
  0x24   : > { %7698 = vmatpush3.bf16.msra.mxu1 %v7695_v36  ;;  %v627_v36 = vsel %vm618_vm0, %v624_v8, %v626_v18  ;;  %v527_v39 = vld [vmem:[%s10945_s2 + $0x28] sm:$0xff]  ;;  %11205 = vst [vmem:[#allocation10_spill] sm:$0xff] %v8951_v43  ;;  %v8958_v47 = vld [vmem:[%s8786_s14 + $0x78] sm:$0xff]  ;;  %v7847_v48 = vpack.c.bf16 %v5737_v35, %v5736_v34  ;;  %v8961_v49 = vld [vmem:[%s8786_s14 + $0x80] sm:$0xff]  ;;  %v644_v57 = vrot.slane %v8955_v46, 1 }
  0x25   : > { %7826 = vmatpush3.bf16.msra.mxu0 %v8812_v37  ;;  %7700 = vmatprep.subr.bf16.mxu1 %v7699_v44  ;;  %v5739_v52 = vld [vmem:[%s10945_s2 + $0x2b8] sm:$0xff]  ;;  %v7719_v53 = vpack.c.bf16 %v527_v39, %v526_v38  ;;  %v528_v54 = vld [vmem:[%s10945_s2 + $0x30] sm:$0xff]  ;;  %v647_v60 = vrot.slane %v8961_v49, 1  ;;  %v8987_v62 = vld [vmem:[%s8786_s14 + $0x88] sm:$0xff] }
  0x26   : > { %7828 = vmatprep.subr.bf16.mxu0 %v8837_v45  ;;  %v529_v55 = vld [vmem:[%s10945_s2 + $0x38] sm:$0xff]  ;;  %v8990_v0 = vld [vmem:[%s8786_s14 + $0x90] sm:$0xff]  ;;  %v5740_v1 = vld [vmem:[%s10945_s2 + $0x2c0] sm:$0xff]  ;;  %v649_v11 = vrot.slane %v8987_v62, 1 }
  0x27   : > { %v7723_v4 = vpack.c.bf16 %v529_v55, %v528_v54  ;;  %v530_v5 = vld [vmem:[%s10945_s2 + $0x40] sm:$0xff]  ;;  %v651_v15 = vrot.slane %v8990_v0, 1  ;;  %v9021_v20 = vld [vmem:[%s8786_s14 + $0xa8] sm:$0xff]  ;;  %v5743_v22 = vld [vmem:[%s10945_s2 + $0x2d8] sm:$0xff] }
  0x28   : > { %7702 = vmatpush3.bf16.msra.mxu1 %v7699_v44  ;;  %v642_v44 = vrot.slane %v8933_v30, 1  ;;  %v9018_v18 = vld [vmem:[%s8786_s14 + $0xa0] sm:$0xff]  ;;  %v532_v24 = vld [vmem:[%s10945_s2 + $0x50] sm:$0xff]  ;;  %v656_v35 = vrot.slane %v9021_v20, 1  ;;  %v9052_v39 = vld [vmem:[%s8786_s14 + $0xb8] sm:$0xff] }
  0x29   : > { %7830 = vmatpush3.bf16.msra.mxu0 %v8837_v45  ;;  %7704 = vmatprep.subr.bf16.mxu1 %v7703_v50  ;;  %v655_v34 = vrot.slane %v9018_v18, 1  ;;  %v660_v55 = vrot.slane %v9052_v39, 1  ;;  %v9192_v45 = vld [vmem:[%s8786_s14 + $0x120] sm:$0xff]  ;;  %v9210_v37 = vld [vmem:[%s8786_s14 + $0x128] sm:$0xff] }
  0x2a   : > { %7832 = vmatprep.subr.bf16.mxu0 %v8853_v51  ;;  %v8982_v59 = vsel %vm618_vm0, %v640_v42, %v642_v44  ;;  %v9007_v8 = vsel %vm618_vm0, %v642_v44, %v644_v57  ;;  %v9078_v57 = vld [vmem:[%s8786_s14 + $0xc0] sm:$0x3]  ;;  %v685_v25 = vrot.slane %v9210_v37, 1  ;;  %v9393_v7 = vld [vmem:[%s8786_s14 + $0x1a8] sm:$0xff] }
  0x2b   : > { %11207 = vst [vmem:[#allocation12_spill] sm:$0xff] %v8982_v59  ;;  %11208 = vst [vmem:[#allocation13_spill] sm:$0xff] %v9007_v8  ;;  %v9074_v54 = vsel %vm618_vm0, %v655_v34, %v656_v35  ;;  %v537_v34 = vld [vmem:[%s10945_s2 + $0x78] sm:$0xff] }
  0x2c   : > { %7706 = vmatpush3.bf16.msra.mxu1 %v7703_v50  ;;  %v5738_v50 = vld [vmem:[%s10945_s2 + $0x2b0] sm:$0xff]  ;;  %11213 = vst [vmem:[#allocation18_spill] sm:$0xff] %v9074_v54 }
  0x2d   : > { %7834 = vmatpush3.bf16.msra.mxu0 %v8853_v51  ;;  %7708 = vmatprep.subr.bf16.mxu1 %v7707_v56  ;;  %v7851_v63 = vpack.c.bf16 %v5739_v52, %v5738_v50  ;;  %v535_v50 = vld [vmem:[%s10945_s2 + $0x68] sm:$0xff]  ;;  %v9189_v51 = vld [vmem:[%s8786_s14 + $0x118] sm:$0xff] }
  0x2e   : > { %7836 = vmatprep.subr.bf16.mxu0 %v8870_v58 }
  0x30   : > { %7710 = vmatpush3.bf16.msra.mxu1 %v7707_v56  ;;  %v8978_v56 = vsel %vm618_vm0, %v638_v26, %v640_v42  ;;  %v533_v26 = vld [vmem:[%s10945_s2 + $0x58] sm:$0xff]  ;;  %v5745_v42 = vld [vmem:[%s10945_s2 + $0x2e8] sm:$0xff] }
  0x31   : > { %7838 = vmatpush3.bf16.msra.mxu0 %v8870_v58  ;;  %7712 = vmatprep.subr.bf16.mxu1 %v7711_v3  ;;  %11206 = vst [vmem:[#allocation11_spill] sm:$0xff] %v8978_v56  ;;  %v7731_v44 = vpack.c.bf16 %v533_v26, %v532_v24  ;;  %v5748_v24 = vld [vmem:[%s10945_s2 + $0x300] sm:$0xff]  ;;  %v5749_v26 = vld [vmem:[%s10945_s2 + $0x308] sm:$0xff]  ;;  %v9185_v58 = vld [vmem:[%s8786_s14 + $0x110] sm:$0x3] }
  0x32   : > { %7840 = vmatprep.subr.bf16.mxu0 %v7839_v6 }
  0x33   : > { %6560 = vmatmul.mubr.f32.vlgmr.msra.gmra.mrb[0].mxu1 %v623_v16  ;;  %v9015_v16 = vld [vmem:[%s8786_s14 + $0x98] sm:$0x3] }
  0x34   : > { %7072 = vmatmul.mubr.f32.vlgmr.msra.gmra.mrb[0].mxu0 %v632_v21  ;;  %7714 = vmatpush3.bf16.msra.mxu1 %v7711_v3  ;;  %v5741_v3 = vld [vmem:[%s10945_s2 + $0x2c8] sm:$0xff] }
  0x35   : > { %7842 = vmatpush3.bf16.msra.mxu0 %v7839_v6  ;;  %6562 = vmatprep.mubr.f32.mxu1 %v625_v23  ;;  %v531_v6 = vld [vmem:[%s10945_s2 + $0x48] sm:$0xff]  ;;  %v7855_v19 = vpack.c.bf16 %v5741_v3, %v5740_v1  ;;  %v5746_v1 = vld [vmem:[%s10945_s2 + $0x2f0] sm:$0xff]  ;;  %v5747_v3 = vld [vmem:[%s10945_s2 + $0x2f8] sm:$0xff] }
  0x36   : > { %7074 = vmatprep.mubr.f32.mxu0 %v634_v29  ;;  %7844 = vmatprep.subr.bf16.mxu0 %v7843_v28  ;;  %v7727_v23 = vpack.c.bf16 %v531_v6, %v530_v5  ;;  %v662_v6 = vrot.slane %v9078_v57, 1 }
  0x37   : > { %6563 = vmatmul.mubr.f32.gmra.mrb[2].mxu1 %v627_v36  ;;  %7716 = vmatprep.subr.bf16.mxu1 %v7715_v33  ;;  %v9048_v36 = vld [vmem:[%s8786_s14 + $0xb0] sm:$0xff] }
  0x38   : > { %7075 = vmatmul.mubr.f32.gmra.mrb[2].mxu0 %v636_v40  ;;  %6565 = vmatprep.mubr.f32.mxu1 %v8826_v41  ;;  %v646_v41 = vrot.slane %v8958_v47, 1 }
  0x39   : > { %7077 = vmatprep.mubr.f32.mxu0 %v8951_v43  ;;  %7846 = vmatpush3.bf16.msra.mxu0 %v7843_v28  ;;  %v9039_v28 = vsel %vm618_vm0, %v647_v60, %v649_v11 }
  0x3a   : > { %7848 = vmatprep.subr.bf16.mxu0 %v7847_v48  ;;  %7718 = vmatpush3.bf16.msra.mxu1 %v7715_v33  ;;  %v9011_v14 = vsel %vm618_vm0, %v646_v41, %v647_v60  ;;  %11210 = vst [vmem:[#allocation15_spill] sm:$0xff] %v9039_v28  ;;  %v9043_v33 = vsel %vm618_vm0, %v649_v11, %v651_v15  ;;  %v9081_v41 = vld [vmem:[%s8786_s14 + $0xc8] sm:$0xff] }
  0x3b   : > { %6566 = vmatmul.mubr.f32.gmra.mrb[4].mxu1 %v632_v21  ;;  %7720 = vmatprep.subr.bf16.mxu1 %v7719_v53  ;;  %11209 = vst [vmem:[#allocation14_spill] sm:$0xff] %v9011_v14  ;;  %v5742_v21 = vld [vmem:[%s10945_s2 + $0x2d0] sm:$0xff]  ;;  %11211 = vst [vmem:[#allocation16_spill] sm:$0xff] %v9043_v33 }
  0x3c   : > { %7078 = vmatmul.mubr.f32.gmra.mrb[4].mxu0 %v8978_v56  ;;  %6568 = vmatprep.mubr.f32.mxu1 %v634_v29  ;;  %v653_v29 = vrot.slane %v9015_v16, 1  ;;  %v7859_v38 = vpack.c.bf16 %v5743_v22, %v5742_v21  ;;  %v9106_v21 = vld [vmem:[%s8786_s14 + $0xd8] sm:$0xff]  ;;  %v7867_v22 = vpack.c.bf16 %v5747_v3, %v5746_v1 }
  0x3d   : > { %7080 = vmatprep.mubr.f32.mxu0 %v8982_v59  ;;  %7850 = vmatpush3.bf16.msra.mxu0 %v7847_v48  ;;  %v534_v48 = vld [vmem:[%s10945_s2 + $0x60] sm:$0xff] }
  0x3e   : > { %7852 = vmatprep.subr.bf16.mxu0 %v7851_v63  ;;  %7722 = vmatpush3.bf16.msra.mxu1 %v7719_v53  ;;  %v9070_v52 = vsel %vm618_vm0, %v651_v15, %v653_v29  ;;  %v658_v53 = vrot.slane %v9048_v36, 1  ;;  %v664_v15 = vrot.slane %v9081_v41, 1  ;;  %v536_v29 = vld [vmem:[%s10945_s2 + $0x70] sm:$0xff] }
  0x3f   : > { %6569 = vmatmul.mubr.f32.gmra.mrb[6].mxu1 %v636_v40  ;;  %7724 = vmatprep.subr.bf16.mxu1 %v7723_v4  ;;  %v5744_v40 = vld [vmem:[%s10945_s2 + $0x2e0] sm:$0xff]  ;;  %11212 = vst [vmem:[#allocation17_spill] sm:$0xff] %v9070_v52 }
  0x40   : > { %7081 = vmatmul.mubr.f32.gmra.mrb[6].mxu0 %v9007_v8  ;;  %6571 = vmatprep.mubr.f32.mxu1 %v8951_v43  ;;  %v7863_v60 = vpack.c.bf16 %v5745_v42, %v5744_v40  ;;  %v9097_v5 = vsel %vm618_vm0, %v656_v35, %v658_v53  ;;  %v9101_v11 = vsel %vm618_vm0, %v658_v53, %v660_v55  ;;  %v9145_v53 = vld [vmem:[%s8786_s14 + $0xf8] sm:$0xff]  ;;  %v1643_v43 = vrot.slane %v8961_v49, 2 }
  0x41   : > { %7083 = vmatprep.mubr.f32.mxu0 %v9011_v14  ;;  %7854 = vmatpush3.bf16.msra.mxu0 %v7851_v63  ;;  %v9085_v63 = vld [vmem:[%s8786_s14 + $0xd0] sm:$0xff]  ;;  %11214 = vst [vmem:[#allocation19_spill] sm:$0xff] %v9097_v5  ;;  %11215 = vst [vmem:[#allocation20_spill] sm:$0xff] %v9101_v11  ;;  %v9128_v35 = vsel %vm618_vm0, %v660_v55, %v662_v6  ;;  %v7739_v55 = vpack.c.bf16 %v537_v34, %v536_v29  ;;  %v674_v6 = vrot.slane %v9145_v53, 1 }
  0x42   : > { %7856 = vmatprep.subr.bf16.mxu0 %v7855_v19  ;;  %7726 = vmatpush3.bf16.msra.mxu1 %v7723_v4  ;;  %v7735_v4 = vpack.c.bf16 %v535_v50, %v534_v48  ;;  %11216 = vst [vmem:[#allocation21_spill] sm:$0xff] %v9128_v35  ;;  %v9138_v48 = vpack.c.bf16 %v5749_v26, %v5748_v24  ;;  %v9142_v50 = vld [vmem:[%s8786_s14 + $0xf0] sm:$0xff]  ;;  %v5685_v24 = vld [vmem:[%s10945_s2 + $0x108] sm:$0xff] }
  0x43   : > { %6572 = vmatmul.mubr.f32.gmra.mrb[8].mxu1 %v8978_v56  ;;  %7728 = vmatprep.subr.bf16.mxu1 %v7727_v23 }
  0x44   : > { %7084 = vmatmul.mubr.f32.gmra.mrb[8].mxu0 %v9039_v28  ;;  %6574 = vmatprep.mubr.f32.mxu1 %v8982_v59 }
  0x45   : > { %7086 = vmatprep.mubr.f32.mxu0 %v9043_v33  ;;  %7858 = vmatpush3.bf16.msra.mxu0 %v7855_v19  ;;  %v665_v19 = vrot.slane %v9085_v63, 1 }
  0x46   : > { %7860 = vmatprep.subr.bf16.mxu0 %v7859_v38  ;;  %7730 = vmatpush3.bf16.msra.mxu1 %v7727_v23  ;;  %v9110_v23 = vld [vmem:[%s8786_s14 + $0xe0] sm:$0xff] }
  0x47   : > { %6575 = vmatmul.mubr.f32.gmra.mrb[10].mxu1 %v9007_v8  ;;  %7732 = vmatprep.subr.bf16.mxu1 %v7731_v44  ;;  %v9132_v40 = vsel %vm618_vm0, %v664_v15, %v665_v19  ;;  %v669_v42 = vrot.slane %v9110_v23, 1  ;;  %v9160_v15 = vld [vmem:[%s8786_s14 + $0x100] sm:$0xff]  ;;  %v1638_v8 = vrot.slane %v8933_v30, 2 }
  0x48   : > { %7087 = vmatmul.mubr.f32.gmra.mrb[10].mxu0 %v9070_v52  ;;  %6577 = vmatprep.mubr.f32.mxu1 %v9011_v14  ;;  %11217 = vst [vmem:[#allocation22_spill] sm:$0xff] %v9132_v40  ;;  %v676_v29 = vrot.slane %v9160_v15, 1  ;;  %v9349_v14 = vld [vmem:[%s8786_s14 + $0x188] sm:$0x3] }
  0x49   : > { %7089 = vmatprep.mubr.f32.mxu0 %v9074_v54  ;;  %7862 = vmatpush3.bf16.msra.mxu0 %v7859_v38  ;;  %v667_v38 = vrot.slane %v9106_v21, 1 }
  0x4a   : > { %7864 = vmatprep.subr.bf16.mxu0 %v7863_v60  ;;  %7734 = vmatpush3.bf16.msra.mxu1 %v7731_v44  ;;  %v9136_v44 = vld [vmem:[%s8786_s14 + $0xe8] sm:$0x3] }
  0x4b   : > { %6578 = vmatmul.mubr.f32.gmra.mrb[12].mxu1 %v9039_v28  ;;  %7736 = vmatprep.subr.bf16.mxu1 %v7735_v4  ;;  %v671_v1 = vrot.slane %v9136_v44, 1  ;;  %v9155_v3 = vsel %vm618_vm0, %v667_v38, %v669_v42  ;;  %v9326_v28 = vld [vmem:[%s8786_s14 + $0x180] sm:$0xff] }
  0x4c   : > { %7090 = vmatmul.mubr.f32.gmra.mrb[12].mxu0 %v9097_v5  ;;  %6580 = vmatprep.mubr.f32.mxu1 %v9043_v33  ;;  %11219 = vst [vmem:[#allocation24_spill] sm:$0xff] %v9155_v3  ;;  %v1633_v33 = vrot.slane %v8899_v10, 2 }
  0x4d   : > { %7092 = vmatprep.mubr.f32.mxu0 %v9101_v11  ;;  %7866 = vmatpush3.bf16.msra.mxu0 %v7863_v60  ;;  %v9151_v60 = vsel %vm618_vm0, %v665_v19, %v667_v38  ;;  %v9165_v19 = vld [vmem:[%s8786_s14 + $0x108] sm:$0xff]  ;;  %v9177_v26 = vsel %vm618_vm0, %v669_v42, %v671_v1  ;;  %v680_v1 = vrot.slane %v9185_v58, 1 }
  0x4e   : > { %7868 = vmatprep.subr.bf16.mxu0 %v7867_v22  ;;  %7738 = vmatpush3.bf16.msra.mxu1 %v7735_v4  ;;  %11218 = vst [vmem:[#allocation23_spill] sm:$0xff] %v9151_v60  ;;  %v673_v4 = vrot.slane %v9142_v50, 1  ;;  %11220 = vst [vmem:[#allocation25_spill] sm:$0xff] %v9177_v26  ;;  %v678_v38 = vrot.slane %v9165_v19, 1 }
  0x4f   : > { %6581 = vmatmul.mubr.f32.gmra.mrb[14].mxu1 %v9070_v52  ;;  %7740 = vmatprep.subr.bf16.mxu1 %v7739_v55  ;;  %v9268_v52 = vld [vmem:[%s8786_s14 + $0x160] sm:$0x3] }
  0x50   : > { %7093 = vmatmul.mubr.f32.gmra.mrb[14].mxu0 %v9128_v35  ;;  %6583 = vmatprep.mubr.f32.mxu1 %v9074_v54  ;;  %v9181_v34 = vsel %vm618_vm0, %v673_v4, %v674_v6  ;;  %v9205_v4 = vsel %vm618_vm0, %v676_v29, %v678_v38 }
  0x51   : > { %7095 = vmatprep.mubr.f32.mxu0 %v9132_v40  ;;  %7870 = vmatpush3.bf16.msra.mxu0 %v7867_v22  ;;  %v5684_v22 = vld [vmem:[%s10945_s2 + $0x100] sm:$0xff]  ;;  %11221 = vst [vmem:[#allocation26_spill] sm:$0xff] %v9181_v34  ;;  %11223 = vst [vmem:[#allocation28_spill] sm:$0xff] %v9205_v4 }
  0x52   : > { %7872 = vmatprep.subr.bf16.mxu0 %v9138_v48  ;;  %7742 = vmatpush3.bf16.msra.mxu1 %v7739_v55  ;;  %v9194_v42 = vpack.c.bf16 %v5685_v24, %v5684_v22  ;;  %v9200_v55 = vsel %vm618_vm0, %v674_v6, %v676_v29  ;;  %v682_v22 = vrot.slane %v9189_v51, 1  ;;  %v683_v24 = vrot.slane %v9192_v45, 1  ;;  %v9214_v6 = vld [vmem:[%s8786_s14 + $0x130] sm:$0xff] }
  0x53   : > { %6584 = vmatmul.mubr.f32.gmra.mrb[16].mxu1 %v9097_v5  ;;  %11222 = vst [vmem:[#allocation27_spill] sm:$0xff] %v9200_v55  ;;  %v9220_v29 = vsel %vm618_vm0, %v678_v38, %v680_v1  ;;  %v687_v12 = vrot.slane %v9214_v6, 1 }
  0x54   : > { %7096 = vmatmul.mubr.f32.gmra.mrb[16].mxu0 %v9151_v60  ;;  %6586 = vmatprep.mubr.f32.mxu1 %v9101_v11  ;;  %11224 = vst [vmem:[#allocation29_spill] sm:$0xff] %v9220_v29  ;;  %v9224_v17 = vsel %vm618_vm0, %v682_v22, %v683_v24  ;;  %v9241_v38 = vsel %vm618_vm0, %v683_v24, %v685_v25  ;;  %v9250_v11 = vld [vmem:[%s8786_s14 + $0x150] sm:$0xff] }
  0x55   : > { %7098 = vmatprep.mubr.f32.mxu0 %v9155_v3  ;;  %7744 = vmatprep.subr.bf16.mxu1 %v9194_v42  ;;  %11225 = vst [vmem:[#allocation30_spill] sm:$0xff] %v9224_v17  ;;  %11226 = vst [vmem:[#allocation31_spill] sm:$0xff] %v9241_v38  ;;  %v9245_v22 = vsel %vm618_vm0, %v685_v25, %v687_v12  ;;  %v694_v25 = vrot.slane %v9250_v11, 1 }
  0x56   : > { %11227 = vst [vmem:[#allocation32_spill] sm:$0xff] %v9245_v22 }
  0x57   : > { %6587 = vmatmul.mubr.f32.gmra.mrb[18].mxu1 %v9128_v35 }
  0x58   : > { %7099 = vmatmul.mubr.f32.gmra.mrb[18].mxu0 %v9177_v26  ;;  %6589 = vmatprep.mubr.f32.mxu1 %v9132_v40  ;;  %v9232_v40 = vld [vmem:[%s8786_s14 + $0x140] sm:$0xff] }
  0x59   : > { %7101 = vmatprep.mubr.f32.mxu0 %v9181_v34 }
  0x5b   : > { %6590 = vmatmul.mubr.f32.gmra.mrb[20].mxu1 %v9151_v60  ;;  %v9228_v60 = vld [vmem:[%s8786_s14 + $0x138] sm:$0x3] }
  0x5c   : > { %7102 = vmatmul.mubr.f32.gmra.mrb[20].mxu0 %v9200_v55  ;;  %6592 = vmatprep.mubr.f32.mxu1 %v9155_v3  ;;  %v9235_v3 = vld [vmem:[%s8786_s14 + $0x148] sm:$0xff]  ;;  %v689_v1 = vrot.slane %v9228_v60, 1 }
  0x5d   : > { %7104 = vmatprep.mubr.f32.mxu0 %v9205_v4  ;;  %v692_v35 = vrot.slane %v9235_v3, 1 }
  0x5e   : > { %v9260_v24 = vsel %vm618_vm0, %v687_v12, %v689_v1 }
  0x5f   : > { %6593 = vmatmul.mubr.f32.gmra.mrb[22].mxu1 %v9177_v26  ;;  %v691_v26 = vrot.slane %v9232_v40, 1  ;;  %11228 = vst [vmem:[#allocation33_spill] sm:$0xff] %v9260_v24  ;;  %v9275_v12 = vsel %vm618_vm0, %v692_v35, %v694_v25 }
  0x60   : > { %7105 = vmatmul.mubr.f32.gmra.mrb[22].mxu0 %v9220_v29  ;;  %6595 = vmatprep.mubr.f32.mxu1 %v9181_v34  ;;  %v9254_v34 = vld [vmem:[%s8786_s14 + $0x158] sm:$0xff]  ;;  %11230 = vst [vmem:[#allocation35_spill] sm:$0xff] %v9275_v12 }
  0x61   : > { %7107 = vmatprep.mubr.f32.mxu0 %v9224_v17  ;;  %v9264_v5 = vsel %vm618_vm0, %v691_v26, %v692_v35  ;;  %v696_v54 = vrot.slane %v9254_v34, 1  ;;  %v698_v26 = vrot.slane %v9268_v52, 1 }
  0x62   : > { %11229 = vst [vmem:[#allocation34_spill] sm:$0xff] %v9264_v5 }
  0x63   : > { %6596 = vmatmul.mubr.f32.gmra.mrb[24].mxu1 %v9200_v55  ;;  %v9279_v1 = vsel %vm618_vm0, %v694_v25, %v696_v54  ;;  %v9288_v35 = vsel %vm618_vm0, %v696_v54, %v698_v26  ;;  %v1627_v25 = vrot.slane %v8879_v61, 2  ;;  %v5750_v54 = vld [vmem:[%s10945_s2 + $0x310] sm:$0xff]  ;;  %v5751_v61 = vld [vmem:[%s10945_s2 + $0x318] sm:$0xff] }
  0x64   : > { %7108 = vmatmul.mubr.f32.gmra.mrb[24].mxu0 %v9241_v38  ;;  %6598 = vmatprep.mubr.f32.mxu1 %v9205_v4  ;;  %11231 = vst [vmem:[#allocation36_spill] sm:$0xff] %v9279_v1  ;;  %v1624_v4 = vrot.slane %v8802_v31, 2  ;;  %11232 = vst [vmem:[#allocation37_spill] sm:$0xff] %v9288_v35  ;;  %v1629_v31 = vrot.slane %v8889_v2, 2 }
  0x65   : > { %7110 = vmatprep.mubr.f32.mxu0 %v9245_v22 }
  0x66   : > { %v9321_v55 = vsel %vm1614_vm1, %v1627_v25, %v1629_v31 }
  0x67   : > { %6599 = vmatmul.mubr.f32.gmra.mrb[26].mxu1 %v9220_v29  ;;  %v1625_v29 = vrot.slane %v8805_v32, 2  ;;  %v9296_v32 = vld [vmem:[%s8786_s14 + $0x168] sm:$0xff]  ;;  %11235 = vst [vmem:[#allocation40_spill] sm:$0xff] %v9321_v55 }
  0x68   : > { %7111 = vmatmul.mubr.f32.gmra.mrb[26].mxu0 %v9260_v24  ;;  %6601 = vmatprep.mubr.f32.mxu1 %v9224_v17  ;;  %v700_v26 = vrot.slane %v9296_v32, 1 }
  0x69   : > { %7113 = vmatprep.mubr.f32.mxu0 %v9264_v5  ;;  %v9292_v17 = vsel %vm1614_vm1, %v1624_v4, %v1625_v29  ;;  %v9312_v2 = vsel %vm1614_vm1, %v1625_v29, %v1627_v25  ;;  %v1631_v4 = vrot.slane %v8896_v9, 2  ;;  %v7875_v29 = vpack.c.bf16 %v5751_v61, %v5750_v54  ;;  %v5752_v9 = vld [vmem:[%s10945_s2 + $0x320] sm:$0xff]  ;;  %v5753_v25 = vld [vmem:[%s10945_s2 + $0x328] sm:$0xff] }
  0x6a   : > { %11233 = vst [vmem:[#allocation38_spill] sm:$0xff] %v9292_v17  ;;  %11234 = vst [vmem:[#allocation39_spill] sm:$0xff] %v9312_v2 }
  0x6b   : > { %6602 = vmatmul.mubr.f32.gmra.mrb[28].mxu1 %v9241_v38  ;;  %v9299_v38 = vld [vmem:[%s8786_s14 + $0x170] sm:$0xff]  ;;  %v9342_v54 = vsel %vm1614_vm1, %v1629_v31, %v1631_v4  ;;  %v7879_v31 = vpack.c.bf16 %v5753_v25, %v5752_v9  ;;  %v707_v9 = vrot.slane %v9349_v14, 1 }
  0x6c   : > { %7114 = vmatmul.mubr.f32.gmra.mrb[28].mxu0 %v9275_v12  ;;  %6604 = vmatprep.mubr.f32.mxu1 %v9245_v22  ;;  %v9318_v22 = vld [vmem:[%s8786_s14 + $0x178] sm:$0xff]  ;;  %11236 = vst [vmem:[#allocation41_spill] sm:$0xff] %v9342_v54  ;;  %v5754_v4 = vld [vmem:[%s10945_s2 + $0x330] sm:$0xff] }
  0x6d   : > { %7116 = vmatprep.mubr.f32.mxu0 %v9279_v1  ;;  %v703_v10 = vrot.slane %v9318_v22, 1 }
  0x6f   : > { %6605 = vmatmul.mubr.f32.gmra.mrb[30].mxu1 %v9260_v24  ;;  %v701_v24 = vrot.slane %v9299_v38, 1 }
  0x70   : > { %7117 = vmatmul.mubr.f32.gmra.mrb[30].mxu0 %v9288_v35  ;;  %6607 = vmatprep.mubr.f32.mxu1 %v9264_v5  ;;  %v1634_v5 = vrot.slane %v8903_v13, 2  ;;  %v1636_v13 = vrot.slane %v8929_v27, 2  ;;  %v9356_v27 = vld [vmem:[%s8786_s14 + $0x190] sm:$0xff] }
  0x71   : > { %7199 = vmatprep.mubr.f32.mxu0 %v9292_v17  ;;  %v9345_v61 = vsel %vm618_vm0, %v700_v26, %v701_v24  ;;  %v9371_v30 = vsel %vm618_vm0, %v701_v24, %v703_v10  ;;  %v709_v59 = vrot.slane %v9356_v27, 1 }
  0x72   : > { %11237 = vst [vmem:[#allocation42_spill] sm:$0xff] %v9345_v61  ;;  %11239 = vst [vmem:[#allocation44_spill] sm:$0xff] %v9371_v30  ;;  %v9374_v26 = vsel %vm1614_vm1, %v1634_v5, %v1636_v13  ;;  %v9388_v24 = vsel %vm1614_vm1, %v1636_v13, %v1638_v8  ;;  %v1645_v13 = vrot.slane %v8987_v62, 2  ;;  %v9428_v62 = vld [vmem:[%s8786_s14 + $0x1c0] sm:$0xff] }
  0x73   : > { %6608 = vmatmul.mubr.f32.gmra.mrb[32].mxu1 %v9275_v12  ;;  %v705_v12 = vrot.slane %v9326_v28, 1  ;;  %11240 = vst [vmem:[#allocation45_spill] sm:$0xff] %v9374_v26  ;;  %11242 = vst [vmem:[#allocation47_spill] sm:$0xff] %v9388_v24 }
  0x74   : > { %7200 = vmatmul.mubr.f32.vlgmr.msra.gmra.mrb[0].mxu0 %v9312_v2  ;;  %6610 = vmatprep.mubr.f32.mxu1 %v9279_v1  ;;  %v9352_v1 = vsel %vm1614_vm1, %v1633_v33, %v1634_v5  ;;  %v5755_v33 = vld [vmem:[%s10945_s2 + $0x338] sm:$0xff]  ;;  %v1642_v5 = vrot.slane %v8958_v47, 2  ;;  %v9947_v2 = vld [vmem:[%s8786_s14 + $0x80] sm:$0xff] }
  0x75   : > { %7874 = vmatpush3.bf16.msra.mxu0 %v9138_v48  ;;  %7202 = vmatprep.mubr.f32.mxu0 %v9321_v55  ;;  %11238 = vst [vmem:[#allocation43_spill] sm:$0xff] %v9352_v1  ;;  %v9359_v48 = vld [vmem:[%s8786_s14 + $0x198] sm:$0xff]  ;;  %v9379_v25 = vsel %vm618_vm0, %v703_v10, %v705_v12  ;;  %v7883_v10 = vpack.c.bf16 %v5755_v33, %v5754_v4  ;;  %v9844_v55 = vld [vmem:[%s8786_s14 + $0x30] sm:$0xff] }
  0x76   : > { %7876 = vmatprep.subr.bf16.mxu0 %v7875_v29  ;;  %11241 = vst [vmem:[#allocation46_spill] sm:$0xff] %v9379_v25  ;;  %v710_v56 = vrot.slane %v9359_v48, 1  ;;  %v9405_v47 = vsel %vm618_vm0, %v705_v12, %v707_v9  ;;  %v9421_v12 = vsel %vm1614_vm1, %v1642_v5, %v1643_v43  ;;  %v1647_v9 = vrot.slane %v8990_v0, 2  ;;  %11309 = vst [vmem:[#allocation114_spill] sm:$0xff] %v9844_v55 }
  0x77   : > { %6611 = vmatmul.mubr.f32.gmra.mrb[34].mxu1 %v9288_v35  ;;  %v1640_v35 = vrot.slane %v8955_v46, 2  ;;  %v5756_v46 = vld [vmem:[%s10945_s2 + $0x340] sm:$0xff]  ;;  %11243 = vst [vmem:[#allocation48_spill] sm:$0xff] %v9405_v47  ;;  %11246 = vst [vmem:[#allocation51_spill] sm:$0xff] %v9421_v12 }
  0x78   : > { %7203 = vmatmul.mubr.f32.gmra.mrb[2].mxu0 %v9342_v54  ;;  %6613 = vmatprep.mubr.f32.mxu1 %v9345_v61  ;;  %v9385_v61 = vld [vmem:[%s8786_s14 + $0x1a0] sm:$0xff]  ;;  %v9414_v33 = vsel %vm618_vm0, %v709_v59, %v710_v56  ;;  %v5758_v59 = vld [vmem:[%s10945_s2 + $0x350] sm:$0xff]  ;;  %v1690_v54 = vrot.slane %v9250_v11, 2 }
  0x79   : > { %7205 = vmatprep.mubr.f32.mxu0 %v9352_v1  ;;  %7878 = vmatpush3.bf16.msra.mxu0 %v7875_v29  ;;  %v5757_v29 = vld [vmem:[%s10945_s2 + $0x348] sm:$0xff]  ;;  %v712_v49 = vrot.slane %v9385_v61, 1  ;;  %v9411_v4 = vsel %vm1614_vm1, %v1638_v8, %v1640_v35  ;;  %11245 = vst [vmem:[#allocation50_spill] sm:$0xff] %v9414_v33  ;;  %v5759_v35 = vld [vmem:[%s10945_s2 + $0x358] sm:$0xff] }
  0x7a   : > { %7880 = vmatprep.subr.bf16.mxu0 %v7879_v31  ;;  %11244 = vst [vmem:[#allocation49_spill] sm:$0xff] %v9411_v4  ;;  %v7887_v8 = vpack.c.bf16 %v5757_v29, %v5756_v46  ;;  %v1649_v29 = vrot.slane %v9015_v16, 2  ;;  %v5760_v16 = vld [vmem:[%s10945_s2 + $0x360] sm:$0xff] }
  0x7b   : > { %6614 = vmatmul.mubr.f32.gmra.mrb[36].mxu1 %v9371_v30  ;;  %v714_v30 = vrot.slane %v9393_v7, 1  ;;  %v9440_v0 = vsel %vm618_vm0, %v710_v56, %v712_v49  ;;  %v9457_v56 = vsel %vm1614_vm1, %v1645_v13, %v1647_v9 }
  0x7c   : > { %7206 = vmatmul.mubr.f32.gmra.mrb[4].mxu0 %v9374_v26  ;;  %6616 = vmatprep.mubr.f32.mxu1 %v9379_v25  ;;  %v9418_v26 = vld [vmem:[%s8786_s14 + $0x1b0] sm:$0x3]  ;;  %v9425_v25 = vld [vmem:[%s8786_s14 + $0x1b8] sm:$0xff]  ;;  %11247 = vst [vmem:[#allocation52_spill] sm:$0xff] %v9440_v0  ;;  %11250 = vst [vmem:[#allocation55_spill] sm:$0xff] %v9457_v56 }
  0x7d   : > { %7208 = vmatprep.mubr.f32.mxu0 %v9388_v24  ;;  %7882 = vmatpush3.bf16.msra.mxu0 %v7879_v31  ;;  %v9443_v31 = vsel %vm1614_vm1, %v1643_v43, %v1645_v13  ;;  %v716_v5 = vrot.slane %v9418_v26, 1  ;;  %v9448_v46 = vsel %vm618_vm0, %v712_v49, %v714_v30  ;;  %v1651_v43 = vrot.slane %v9018_v18, 2 }
  0x7e   : > { %7884 = vmatprep.subr.bf16.mxu0 %v7883_v10  ;;  %11248 = vst [vmem:[#allocation53_spill] sm:$0xff] %v9443_v31  ;;  %11249 = vst [vmem:[#allocation54_spill] sm:$0xff] %v9448_v46  ;;  %v1652_v24 = vrot.slane %v9021_v20, 2  ;;  %v7891_v49 = vpack.c.bf16 %v5759_v35, %v5758_v59  ;;  %v9479_v13 = vsel %vm1614_vm1, %v1647_v9, %v1649_v29  ;;  %v1654_v35 = vrot.slane %v9048_v36, 2  ;;  %v5762_v36 = vld [vmem:[%s10945_s2 + $0x370] sm:$0xff]  ;;  %v5763_v9 = vld [vmem:[%s10945_s2 + $0x378] sm:$0xff] }
  0x7f   : > { %6617 = vmatmul.mubr.f32.gmra.mrb[38].mxu1 %v9405_v47  ;;  %v718_v47 = vrot.slane %v9425_v25, 1  ;;  %v9474_v18 = vsel %vm618_vm0, %v714_v30, %v716_v5  ;;  %11252 = vst [vmem:[#allocation57_spill] sm:$0xff] %v9479_v13  ;;  %v1656_v5 = vrot.slane %v9052_v39, 2  ;;  %v1658_v29 = vrot.slane %v9078_v57, 2 }
  0x80   : > { %7209 = vmatmul.mubr.f32.gmra.mrb[6].mxu0 %v9411_v4  ;;  %6619 = vmatprep.mubr.f32.mxu1 %v9414_v33  ;;  %v719_v4 = vrot.slane %v9428_v62, 1  ;;  %v9454_v33 = vld [vmem:[%s8786_s14 + $0x1c8] sm:$0xff]  ;;  %11251 = vst [vmem:[#allocation56_spill] sm:$0xff] %v9474_v18  ;;  %v9490_v30 = vsel %vm1614_vm1, %v1651_v43, %v1652_v24  ;;  %v9515_v43 = vsel %vm1614_vm1, %v1652_v24, %v1654_v35  ;;  %v1660_v57 = vrot.slane %v9081_v41, 2  ;;  %v9531_v24 = vld [vmem:[%s8786_s14 + $0x1f8] sm:$0xff] }
  0x81   : > { %7211 = vmatprep.mubr.f32.mxu0 %v9421_v12  ;;  %7886 = vmatpush3.bf16.msra.mxu0 %v7883_v10  ;;  %v9462_v12 = vld [vmem:[%s8786_s14 + $0x1d0] sm:$0xff]  ;;  %v5761_v10 = vld [vmem:[%s10945_s2 + $0x368] sm:$0xff]  ;;  %v721_v20 = vrot.slane %v9454_v33, 1  ;;  %11254 = vst [vmem:[#allocation59_spill] sm:$0xff] %v9490_v30  ;;  %11256 = vst [vmem:[#allocation61_spill] sm:$0xff] %v9515_v43 }
  0x82   : > { %7888 = vmatprep.subr.bf16.mxu0 %v7887_v8  ;;  %v9482_v59 = vsel %vm618_vm0, %v718_v47, %v719_v4  ;;  %v7895_v47 = vpack.c.bf16 %v5761_v10, %v5760_v16 }
  0x83   : > { %6620 = vmatmul.mubr.f32.gmra.mrb[40].mxu1 %v9440_v0  ;;  %11253 = vst [vmem:[#allocation58_spill] sm:$0xff] %v9482_v59  ;;  %v723_v0 = vrot.slane %v9462_v12, 1  ;;  %v9509_v39 = vsel %vm618_vm0, %v719_v4, %v721_v20  ;;  %v9526_v4 = vsel %vm1614_vm1, %v1654_v35, %v1656_v5  ;;  %v1663_v35 = vrot.slane %v9106_v21, 2  ;;  %v9563_v21 = vld [vmem:[%s8786_s14 + $0x208] sm:$0xff] }
  0x84   : > { %7212 = vmatmul.mubr.f32.gmra.mrb[8].mxu0 %v9443_v31  ;;  %6622 = vmatprep.mubr.f32.mxu1 %v9448_v46  ;;  %v9487_v31 = vld [vmem:[%s8786_s14 + $0x1d8] sm:$0x3]  ;;  %v9494_v46 = vld [vmem:[%s8786_s14 + $0x1e0] sm:$0xff]  ;;  %11255 = vst [vmem:[#allocation60_spill] sm:$0xff] %v9509_v39  ;;  %11258 = vst [vmem:[#allocation63_spill] sm:$0xff] %v9526_v4 }
  0x85   : > { %7214 = vmatprep.mubr.f32.mxu0 %v9457_v56  ;;  %7890 = vmatpush3.bf16.msra.mxu0 %v7887_v8  ;;  %v9497_v56 = vld [vmem:[%s8786_s14 + $0x1e8] sm:$0xff]  ;;  %v725_v8 = vrot.slane %v9487_v31, 1  ;;  %v9518_v16 = vsel %vm618_vm0, %v721_v20, %v723_v0  ;;  %v727_v10 = vrot.slane %v9494_v46, 1  ;;  %v7899_v20 = vpack.c.bf16 %v5763_v9, %v5762_v36 }
  0x86   : > { %7892 = vmatprep.subr.bf16.mxu0 %v7891_v49  ;;  %11257 = vst [vmem:[#allocation62_spill] sm:$0xff] %v9518_v16  ;;  %v9549_v36 = vsel %vm1614_vm1, %v1656_v5, %v1658_v29 }
  0x87   : > { %6623 = vmatmul.mubr.f32.gmra.mrb[42].mxu1 %v9474_v18  ;;  %v728_v18 = vrot.slane %v9497_v56, 1  ;;  %v9543_v41 = vsel %vm618_vm0, %v723_v0, %v725_v8  ;;  %11260 = vst [vmem:[#allocation65_spill] sm:$0xff] %v9549_v36  ;;  %v1665_v8 = vrot.slane %v9110_v23, 2 }
  0x88   : > { %7215 = vmatmul.mubr.f32.gmra.mrb[10].mxu0 %v9479_v13  ;;  %6625 = vmatprep.mubr.f32.mxu1 %v9482_v59  ;;  %v9523_v59 = vld [vmem:[%s8786_s14 + $0x1f0] sm:$0xff]  ;;  %v5764_v13 = vld [vmem:[%s10945_s2 + $0x380] sm:$0xff]  ;;  %11259 = vst [vmem:[#allocation64_spill] sm:$0xff] %v9543_v41 }
  0x89   : > { %7217 = vmatprep.mubr.f32.mxu0 %v9490_v30  ;;  %7894 = vmatpush3.bf16.msra.mxu0 %v7891_v49  ;;  %v1661_v30 = vrot.slane %v9085_v63, 2  ;;  %v5765_v49 = vld [vmem:[%s10945_s2 + $0x388] sm:$0xff]  ;;  %v730_v63 = vrot.slane %v9523_v59, 1  ;;  %v9552_v9 = vsel %vm618_vm0, %v727_v10, %v728_v18  ;;  %v1667_v10 = vrot.slane %v9136_v44, 2 }
  0x8a   : > { %7896 = vmatprep.subr.bf16.mxu0 %v7895_v47  ;;  %11261 = vst [vmem:[#allocation66_spill] sm:$0xff] %v9552_v9  ;;  %v9568_v5 = vpack.c.bf16 %v5765_v49, %v5764_v13 }
  0x8b   : > { %6626 = vmatmul.mubr.f32.gmra.mrb[44].mxu1 %v9509_v39  ;;  %v732_v39 = vrot.slane %v9531_v24, 1  ;;  %v9559_v0 = vsel %vm1614_vm1, %v1660_v57, %v1661_v30  ;;  %v9577_v23 = vsel %vm1614_vm1, %v1661_v30, %v1663_v35  ;;  %v736_v57 = vrot.slane %v9563_v21, 1 }
  0x8c   : > { %7218 = vmatmul.mubr.f32.gmra.mrb[12].mxu0 %v9515_v43  ;;  %6628 = vmatprep.mubr.f32.mxu1 %v9518_v16  ;;  %v9556_v43 = vld [vmem:[%s8786_s14 + $0x200] sm:$0x3]  ;;  %11262 = vst [vmem:[#allocation67_spill] sm:$0xff] %v9559_v0  ;;  %v9566_v16 = vld [vmem:[%s8786_s14 + $0x210] sm:$0xff]  ;;  %11264 = vst [vmem:[#allocation69_spill] sm:$0xff] %v9577_v23  ;;  %v1669_v30 = vrot.slane %v9142_v50, 2 }
  0x8d   : > { %7220 = vmatprep.mubr.f32.mxu0 %v9526_v4  ;;  %7898 = vmatpush3.bf16.msra.mxu0 %v7895_v47  ;;  %v9574_v47 = vsel %vm618_vm0, %v728_v18, %v730_v63  ;;  %v734_v29 = vrot.slane %v9556_v43, 1  ;;  %v9582_v13 = vsel %vm618_vm0, %v730_v63, %v732_v39  ;;  %v737_v49 = vrot.slane %v9566_v16, 1  ;;  %v9596_v63 = vld [vmem:[%s8786_s14 + $0x220] sm:$0xff] }
  0x8e   : > { %7900 = vmatprep.subr.bf16.mxu0 %v7899_v20  ;;  %11263 = vst [vmem:[#allocation68_spill] sm:$0xff] %v9574_v47  ;;  %11265 = vst [vmem:[#allocation70_spill] sm:$0xff] %v9582_v13  ;;  %v9591_v18 = vsel %vm1614_vm1, %v1663_v35, %v1665_v8  ;;  %v1672_v50 = vrot.slane %v9160_v15, 2  ;;  %v9626_v15 = vld [vmem:[%s8786_s14 + $0x238] sm:$0xff]  ;;  %v1688_v4 = vrot.slane %v9235_v3, 2  ;;  %v1737_v17 = vrot.slane %v9596_v63, 2 }
  0x8f   : > { %6629 = vmatmul.mubr.f32.gmra.mrb[46].mxu1 %v9543_v41  ;;  %11266 = vst [vmem:[#allocation71_spill] sm:$0xff] %v9591_v18  ;;  %v1670_v41 = vrot.slane %v9145_v53, 2  ;;  %v9603_v44 = vsel %vm618_vm0, %v732_v39, %v734_v29  ;;  %v9609_v53 = vsel %vm1614_vm1, %v1665_v8, %v1667_v10  ;;  %v9612_v35 = vsel %vm618_vm0, %v736_v57, %v737_v49 }
  0x90   : > { %7221 = vmatmul.mubr.f32.gmra.mrb[14].mxu0 %v9549_v36  ;;  %6631 = vmatprep.mubr.f32.mxu1 %v9552_v9  ;;  %v9588_v9 = vld [vmem:[%s8786_s14 + $0x218] sm:$0xff]  ;;  %11267 = vst [vmem:[#allocation72_spill] sm:$0xff] %v9603_v44  ;;  %11268 = vst [vmem:[#allocation73_spill] sm:$0xff] %v9609_v53  ;;  %v1674_v29 = vrot.slane %v9165_v19, 2  ;;  %v9683_v36 = vld [vmem:[%s8786_s14 + $0x260] sm:$0xff] }
  0x91   : > { %7223 = vmatprep.mubr.f32.mxu0 %v9559_v0  ;;  %7902 = vmatpush3.bf16.msra.mxu0 %v7899_v20  ;;  %v739_v20 = vrot.slane %v9588_v9, 1  ;;  %11269 = vst [vmem:[#allocation74_spill] sm:$0xff] %v9612_v35  ;;  %v9619_v39 = vsel %vm1614_vm1, %v1669_v30, %v1670_v41  ;;  %v9635_v10 = vsel %vm1614_vm1, %v1670_v41, %v1672_v50  ;;  %v1676_v30 = vrot.slane %v9185_v58, 2 }
  0x92   : > { %7904 = vmatprep.subr.bf16.mxu0 %v9568_v5  ;;  %11270 = vst [vmem:[#allocation75_spill] sm:$0xff] %v9619_v39  ;;  %11272 = vst [vmem:[#allocation77_spill] sm:$0xff] %v9635_v10  ;;  %v1678_v41 = vrot.slane %v9189_v51, 2 }
  0x93   : > { %6632 = vmatmul.mubr.f32.gmra.mrb[48].mxu1 %v9574_v47  ;;  %v741_v47 = vrot.slane %v9596_v63, 1  ;;  %v9632_v8 = vsel %vm618_vm0, %v737_v49, %v739_v20  ;;  %v9649_v49 = vsel %vm1614_vm1, %v1672_v50, %v1674_v29  ;;  %11280 = vst [vmem:[#allocation85_spill] sm:$0xff] %v9683_v36 }
  0x94   : > { %7224 = vmatmul.mubr.f32.gmra.mrb[16].mxu0 %v9577_v23  ;;  %6634 = vmatprep.mubr.f32.mxu1 %v9582_v13  ;;  %v9616_v23 = vld [vmem:[%s8786_s14 + $0x228] sm:$0x3]  ;;  %v9623_v13 = vld [vmem:[%s8786_s14 + $0x230] sm:$0xff]  ;;  %11271 = vst [vmem:[#allocation76_spill] sm:$0xff] %v9632_v8  ;;  %11274 = vst [vmem:[#allocation79_spill] sm:$0xff] %v9649_v49 }
  0x95   : > { %7226 = vmatprep.mubr.f32.mxu0 %v9591_v18  ;;  %v743_v57 = vrot.slane %v9616_v23, 1  ;;  %v9640_v19 = vsel %vm618_vm0, %v739_v20, %v741_v47  ;;  %v9654_v20 = vld [vmem:[%s8786_s14 + $0x248] sm:$0xff]  ;;  %v1681_v18 = vrot.slane %v9210_v37, 2 }
  0x96   : > { %11273 = vst [vmem:[#allocation78_spill] sm:$0xff] %v9640_v19 }
  0x97   : > { %6635 = vmatmul.mubr.f32.gmra.mrb[50].mxu1 %v9603_v44  ;;  %v745_v44 = vrot.slane %v9623_v13, 1  ;;  %v9660_v58 = vsel %vm618_vm0, %v741_v47, %v743_v57  ;;  %v1683_v57 = vrot.slane %v9214_v6, 2 }
  0x98   : > { %7227 = vmatmul.mubr.f32.gmra.mrb[18].mxu0 %v9609_v53  ;;  %6637 = vmatprep.mubr.f32.mxu1 %v9612_v35  ;;  %v746_v53 = vrot.slane %v9626_v15, 1  ;;  %v9646_v35 = vld [vmem:[%s8786_s14 + $0x240] sm:$0xff]  ;;  %11275 = vst [vmem:[#allocation80_spill] sm:$0xff] %v9660_v58 }
  0x99   : > { %7229 = vmatprep.mubr.f32.mxu0 %v9619_v39  ;;  %v1679_v39 = vrot.slane %v9192_v45, 2  ;;  %v748_v50 = vrot.slane %v9646_v35, 1  ;;  %v9666_v45 = vsel %vm1614_vm1, %v1674_v29, %v1676_v30 }
  0x9a   : > { %11276 = vst [vmem:[#allocation81_spill] sm:$0xff] %v9666_v45  ;;  %v9669_v0 = vsel %vm618_vm0, %v745_v44, %v746_v53 }
  0x9b   : > { %6638 = vmatmul.mubr.f32.gmra.mrb[52].mxu1 %v9632_v8  ;;  %11277 = vst [vmem:[#allocation82_spill] sm:$0xff] %v9669_v0  ;;  %v750_v8 = vrot.slane %v9654_v20, 1  ;;  %v9676_v47 = vsel %vm1614_vm1, %v1678_v41, %v1679_v39  ;;  %v9689_v44 = vsel %vm618_vm0, %v746_v53, %v748_v50  ;;  %v9692_v29 = vsel %vm1614_vm1, %v1679_v39, %v1681_v18 }
  0x9c   : > { %7230 = vmatmul.mubr.f32.gmra.mrb[20].mxu0 %v9635_v10  ;;  %6640 = vmatprep.mubr.f32.mxu1 %v9640_v19  ;;  %v9673_v10 = vld [vmem:[%s8786_s14 + $0x250] sm:$0x3]  ;;  %11278 = vst [vmem:[#allocation83_spill] sm:$0xff] %v9676_v47  ;;  %v9680_v19 = vld [vmem:[%s8786_s14 + $0x258] sm:$0xff]  ;;  %11281 = vst [vmem:[#allocation86_spill] sm:$0xff] %v9689_v44  ;;  %v9706_v53 = vsel %vm1614_vm1, %v1681_v18, %v1683_v57  ;;  %v1687_v39 = vrot.slane %v9232_v40, 2 }
  0x9d   : > { %7232 = vmatprep.mubr.f32.mxu0 %v9649_v49  ;;  %11279 = vst [vmem:[#allocation84_spill] sm:$0xff] %v9680_v19  ;;  %11282 = vst [vmem:[#allocation87_spill] sm:$0xff] %v9692_v29  ;;  %v752_v30 = vrot.slane %v9673_v10, 1  ;;  %v9697_v41 = vsel %vm618_vm0, %v748_v50, %v750_v8  ;;  %v1685_v49 = vrot.slane %v9228_v60, 2 }
  0x9e   : > { %11283 = vst [vmem:[#allocation88_spill] sm:$0xff] %v9697_v41  ;;  %11285 = vst [vmem:[#allocation90_spill] sm:$0xff] %v9706_v53 }
  0x9f   : > { %6641 = vmatmul.mubr.f32.gmra.mrb[54].mxu1 %v9660_v58  ;;  %v754_v58 = vrot.slane %v9680_v19, 1  ;;  %v9717_v60 = vsel %vm618_vm0, %v750_v8, %v752_v30  ;;  %v9722_v18 = vsel %vm1614_vm1, %v1683_v57, %v1685_v49  ;;  %v1692_v8 = vrot.slane %v9254_v34, 2 }
  0xa0   : > { %7233 = vmatmul.mubr.f32.gmra.mrb[22].mxu0 %v9666_v45  ;;  %6643 = vmatprep.mubr.f32.mxu1 %v9669_v0  ;;  %v755_v45 = vrot.slane %v9683_v36, 1  ;;  %v9703_v0 = vld [vmem:[%s8786_s14 + $0x268] sm:$0xff]  ;;  %11287 = vst [vmem:[#allocation92_spill] sm:$0xff] %v9717_v60  ;;  %11288 = vst [vmem:[#allocation93_spill] sm:$0xff] %v9722_v18  ;;  %v9745_v57 = vsel %vm1614_vm1, %v1688_v4, %v1690_v54 }
  0xa1   : > { %7235 = vmatprep.mubr.f32.mxu0 %v9676_v47  ;;  %11284 = vst [vmem:[#allocation89_spill] sm:$0xff] %v9703_v0  ;;  %v9711_v47 = vld [vmem:[%s8786_s14 + $0x270] sm:$0xff]  ;;  %v757_v50 = vrot.slane %v9703_v0, 1  ;;  %11292 = vst [vmem:[#allocation97_spill] sm:$0xff] %v9745_v57 }
  0xa2   : > { %11286 = vst [vmem:[#allocation91_spill] sm:$0xff] %v9711_v47  ;;  %v9725_v1 = vsel %vm618_vm0, %v754_v58, %v755_v45 }
  0xa3   : > { %6644 = vmatmul.mubr.f32.gmra.mrb[56].mxu1 %v9689_v44  ;;  %11289 = vst [vmem:[#allocation94_spill] sm:$0xff] %v9725_v1  ;;  %v759_v44 = vrot.slane %v9711_v47, 1  ;;  %v9740_v49 = vsel %vm618_vm0, %v755_v45, %v757_v50  ;;  %v1697_v45 = vrot.slane %v9299_v38, 2 }
  0xa4   : > { %7236 = vmatmul.mubr.f32.gmra.mrb[24].mxu0 %v9692_v29  ;;  %6646 = vmatprep.mubr.f32.mxu1 %v9697_v41  ;;  %v9730_v29 = vld [vmem:[%s8786_s14 + $0x278] sm:$0x3]  ;;  %v9733_v41 = vsel %vm1614_vm1, %v1687_v39, %v1688_v4  ;;  %11291 = vst [vmem:[#allocation96_spill] sm:$0xff] %v9740_v49  ;;  %v1694_v39 = vrot.slane %v9268_v52, 2 }
  0xa5   : > { %7238 = vmatprep.mubr.f32.mxu0 %v9706_v53  ;;  %11290 = vst [vmem:[#allocation95_spill] sm:$0xff] %v9733_v41  ;;  %v761_v58 = vrot.slane %v9730_v29, 1  ;;  %v9748_v30 = vsel %vm618_vm0, %v757_v50, %v759_v44 }
  0xa6   : > { %11293 = vst [vmem:[#allocation98_spill] sm:$0xff] %v9748_v30  ;;  %v9764_v52 = vsel %vm1614_vm1, %v1692_v8, %v1694_v39  ;;  %v1703_v39 = vrot.slane %v9349_v14, 2  ;;  %v5689_v14 = vld [vmem:[%s10945_s2 + $0x128] sm:$0xff] }
  0xa7   : > { %6647 = vmatmul.mubr.f32.gmra.mrb[58].mxu1 %v9717_v60  ;;  %v9752_v60 = vsel %vm1614_vm1, %v1690_v54, %v1692_v8  ;;  %v9760_v4 = vsel %vm618_vm0, %v759_v44, %v761_v58  ;;  %11296 = vst [vmem:[#allocation101_spill] sm:$0xff] %v9764_v52  ;;  %v1699_v54 = vrot.slane %v9318_v22, 2  ;;  %v5686_v44 = vld [vmem:[%s10945_s2 + $0x110] sm:$0xff]  ;;  %v5687_v58 = vld [vmem:[%s10945_s2 + $0x118] sm:$0xff]  ;;  %v9780_v8 = vld [vmem:[%s8786_s14] sm:$0xff] }
  0xa8   : > { %7239 = vmatmul.mubr.f32.gmra.mrb[26].mxu0 %v9722_v18  ;;  %6649 = vmatprep.mubr.f32.mxu1 %v9725_v1  ;;  %11294 = vst [vmem:[#allocation99_spill] sm:$0xff] %v9752_v60  ;;  %v1696_v1 = vrot.slane %v9296_v32, 2  ;;  %11295 = vst [vmem:[#allocation100_spill] sm:$0xff] %v9760_v4  ;;  %v9819_v18 = vld [vmem:[%s8786_s14 + $0x18] sm:$0xff] }
  0xa9   : > { %7241 = vmatprep.mubr.f32.mxu0 %v9733_v41  ;;  %11298 = vst [vmem:[#allocation103_spill] sm:$0xff] %v9780_v8  ;;  %v1710_v41 = vrot.slane %v9393_v7, 2  ;;  %11305 = vst [vmem:[#allocation110_spill] sm:$0xff] %v9819_v18 }
  0xaa   : > { %v9768_v50 = vsel %vm1614_vm1, %v1696_v1, %v1697_v45  ;;  %v9785_v1 = vsel %vm1614_vm1, %v1697_v45, %v1699_v54  ;;  %v5688_v45 = vld [vmem:[%s10945_s2 + $0x120] sm:$0xff] }
  0xab   : > { %6650 = vmatmul.mubr.f32.gmra.mrb[60].mxu1 %v9740_v49  ;;  %11297 = vst [vmem:[#allocation102_spill] sm:$0xff] %v9768_v50  ;;  %v1701_v49 = vrot.slane %v9326_v28, 2  ;;  %11299 = vst [vmem:[#allocation104_spill] sm:$0xff] %v9785_v1 }
  0xac   : > { %7242 = vmatmul.mubr.f32.gmra.mrb[28].mxu0 %v9745_v57  ;;  %6652 = vmatprep.mubr.f32.mxu1 %v9748_v30  ;;  %v1705_v30 = vrot.slane %v9356_v27, 2  ;;  %v9794_v57 = vld [vmem:[%s8786_s14 + $0x8] sm:$0xff] }
  0xad   : > { %7244 = vmatprep.mubr.f32.mxu0 %v9752_v60  ;;  %v1706_v60 = vrot.slane %v9359_v48, 2  ;;  %11301 = vst [vmem:[#allocation106_spill] sm:$0xff] %v9794_v57 }
  0xaf   : > { %6653 = vmatmul.mubr.f32.gmra.mrb[62].mxu1 %v9760_v4  ;;  %v9789_v4 = vsel %vm1614_vm1, %v1699_v54, %v1701_v49  ;;  %v9806_v54 = vld [vmem:[%s8786_s14 + $0x10] sm:$0xff] }
  0xb0   : > { %7245 = vmatmul.mubr.f32.gmra.mrb[30].mxu0 %v9764_v52  ;;  %6687 = vmatprep.mubr.f32.mxu1 %v9780_v8  ;;  %11300 = vst [vmem:[#allocation105_spill] sm:$0xff] %v9789_v4  ;;  %v7747_v52 = vpack.c.bf16 %v5687_v58, %v5686_v44  ;;  %11302 = vst [vmem:[#allocation107_spill] sm:$0xff] %v9806_v54  ;;  %v9811_v44 = vsel %vm1614_vm1, %v1701_v49, %v1703_v39  ;;  %v1708_v58 = vrot.slane %v9385_v61, 2  ;;  %v5691_v49 = vld [vmem:[%s10945_s2 + $0x138] sm:$0xff] }
  0xb1   : > { %7247 = vmatprep.mubr.f32.mxu0 %v9768_v50  ;;  %11303 = vst [vmem:[#allocation108_spill] sm:$0xff] %v9811_v44  ;;  %v9815_v50 = vsel %vm1614_vm1, %v1705_v30, %v1706_v60  ;;  %v9830_v30 = vld [vmem:[%s8786_s14 + $0x28] sm:$0xff]  ;;  %v10085_v8 = vld [vmem:[%s8786_s14 + $0xf8] sm:$0xff] }
  0xb2   : > { %11304 = vst [vmem:[#allocation109_spill] sm:$0xff] %v9815_v50  ;;  %11306 = vst [vmem:[#allocation111_spill] sm:$0xff] %v9830_v30  ;;  %v9835_v39 = vsel %vm1614_vm1, %v1706_v60, %v1708_v58  ;;  %v5692_v60 = vld [vmem:[%s10945_s2 + $0x140] sm:$0xff] }
  0xb3   : > { %6688 = vmatmul.mubr.f32.vlgmr.msra.gmra.mrb[0].mxu1 %v9794_v57  ;;  %11307 = vst [vmem:[#allocation112_spill] sm:$0xff] %v9835_v39  ;;  %v10082_v57 = vld [vmem:[%s10045_s16 + $0x10] sm:$0xff] }
  0xb4   : > { %7248 = vmatmul.mubr.f32.gmra.mrb[32].mxu0 %v9785_v1  ;;  %7746 = vmatpush3.bf16.msra.mxu1 %v9194_v42  ;;  %v7751_v1 = vpack.c.bf16 %v5689_v14, %v5688_v45  ;;  %v5690_v42 = vld [vmem:[%s10945_s2 + $0x130] sm:$0xff]  ;;  %v1712_v45 = vrot.slane %v9418_v26, 2  ;;  %v9839_v14 = vsel %vm1614_vm1, %v1708_v58, %v1710_v41  ;;  %v5693_v26 = vld [vmem:[%s10945_s2 + $0x148] sm:$0xff] }
  0xb5   : > { %6690 = vmatprep.mubr.f32.mxu1 %v9806_v54  ;;  %7250 = vmatprep.mubr.f32.mxu0 %v9789_v4  ;;  %11308 = vst [vmem:[#allocation113_spill] sm:$0xff] %v9839_v14  ;;  %v1714_v4 = vrot.slane %v9425_v25, 2  ;;  %v7755_v53 = vpack.c.bf16 %v5691_v49, %v5690_v42  ;;  %v1717_v42 = vrot.slane %v9454_v33, 2  ;;  %v10057_v54 = vld [vmem:[%s8786_s14 + $0xe0] sm:$0xff] }
  0xb6   : > { %7748 = vmatprep.subr.bf16.mxu1 %v7747_v52  ;;  %v9860_v58 = vsel %vm1614_vm1, %v1710_v41, %v1712_v45  ;;  %v5694_v41 = vld [vmem:[%s10945_s2 + $0x150] sm:$0xff] }
  0xb7   : > { %6691 = vmatmul.mubr.f32.gmra.mrb[2].mxu1 %v9819_v18  ;;  %11311 = vst [vmem:[#allocation116_spill] sm:$0xff] %v9860_v58  ;;  %v9975_v18 = vld [vmem:[%s8786_s14 + $0x90] sm:$0xff] }
  0xb8   : > { %7251 = vmatmul.mubr.f32.gmra.mrb[34].mxu0 %v9811_v44  ;;  %6693 = vmatprep.mubr.f32.mxu1 %v9830_v30  ;;  %v1715_v44 = vrot.slane %v9428_v62, 2  ;;  %v7759_v30 = vpack.c.bf16 %v5693_v26, %v5692_v60  ;;  %v1721_v60 = vrot.slane %v9487_v31, 2  ;;  %v5696_v31 = vld [vmem:[%s10945_s2 + $0x160] sm:$0xff] }
  0xb9   : > { %7253 = vmatprep.mubr.f32.mxu0 %v9815_v50  ;;  %7750 = vmatpush3.bf16.msra.mxu1 %v7747_v52  ;;  %v9855_v52 = vld [vmem:[%s8786_s14 + $0x38] sm:$0xff]  ;;  %v9917_v50 = vld [vmem:[%s8786_s14 + $0x68] sm:$0xff] }
  0xba   : > { %7752 = vmatprep.subr.bf16.mxu1 %v7751_v1  ;;  %11310 = vst [vmem:[#allocation115_spill] sm:$0xff] %v9855_v52  ;;  %v9864_v49 = vsel %vm1614_vm1, %v1714_v4, %v1715_v44  ;;  %v9879_v4 = vld [vmem:[%s8786_s14 + $0x50] sm:$0xff]  ;;  %v9884_v45 = vsel %vm1614_vm1, %v1715_v44, %v1717_v42  ;;  %v9904_v44 = vld [vmem:[%s8786_s14 + $0x60] sm:$0xff] }
  0xbb   : > { %6694 = vmatmul.mubr.f32.gmra.mrb[4].mxu1 %v9844_v55  ;;  %11312 = vst [vmem:[#allocation117_spill] sm:$0xff] %v9864_v49  ;;  %v1719_v55 = vrot.slane %v9462_v12, 2  ;;  %11314 = vst [vmem:[#allocation119_spill] sm:$0xff] %v9884_v45 }
  0xbc   : > { %7254 = vmatmul.mubr.f32.gmra.mrb[36].mxu0 %v9835_v39  ;;  %6696 = vmatprep.mubr.f32.mxu1 %v9855_v52  ;;  %v9868_v39 = vld [vmem:[%s8786_s14 + $0x40] sm:$0xff]  ;;  %v1724_v52 = vrot.slane %v9497_v56, 2 }
  0xbd   : > { %7256 = vmatprep.mubr.f32.mxu0 %v9839_v14  ;;  %7754 = vmatpush3.bf16.msra.mxu1 %v7751_v1  ;;  %11313 = vst [vmem:[#allocation118_spill] sm:$0xff] %v9868_v39  ;;  %v5695_v1 = vld [vmem:[%s10945_s2 + $0x158] sm:$0xff]  ;;  %v9888_v26 = vsel %vm1614_vm1, %v1717_v42, %v1719_v55  ;;  %v9909_v42 = vsel %vm1614_vm1, %v1719_v55, %v1721_v60  ;;  %v5698_v55 = vld [vmem:[%s10945_s2 + $0x170] sm:$0xff] }
  0xbe   : > { %7756 = vmatprep.subr.bf16.mxu1 %v7755_v53  ;;  %11315 = vst [vmem:[#allocation120_spill] sm:$0xff] %v9888_v26  ;;  %v9893_v14 = vld [vmem:[%s8786_s14 + $0x58] sm:$0xff]  ;;  %11316 = vst [vmem:[#allocation121_spill] sm:$0xff] %v9909_v42 }
  0xbf   : > { %6697 = vmatmul.mubr.f32.gmra.mrb[6].mxu1 %v9868_v39  ;;  %v1723_v39 = vrot.slane %v9494_v46, 2 }
  0xc0   : > { %7257 = vmatmul.mubr.f32.gmra.mrb[38].mxu0 %v9860_v58  ;;  %6699 = vmatprep.mubr.f32.mxu1 %v9879_v4  ;;  %v7763_v58 = vpack.c.bf16 %v5695_v1, %v5694_v41  ;;  %v1726_v41 = vrot.slane %v9523_v59, 2 }
  0xc1   : > { %7259 = vmatprep.mubr.f32.mxu0 %v9864_v49  ;;  %7758 = vmatpush3.bf16.msra.mxu1 %v7755_v53  ;;  %v5697_v53 = vld [vmem:[%s10945_s2 + $0x168] sm:$0xff]  ;;  %v9913_v1 = vsel %vm1614_vm1, %v1723_v39, %v1724_v52  ;;  %v1728_v49 = vrot.slane %v9531_v24, 2  ;;  %v9929_v39 = vld [vmem:[%s8786_s14 + $0x78] sm:$0xff] }
  0xc2   : > { %7760 = vmatprep.subr.bf16.mxu1 %v7759_v30  ;;  %11317 = vst [vmem:[#allocation122_spill] sm:$0xff] %v9913_v1  ;;  %v9934_v60 = vsel %vm1614_vm1, %v1724_v52, %v1726_v41  ;;  %v5701_v52 = vld [vmem:[%s10945_s2 + $0x188] sm:$0xff] }
  0xc3   : > { %6700 = vmatmul.mubr.f32.gmra.mrb[8].mxu1 %v9893_v14  ;;  %11318 = vst [vmem:[#allocation123_spill] sm:$0xff] %v9934_v60 }
  0xc4   : > { %7260 = vmatmul.mubr.f32.gmra.mrb[40].mxu0 %v9884_v45  ;;  %6702 = vmatprep.mubr.f32.mxu1 %v9904_v44  ;;  %v7767_v45 = vpack.c.bf16 %v5697_v53, %v5696_v31  ;;  %v1730_v31 = vrot.slane %v9556_v43, 2  ;;  %v9938_v53 = vsel %vm1614_vm1, %v1726_v41, %v1728_v49  ;;  %v5700_v43 = vld [vmem:[%s10945_s2 + $0x180] sm:$0xff] }
  0xc5   : > { %7262 = vmatprep.mubr.f32.mxu0 %v9888_v26  ;;  %7762 = vmatpush3.bf16.msra.mxu1 %v7759_v30  ;;  %v5699_v30 = vld [vmem:[%s10945_s2 + $0x178] sm:$0xff]  ;;  %11319 = vst [vmem:[#allocation124_spill] sm:$0xff] %v9938_v53  ;;  %v1732_v26 = vrot.slane %v9563_v21, 2 }
  0xc6   : > { %7764 = vmatprep.subr.bf16.mxu1 %v7763_v58  ;;  %v9963_v41 = vsel %vm1614_vm1, %v1728_v49, %v1730_v31  ;;  %v9980_v49 = vld [vmem:[%s8786_s14 + $0xa0] sm:$0xff] }
  0xc7   : > { %6703 = vmatmul.mubr.f32.gmra.mrb[10].mxu1 %v9917_v50  ;;  %11321 = vst [vmem:[#allocation125_spill] sm:$0xff] %v9963_v41 }
  0xc8   : > { %7263 = vmatmul.mubr.f32.gmra.mrb[42].mxu0 %v9909_v42  ;;  %6705 = vmatprep.mubr.f32.mxu1 %v9929_v39  ;;  %v1733_v42 = vrot.slane %v9566_v16, 2 }
  0xc9   : > { %7265 = vmatprep.mubr.f32.mxu0 %v9913_v1  ;;  %7766 = vmatpush3.bf16.msra.mxu1 %v7763_v58  ;;  %v7771_v1 = vpack.c.bf16 %v5699_v30, %v5698_v55  ;;  %v9958_v58 = vld [vmem:[%s8786_s14 + $0x88] sm:$0xff]  ;;  %v1735_v55 = vrot.slane %v9588_v9, 2 }
  0xca   : > { %7768 = vmatprep.subr.bf16.mxu1 %v7767_v45  ;;  %v9967_v30 = vsel %vm1614_vm1, %v1732_v26, %v1733_v42  ;;  %v1739_v26 = vrot.slane %v9616_v23, 2  ;;  %v10000_v23 = vld [vmem:[%s8786_s14 + $0xb0] sm:$0xff] }
  0xcb   : > { %6706 = vmatmul.mubr.f32.gmra.mrb[12].mxu1 %v9947_v2  ;;  %11322 = vst [vmem:[#allocation126_spill] sm:$0xff] %v9967_v30  ;;  %v9989_v31 = vsel %vm1614_vm1, %v1735_v55, %v1737_v17 }
  0xcc   : > { %7266 = vmatmul.mubr.f32.gmra.mrb[44].mxu0 %v9934_v60  ;;  %6708 = vmatprep.mubr.f32.mxu1 %v9958_v58  ;;  %v9972_v60 = vpack.c.bf16 %v5701_v52, %v5700_v43  ;;  %11325 = vst [vmem:[#allocation129_spill] sm:$0xff] %v9989_v31  ;;  %v1741_v43 = vrot.slane %v9623_v13, 2  ;;  %v1742_v52 = vrot.slane %v9626_v15, 2 }
  0xcd   : > { %7268 = vmatprep.mubr.f32.mxu0 %v9938_v53  ;;  %7770 = vmatpush3.bf16.msra.mxu1 %v7767_v45  ;;  %v9985_v45 = vsel %vm1614_vm1, %v1733_v42, %v1735_v55  ;;  %v10005_v42 = vsel %vm1614_vm1, %v1737_v17, %v1739_v26  ;;  %v1748_v26 = vrot.slane %v9673_v10, 2  ;;  %v1750_v53 = vrot.slane %v9680_v19, 2  ;;  %v10106_v19 = vld [vmem:[%s10045_s16 + $0x20] sm:$0x3] }
  0xce   : > { %7772 = vmatprep.subr.bf16.mxu1 %v7771_v1  ;;  %11323 = vst [vmem:[#allocation127_spill] sm:$0xff] %v9972_v60  ;;  %11324 = vst [vmem:[#allocation128_spill] sm:$0xff] %v9985_v45  ;;  %v10009_v55 = vsel %vm1614_vm1, %v1741_v43, %v1742_v52 }
  0xcf   : > { %6709 = vmatmul.mubr.f32.gmra.mrb[14].mxu1 %v9975_v18  ;;  %11326 = vst [vmem:[#allocation130_spill] sm:$0xff] %v10005_v42  ;;  %11327 = vst [vmem:[#allocation131_spill] sm:$0xff] %v10009_v55 }
  0xd0   : > { %7269 = vmatmul.mubr.f32.gmra.mrb[46].mxu0 %v9963_v41  ;;  %6711 = vmatprep.mubr.f32.mxu1 %v9980_v49  ;;  %v1746_v41 = vrot.slane %v9654_v20, 2 }
  0xd1   : > { %7271 = vmatprep.mubr.f32.mxu0 %v9967_v30  ;;  %7774 = vmatpush3.bf16.msra.mxu1 %v7771_v1  ;;  %v9995_v30 = vld [vmem:[%s8786_s14 + $0xa8] sm:$0xff]  ;;  %v1744_v1 = vrot.slane %v9646_v35, 2 }
  0xd2   : > { %7776 = vmatprep.subr.bf16.mxu1 %v9972_v60  ;;  %v10034_v60 = vld [vmem:[%s8786_s14 + $0xd0] sm:$0xff]  ;;  %v10049_v10 = vsel %vm1614_vm1, %v1746_v41, %v1748_v26  ;;  %v1757_v26 = vrot.slane %v9730_v29, 2  ;;  %v10093_v29 = vld [vmem:[%s8786_s14 + $0x100] sm:$0xff] }
  0xd3   : > { %6712 = vmatmul.mubr.f32.gmra.mrb[16].mxu1 %v9995_v30  ;;  %v10025_v17 = vsel %vm1614_vm1, %v1742_v52, %v1744_v1  ;;  %v10029_v43 = vsel %vm1614_vm1, %v1744_v1, %v1746_v41  ;;  %v10039_v52 = vld [vmem:[%s8786_s14 + $0xd8] sm:$0xff]  ;;  %11330 = vst [vmem:[#allocation134_spill] sm:$0xff] %v10049_v10  ;;  %v1753_v1 = vrot.slane %v9703_v0, 2  ;;  %v10068_v41 = vld [vmem:[%s8786_s14 + $0xf0] sm:$0xff] }
  0xd4   : > { %7272 = vmatmul.mubr.f32.gmra.mrb[48].mxu0 %v9985_v45  ;;  %6714 = vmatprep.mubr.f32.mxu1 %v10000_v23  ;;  %v10015_v45 = vld [vmem:[%s8786_s14 + $0xb8] sm:$0xff]  ;;  %11328 = vst [vmem:[#allocation132_spill] sm:$0xff] %v10025_v17  ;;  %11329 = vst [vmem:[#allocation133_spill] sm:$0xff] %v10029_v43 }
  0xd5   : > { %7274 = vmatprep.mubr.f32.mxu0 %v9989_v31  ;;  %v10020_v31 = vld [vmem:[%s8786_s14 + $0xc8] sm:$0xff] }
  0xd7   : > { %6715 = vmatmul.mubr.f32.gmra.mrb[18].mxu1 %v10015_v45 }
  0xd8   : > { %7275 = vmatmul.mubr.f32.gmra.mrb[50].mxu0 %v10005_v42  ;;  %6717 = vmatprep.mubr.f32.mxu1 %v10020_v31  ;;  %v1751_v42 = vrot.slane %v9683_v36, 2  ;;  %v10061_v36 = vld [vmem:[%s10045_s16] sm:$0xff] }
  0xd9   : > { %7277 = vmatprep.mubr.f32.mxu0 %v10009_v55  ;;  %v1755_v55 = vrot.slane %v9711_v47, 2  ;;  %11332 = vst [vmem:[#allocation136_spill] sm:$0xff] %v10061_v36  ;;  %v3239_v0 = vrot.slane %v10061_v36, 2 }
  0xdb   : > { %6718 = vmatmul.mubr.f32.gmra.mrb[20].mxu1 %v10034_v60  ;;  %v10077_v47 = vsel %vm1614_vm1, %v1753_v1, %v1755_v55 }
  0xdc   : > { %7278 = vmatmul.mubr.f32.gmra.mrb[52].mxu0 %v10025_v17  ;;  %6720 = vmatprep.mubr.f32.mxu1 %v10039_v52  ;;  %v10053_v17 = vsel %vm1614_vm1, %v1750_v53, %v1751_v42  ;;  %v10073_v53 = vsel %vm1614_vm1, %v1751_v42, %v1753_v1  ;;  %11335 = vst [vmem:[#allocation139_spill] sm:$0xff] %v10077_v47  ;;  %v3242_v1 = vrot.slane %v10082_v57, 2 }
  0xdd   : > { %7280 = vmatprep.mubr.f32.mxu0 %v10029_v43  ;;  %11331 = vst [vmem:[#allocation135_spill] sm:$0xff] %v10053_v17  ;;  %v10064_v43 = vld [vmem:[%s10045_s16 + $0x8] sm:$0xff]  ;;  %11334 = vst [vmem:[#allocation138_spill] sm:$0xff] %v10073_v53  ;;  %v10098_v42 = vsel %vm1614_vm1, %v1755_v55, %v1757_v26 }
  0xde   : > { %11333 = vst [vmem:[#allocation137_spill] sm:$0xff] %v10064_v43  ;;  %11336 = vst [vmem:[#allocation140_spill] sm:$0xff] %v10098_v42 }
  0xdf   : > { %6721 = vmatmul.mubr.f32.gmra.mrb[22].mxu1 %v10057_v54 }
  0xe0   : > { %7281 = vmatmul.mubr.f32.gmra.mrb[54].mxu0 %v10049_v10  ;;  %6723 = vmatprep.mubr.f32.mxu1 %v10068_v41  ;;  %v3240_v10 = vrot.slane %v10064_v43, 2 }
  0xe1   : > { %7283 = vmatprep.mubr.f32.mxu0 %v10053_v17  ;;  %v10089_v17 = vld [vmem:[%s10045_s16 + $0x18] sm:$0xff] }
  0xe2   : > { %v10102_v43 = vsel %vm1614_vm1, %v3239_v0, %v3240_v10  ;;  %v3244_v36 = vrot.slane %v10089_v17, 2  ;;  %v10116_v55 = vsel %vm1614_vm1, %v3240_v10, %v3242_v1  ;;  %v3246_v0 = vrot.slane %v10106_v19, 2  ;;  %v5766_v10 = vld [vmem:[%s10945_s2 + $0x390] sm:$0xff] }
  0xe3   : > { %6724 = vmatmul.mubr.f32.gmra.mrb[24].mxu1 %v10085_v8  ;;  %11337 = vst [vmem:[#allocation141_spill] sm:$0xff] %v10102_v43  ;;  %11338 = vst [vmem:[#allocation142_spill] sm:$0xff] %v10116_v55 }
  0xe4   : > { %7284 = vmatmul.mubr.f32.gmra.mrb[56].mxu0 %v10073_v53  ;;  %6726 = vmatprep.mubr.f32.mxu1 %v10093_v29  ;;  %v10109_v53 = vld [vmem:[%s8786_s14 + $0x108] sm:$0xff]  ;;  %v10120_v26 = vsel %vm1614_vm1, %v3242_v1, %v3244_v36  ;;  %v5767_v1 = vld [vmem:[%s10945_s2 + $0x398] sm:$0xff] }
  0xe5   : > { %7286 = vmatprep.mubr.f32.mxu0 %v10077_v47  ;;  %11339 = vst [vmem:[#allocation143_spill] sm:$0xff] %v10120_v26  ;;  %v10123_v47 = vld [vmem:[%s8786_s14 + $0x120] sm:$0xff] }
  0xe7   : > { %6727 = vmatmul.mubr.f32.gmra.mrb[26].mxu1 %v10109_v53 }
  0xe8   : > { %7287 = vmatmul.mubr.f32.gmra.mrb[58].mxu0 %v10098_v42  ;;  %6729 = vmatprep.mubr.f32.mxu1 %v9189_v51  ;;  %v10130_v51 = vsel %vm1614_vm1, %v3244_v36, %v3246_v0  ;;  %v5769_v36 = vld [vmem:[%s10945_s2 + $0x3a8] sm:$0xff]  ;;  %v5771_v0 = vld [vmem:[%s10945_s2 + $0x3b8] sm:$0xff] }
  0xe9   : > { %7289 = vmatprep.mubr.f32.mxu0 %v10102_v43  ;;  %11340 = vst [vmem:[#allocation144_spill] sm:$0xff] %v10130_v51 }
  0xeb   : > { %6730 = vmatmul.mubr.f32.gmra.mrb[28].mxu1 %v10123_v47 }
  0xec   : > { %7290 = vmatmul.mubr.f32.gmra.mrb[60].mxu0 %v10116_v55  ;;  %6732 = vmatprep.mubr.f32.mxu1 %v9210_v37  ;;  %v7907_v37 = vpack.c.bf16 %v5767_v1, %v5766_v10  ;;  %v5775_v10 = vld [vmem:[%s10945_s2 + $0x3d8] sm:$0xff]  ;;  %v5777_v1 = vld [vmem:[%s10945_s2 + $0x3e8] sm:$0xff] }
  0xed   : > { %7292 = vmatprep.mubr.f32.mxu0 %v10120_v26  ;;  %v5702_v26 = vld [vmem:[%s10945_s2 + $0x190] sm:$0xff]  ;;  %v5703_v55 = vld [vmem:[%s10945_s2 + $0x198] sm:$0xff] }
  0xef   : > { %6733 = vmatmul.mubr.f32.gmra.mrb[30].mxu1 %v9214_v6  ;;  %v5768_v6 = vld [vmem:[%s10945_s2 + $0x3a0] sm:$0xff] }
  0xf0   : > { %7293 = vmatmul.mubr.f32.gmra.mrb[62].mxu0 %v10130_v51  ;;  %6735 = vmatprep.mubr.f32.mxu1 %v9232_v40  ;;  %v7911_v40 = vpack.c.bf16 %v5769_v36, %v5768_v6  ;;  %v5781_v6 = vld [vmem:[%s10945_s2 + $0x408] sm:$0xff] }
  0xf1   : > { %7327 = vmatprep.mubr.f32.mxu0 %v9879_v4  ;;  %v10235_v36 = vld [vmem:[%s8786_s14 + $0x128] sm:$0xff] }
  0xf2   : > { %v11352_v51 = vld [vmem:[#allocation91_spill] sm:$0xff] }
  0xf3   : > { %6736 = vmatmul.mubr.f32.gmra.mrb[32].mxu1 %v9235_v3  ;;  %v5770_v3 = vld [vmem:[%s10945_s2 + $0x3b0] sm:$0xff] }
  0xf4   : > { %7328 = vmatmul.mubr.f32.vlgmr.msra.gmra.mrb[0].mxu0 %v9893_v14  ;;  %6738 = vmatprep.mubr.f32.mxu1 %v9250_v11  ;;  %v7915_v11 = vpack.c.bf16 %v5771_v0, %v5770_v3  ;;  %v10245_v3 = vld [vmem:[%s8786_s14 + $0x140] sm:$0xff]  ;;  %v10250_v0 = vld [vmem:[%s8786_s14 + $0x148] sm:$0xff] }
  0xf5   : > { %7906 = vmatpush3.bf16.msra.mxu0 %v9568_v5  ;;  %7330 = vmatprep.mubr.f32.mxu0 %v9904_v44  ;;  %v5773_v5 = vld [vmem:[%s10945_s2 + $0x3c8] sm:$0xff] }
  0xf6   : > { %7908 = vmatprep.subr.bf16.mxu0 %v7907_v37 }
  0xf7   : > { %6739 = vmatmul.mubr.f32.gmra.mrb[34].mxu1 %v9254_v34  ;;  %v5772_v34 = vld [vmem:[%s10945_s2 + $0x3c0] sm:$0xff] }
  0xf8   : > { %7331 = vmatmul.mubr.f32.gmra.mrb[2].mxu0 %v9917_v50  ;;  %6741 = vmatprep.mubr.f32.mxu1 %v9296_v32  ;;  %v7919_v32 = vpack.c.bf16 %v5773_v5, %v5772_v34  ;;  %v10260_v34 = vld [vmem:[%s8786_s14 + $0x158] sm:$0xff]  ;;  %v11342_v5 = vld [vmem:[#allocation84_spill] sm:$0xff] }
  0xf9   : > { %7333 = vmatprep.mubr.f32.mxu0 %v9929_v39  ;;  %7910 = vmatpush3.bf16.msra.mxu0 %v7907_v37  ;;  %v5779_v37 = vld [vmem:[%s10945_s2 + $0x3f8] sm:$0xff]  ;;  %11341 = vst [vmem:[#allocation145_spill] sm:$0xff] %v10260_v34 }
  0xfa   : > { %7912 = vmatprep.subr.bf16.mxu0 %v7911_v40 }
  0xfb   : > { %6742 = vmatmul.mubr.f32.gmra.mrb[36].mxu1 %v9299_v38  ;;  %v5774_v38 = vld [vmem:[%s10945_s2 + $0x3d0] sm:$0xff] }
  0xfc   : > { %7334 = vmatmul.mubr.f32.gmra.mrb[4].mxu0 %v9947_v2  ;;  %6744 = vmatprep.mubr.f32.mxu1 %v9318_v22  ;;  %v7923_v22 = vpack.c.bf16 %v5775_v10, %v5774_v38  ;;  %v11344_v38 = vld [vmem:[#allocation103_spill] sm:$0xff] }
  0xfd   : > { %7336 = vmatprep.mubr.f32.mxu0 %v9958_v58  ;;  %7914 = vmatpush3.bf16.msra.mxu0 %v7911_v40  ;;  %v10240_v40 = vld [vmem:[%s8786_s14 + $0x130] sm:$0xff]  ;;  %v1615_v10 = vrot.slane %v11344_v38, 2  ;;  %v11351_v38 = vld [vmem:[#allocation110_spill] sm:$0xff] }
  0xfe   : > { %7916 = vmatprep.subr.bf16.mxu0 %v7915_v11 }
  0xff   : > { %6745 = vmatmul.mubr.f32.gmra.mrb[38].mxu1 %v9326_v28  ;;  %v5776_v28 = vld [vmem:[%s10945_s2 + $0x3e0] sm:$0xff] }
 0x100   : > { %7337 = vmatmul.mubr.f32.gmra.mrb[6].mxu0 %v9975_v18  ;;  %6747 = vmatprep.mubr.f32.mxu1 %v9356_v27  ;;  %v7927_v27 = vpack.c.bf16 %v5777_v1, %v5776_v28  ;;  %v11346_v1 = vld [vmem:[#allocation85_spill] sm:$0xff] }
 0x101   : > { %7339 = vmatprep.mubr.f32.mxu0 %v9980_v49  ;;  %7918 = vmatpush3.bf16.msra.mxu0 %v7915_v11  ;;  %v10255_v11 = vld [vmem:[%s8786_s14 + $0x150] sm:$0xff] }
 0x102   : > { %7920 = vmatprep.subr.bf16.mxu0 %v7919_v32 }
 0x103   : > { %6748 = vmatmul.mubr.f32.gmra.mrb[40].mxu1 %v9359_v48  ;;  %v5778_v48 = vld [vmem:[%s10945_s2 + $0x3f0] sm:$0xff] }
 0x104   : > { %7340 = vmatmul.mubr.f32.gmra.mrb[8].mxu0 %v9995_v30  ;;  %6750 = vmatprep.mubr.f32.mxu1 %v9385_v61  ;;  %v7931_v61 = vpack.c.bf16 %v5779_v37, %v5778_v48  ;;  %v11348_v48 = vld [vmem:[#allocation89_spill] sm:$0xff]  ;;  %v11349_v37 = vld [vmem:[#allocation107_spill] sm:$0xff] }
 0x105   : > { %7342 = vmatprep.mubr.f32.mxu0 %v10000_v23  ;;  %7922 = vmatpush3.bf16.msra.mxu0 %v7919_v32  ;;  %v10265_v32 = vld [vmem:[%s8786_s14 + $0x168] sm:$0xff] }
 0x106   : > { %7924 = vmatprep.subr.bf16.mxu0 %v7923_v22  ;;  %11343 = vst [vmem:[#allocation84_spill] sm:$0xff] %v10265_v32 }
 0x107   : > { %6751 = vmatmul.mubr.f32.gmra.mrb[42].mxu1 %v9393_v7  ;;  %v5780_v7 = vld [vmem:[%s10945_s2 + $0x400] sm:$0xff] }
 0x108   : > { %7343 = vmatmul.mubr.f32.gmra.mrb[10].mxu0 %v10015_v45  ;;  %6753 = vmatprep.mubr.f32.mxu1 %v9425_v25  ;;  %v10213_v25 = vpack.c.bf16 %v5781_v6, %v5780_v7  ;;  %v10278_v7 = vld [vmem:[%s8786_s14 + $0x178] sm:$0xff] }
 0x109   : > { %7345 = vmatprep.mubr.f32.mxu0 %v10020_v31  ;;  %7926 = vmatpush3.bf16.msra.mxu0 %v7923_v22  ;;  %v11345_v22 = vld [vmem:[#allocation106_spill] sm:$0xff] }
 0x10a   : > { %7928 = vmatprep.subr.bf16.mxu0 %v7927_v27  ;;  %v1616_v28 = vrot.slane %v11345_v22, 2  ;;  %11350 = vst [vmem:[#allocation106_spill] sm:$0xff] %v10278_v7  ;;  %v1620_v22 = vrot.slane %v11351_v38, 2  ;;  %v8578_v38 = vld [vmem:[%s8786_s14 + $0x20] sm:$0x3] }
 0x10b   : > { %6754 = vmatmul.mubr.f32.gmra.mrb[44].mxu1 %v9428_v62  ;;  %v10228_v62 = vld [vmem:[%s8786_s14 + $0x118] sm:$0xff]  ;;  %v1622_v43 = vrot.slane %v8578_v38, 2  ;;  %v11354_v38 = vld [vmem:[#allocation127_spill] sm:$0xff] }
 0x10c   : > { %7346 = vmatmul.mubr.f32.gmra.mrb[12].mxu0 %v10034_v60  ;;  %6756 = vmatprep.mubr.f32.mxu1 %v9454_v33  ;;  %v1617_v6 = vsel %vm1614_vm1, %v1615_v10, %v1616_v28 }
 0x10d   : > { %7348 = vmatprep.mubr.f32.mxu0 %v10039_v52  ;;  %7930 = vmatpush3.bf16.msra.mxu0 %v7927_v27  ;;  %v10272_v27 = vld [vmem:[%s8786_s14 + $0x170] sm:$0xff] }
 0x10e   : > { %7932 = vmatprep.subr.bf16.mxu0 %v7931_v61  ;;  %11347 = vst [vmem:[#allocation103_spill] sm:$0xff] %v10272_v27 }
 0x10f   : > { %6757 = vmatmul.mubr.f32.gmra.mrb[46].mxu1 %v9462_v12 }
 0x110   : > { %7349 = vmatmul.mubr.f32.gmra.mrb[14].mxu0 %v10057_v54  ;;  %6759 = vmatprep.mubr.f32.mxu1 %v9494_v46 }
 0x111   : > { %7351 = vmatprep.mubr.f32.mxu0 %v10068_v41  ;;  %7934 = vmatpush3.bf16.msra.mxu0 %v7931_v61  ;;  %v1618_v61 = vrot.slane %v11349_v37, 2  ;;  %v10291_v37 = vld [vmem:[%s8786_s14 + $0x180] sm:$0xff] }
 0x112   : > { %7936 = vmatprep.subr.bf16.mxu0 %v10213_v25 }
 0x113   : > { %6760 = vmatmul.mubr.f32.gmra.mrb[48].mxu1 %v9497_v56  ;;  %v1619_v10 = vsel %vm1614_vm1, %v1616_v28, %v1618_v61  ;;  %v10308_v28 = vld [vmem:[%s8786_s14 + $0x198] sm:$0xff] }
 0x114   : > { %7352 = vmatmul.mubr.f32.gmra.mrb[16].mxu0 %v10085_v8  ;;  %6762 = vmatprep.mubr.f32.mxu1 %v9523_v59  ;;  %11353 = vst [vmem:[#allocation85_spill] sm:$0xff] %v10308_v28 }
 0x115   : > { %7354 = vmatprep.mubr.f32.mxu0 %v10093_v29 }
 0x117   : > { %6763 = vmatmul.mubr.f32.gmra.mrb[50].mxu1 %v9531_v24 }
 0x118   : > { %7355 = vmatmul.mubr.f32.gmra.mrb[18].mxu0 %v10109_v53  ;;  %6765 = vmatprep.mubr.f32.mxu1 %v9563_v21 }
 0x119   : > { %7357 = vmatprep.mubr.f32.mxu0 %v10228_v62 }
 0x11b   : > { %6766 = vmatmul.mubr.f32.gmra.mrb[52].mxu1 %v9566_v16 }
 0x11c   : > { %7358 = vmatmul.mubr.f32.gmra.mrb[20].mxu0 %v10123_v47  ;;  %6768 = vmatprep.mubr.f32.mxu1 %v9588_v9 }
 0x11d   : > { %7360 = vmatprep.mubr.f32.mxu0 %v10235_v36 }
 0x11f   : > { %6769 = vmatmul.mubr.f32.gmra.mrb[54].mxu1 %v9596_v63 }
 0x120   : > { %7361 = vmatmul.mubr.f32.gmra.mrb[22].mxu0 %v10240_v40  ;;  %6771 = vmatprep.mubr.f32.mxu1 %v9623_v13 }
 0x121   : > { %7363 = vmatprep.mubr.f32.mxu0 %v10245_v3 }
 0x123   : > { %6772 = vmatmul.mubr.f32.gmra.mrb[56].mxu1 %v9626_v15 }
 0x124   : > { %7364 = vmatmul.mubr.f32.gmra.mrb[24].mxu0 %v10250_v0  ;;  %6774 = vmatprep.mubr.f32.mxu1 %v9646_v35 }
 0x125   : > { %7366 = vmatprep.mubr.f32.mxu0 %v10255_v11 }
 0x127   : > { %6775 = vmatmul.mubr.f32.gmra.mrb[58].mxu1 %v9654_v20 }
 0x128   : > { %7367 = vmatmul.mubr.f32.gmra.mrb[26].mxu0 %v10260_v34  ;;  %6777 = vmatprep.mubr.f32.mxu1 %v11342_v5  ;;  %v5704_v34 = vld [vmem:[%s10945_s2 + $0x1a0] sm:$0xff] }
 0x129   : > { %7369 = vmatprep.mubr.f32.mxu0 %v10265_v32  ;;  %v7779_v32 = vpack.c.bf16 %v5703_v55, %v5702_v26  ;;  %v10314_v55 = vld [vmem:[%s8786_s14 + $0x1a0] sm:$0xff] }
 0x12b   : > { %6778 = vmatmul.mubr.f32.gmra.mrb[60].mxu1 %v11346_v1 }
 0x12c   : > { %7370 = vmatmul.mubr.f32.gmra.mrb[28].mxu0 %v10272_v27  ;;  %6780 = vmatprep.mubr.f32.mxu1 %v11348_v48  ;;  %v1621_v27 = vsel %vm1614_vm1, %v1618_v61, %v1620_v22  ;;  %v1623_v61 = vsel %vm1614_vm1, %v1620_v22, %v1622_v43  ;;  %v11356_v43 = vld [vmem:[#allocation38_spill] sm:$0xff]  ;;  %v11357_v22 = vld [vmem:[#allocation39_spill] sm:$0xff] }
 0x12d   : > { %7372 = vmatprep.mubr.f32.mxu0 %v10278_v7  ;;  %v10297_v7 = vld [vmem:[%s8786_s14 + $0x190] sm:$0xff] }
 0x12f   : > { %6781 = vmatmul.mubr.f32.gmra.mrb[62].mxu1 %v11352_v51 }
 0x130   : > { %7373 = vmatmul.mubr.f32.gmra.mrb[30].mxu0 %v10291_v37  ;;  %6815 = vmatprep.mubr.f32.mxu1 %v1617_v6  ;;  %v5705_v6 = vld [vmem:[%s10945_s2 + $0x1a8] sm:$0xff] }
 0x131   : > { %7375 = vmatprep.mubr.f32.mxu0 %v10297_v7  ;;  %v7783_v26 = vpack.c.bf16 %v5705_v6, %v5704_v34  ;;  %v5708_v6 = vld [vmem:[%s10945_s2 + $0x1c0] sm:$0xff] }
 0x133   : > { %6816 = vmatmul.mubr.f32.vlgmr.msra.gmra.mrb[0].mxu1 %v1619_v10  ;;  %v5706_v10 = vld [vmem:[%s10945_s2 + $0x1b0] sm:$0xff] }
 0x134   : > { %7376 = vmatmul.mubr.f32.gmra.mrb[32].mxu0 %v10308_v28  ;;  %7778 = vmatpush3.bf16.msra.mxu1 %v11354_v38  ;;  %v5707_v28 = vld [vmem:[%s10945_s2 + $0x1b8] sm:$0xff]  ;;  %v10324_v38 = vld [vmem:[%s8786_s14 + $0x1a8] sm:$0xff] }
 0x135   : > { %6818 = vmatprep.mubr.f32.mxu1 %v1621_v27  ;;  %7378 = vmatprep.mubr.f32.mxu0 %v10314_v55  ;;  %11355 = vst [vmem:[#allocation89_spill] sm:$0xff] %v10324_v38  ;;  %v10329_v27 = vld [vmem:[%s8786_s14 + $0x1b8] sm:$0xff]  ;;  %v7787_v34 = vpack.c.bf16 %v5707_v28, %v5706_v10  ;;  %v5710_v10 = vld [vmem:[%s10945_s2 + $0x1d0] sm:$0xff] }
 0x136   : > { %7780 = vmatprep.subr.bf16.mxu1 %v7779_v32  ;;  %v11360_v28 = vld [vmem:[#allocation41_spill] sm:$0xff] }
 0x137   : > { %6819 = vmatmul.mubr.f32.gmra.mrb[2].mxu1 %v1623_v61  ;;  %v5709_v61 = vld [vmem:[%s10945_s2 + $0x1c8] sm:$0xff] }
 0x138   : > { %7379 = vmatmul.mubr.f32.gmra.mrb[34].mxu0 %v10324_v38  ;;  %6821 = vmatprep.mubr.f32.mxu1 %v11356_v43  ;;  %v10340_v38 = vld [vmem:[%s8786_s14 + $0x1c0] sm:$0xff]  ;;  %v11359_v43 = vld [vmem:[#allocation40_spill] sm:$0xff] }
 0x139   : > { %7381 = vmatprep.mubr.f32.mxu0 %v10329_v27  ;;  %7782 = vmatpush3.bf16.msra.mxu1 %v7779_v32  ;;  %11358 = vst [vmem:[#allocation107_spill] sm:$0xff] %v10340_v38  ;;  %v7791_v32 = vpack.c.bf16 %v5709_v61, %v5708_v6  ;;  %v5712_v6 = vld [vmem:[%s10945_s2 + $0x1e0] sm:$0xff]  ;;  %v5713_v61 = vld [vmem:[%s10945_s2 + $0x1e8] sm:$0xff] }
 0x13a   : > { %7784 = vmatprep.subr.bf16.mxu1 %v7783_v26 }
 0x13b   : > { %6822 = vmatmul.mubr.f32.gmra.mrb[4].mxu1 %v11357_v22  ;;  %v5711_v22 = vld [vmem:[%s10945_s2 + $0x1d8] sm:$0xff] }
 0x13c   : > { %7382 = vmatmul.mubr.f32.gmra.mrb[36].mxu0 %v10340_v38  ;;  %6824 = vmatprep.mubr.f32.mxu1 %v11359_v43  ;;  %v11361_v38 = vld [vmem:[#allocation43_spill] sm:$0xff]  ;;  %v5714_v43 = vld [vmem:[%s10945_s2 + $0x1f0] sm:$0xff] }
 0x13d   : > { %7384 = vmatprep.mubr.f32.mxu0 %v9454_v33  ;;  %7786 = vmatpush3.bf16.msra.mxu1 %v7783_v26  ;;  %v7795_v33 = vpack.c.bf16 %v5711_v22, %v5710_v10  ;;  %v11362_v26 = vld [vmem:[#allocation45_spill] sm:$0xff]  ;;  %v11367_v10 = vld [vmem:[#allocation55_spill] sm:$0xff] }
 0x13e   : > { %7788 = vmatprep.subr.bf16.mxu1 %v7787_v34  ;;  %v11368_v22 = vld [vmem:[#allocation57_spill] sm:$0xff] }
 0x13f   : > { %6825 = vmatmul.mubr.f32.gmra.mrb[6].mxu1 %v11360_v28  ;;  %v5715_v28 = vld [vmem:[%s10945_s2 + $0x1f8] sm:$0xff] }
 0x140   : > { %7385 = vmatmul.mubr.f32.gmra.mrb[38].mxu0 %v9462_v12  ;;  %6827 = vmatprep.mubr.f32.mxu1 %v11361_v38  ;;  %v11363_v12 = vld [vmem:[#allocation47_spill] sm:$0xff] }
 0x141   : > { %7387 = vmatprep.mubr.f32.mxu0 %v9494_v46  ;;  %7790 = vmatpush3.bf16.msra.mxu1 %v7787_v34  ;;  %v7799_v46 = vpack.c.bf16 %v5713_v61, %v5712_v6  ;;  %v11364_v34 = vld [vmem:[#allocation49_spill] sm:$0xff]  ;;  %v11376_v6 = vld [vmem:[#allocation71_spill] sm:$0xff] }
 0x142   : > { %7792 = vmatprep.subr.bf16.mxu1 %v7791_v32  ;;  %v11380_v61 = vld [vmem:[#allocation77_spill] sm:$0xff] }
 0x143   : > { %6828 = vmatmul.mubr.f32.gmra.mrb[8].mxu1 %v11362_v26 }
 0x144   : > { %7388 = vmatmul.mubr.f32.gmra.mrb[40].mxu0 %v9497_v56  ;;  %6830 = vmatprep.mubr.f32.mxu1 %v11363_v12  ;;  %v11365_v56 = vld [vmem:[#allocation51_spill] sm:$0xff] }
 0x145   : > { %7390 = vmatprep.mubr.f32.mxu0 %v9523_v59  ;;  %7794 = vmatpush3.bf16.msra.mxu1 %v7791_v32  ;;  %v7803_v59 = vpack.c.bf16 %v5715_v28, %v5714_v43  ;;  %v11366_v32 = vld [vmem:[#allocation53_spill] sm:$0xff]  ;;  %v10412_v43 = vld [vmem:[%s10045_s16 + $0x30] sm:$0xff] }
 0x146   : > { %7796 = vmatprep.subr.bf16.mxu1 %v7795_v33  ;;  %v10415_v28 = vld [vmem:[%s10045_s16 + $0x38] sm:$0xff] }
 0x147   : > { %6831 = vmatmul.mubr.f32.gmra.mrb[10].mxu1 %v11364_v34 }
 0x148   : > { %7391 = vmatmul.mubr.f32.gmra.mrb[42].mxu0 %v9531_v24  ;;  %6833 = vmatprep.mubr.f32.mxu1 %v11365_v56  ;;  %v11369_v24 = vld [vmem:[#allocation59_spill] sm:$0xff] }
 0x149   : > { %7393 = vmatprep.mubr.f32.mxu0 %v9563_v21  ;;  %7798 = vmatpush3.bf16.msra.mxu1 %v7795_v33  ;;  %v11370_v21 = vld [vmem:[#allocation2_spill] sm:$0xff]  ;;  %v11371_v33 = vld [vmem:[#allocation61_spill] sm:$0xff] }
 0x14a   : > { %7800 = vmatprep.subr.bf16.mxu1 %v7799_v46 }
 0x14b   : > { %6834 = vmatmul.mubr.f32.gmra.mrb[12].mxu1 %v11366_v32 }
 0x14c   : > { %7394 = vmatmul.mubr.f32.gmra.mrb[44].mxu0 %v9566_v16  ;;  %6836 = vmatprep.mubr.f32.mxu1 %v11367_v10  ;;  %v11372_v16 = vld [vmem:[#allocation63_spill] sm:$0xff] }
 0x14d   : > { %7396 = vmatprep.mubr.f32.mxu0 %v9588_v9  ;;  %7802 = vmatpush3.bf16.msra.mxu1 %v7799_v46  ;;  %v11373_v9 = vld [vmem:[#allocation65_spill] sm:$0xff]  ;;  %v10405_v46 = vld [vmem:[%s10045_s16 + $0x28] sm:$0xff] }
 0x14e   : > { %7804 = vmatprep.subr.bf16.mxu1 %v7803_v59 }
 0x14f   : > { %6837 = vmatmul.mubr.f32.gmra.mrb[14].mxu1 %v11368_v22 }
 0x150   : > { %7397 = vmatmul.mubr.f32.gmra.mrb[46].mxu0 %v9596_v63  ;;  %6839 = vmatprep.mubr.f32.mxu1 %v11369_v24  ;;  %v11374_v63 = vld [vmem:[#allocation67_spill] sm:$0xff] }
 0x151   : > { %7399 = vmatprep.mubr.f32.mxu0 %v9623_v13  ;;  %7806 = vmatpush3.bf16.msra.mxu1 %v7803_v59  ;;  %v11375_v13 = vld [vmem:[#allocation69_spill] sm:$0xff]  ;;  %v11385_v59 = vld [vmem:[#allocation87_spill] sm:$0xff] }
 0x152   : > { %7967 = vmatprep.subr.bf16.mxu1 %v11370_v21 }
 0x153   : > { %6840 = vmatmul.mubr.f32.gmra.mrb[16].mxu1 %v11371_v33  ;;  %v11418_v33 = vld [vmem:[#allocation121_spill] sm:$0xff] }
 0x154   : > { %7400 = vmatmul.mubr.f32.gmra.mrb[48].mxu0 %v9626_v15  ;;  %6842 = vmatprep.mubr.f32.mxu1 %v11372_v16  ;;  %v11378_v15 = vld [vmem:[#allocation75_spill] sm:$0xff]  ;;  %v11395_v16 = vld [vmem:[#allocation13_spill] sm:$0xff] }
 0x155   : > { %7402 = vmatprep.mubr.f32.mxu0 %v9646_v35  ;;  %v11377_v35 = vld [vmem:[#allocation73_spill] sm:$0xff] }
 0x157   : > { %6843 = vmatmul.mubr.f32.gmra.mrb[18].mxu1 %v11373_v9  ;;  %v11392_v9 = vld [vmem:[#allocation99_spill] sm:$0xff] }
 0x158   : > { %7403 = vmatmul.mubr.f32.gmra.mrb[50].mxu0 %v9654_v20  ;;  %6845 = vmatprep.mubr.f32.mxu1 %v11374_v63  ;;  %v11379_v20 = vld [vmem:[#allocation136_spill] sm:$0xff]  ;;  %v11391_v63 = vld [vmem:[#allocation11_spill] sm:$0xff] }
 0x159   : > { %7405 = vmatprep.mubr.f32.mxu0 %v11342_v5  ;;  %v11381_v5 = vld [vmem:[#allocation137_spill] sm:$0xff] }
 0x15b   : > { %6846 = vmatmul.mubr.f32.gmra.mrb[20].mxu1 %v11375_v13  ;;  %v5785_v13 = vld [vmem:[%s10945_s2 + $0x428] sm:$0xff] }
 0x15c   : > { %7406 = vmatmul.mubr.f32.gmra.mrb[52].mxu0 %v11346_v1  ;;  %6848 = vmatprep.mubr.f32.mxu1 %v11376_v6  ;;  %v11382_v1 = vld [vmem:[#allocation79_spill] sm:$0xff]  ;;  %v11390_v6 = vld [vmem:[#allocation97_spill] sm:$0xff] }
 0x15d   : > { %7408 = vmatprep.mubr.f32.mxu0 %v11348_v48  ;;  %v11383_v48 = vld [vmem:[#allocation81_spill] sm:$0xff] }
 0x15f   : > { %6849 = vmatmul.mubr.f32.gmra.mrb[22].mxu1 %v11377_v35  ;;  %v11389_v35 = vld [vmem:[#allocation10_spill] sm:$0xff] }
 0x160   : > { %7409 = vmatmul.mubr.f32.gmra.mrb[54].mxu0 %v11352_v51  ;;  %6851 = vmatprep.mubr.f32.mxu1 %v11378_v15  ;;  %v11384_v51 = vld [vmem:[#allocation83_spill] sm:$0xff]  ;;  %v5783_v15 = vld [vmem:[%s10945_s2 + $0x418] sm:$0xff] }
 0x161   : > { %7411 = vmatprep.mubr.f32.mxu0 %v11379_v20 }
 0x163   : > { %6852 = vmatmul.mubr.f32.gmra.mrb[24].mxu1 %v11380_v61  ;;  %v10422_v61 = vld [vmem:[%s10045_s16 + $0x40] sm:$0xff] }
 0x164   : > { %7412 = vmatmul.mubr.f32.gmra.mrb[56].mxu0 %v11381_v5  ;;  %6854 = vmatprep.mubr.f32.mxu1 %v11382_v1  ;;  %v11386_v1 = vld [vmem:[#allocation90_spill] sm:$0xff] }
 0x165   : > { %7414 = vmatprep.mubr.f32.mxu0 %v10082_v57 }
 0x167   : > { %6855 = vmatmul.mubr.f32.gmra.mrb[26].mxu1 %v11383_v48  ;;  %v11387_v48 = vld [vmem:[#allocation93_spill] sm:$0xff] }
 0x168   : > { %7415 = vmatmul.mubr.f32.gmra.mrb[58].mxu0 %v10089_v17  ;;  %6857 = vmatprep.mubr.f32.mxu1 %v11384_v51  ;;  %v5782_v51 = vld [vmem:[%s10945_s2 + $0x410] sm:$0xff] }
 0x169   : > { %7417 = vmatprep.mubr.f32.mxu0 %v10405_v46 }
 0x16b   : > { %6858 = vmatmul.mubr.f32.gmra.mrb[28].mxu1 %v11385_v59  ;;  %v11388_v59 = vld [vmem:[#allocation95_spill] sm:$0xff] }
 0x16c   : > { %7418 = vmatmul.mubr.f32.gmra.mrb[60].mxu0 %v10412_v43  ;;  %6860 = vmatprep.mubr.f32.mxu1 %v11386_v1  ;;  %v7939_v1 = vpack.c.bf16 %v5783_v15, %v5782_v51  ;;  %v11394_v15 = vld [vmem:[#allocation101_spill] sm:$0xff]  ;;  %v5786_v51 = vld [vmem:[%s10945_s2 + $0x430] sm:$0xff] }
 0x16d   : > { %7420 = vmatprep.mubr.f32.mxu0 %v10415_v28 }
 0x16f   : > { %6861 = vmatmul.mubr.f32.gmra.mrb[30].mxu1 %v11387_v48  ;;  %v5784_v48 = vld [vmem:[%s10945_s2 + $0x420] sm:$0xff] }
 0x170   : > { %7421 = vmatmul.mubr.f32.gmra.mrb[62].mxu0 %v10422_v61  ;;  %6863 = vmatprep.mubr.f32.mxu1 %v11388_v59  ;;  %v11393_v59 = vld [vmem:[#allocation12_spill] sm:$0xff] }
 0x171   : > { %7455 = vmatprep.mubr.f32.mxu0 %v11389_v35  ;;  %v7943_v35 = vpack.c.bf16 %v5785_v13, %v5784_v48  ;;  %v11398_v13 = vld [vmem:[#allocation104_spill] sm:$0xff]  ;;  %v5788_v48 = vld [vmem:[%s10945_s2 + $0x440] sm:$0xff] }
 0x173   : > { %6864 = vmatmul.mubr.f32.gmra.mrb[32].mxu1 %v11390_v6  ;;  %v5787_v6 = vld [vmem:[%s10945_s2 + $0x438] sm:$0xff] }
 0x174   : > { %7456 = vmatmul.mubr.f32.vlgmr.msra.gmra.mrb[0].mxu0 %v11391_v63  ;;  %6866 = vmatprep.mubr.f32.mxu1 %v11392_v9  ;;  %v11396_v63 = vld [vmem:[#allocation102_spill] sm:$0xff] }
 0x175   : > { %7938 = vmatpush3.bf16.msra.mxu0 %v10213_v25  ;;  %7458 = vmatprep.mubr.f32.mxu0 %v11393_v59  ;;  %v11397_v9 = vld [vmem:[#allocation14_spill] sm:$0xff]  ;;  %v7947_v25 = vpack.c.bf16 %v5787_v6, %v5786_v51  ;;  %v5789_v59 = vld [vmem:[%s10945_s2 + $0x448] sm:$0xff]  ;;  %v11402_v6 = vld [vmem:[#allocation108_spill] sm:$0xff] }
 0x176   : > { %7940 = vmatprep.subr.bf16.mxu0 %v7939_v1  ;;  %v5791_v51 = vld [vmem:[%s10945_s2 + $0x458] sm:$0xff] }
 0x177   : > { %6867 = vmatmul.mubr.f32.gmra.mrb[34].mxu1 %v11394_v15  ;;  %v11399_v15 = vld [vmem:[#allocation15_spill] sm:$0xff] }
 0x178   : > { %7459 = vmatmul.mubr.f32.gmra.mrb[2].mxu0 %v11395_v16  ;;  %6869 = vmatprep.mubr.f32.mxu1 %v11396_v63  ;;  %v11400_v16 = vld [vmem:[#allocation105_spill] sm:$0xff]  ;;  %v11401_v63 = vld [vmem:[#allocation16_spill] sm:$0xff] }
 0x179   : > { %7461 = vmatprep.mubr.f32.mxu0 %v11397_v9  ;;  %7942 = vmatpush3.bf16.msra.mxu0 %v7939_v1  ;;  %v7951_v9 = vpack.c.bf16 %v5789_v59, %v5788_v48  ;;  %v5790_v1 = vld [vmem:[%s10945_s2 + $0x450] sm:$0xff]  ;;  %v5792_v48 = vld [vmem:[%s10945_s2 + $0x460] sm:$0xff]  ;;  %v5793_v59 = vld [vmem:[%s10945_s2 + $0x468] sm:$0xff] }
 0x17a   : > { %7944 = vmatprep.subr.bf16.mxu0 %v7943_v35 }
 0x17b   : > { %6870 = vmatmul.mubr.f32.gmra.mrb[36].mxu1 %v11398_v13  ;;  %v11403_v13 = vld [vmem:[#allocation17_spill] sm:$0xff] }
 0x17c   : > { %7462 = vmatmul.mubr.f32.gmra.mrb[4].mxu0 %v11399_v15  ;;  %6872 = vmatprep.mubr.f32.mxu1 %v11400_v16  ;;  %v11404_v15 = vld [vmem:[#allocation109_spill] sm:$0xff]  ;;  %v11405_v16 = vld [vmem:[#allocation18_spill] sm:$0xff] }
 0x17d   : > { %7464 = vmatprep.mubr.f32.mxu0 %v11401_v63  ;;  %7946 = vmatpush3.bf16.msra.mxu0 %v7943_v35  ;;  %v7955_v35 = vpack.c.bf16 %v5791_v51, %v5790_v1  ;;  %v11406_v63 = vld [vmem:[#allocation112_spill] sm:$0xff]  ;;  %v5795_v51 = vld [vmem:[%s10945_s2 + $0x478] sm:$0xff] }
 0x17e   : > { %7948 = vmatprep.subr.bf16.mxu0 %v7947_v25  ;;  %v5794_v1 = vld [vmem:[%s10945_s2 + $0x470] sm:$0xff] }
 0x17f   : > { %6873 = vmatmul.mubr.f32.gmra.mrb[38].mxu1 %v11402_v6  ;;  %v11407_v6 = vld [vmem:[#allocation19_spill] sm:$0xff] }
 0x180   : > { %7465 = vmatmul.mubr.f32.gmra.mrb[6].mxu0 %v11403_v13  ;;  %6875 = vmatprep.mubr.f32.mxu1 %v11404_v15  ;;  %v11408_v13 = vld [vmem:[#allocation113_spill] sm:$0xff]  ;;  %v11409_v15 = vld [vmem:[#allocation20_spill] sm:$0xff] }
 0x181   : > { %7467 = vmatprep.mubr.f32.mxu0 %v11405_v16  ;;  %7950 = vmatpush3.bf16.msra.mxu0 %v7947_v25  ;;  %v7959_v25 = vpack.c.bf16 %v5793_v59, %v5792_v48  ;;  %v11410_v16 = vld [vmem:[#allocation116_spill] sm:$0xff]  ;;  %v11415_v48 = vld [vmem:[#allocation23_spill] sm:$0xff] }
 0x182   : > { %7952 = vmatprep.subr.bf16.mxu0 %v7951_v9  ;;  %v11416_v59 = vld [vmem:[#allocation120_spill] sm:$0xff] }
 0x183   : > { %6876 = vmatmul.mubr.f32.gmra.mrb[40].mxu1 %v11406_v63  ;;  %v11411_v63 = vld [vmem:[#allocation21_spill] sm:$0xff] }
 0x184   : > { %7468 = vmatmul.mubr.f32.gmra.mrb[8].mxu0 %v11407_v6  ;;  %6878 = vmatprep.mubr.f32.mxu1 %v11408_v13  ;;  %v11412_v6 = vld [vmem:[#allocation117_spill] sm:$0xff]  ;;  %v11413_v13 = vld [vmem:[#allocation22_spill] sm:$0xff] }
 0x185   : > { %7470 = vmatprep.mubr.f32.mxu0 %v11409_v15  ;;  %7954 = vmatpush3.bf16.msra.mxu0 %v7951_v9  ;;  %v7963_v9 = vpack.c.bf16 %v5795_v51, %v5794_v1  ;;  %v11414_v15 = vld [vmem:[#allocation119_spill] sm:$0xff]  ;;  %v11424_v51 = vld [vmem:[#allocation124_spill] sm:$0xff] }
 0x186   : > { %7956 = vmatprep.subr.bf16.mxu0 %v7955_v35  ;;  %v11423_v1 = vld [vmem:[#allocation27_spill] sm:$0xff] }
 0x187   : > { %6879 = vmatmul.mubr.f32.gmra.mrb[42].mxu1 %v11410_v16  ;;  %v11417_v16 = vld [vmem:[#allocation24_spill] sm:$0xff] }
 0x188   : > { %7471 = vmatmul.mubr.f32.gmra.mrb[10].mxu0 %v11411_v63  ;;  %6881 = vmatprep.mubr.f32.mxu1 %v11412_v6  ;;  %v11419_v63 = vld [vmem:[#allocation25_spill] sm:$0xff]  ;;  %v11420_v6 = vld [vmem:[#allocation122_spill] sm:$0xff] }
 0x189   : > { %7473 = vmatprep.mubr.f32.mxu0 %v11413_v13  ;;  %7958 = vmatpush3.bf16.msra.mxu0 %v7955_v35  ;;  %v11421_v13 = vld [vmem:[#allocation26_spill] sm:$0xff]  ;;  %v11422_v35 = vld [vmem:[#allocation123_spill] sm:$0xff] }
 0x18a   : > { %7960 = vmatprep.subr.bf16.mxu0 %v7959_v25 }
 0x18b   : > { %6882 = vmatmul.mubr.f32.gmra.mrb[44].mxu1 %v11414_v15 }
 0x18c   : > { %7474 = vmatmul.mubr.f32.gmra.mrb[12].mxu0 %v11415_v48  ;;  %6884 = vmatprep.mubr.f32.mxu1 %v11416_v59  ;;  %v11425_v48 = vld [vmem:[#allocation28_spill] sm:$0xff]  ;;  %v11458_v59 = vld [vmem:[#allocation118_spill] sm:$0xff] }
 0x18d   : > { %7476 = vmatprep.mubr.f32.mxu0 %v11417_v16  ;;  %7962 = vmatpush3.bf16.msra.mxu0 %v7959_v25  ;;  %v11426_v16 = vld [vmem:[#allocation125_spill] sm:$0xff] }
 0x18e   : > { %7964 = vmatprep.subr.bf16.mxu0 %v7963_v9  ;;  %v11427_v25 = vld [vmem:[#allocation29_spill] sm:$0xff] }
 0x18f   : > { %6885 = vmatmul.mubr.f32.gmra.mrb[46].mxu1 %v11418_v33  ;;  %v11428_v33 = vld [vmem:[#allocation126_spill] sm:$0xff] }
 0x190   : > { %7477 = vmatmul.mubr.f32.gmra.mrb[14].mxu0 %v11419_v63  ;;  %6887 = vmatprep.mubr.f32.mxu1 %v11420_v6  ;;  %v11429_v63 = vld [vmem:[#allocation30_spill] sm:$0xff]  ;;  %v11430_v6 = vld [vmem:[#allocation128_spill] sm:$0xff] }
 0x191   : > { %7479 = vmatprep.mubr.f32.mxu0 %v11421_v13  ;;  %7966 = vmatpush3.bf16.msra.mxu0 %v7963_v9  ;;  %v11431_v13 = vld [vmem:[#allocation31_spill] sm:$0xff]  ;;  %v11432_v9 = vld [vmem:[#allocation129_spill] sm:$0xff] }
 0x193   : > { %6888 = vmatmul.mubr.f32.gmra.mrb[48].mxu1 %v11422_v35  ;;  %v11433_v35 = vld [vmem:[#allocation32_spill] sm:$0xff] }
 0x194   : > { %7480 = vmatmul.mubr.f32.gmra.mrb[16].mxu0 %v11423_v1  ;;  %6890 = vmatprep.mubr.f32.mxu1 %v11424_v51  ;;  %v11434_v1 = vld [vmem:[#allocation130_spill] sm:$0xff]  ;;  %v11435_v51 = vld [vmem:[#allocation33_spill] sm:$0xff] }
 0x195   : > { %7482 = vmatprep.mubr.f32.mxu0 %v11425_v48  ;;  %v11436_v48 = vld [vmem:[#allocation131_spill] sm:$0xff] }
 0x197   : > { %6891 = vmatmul.mubr.f32.gmra.mrb[50].mxu1 %v11426_v16  ;;  %v11437_v16 = vld [vmem:[#allocation34_spill] sm:$0xff] }
 0x198   : > { %7483 = vmatmul.mubr.f32.gmra.mrb[18].mxu0 %v11427_v25  ;;  %6893 = vmatprep.mubr.f32.mxu1 %v11428_v33  ;;  %v11438_v25 = vld [vmem:[#allocation132_spill] sm:$0xff]  ;;  %v11439_v33 = vld [vmem:[#allocation35_spill] sm:$0xff] }
 0x199   : > { %7485 = vmatprep.mubr.f32.mxu0 %v11429_v63  ;;  %v11440_v63 = vld [vmem:[#allocation133_spill] sm:$0xff] }
 0x19b   : > { %6894 = vmatmul.mubr.f32.gmra.mrb[52].mxu1 %v11430_v6  ;;  %v11441_v6 = vld [vmem:[#allocation36_spill] sm:$0xff] }
 0x19c   : > { %7486 = vmatmul.mubr.f32.gmra.mrb[20].mxu0 %v11431_v13  ;;  %6896 = vmatprep.mubr.f32.mxu1 %v11432_v9  ;;  %v11442_v13 = vld [vmem:[#allocation134_spill] sm:$0xff]  ;;  %v11443_v9 = vld [vmem:[#allocation37_spill] sm:$0xff] }
 0x19d   : > { %7488 = vmatprep.mubr.f32.mxu0 %v11433_v35  ;;  %v11444_v35 = vld [vmem:[#allocation135_spill] sm:$0xff] }
 0x19f   : > { %6897 = vmatmul.mubr.f32.gmra.mrb[54].mxu1 %v11434_v1  ;;  %v11445_v1 = vld [vmem:[#allocation42_spill] sm:$0xff] }
 0x1a0   : > { %7489 = vmatmul.mubr.f32.gmra.mrb[22].mxu0 %v11435_v51  ;;  %6899 = vmatprep.mubr.f32.mxu1 %v11436_v48  ;;  %v11446_v51 = vld [vmem:[#allocation138_spill] sm:$0xff]  ;;  %v11447_v48 = vld [vmem:[#allocation44_spill] sm:$0xff] }
 0x1a1   : > { %7491 = vmatprep.mubr.f32.mxu0 %v11437_v16  ;;  %v11448_v16 = vld [vmem:[#allocation139_spill] sm:$0xff] }
 0x1a3   : > { %6900 = vmatmul.mubr.f32.gmra.mrb[56].mxu1 %v11438_v25  ;;  %v11449_v25 = vld [vmem:[#allocation46_spill] sm:$0xff] }
 0x1a4   : > { %7492 = vmatmul.mubr.f32.gmra.mrb[24].mxu0 %v11439_v33  ;;  %6902 = vmatprep.mubr.f32.mxu1 %v11440_v63  ;;  %v11450_v33 = vld [vmem:[#allocation48_spill] sm:$0xff]  ;;  %v11456_v63 = vld [vmem:[#allocation54_spill] sm:$0xff] }
 0x1a5   : > { %7494 = vmatprep.mubr.f32.mxu0 %v11441_v6  ;;  %v11451_v6 = vld [vmem:[#allocation111_spill] sm:$0xff] }
 0x1a7   : > { %6903 = vmatmul.mubr.f32.gmra.mrb[58].mxu1 %v11442_v13  ;;  %v11452_v13 = vld [vmem:[#allocation50_spill] sm:$0xff] }
 0x1a8   : > { %7495 = vmatmul.mubr.f32.gmra.mrb[26].mxu0 %v11443_v9  ;;  %6905 = vmatprep.mubr.f32.mxu1 %v11444_v35  ;;  %v11453_v9 = vld [vmem:[#allocation114_spill] sm:$0xff]  ;;  %v11454_v35 = vld [vmem:[#allocation52_spill] sm:$0xff] }
 0x1a9   : > { %7497 = vmatprep.mubr.f32.mxu0 %v11445_v1 }
 0x1ab   : > { %6906 = vmatmul.mubr.f32.gmra.mrb[60].mxu1 %v11446_v51  ;;  %v11455_v51 = vld [vmem:[#allocation115_spill] sm:$0xff] }
 0x1ac   : > { %7498 = vmatmul.mubr.f32.gmra.mrb[28].mxu0 %v11447_v48  ;;  %6908 = vmatprep.mubr.f32.mxu1 %v11448_v16  ;;  %v11457_v16 = vld [vmem:[#allocation3_spill] sm:$0xff] }
 0x1ad   : > { %7500 = vmatprep.mubr.f32.mxu0 %v11449_v25 }
 0x1af   : > { %6909 = vmatmul.mubr.f32.gmra.mrb[62].mxu1 %v10098_v42  ;;  %v11459_v42 = vld [vmem:[#allocation56_spill] sm:$0xff] }
 0x1b0   : > { %7501 = vmatmul.mubr.f32.gmra.mrb[30].mxu0 %v11450_v33  ;;  %6943 = vmatprep.mubr.f32.mxu1 %v11451_v6  ;;  %v11460_v6 = vld [vmem:[#allocation58_spill] sm:$0xff] }
 0x1b1   : > { %7503 = vmatprep.mubr.f32.mxu0 %v11452_v13 }
 0x1b3   : > { %6944 = vmatmul.mubr.f32.vlgmr.msra.gmra.mrb[0].mxu1 %v11453_v9  ;;  %v11461_v9 = vld [vmem:[#allocation4_spill] sm:$0xff] }
 0x1b4   : > { %7504 = vmatmul.mubr.f32.gmra.mrb[32].mxu0 %v11454_v35  ;;  %7975 = vmatpush3.bf16.msra.mxu1 %v11370_v21  ;;  %v11462_v21 = vld [vmem:[#allocation60_spill] sm:$0xff] }
 0x1b5   : > { %6946 = vmatprep.mubr.f32.mxu1 %v11455_v51  ;;  %7506 = vmatprep.mubr.f32.mxu0 %v11456_v63  ;;  %v11463_v51 = vld [vmem:[#allocation62_spill] sm:$0xff] }
 0x1b6   : > { %7968 = vmatprep.subr.bf16.mxu1 %v11457_v16 }
 0x1b7   : > { %6947 = vmatmul.mubr.f32.gmra.mrb[2].mxu1 %v11458_v59  ;;  %v11464_v59 = vld [vmem:[#allocation5_spill] sm:$0xff] }
 0x1b8   : > { %7507 = vmatmul.mubr.f32.gmra.mrb[34].mxu0 %v11459_v42  ;;  %6949 = vmatprep.mubr.f32.mxu1 %v9879_v4  ;;  %v11465_v4 = vld [vmem:[#allocation64_spill] sm:$0xff] }
 0x1b9   : > { %7509 = vmatprep.mubr.f32.mxu0 %v11460_v6  ;;  %7976 = vmatpush3.bf16.msra.mxu1 %v11457_v16  ;;  %v11466_v16 = vld [vmem:[#allocation66_spill] sm:$0xff] }
 0x1ba   : > { %7969 = vmatprep.subr.bf16.mxu1 %v11461_v9 }
 0x1bb   : > { %6950 = vmatmul.mubr.f32.gmra.mrb[4].mxu1 %v9893_v14  ;;  %v11467_v14 = vld [vmem:[#allocation6_spill] sm:$0xff] }
 0x1bc   : > { %7510 = vmatmul.mubr.f32.gmra.mrb[36].mxu0 %v11462_v21  ;;  %6952 = vmatprep.mubr.f32.mxu1 %v9904_v44  ;;  %v11468_v44 = vld [vmem:[#allocation68_spill] sm:$0xff] }
 0x1bd   : > { %7512 = vmatprep.mubr.f32.mxu0 %v11463_v51  ;;  %7977 = vmatpush3.bf16.msra.mxu1 %v11461_v9  ;;  %v11469_v9 = vld [vmem:[#allocation70_spill] sm:$0xff] }
 0x1be   : > { %7970 = vmatprep.subr.bf16.mxu1 %v11464_v59 }
 0x1bf   : > { %6953 = vmatmul.mubr.f32.gmra.mrb[6].mxu1 %v9917_v50  ;;  %v11470_v50 = vld [vmem:[#allocation7_spill] sm:$0xff] }
 0x1c0   : > { %7513 = vmatmul.mubr.f32.gmra.mrb[38].mxu0 %v11465_v4  ;;  %6955 = vmatprep.mubr.f32.mxu1 %v9929_v39  ;;  %v11471_v39 = vld [vmem:[#allocation72_spill] sm:$0xff] }
 0x1c1   : > { %7515 = vmatprep.mubr.f32.mxu0 %v11466_v16  ;;  %7978 = vmatpush3.bf16.msra.mxu1 %v11464_v59  ;;  %v11472_v59 = vld [vmem:[#allocation74_spill] sm:$0xff] }
 0x1c2   : > { %7971 = vmatprep.subr.bf16.mxu1 %v11467_v14 }
 0x1c3   : > { %6956 = vmatmul.mubr.f32.gmra.mrb[8].mxu1 %v9947_v2  ;;  %v11473_v2 = vld [vmem:[#allocation8_spill] sm:$0xff] }
 0x1c4   : > { %7516 = vmatmul.mubr.f32.gmra.mrb[40].mxu0 %v11468_v44  ;;  %6958 = vmatprep.mubr.f32.mxu1 %v9958_v58  ;;  %v11474_v58 = vld [vmem:[#allocation76_spill] sm:$0xff] }
 0x1c5   : > { %7518 = vmatprep.mubr.f32.mxu0 %v11469_v9  ;;  %7979 = vmatpush3.bf16.msra.mxu1 %v11467_v14  ;;  %v11475_v14 = vld [vmem:[#allocation78_spill] sm:$0xff] }
 0x1c6   : > { %7972 = vmatprep.subr.bf16.mxu1 %v11470_v50 }
 0x1c7   : > { %6959 = vmatmul.mubr.f32.gmra.mrb[10].mxu1 %v9975_v18  ;;  %v11476_v18 = vld [vmem:[#allocation9_spill] sm:$0xff] }
 0x1c8   : > { %7519 = vmatmul.mubr.f32.gmra.mrb[42].mxu0 %v11471_v39  ;;  %6961 = vmatprep.mubr.f32.mxu1 %v9980_v49  ;;  %v11477_v49 = vld [vmem:[#allocation80_spill] sm:$0xff] }
 0x1c9   : > { %7521 = vmatprep.mubr.f32.mxu0 %v11472_v59  ;;  %7980 = vmatpush3.bf16.msra.mxu1 %v11470_v50  ;;  %v11478_v50 = vld [vmem:[#allocation82_spill] sm:$0xff] }
 0x1ca   : > { %7973 = vmatprep.subr.bf16.mxu1 %v11473_v2 }
 0x1cb   : > { %6962 = vmatmul.mubr.f32.gmra.mrb[12].mxu1 %v9995_v30  ;;  %v11479_v30 = vld [vmem:[#allocation86_spill] sm:$0xff] }
 0x1cc   : > { %7522 = vmatmul.mubr.f32.gmra.mrb[44].mxu0 %v11474_v58  ;;  %6964 = vmatprep.mubr.f32.mxu1 %v10000_v23  ;;  %v11480_v23 = vld [vmem:[#allocation88_spill] sm:$0xff] }
 0x1cd   : > { %7524 = vmatprep.mubr.f32.mxu0 %v11475_v14  ;;  %7981 = vmatpush3.bf16.msra.mxu1 %v11473_v2  ;;  %v11481_v2 = vld [vmem:[#allocation92_spill] sm:$0xff] }
 0x1ce   : > { %7974 = vmatprep.subr.bf16.mxu1 %v11476_v18 }
 0x1cf   : > { %6965 = vmatmul.mubr.f32.gmra.mrb[14].mxu1 %v10015_v45  ;;  %v11482_v45 = vld [vmem:[#allocation94_spill] sm:$0xff] }
 0x1d0   : > { %7525 = vmatmul.mubr.f32.gmra.mrb[46].mxu0 %v11477_v49  ;;  %6967 = vmatprep.mubr.f32.mxu1 %v10020_v31  ;;  %v2760_v31 = vrot.slane %v11379_v20, 1 }
 0x1d1   : > { %7527 = vmatprep.mubr.f32.mxu0 %v11478_v50  ;;  %7982 = vmatpush3.bf16.msra.mxu1 %v11476_v18  ;;  %v2761_v18 = vrot.slane %v11381_v5, 1 }
 0x1d3   : > { %6968 = vmatmul.mubr.f32.gmra.mrb[16].mxu1 %v10034_v60  ;;  %v11483_v60 = vld [vmem:[#allocation96_spill] sm:$0xff] }
 0x1d4   : > { %7528 = vmatmul.mubr.f32.gmra.mrb[48].mxu0 %v11479_v30  ;;  %6970 = vmatprep.mubr.f32.mxu1 %v10039_v52  ;;  %v11484_v52 = vld [vmem:[#allocation98_spill] sm:$0xff] }
 0x1d5   : > { %7530 = vmatprep.mubr.f32.mxu0 %v11480_v23 }
 0x1d7   : > { %6971 = vmatmul.mubr.f32.gmra.mrb[18].mxu1 %v10057_v54  ;;  %v2763_v54 = vrot.slane %v10082_v57, 1 }
 0x1d8   : > { %7531 = vmatmul.mubr.f32.gmra.mrb[50].mxu0 %v11481_v2  ;;  %6973 = vmatprep.mubr.f32.mxu1 %v10068_v41  ;;  %v10598_v2 = vsel %vm618_vm0, %v2760_v31, %v2761_v18  ;;  %v2765_v41 = vrot.slane %v10089_v17, 1  ;;  %v4190_v31 = vrot.slane %v10412_v43, 1 }
 0x1d9   : > { %7533 = vmatprep.mubr.f32.mxu0 %v11482_v45  ;;  %11485 = vst [vmem:[#allocation110_spill] sm:$0xff] %v10598_v2  ;;  %v11486_v45 = vld [vmem:[#allocation100_spill] sm:$0xff] }
 0x1db   : > { %6974 = vmatmul.mubr.f32.gmra.mrb[20].mxu1 %v10085_v8  ;;  %v10606_v8 = vsel %vm618_vm0, %v2761_v18, %v2763_v54 }
 0x1dc   : > { %7534 = vmatmul.mubr.f32.gmra.mrb[52].mxu0 %v11483_v60  ;;  %6976 = vmatprep.mubr.f32.mxu1 %v10093_v29  ;;  %v2767_v29 = vrot.slane %v10106_v19, 1  ;;  %v10612_v60 = vsel %vm618_vm0, %v2763_v54, %v2765_v41  ;;  %v4194_v19 = vrot.slane %v10422_v61, 1 }
 0x1dd   : > { %7536 = vmatprep.mubr.f32.mxu0 %v11484_v52  ;;  %v4189_v52 = vrot.slane %v10405_v46, 1 }
 0x1df   : > { %6977 = vmatmul.mubr.f32.gmra.mrb[22].mxu1 %v10109_v53  ;;  %v4192_v53 = vrot.slane %v10415_v28, 1  ;;  %v4191_v18 = vsel %vm618_vm0, %v4189_v52, %v4190_v31 }
 0x1e0   : > { %7537 = vmatmul.mubr.f32.gmra.mrb[54].mxu0 %v11486_v45  ;;  %6979 = vmatprep.mubr.f32.mxu1 %v10228_v62  ;;  %v10620_v62 = vsel %vm618_vm0, %v2765_v41, %v2767_v29  ;;  %v11488_v41 = vld [vmem:[#allocation84_spill] sm:$0xff]  ;;  %v11490_v29 = vld [vmem:[#allocation106_spill] sm:$0xff] }
 0x1e1   : > { %7539 = vmatprep.mubr.f32.mxu0 %v10598_v2  ;;  %v10625_v2 = vld [vmem:[%s10045_s16 + $0x48] sm:$0x3]  ;;  %v4195_v54 = vsel %vm618_vm0, %v4192_v53, %v4194_v19  ;;  %s5664_s16 = sshll.u32 %s8742_s26, 7 }
 0x1e3   : > { %6980 = vmatmul.mubr.f32.gmra.mrb[24].mxu1 %v10123_v47  ;;  %v4193_v47 = vsel %vm618_vm0, %v4190_v31, %v4192_v53  ;;  %v11500_v31 = vld [vmem:[#allocation73_spill] sm:$0xff]  ;;  %v8591_v53 = vld [vmem:[%s8786_s14 + $0x208] sm:$0xff] }
 0x1e4   : > { %7540 = vmatmul.mubr.f32.gmra.mrb[56].mxu0 %v10606_v8  ;;  %6982 = vmatprep.mubr.f32.mxu1 %v10235_v36  ;;  %v4196_v36 = vrot.slane %v10625_v2, 1 }
 0x1e5   : > { %7542 = vmatprep.mubr.f32.mxu0 %v10612_v60 }
 0x1e6   : > { %v4197_v52 = vsel %vm618_vm0, %v4194_v19, %v4196_v36  ;;  %v11501_v19 = vld [vmem:[#allocation75_spill] sm:$0xff]  ;;  %v8593_v36 = vld [vmem:[%s8786_s14 + $0x218] sm:$0xff] }
 0x1e7   : > { %6983 = vmatmul.mubr.f32.gmra.mrb[26].mxu1 %v10240_v40  ;;  %v11487_v40 = vld [vmem:[#allocation145_spill] sm:$0xff] }
 0x1e8   : > { %7543 = vmatmul.mubr.f32.gmra.mrb[58].mxu0 %v10620_v62  ;;  %6985 = vmatprep.mubr.f32.mxu1 %v10245_v3  ;;  %v11489_v3 = vld [vmem:[#allocation103_spill] sm:$0xff] }
 0x1e9   : > { %7545 = vmatprep.mubr.f32.mxu0 %v4191_v18  ;;  %v8592_v18 = vld [vmem:[%s8786_s14 + $0x210] sm:$0xff] }
 0x1eb   : > { %6986 = vmatmul.mubr.f32.gmra.mrb[28].mxu1 %v10250_v0  ;;  %v11491_v0 = vld [vmem:[#allocation85_spill] sm:$0xff] }
 0x1ec   : > { %7546 = vmatmul.mubr.f32.gmra.mrb[60].mxu0 %v4193_v47  ;;  %6988 = vmatprep.mubr.f32.mxu1 %v10255_v11  ;;  %v11492_v11 = vld [vmem:[#allocation89_spill] sm:$0xff] }
 0x1ed   : > { %7548 = vmatprep.mubr.f32.mxu0 %v4195_v54  ;;  %v11502_v47 = vld [vmem:[#allocation77_spill] sm:$0xff]  ;;  %v11503_v54 = vld [vmem:[#allocation79_spill] sm:$0xff] }
 0x1ef   : > { %6989 = vmatmul.mubr.f32.gmra.mrb[30].mxu1 %v11487_v40  ;;  %v11504_v40 = vld [vmem:[#allocation81_spill] sm:$0xff] }
 0x1f0   : > { %7549 = vmatmul.mubr.f32.gmra.mrb[62].mxu0 %v4197_v52  ;;  %6991 = vmatprep.mubr.f32.mxu1 %v11488_v41  ;;  %v8594_v52 = vld [vmem:[%s8786_s14 + $0x220] sm:$0xff]  ;;  %v8595_v41 = vld [vmem:[%s8786_s14 + $0x230] sm:$0xff] }
 0x1f1   : > { %7583 = vmatprep.mubr.f32.mxu0 %v11361_v38  ;;  %v8585_v38 = vld [vmem:[%s8786_s14 + $0x1c8] sm:$0xff] }
 0x1f3   : > { %6992 = vmatmul.mubr.f32.gmra.mrb[32].mxu1 %v11489_v3  ;;  %v11505_v3 = vld [vmem:[#allocation83_spill] sm:$0xff] }
 0x1f4   : > { %7584 = vmatmul.mubr.f32.vlgmr.msra.gmra.mrb[0].mxu0 %v11362_v26  ;;  %6994 = vmatprep.mubr.f32.mxu1 %v11490_v29  ;;  %v8586_v26 = vld [vmem:[%s8786_s14 + $0x1d0] sm:$0xff]  ;;  %v8596_v29 = vld [vmem:[%s8786_s14 + $0x238] sm:$0xff] }
 0x1f5   : > { %7586 = vmatprep.mubr.f32.mxu0 %v11363_v12  ;;  %v11496_v12 = vld [vmem:[#allocation65_spill] sm:$0xff] }
 0x1f7   : > { %6995 = vmatmul.mubr.f32.gmra.mrb[34].mxu1 %v10291_v37  ;;  %v11494_v37 = vld [vmem:[#allocation61_spill] sm:$0xff] }
 0x1f8   : > { %7587 = vmatmul.mubr.f32.gmra.mrb[2].mxu0 %v11364_v34  ;;  %6997 = vmatprep.mubr.f32.mxu1 %v10297_v7  ;;  %v11493_v7 = vld [vmem:[#allocation107_spill] sm:$0xff]  ;;  %v8587_v34 = vld [vmem:[%s8786_s14 + $0x1e0] sm:$0xff] }
 0x1f9   : > { %7589 = vmatprep.mubr.f32.mxu0 %v11365_v56  ;;  %v8588_v56 = vld [vmem:[%s8786_s14 + $0x1e8] sm:$0xff] }
 0x1fb   : > { %6998 = vmatmul.mubr.f32.gmra.mrb[36].mxu1 %v11491_v0  ;;  %v11506_v0 = vld [vmem:[#allocation87_spill] sm:$0xff] }
 0x1fc   : > { %7590 = vmatmul.mubr.f32.gmra.mrb[4].mxu0 %v11366_v32  ;;  %7000 = vmatprep.mubr.f32.mxu1 %v10314_v55  ;;  %v11495_v55 = vld [vmem:[#allocation63_spill] sm:$0xff]  ;;  %v11498_v32 = vld [vmem:[#allocation69_spill] sm:$0xff] }
 0x1fd   : > { %7592 = vmatprep.mubr.f32.mxu0 %v11367_v10  ;;  %v8589_v10 = vld [vmem:[%s8786_s14 + $0x1f0] sm:$0xff] }
 0x1ff   : > { %7001 = vmatmul.mubr.f32.gmra.mrb[38].mxu1 %v11492_v11  ;;  %v8597_v11 = vld [vmem:[%s8786_s14 + $0x240] sm:$0xff] }
 0x200   : > { %7593 = vmatmul.mubr.f32.gmra.mrb[6].mxu0 %v11368_v22  ;;  %7003 = vmatprep.mubr.f32.mxu1 %v10329_v27  ;;  %v11497_v27 = vld [vmem:[#allocation67_spill] sm:$0xff] }
 0x201   : > { %7595 = vmatprep.mubr.f32.mxu0 %v11369_v24  ;;  %v11499_v22 = vld [vmem:[#allocation71_spill] sm:$0xff]  ;;  %v8590_v24 = vld [vmem:[%s8786_s14 + $0x1f8] sm:$0xff] }
 0x203   : > { %7004 = vmatmul.mubr.f32.gmra.mrb[40].mxu1 %v11493_v7  ;;  %v11507_v7 = vld [vmem:[#allocation90_spill] sm:$0xff] }
 0x204   : > { %7596 = vmatmul.mubr.f32.gmra.mrb[8].mxu0 %v11494_v37  ;;  %7006 = vmatprep.mubr.f32.mxu1 %v8585_v38  ;;  %v8598_v37 = vld [vmem:[%s8786_s14 + $0x248] sm:$0xff]  ;;  %v11508_v38 = vld [vmem:[#allocation93_spill] sm:$0xff] }
 0x205   : > { %7598 = vmatprep.mubr.f32.mxu0 %v11495_v55  ;;  %v8599_v55 = vld [vmem:[%s8786_s14 + $0x258] sm:$0xff] }
 0x207   : > { %7007 = vmatmul.mubr.f32.gmra.mrb[42].mxu1 %v8586_v26  ;;  %v11509_v26 = vld [vmem:[#allocation95_spill] sm:$0xff] }
 0x208   : > { %7599 = vmatmul.mubr.f32.gmra.mrb[10].mxu0 %v11496_v12  ;;  %7009 = vmatprep.mubr.f32.mxu1 %v8587_v34  ;;  %v8600_v12 = vld [vmem:[%s8786_s14 + $0x260] sm:$0xff]  ;;  %v11510_v34 = vld [vmem:[#allocation97_spill] sm:$0xff] }
 0x209   : > { %7601 = vmatprep.mubr.f32.mxu0 %v11497_v27  ;;  %v8601_v27 = vld [vmem:[%s8786_s14 + $0x268] sm:$0xff] }
 0x20b   : > { %7010 = vmatmul.mubr.f32.gmra.mrb[44].mxu1 %v8588_v56  ;;  %v11511_v56 = vld [vmem:[#allocation99_spill] sm:$0xff] }
 0x20c   : > { %7602 = vmatmul.mubr.f32.gmra.mrb[12].mxu0 %v11498_v32  ;;  %7012 = vmatprep.mubr.f32.mxu1 %v8589_v10  ;;  %v8602_v32 = vld [vmem:[%s8786_s14 + $0x270] sm:$0xff]  ;;  %v11512_v10 = vld [vmem:[#allocation101_spill] sm:$0xff]  ;;  %s5663_s14 = sshll.u32 %s11562_s6, 2  ;;  %s5666_s6 = sshll.u32 %s8629_s19, 1 }
 0x20d   : > { %7604 = vmatprep.mubr.f32.mxu0 %v11499_v22  ;;  %v11513_v22 = vld [vmem:[#allocation102_spill] sm:$0xff]  ;;  %s408_s29 = sadd.s32 %s5664_s16, %s5663_s14  ;;  %s413_s26 = sadd.s32 %s8625_s18, %s5666_s6 }
 0x20e   : > { %s5665_s30 = sshll.u32 %s408_s29, 3  ;;  %p414_p9 = scmp.lt.s32.totalorder %s413_s26, 3 }
 0x20f   : > { %7013 = vmatmul.mubr.f32.gmra.mrb[46].mxu1 %v8590_v24  ;;  %v11514_v24 = vld [vmem:[#allocation104_spill] sm:$0xff]  ;;  %s10828_s9 = scalar_lea.vmem %s10946_s3, %s5665_s30 }
 0x210   : > { %7605 = vmatmul.mubr.f32.gmra.mrb[14].mxu0 %v11500_v31  ;;  %7015 = vmatprep.mubr.f32.mxu1 %v8591_v53  ;;  %v11515_v31 = vld [vmem:[#allocation105_spill] sm:$0xff]  ;;  %v11516_v53 = vld [vmem:[#allocation108_spill] sm:$0xff]  ;;  %s11564_s26 = smov (!%p414_p9, %s413_s26), 3 }
 0x211   : > { %7607 = vmatprep.mubr.f32.mxu0 %v11501_v19  ;;  %v11517_v19 = vld [vmem:[#allocation109_spill] sm:$0xff]  ;;  %s419_s13 = scalar_lea.vmem %s10947_s4, %s11564_s26  ;;  %s429_s11 = scalar_lea.vmem %s10948_s5, %s11564_s26 }
 0x213   : > { %7016 = vmatmul.mubr.f32.gmra.mrb[48].mxu1 %v8592_v18  ;;  %v4669_v18 = vrot.slane %v10412_v43, 2 }
 0x214   : > { %7608 = vmatmul.mubr.f32.gmra.mrb[16].mxu0 %v11502_v47  ;;  %7018 = vmatprep.mubr.f32.mxu1 %v8593_v36  ;;  %v11543_v47 = vld [vmem:[#allocation96_spill] sm:$0xff]  ;;  %v11545_v36 = vld [vmem:[#allocation98_spill] sm:$0xff] }
 0x215   : > { %7610 = vmatprep.mubr.f32.mxu0 %v11503_v54  ;;  %v11546_v54 = vld [vmem:[#allocation143_spill] sm:$0xff] }
 0x217   : > { %7019 = vmatmul.mubr.f32.gmra.mrb[50].mxu1 %v8594_v52  ;;  %v4673_v52 = vrot.slane %v10422_v61, 2 }
 0x218   : > { %7611 = vmatmul.mubr.f32.gmra.mrb[18].mxu0 %v11504_v40  ;;  %7021 = vmatprep.mubr.f32.mxu1 %v8595_v41  ;;  %v11547_v41 = vld [vmem:[#allocation144_spill] sm:$0xff] }
 0x219   : > { %7613 = vmatprep.mubr.f32.mxu0 %v11505_v3  ;;  %v4675_v3 = vrot.slane %v10625_v2, 2 }
 0x21b   : > { %7022 = vmatmul.mubr.f32.gmra.mrb[52].mxu1 %v8596_v29  ;;  %v4676_v61 = vsel %vm1614_vm1, %v4673_v52, %v4675_v3 }
 0x21c   : > { %7614 = vmatmul.mubr.f32.gmra.mrb[20].mxu0 %v11506_v0  ;;  %7024 = vmatprep.mubr.f32.mxu1 %v8597_v11 }
 0x21d   : > { %7616 = vmatprep.mubr.f32.mxu0 %v11507_v7 }
 0x21f   : > { %7025 = vmatmul.mubr.f32.gmra.mrb[54].mxu1 %v8598_v37 }
 0x220   : > { %7617 = vmatmul.mubr.f32.gmra.mrb[22].mxu0 %v11508_v38  ;;  %7027 = vmatprep.mubr.f32.mxu1 %v8599_v55 }
 0x221   : > { %7619 = vmatprep.mubr.f32.mxu0 %v11509_v26 }
 0x223   : > { %7028 = vmatmul.mubr.f32.gmra.mrb[56].mxu1 %v8600_v12 }
 0x224   : > { %7620 = vmatmul.mubr.f32.gmra.mrb[24].mxu0 %v11510_v34  ;;  %7030 = vmatprep.mubr.f32.mxu1 %v8601_v27 }
 0x225   : > { %7622 = vmatprep.mubr.f32.mxu0 %v11511_v56 }
 0x227   : > { %7031 = vmatmul.mubr.f32.gmra.mrb[58].mxu1 %v8602_v32 }
 0x228   : > { %7623 = vmatmul.mubr.f32.gmra.mrb[26].mxu0 %v11512_v10  ;;  %7033 = vmatprep.mubr.f32.mxu1 %v11379_v20  ;;  %v11518_v20 = vld [vmem:[#allocation112_spill] sm:$0xff] }
 0x229   : > { %7625 = vmatprep.mubr.f32.mxu0 %v11513_v22 }
 0x22b   : > { %7034 = vmatmul.mubr.f32.gmra.mrb[60].mxu1 %v11381_v5  ;;  %v11519_v5 = vld [vmem:[#allocation113_spill] sm:$0xff] }
 0x22c   : > { %7626 = vmatmul.mubr.f32.gmra.mrb[28].mxu0 %v11514_v24  ;;  %7036 = vmatprep.mubr.f32.mxu1 %v10082_v57  ;;  %v11520_v57 = vld [vmem:[#allocation116_spill] sm:$0xff] }
 0x22d   : > { %7628 = vmatprep.mubr.f32.mxu0 %v11515_v31 }
 0x22f   : > { %7037 = vmatmul.mubr.f32.gmra.mrb[62].mxu1 %v10089_v17  ;;  %v11521_v17 = vld [vmem:[#allocation117_spill] sm:$0xff] }
 0x230   : > { %7629 = vmatmul.mubr.f32.gmra.mrb[30].mxu0 %v11516_v53  ;;  %7119 = vmatprep.mubr.f32.mxu1 %v11445_v1  ;;  %v11522_v1 = vld [vmem:[#allocation120_spill] sm:$0xff] }
 0x231   : > { %7631 = vmatprep.mubr.f32.mxu0 %v11517_v19 }
 0x233   : > { %7120 = vmatmul.mubr.f32.vlgmr.msra.gmra.mrb[32].mxu1 %v11447_v48  ;;  %v11523_v48 = vld [vmem:[#allocation121_spill] sm:$0xff] }
 0x234   : > { %7632 = vmatmul.mubr.f32.gmra.mrb[32].mxu0 %v11518_v20  ;;  %7122 = vmatprep.mubr.f32.mxu1 %v11449_v25  ;;  %v11524_v25 = vld [vmem:[#allocation122_spill] sm:$0xff] }
 0x235   : > { %7634 = vmatprep.mubr.f32.mxu0 %v11519_v5 }
 0x237   : > { %7123 = vmatmul.mubr.f32.gmra.mrb[34].mxu1 %v11450_v33  ;;  %v11530_v33 = vld [vmem:[#allocation129_spill] sm:$0xff] }
 0x238   : > { %7635 = vmatmul.mubr.f32.gmra.mrb[34].mxu0 %v11520_v57  ;;  %7125 = vmatprep.mubr.f32.mxu1 %v11452_v13  ;;  %v11525_v13 = vld [vmem:[#allocation123_spill] sm:$0xff] }
 0x239   : > { %7637 = vmatprep.mubr.f32.mxu0 %v11521_v17 }
 0x23b   : > { %7126 = vmatmul.mubr.f32.gmra.mrb[36].mxu1 %v11454_v35  ;;  %v11526_v35 = vld [vmem:[#allocation124_spill] sm:$0xff] }
 0x23c   : > { %7638 = vmatmul.mubr.f32.gmra.mrb[36].mxu0 %v11414_v15  ;;  %7128 = vmatprep.mubr.f32.mxu1 %v11456_v63  ;;  %v11527_v15 = vld [vmem:[#allocation125_spill] sm:$0xff]  ;;  %v11529_v63 = vld [vmem:[#allocation128_spill] sm:$0xff] }
 0x23d   : > { %7640 = vmatprep.mubr.f32.mxu0 %v11522_v1 }
 0x23f   : > { %7129 = vmatmul.mubr.f32.gmra.mrb[38].mxu1 %v11459_v42  ;;  %v11528_v42 = vld [vmem:[#allocation126_spill] sm:$0xff] }
 0x240   : > { %7641 = vmatmul.mubr.f32.gmra.mrb[38].mxu0 %v11523_v48  ;;  %7131 = vmatprep.mubr.f32.mxu1 %v11460_v6  ;;  %v11531_v6 = vld [vmem:[#allocation130_spill] sm:$0xff] }
 0x241   : > { %7643 = vmatprep.mubr.f32.mxu0 %v11524_v25 }
 0x243   : > { %7132 = vmatmul.mubr.f32.gmra.mrb[40].mxu1 %v11462_v21  ;;  %v11532_v21 = vld [vmem:[#allocation131_spill] sm:$0xff] }
 0x244   : > { %7644 = vmatmul.mubr.f32.gmra.mrb[40].mxu0 %v11525_v13  ;;  %7134 = vmatprep.mubr.f32.mxu1 %v11463_v51  ;;  %v11533_v51 = vld [vmem:[#allocation132_spill] sm:$0xff] }
 0x245   : > { %7646 = vmatprep.mubr.f32.mxu0 %v11526_v35 }
 0x247   : > { %7135 = vmatmul.mubr.f32.gmra.mrb[42].mxu1 %v11465_v4  ;;  %v11534_v4 = vld [vmem:[#allocation133_spill] sm:$0xff] }
 0x248   : > { %7647 = vmatmul.mubr.f32.gmra.mrb[42].mxu0 %v11527_v15  ;;  %7137 = vmatprep.mubr.f32.mxu1 %v11466_v16  ;;  %v11535_v16 = vld [vmem:[#allocation134_spill] sm:$0xff] }
 0x249   : > { %7649 = vmatprep.mubr.f32.mxu0 %v11528_v42 }
 0x24b   : > { %7138 = vmatmul.mubr.f32.gmra.mrb[44].mxu1 %v11468_v44  ;;  %v11536_v44 = vld [vmem:[#allocation135_spill] sm:$0xff] }
 0x24c   : > { %7650 = vmatmul.mubr.f32.gmra.mrb[44].mxu0 %v11529_v63  ;;  %7140 = vmatprep.mubr.f32.mxu1 %v11469_v9  ;;  %v11537_v9 = vld [vmem:[#allocation138_spill] sm:$0xff] }
 0x24d   : > { %7652 = vmatprep.mubr.f32.mxu0 %v11530_v33 }
 0x24f   : > { %7141 = vmatmul.mubr.f32.gmra.mrb[46].mxu1 %v11471_v39  ;;  %v11538_v39 = vld [vmem:[#allocation139_spill] sm:$0xff] }
 0x250   : > { %7653 = vmatmul.mubr.f32.gmra.mrb[46].mxu0 %v11531_v6  ;;  %7143 = vmatprep.mubr.f32.mxu1 %v11472_v59  ;;  %v11539_v59 = vld [vmem:[#allocation92_spill] sm:$0xff] }
 0x251   : > { %7655 = vmatprep.mubr.f32.mxu0 %v11532_v21 }
 0x253   : > { %7144 = vmatmul.mubr.f32.gmra.mrb[48].mxu1 %v11474_v58  ;;  %v11540_v58 = vld [vmem:[#allocation140_spill] sm:$0xff] }
 0x254   : > { %7656 = vmatmul.mubr.f32.gmra.mrb[48].mxu0 %v11533_v51  ;;  %7146 = vmatprep.mubr.f32.mxu1 %v11475_v14  ;;  %v11541_v14 = vld [vmem:[#allocation94_spill] sm:$0xff] }
 0x255   : > { %7658 = vmatprep.mubr.f32.mxu0 %v11534_v4 }
 0x257   : > { %7147 = vmatmul.mubr.f32.gmra.mrb[50].mxu1 %v11477_v49  ;;  %v11542_v49 = vld [vmem:[#allocation141_spill] sm:$0xff] }
 0x258   : > { %7659 = vmatmul.mubr.f32.gmra.mrb[50].mxu0 %v11535_v16  ;;  %7149 = vmatprep.mubr.f32.mxu1 %v11478_v50  ;;  %v4668_v50 = vrot.slane %v10405_v46, 2  ;;  %v11548_v46 = vld [vmem:[#allocation110_spill] sm:$0xff] }
 0x259   : > { %7661 = vmatprep.mubr.f32.mxu0 %v11536_v44 }
 0x25a   : > { %v4670_v40 = vsel %vm1614_vm1, %v4668_v50, %v4669_v18 }
 0x25b   : > { %7150 = vmatmul.mubr.f32.gmra.mrb[52].mxu1 %v11479_v30  ;;  %v11544_v30 = vld [vmem:[#allocation142_spill] sm:$0xff] }
 0x25c   : > { %7662 = vmatmul.mubr.f32.gmra.mrb[52].mxu0 %v11537_v9  ;;  %7152 = vmatprep.mubr.f32.mxu1 %v11480_v23  ;;  %v4671_v23 = vrot.slane %v10415_v28, 2 }
 0x25d   : > { %7664 = vmatprep.mubr.f32.mxu0 %v11538_v39 }
 0x25e   : > { %v4672_v43 = vsel %vm1614_vm1, %v4669_v18, %v4671_v23  ;;  %v4674_v29 = vsel %vm1614_vm1, %v4671_v23, %v4673_v52 }
 0x25f   : > { %7153 = vmatmul.mubr.f32.gmra.mrb[54].mxu1 %v11539_v59 }
 0x260   : > { %7665 = vmatmul.mubr.f32.gmra.mrb[54].mxu0 %v11540_v58  ;;  %7155 = vmatprep.mubr.f32.mxu1 %v11541_v14 }
 0x261   : > { %7667 = vmatprep.mubr.f32.mxu0 %v11542_v49 }
 0x263   : > { %7156 = vmatmul.mubr.f32.gmra.mrb[56].mxu1 %v11543_v47 }
 0x264   : > { %7668 = vmatmul.mubr.f32.gmra.mrb[56].mxu0 %v11544_v30  ;;  %7158 = vmatprep.mubr.f32.mxu1 %v11545_v36 }
 0x265   : > { %7670 = vmatprep.mubr.f32.mxu0 %v11546_v54 }
 0x267   : > { %7159 = vmatmul.mubr.f32.gmra.mrb[58].mxu1 %v11486_v45 }
 0x268   : > { %7671 = vmatmul.mubr.f32.gmra.mrb[58].mxu0 %v11547_v41  ;;  %7161 = vmatprep.mubr.f32.mxu1 %v11548_v46 }
 0x269   : > { %7673 = vmatprep.mubr.f32.mxu0 %v4670_v40 }
 0x26b   : > { %7162 = vmatmul.mubr.f32.gmra.mrb[60].mxu1 %v10606_v8 }
 0x26c   : > { %7674 = vmatmul.mubr.f32.gmra.mrb[60].mxu0 %v4672_v43  ;;  %7164 = vmatprep.mubr.f32.mxu1 %v10612_v60 }
 0x26d   : > { %7676 = vmatprep.mubr.f32.mxu0 %v4674_v29 }
 0x26f   : > { %7165 = vmatmul.mubr.f32.gmra.mrb[62].mxu1 %v10620_v62 }
 0x270   : > { %7677 = vmatmul.mubr.f32.gmra.mrb[62].mxu0 %v4676_v61 }
 0x286   : > { %v6945_v28 = vpop.f32.mrb[0].mxu1 }
 0x287   : > { %v2372_v45 = vpop.f32.mrb[1].mxu1 }
 0x28a   : > { %v6948_v0 = vpop.f32.mrb[2].mxu1 }
 0x28b   : > { %v2382_v11 = vpop.f32.mrb[3].mxu1 }
 0x28e   : > { %v6951_v7 = vpop.f32.mrb[4].mxu1 }
 0x28f   : > { %v2392_v37 = vpop.f32.mrb[5].mxu1 }
 0x292   : > { %v10770_v2 = vpop.f32.mrb[6].mxu1 }
 0x293   : > { %v10772_v38 = vpop.f32.mrb[7].mxu1 }
 0x296   : > { %v10774_v8 = vpop.f32.mrb[8].mxu1 }
 0x297   : > { %v10776_v55 = vpop.f32.mrb[9].mxu1 }
 0x29a   : > { %v10778_v60 = vpop.f32.mrb[10].mxu1 }
 0x29b   : > { %v10780_v26 = vpop.f32.mrb[11].mxu1 }
 0x29e   : > { %v10782_v62 = vpop.f32.mrb[12].mxu1 }
 0x29f   : > { %v10784_v12 = vpop.f32.mrb[13].mxu1 }
 0x2a2   : > { %v10786_v34 = vpop.f32.mrb[14].mxu1 }
 0x2a3   : > { %v10788_v27 = vpop.f32.mrb[15].mxu1 }
 0x2a6   : > { %v10790_v56 = vpop.f32.mrb[16].mxu1 }
 0x2a7   : > { %v10792_v32 = vpop.f32.mrb[17].mxu1 }
 0x2aa   : > { %v10794_v10 = vpop.f32.mrb[18].mxu1 }
 0x2ab   : > { %v10796_v22 = vpop.f32.mrb[19].mxu1 }
 0x2ae   : > { %v10798_v24 = vpop.f32.mrb[20].mxu1 }
 0x2af   : > { %v10800_v31 = vpop.f32.mrb[21].mxu1 }
 0x2b2   : > { %v10802_v53 = vpop.f32.mrb[22].mxu1 }
 0x2b3   : > { %v10804_v19 = vpop.f32.mrb[23].mxu1 }
 0x2b6   : > { %v10806_v20 = vpop.f32.mrb[24].mxu1 }
 0x2b7   : > { %v10809_v5 = vpop.f32.mrb[25].mxu1 }
 0x2ba   : > { %v10811_v57 = vpop.f32.mrb[26].mxu1 }
 0x2bb   : > { %v10814_v17 = vpop.f32.mrb[27].mxu1 }
 0x2be   : > { %v10816_v1 = vpop.f32.mrb[28].mxu1 }
 0x2bf   : > { %v10819_v48 = vpop.f32.mrb[29].mxu1 }
 0x2c2   : > { %v10821_v25 = vpop.f32.mrb[30].mxu1 }
 0x2c3   : > { %v10823_v13 = vpop.f32.mrb[31].mxu1 }
 0x2c7   : > { %v7585_v35 = vpop.f32.mrb[0].mxu0 }
 0x2c8   : > { %v7983_v15 = vadd.f32 %v7585_v35, %v6945_v28  ;;  %v4764_v42 = vpop.f32.mrb[1].mxu0 }
 0x2c9   : > { %v7984_v63 = vadd.f32 %v4764_v42, %v2372_v45 }
 0x2ca   : > { %5148 = vst [vmem:[%s10828_s9 + $0x8] sm:$0xff] %v7983_v15  ;;  %v5282_v33 = vmul.f32 %v7983_v15, %v7983_v15 }
 0x2cb   : > { %5147 = vst [vmem:[%s10828_s9] sm:$0xff] %v7984_v63  ;;  %v5211_v6 = vadd.f32 %v7984_v63, %v7983_v15  ;;  %v5281_v21 = vmul.f32 %v7984_v63, %v7984_v63  ;;  %v7588_v51 = vpop.f32.mrb[2].mxu0 }
 0x2cc   : > { %v7985_v4 = vadd.f32 %v7588_v51, %v6948_v0  ;;  %v4774_v16 = vpop.f32.mrb[3].mxu0 }
 0x2cd   : > { %v5345_v44 = vadd.f32 %v5282_v33, %v5281_v21  ;;  %v7986_v9 = vadd.f32 %v4774_v16, %v2382_v11 }
 0x2ce   : > { %5150 = vst [vmem:[%s10828_s9 + $0x18] sm:$0xff] %v7985_v4  ;;  %v5284_v50 = vmul.f32 %v7985_v4, %v7985_v4 }
 0x2cf   : > { %5149 = vst [vmem:[%s10828_s9 + $0x10] sm:$0xff] %v7986_v9  ;;  %v5212_v39 = vadd.f32 %v7986_v9, %v5211_v6  ;;  %v5283_v59 = vmul.f32 %v7986_v9, %v7986_v9  ;;  %v7591_v58 = vpop.f32.mrb[4].mxu0 }
 0x2d0   : > { %v7987_v14 = vadd.f32 %v7591_v58, %v6951_v7  ;;  %v4784_v49 = vpop.f32.mrb[5].mxu0 }
 0x2d1   : > { %v5346_v18 = vadd.f32 %v5345_v44, %v5283_v59  ;;  %v7988_v47 = vadd.f32 %v4784_v49, %v2392_v37  ;;  %v5213_v30 = vadd.f32 %v7985_v4, %v5212_v39 }
 0x2d2   : > { %5152 = vst [vmem:[%s10828_s9 + $0x28] sm:$0xff] %v7987_v14  ;;  %v5286_v46 = vmul.f32 %v7987_v14, %v7987_v14 }
 0x2d3   : > { %5151 = vst [vmem:[%s10828_s9 + $0x20] sm:$0xff] %v7988_v47  ;;  %v5214_v36 = vadd.f32 %v7988_v47, %v5213_v30  ;;  %v5285_v23 = vmul.f32 %v7988_v47, %v7988_v47  ;;  %v5347_v54 = vadd.f32 %v5346_v18, %v5284_v50  ;;  %v7594_v52 = vpop.f32.mrb[6].mxu0 }
 0x2d4   : > { %v7989_v40 = vadd.f32 %v7594_v52, %v10770_v2  ;;  %v4794_v41 = vpop.f32.mrb[7].mxu0 }
 0x2d5   : > { %v5348_v43 = vadd.f32 %v5347_v54, %v5285_v23  ;;  %v7990_v3 = vadd.f32 %v4794_v41, %v10772_v38  ;;  %v5215_v29 = vadd.f32 %v7987_v14, %v5214_v36 }
 0x2d6   : > { %5154 = vst [vmem:[%s10828_s9 + $0x38] sm:$0xff] %v7989_v40  ;;  %v5288_v37 = vmul.f32 %v7989_v40, %v7989_v40 }
 0x2d7   : > { %5153 = vst [vmem:[%s10828_s9 + $0x30] sm:$0xff] %v7990_v3  ;;  %v5216_v61 = vadd.f32 %v7990_v3, %v5215_v29  ;;  %v5287_v28 = vmul.f32 %v7990_v3, %v7990_v3  ;;  %v5349_v45 = vadd.f32 %v5348_v43, %v5286_v46  ;;  %v7597_v0 = vpop.f32.mrb[8].mxu0 }
 0x2d8   : > { %v7991_v11 = vadd.f32 %v7597_v0, %v10774_v8  ;;  %v4804_v7 = vpop.f32.mrb[9].mxu0 }
 0x2d9   : > { %v5350_v2 = vadd.f32 %v5349_v45, %v5287_v28  ;;  %v7992_v35 = vadd.f32 %v4804_v7, %v10776_v55  ;;  %v5217_v15 = vadd.f32 %v7989_v40, %v5216_v61 }
 0x2da   : > { %5156 = vst [vmem:[%s10828_s9 + $0x48] sm:$0xff] %v7991_v11  ;;  %v5290_v51 = vmul.f32 %v7991_v11, %v7991_v11 }
 0x2db   : > { %5155 = vst [vmem:[%s10828_s9 + $0x40] sm:$0xff] %v7992_v35  ;;  %v5218_v38 = vadd.f32 %v7992_v35, %v5217_v15  ;;  %v5289_v42 = vmul.f32 %v7992_v35, %v7992_v35  ;;  %v5351_v63 = vadd.f32 %v5350_v2, %v5288_v37  ;;  %v7600_v33 = vpop.f32.mrb[10].mxu0 }
 0x2dc   : > { %v7993_v6 = vadd.f32 %v7600_v33, %v10778_v60  ;;  %v4814_v21 = vpop.f32.mrb[11].mxu0 }
 0x2dd   : > { %v5352_v8 = vadd.f32 %v5351_v63, %v5289_v42  ;;  %v7994_v4 = vadd.f32 %v4814_v21, %v10780_v26  ;;  %v5219_v16 = vadd.f32 %v7991_v11, %v5218_v38 }
 0x2de   : > { %5158 = vst [vmem:[%s10828_s9 + $0x58] sm:$0xff] %v7993_v6  ;;  %v5292_v14 = vmul.f32 %v7993_v6, %v7993_v6 }
 0x2df   : > { %5157 = vst [vmem:[%s10828_s9 + $0x50] sm:$0xff] %v7994_v4  ;;  %v5220_v55 = vadd.f32 %v7994_v4, %v5219_v16  ;;  %v5291_v44 = vmul.f32 %v7994_v4, %v7994_v4  ;;  %v5353_v9 = vadd.f32 %v5352_v8, %v5290_v51  ;;  %v7603_v39 = vpop.f32.mrb[12].mxu0 }
 0x2e0   : > { %v7995_v59 = vadd.f32 %v7603_v39, %v10782_v62  ;;  %v4824_v58 = vpop.f32.mrb[13].mxu0 }
 0x2e1   : > { %v5354_v60 = vadd.f32 %v5353_v9, %v5291_v44  ;;  %v7996_v49 = vadd.f32 %v4824_v58, %v10784_v12  ;;  %v5221_v50 = vadd.f32 %v7993_v6, %v5220_v55 }
 0x2e2   : > { %5160 = vst [vmem:[%s10828_s9 + $0x68] sm:$0xff] %v7995_v59  ;;  %v5294_v54 = vmul.f32 %v7995_v59, %v7995_v59 }
 0x2e3   : > { %5159 = vst [vmem:[%s10828_s9 + $0x60] sm:$0xff] %v7996_v49  ;;  %v5222_v26 = vadd.f32 %v7996_v49, %v5221_v50  ;;  %v5293_v18 = vmul.f32 %v7996_v49, %v7996_v49  ;;  %v5355_v47 = vadd.f32 %v5354_v60, %v5292_v14  ;;  %v7606_v30 = vpop.f32.mrb[14].mxu0 }
 0x2e4   : > { %v7997_v36 = vadd.f32 %v7606_v30, %v10786_v34  ;;  %v4834_v23 = vpop.f32.mrb[15].mxu0 }
 0x2e5   : > { %v5356_v62 = vadd.f32 %v5355_v47, %v5293_v18  ;;  %v7998_v52 = vadd.f32 %v4834_v23, %v10788_v27  ;;  %v5223_v40 = vadd.f32 %v7995_v59, %v5222_v26 }
 0x2e6   : > { %5162 = vst [vmem:[%s10828_s9 + $0x78] sm:$0xff] %v7997_v36  ;;  %v5296_v61 = vmul.f32 %v7997_v36, %v7997_v36 }
 0x2e7   : > { %5161 = vst [vmem:[%s10828_s9 + $0x70] sm:$0xff] %v7998_v52  ;;  %v5224_v12 = vadd.f32 %v7998_v52, %v5223_v40  ;;  %v5295_v41 = vmul.f32 %v7998_v52, %v7998_v52  ;;  %v5357_v46 = vadd.f32 %v5356_v62, %v5294_v54  ;;  %v7609_v43 = vpop.f32.mrb[16].mxu0 }
 0x2e8   : > { %v7999_v3 = vadd.f32 %v7609_v43, %v10790_v56  ;;  %v4844_v29 = vpop.f32.mrb[17].mxu0 }
 0x2e9   : > { %v5358_v34 = vadd.f32 %v5357_v46, %v5295_v41  ;;  %v8000_v28 = vadd.f32 %v4844_v29, %v10792_v32  ;;  %v5225_v45 = vadd.f32 %v7997_v36, %v5224_v12 }
 0x2ea   : > { %5164 = vst [vmem:[%s10828_s9 + $0x88] sm:$0xff] %v7999_v3  ;;  %v5298_v35 = vmul.f32 %v7999_v3, %v7999_v3 }
 0x2eb   : > { %5163 = vst [vmem:[%s10828_s9 + $0x80] sm:$0xff] %v8000_v28  ;;  %v5226_v27 = vadd.f32 %v8000_v28, %v5225_v45  ;;  %v5297_v0 = vmul.f32 %v8000_v28, %v8000_v28  ;;  %v5359_v11 = vadd.f32 %v5358_v34, %v5296_v61  ;;  %v7612_v7 = vpop.f32.mrb[18].mxu0 }
 0x2ec   : > { %v8001_v37 = vadd.f32 %v7612_v7, %v10794_v10  ;;  %v4854_v2 = vpop.f32.mrb[19].mxu0 }
 0x2ed   : > { %v5360_v56 = vadd.f32 %v5359_v11, %v5297_v0  ;;  %v8002_v15 = vadd.f32 %v4854_v2, %v10796_v22  ;;  %v5227_v38 = vadd.f32 %v7999_v3, %v5226_v27 }
 0x2ee   : > { %5166 = vst [vmem:[%s10828_s9 + $0x98] sm:$0xff] %v8001_v37  ;;  %v5300_v51 = vmul.f32 %v8001_v37, %v8001_v37 }
 0x2ef   : > { %5165 = vst [vmem:[%s10828_s9 + $0x90] sm:$0xff] %v8002_v15  ;;  %v5228_v32 = vadd.f32 %v8002_v15, %v5227_v38  ;;  %v5299_v42 = vmul.f32 %v8002_v15, %v8002_v15  ;;  %v5361_v63 = vadd.f32 %v5360_v56, %v5298_v35  ;;  %v7615_v33 = vpop.f32.mrb[20].mxu0 }
 0x2f0   : > { %v8003_v6 = vadd.f32 %v7615_v33, %v10798_v24  ;;  %v4864_v21 = vpop.f32.mrb[21].mxu0 }
 0x2f1   : > { %v5362_v10 = vadd.f32 %v5361_v63, %v5299_v42  ;;  %v8004_v8 = vadd.f32 %v4864_v21, %v10800_v31  ;;  %v5229_v4 = vadd.f32 %v8001_v37, %v5228_v32 }
 0x2f2   : > { %5168 = vst [vmem:[%s10828_s9 + $0xa8] sm:$0xff] %v8003_v6  ;;  %v5302_v59 = vmul.f32 %v8003_v6, %v8003_v6 }
 0x2f3   : > { %5167 = vst [vmem:[%s10828_s9 + $0xa0] sm:$0xff] %v8004_v8  ;;  %v5230_v22 = vadd.f32 %v8004_v8, %v5229_v4  ;;  %v5301_v16 = vmul.f32 %v8004_v8, %v8004_v8  ;;  %v5363_v55 = vadd.f32 %v5362_v10, %v5300_v51  ;;  %v7618_v44 = vpop.f32.mrb[22].mxu0 }
 0x2f4   : > { %v8005_v9 = vadd.f32 %v7618_v44, %v10802_v53  ;;  %v4874_v39 = vpop.f32.mrb[23].mxu0 }
 0x2f5   : > { %v5364_v24 = vadd.f32 %v5363_v55, %v5301_v16  ;;  %v8006_v58 = vadd.f32 %v4874_v39, %v10804_v19  ;;  %v5231_v14 = vadd.f32 %v8003_v6, %v5230_v22 }
 0x2f6   : > { %5170 = vst [vmem:[%s10828_s9 + $0xb8] sm:$0xff] %v8005_v9  ;;  %v5304_v47 = vmul.f32 %v8005_v9, %v8005_v9 }
 0x2f7   : > { %5169 = vst [vmem:[%s10828_s9 + $0xb0] sm:$0xff] %v8006_v58  ;;  %v5232_v31 = vadd.f32 %v8006_v58, %v5231_v14  ;;  %v5303_v60 = vmul.f32 %v8006_v58, %v8006_v58  ;;  %v5365_v49 = vadd.f32 %v5364_v24, %v5302_v59  ;;  %v7621_v50 = vpop.f32.mrb[24].mxu0 }
 0x2f8   : > { %v8007_v26 = vadd.f32 %v7621_v50, %v10806_v20  ;;  %v4884_v18 = vpop.f32.mrb[25].mxu0 }
 0x2f9   : > { %v5366_v53 = vadd.f32 %v5365_v49, %v5303_v60  ;;  %v8008_v30 = vadd.f32 %v4884_v18, %v10809_v5  ;;  %v5233_v36 = vadd.f32 %v8005_v9, %v5232_v31 }
 0x2fa   : > { %5172 = vst [vmem:[%s10828_s9 + $0xc8] sm:$0xff] %v8007_v26  ;;  %v5306_v12 = vmul.f32 %v8007_v26, %v8007_v26 }
 0x2fb   : > { %5171 = vst [vmem:[%s10828_s9 + $0xc0] sm:$0xff] %v8008_v30  ;;  %v5234_v19 = vadd.f32 %v8008_v30, %v5233_v36  ;;  %v5305_v23 = vmul.f32 %v8008_v30, %v8008_v30  ;;  %v5367_v54 = vadd.f32 %v5366_v53, %v5304_v47  ;;  %v7624_v62 = vpop.f32.mrb[26].mxu0 }
 0x2fc   : > { %v8009_v52 = vadd.f32 %v7624_v62, %v10811_v57  ;;  %v4894_v40 = vpop.f32.mrb[27].mxu0 }
 0x2fd   : > { %v5368_v20 = vadd.f32 %v5367_v54, %v5305_v23  ;;  %v8010_v41 = vadd.f32 %v4894_v40, %v10814_v17  ;;  %v5235_v46 = vadd.f32 %v8007_v26, %v5234_v19 }
 0x2fe   : > { %5174 = vst [vmem:[%s10828_s9 + $0xd8] sm:$0xff] %v8009_v52  ;;  %v5308_v28 = vmul.f32 %v8009_v52, %v8009_v52 }
 0x2ff   : > { %5173 = vst [vmem:[%s10828_s9 + $0xd0] sm:$0xff] %v8010_v41  ;;  %v5236_v5 = vadd.f32 %v8010_v41, %v5235_v46  ;;  %v5307_v43 = vmul.f32 %v8010_v41, %v8010_v41  ;;  %v5369_v3 = vadd.f32 %v5368_v20, %v5306_v12  ;;  %v7627_v29 = vpop.f32.mrb[28].mxu0 }
 0x300   : > { %v8011_v61 = vadd.f32 %v7627_v29, %v10816_v1  ;;  %v4904_v34 = vpop.f32.mrb[29].mxu0 }
 0x301   : > { %v5370_v57 = vadd.f32 %v5369_v3, %v5307_v43  ;;  %v8012_v45 = vadd.f32 %v4904_v34, %v10819_v48  ;;  %v5237_v27 = vadd.f32 %v8009_v52, %v5236_v5 }
 0x302   : > { %5176 = vst [vmem:[%s10828_s9 + $0xe8] sm:$0xff] %v8011_v61  ;;  %v5310_v35 = vmul.f32 %v8011_v61, %v8011_v61 }
 0x303   : > { %5175 = vst [vmem:[%s10828_s9 + $0xe0] sm:$0xff] %v8012_v45  ;;  %v5238_v17 = vadd.f32 %v8012_v45, %v5237_v27  ;;  %v5309_v0 = vmul.f32 %v8012_v45, %v8012_v45  ;;  %v5371_v11 = vadd.f32 %v5370_v57, %v5308_v28  ;;  %v7630_v7 = vpop.f32.mrb[30].mxu0 }
 0x304   : > { %v8013_v37 = vadd.f32 %v7630_v7, %v10821_v25  ;;  %v4914_v2 = vpop.f32.mrb[31].mxu0 }
 0x305   : > { %v5372_v56 = vadd.f32 %v5371_v11, %v5309_v0  ;;  %v8014_v1 = vadd.f32 %v4914_v2, %v10823_v13  ;;  %v5239_v15 = vadd.f32 %v8011_v61, %v5238_v17 }
 0x306   : > { %5178 = vst [vmem:[%s10828_s9 + $0xf8] sm:$0xff] %v8013_v37  ;;  %v7121_v48 = vpop.f32.mrb[32].mxu1  ;;  %v5312_v51 = vmul.f32 %v8013_v37, %v8013_v37 }
 0x307   : > { %5177 = vst [vmem:[%s10828_s9 + $0xf0] sm:$0xff] %v8014_v1  ;;  %v5240_v38 = vadd.f32 %v8014_v1, %v5239_v15  ;;  %v5311_v32 = vmul.f32 %v8014_v1, %v8014_v1  ;;  %v5373_v42 = vadd.f32 %v5372_v56, %v5310_v35  ;;  %v7633_v63 = vpop.f32.mrb[32].mxu0  ;;  %v3016_v33 = vpop.f32.mrb[33].mxu1 }
 0x308   : > { %v8015_v6 = vadd.f32 %v7633_v63, %v7121_v48  ;;  %v4924_v21 = vpop.f32.mrb[33].mxu0 }
 0x309   : > { %v5374_v25 = vadd.f32 %v5373_v42, %v5311_v32  ;;  %v8016_v10 = vadd.f32 %v4924_v21, %v3016_v33  ;;  %v5241_v8 = vadd.f32 %v8013_v37, %v5240_v38 }
 0x30a   : > { %5180 = vst [vmem:[%s10828_s9 + $0x108] sm:$0xff] %v8015_v6  ;;  %v7124_v13 = vpop.f32.mrb[34].mxu1  ;;  %v5314_v59 = vmul.f32 %v8015_v6, %v8015_v6 }
 0x30b   : > { %5179 = vst [vmem:[%s10828_s9 + $0x100] sm:$0xff] %v8016_v10  ;;  %v5242_v4 = vadd.f32 %v8016_v10, %v5241_v8  ;;  %v5313_v22 = vmul.f32 %v8016_v10, %v8016_v10  ;;  %v5375_v16 = vadd.f32 %v5374_v25, %v5312_v51  ;;  %v7636_v55 = vpop.f32.mrb[34].mxu0  ;;  %v3026_v44 = vpop.f32.mrb[35].mxu1 }
 0x30c   : > { %v8017_v9 = vadd.f32 %v7636_v55, %v7124_v13  ;;  %v4934_v39 = vpop.f32.mrb[35].mxu0 }
 0x30d   : > { %v5376_v24 = vadd.f32 %v5375_v16, %v5313_v22  ;;  %v8018_v58 = vadd.f32 %v4934_v39, %v3026_v44  ;;  %v5243_v14 = vadd.f32 %v8015_v6, %v5242_v4 }
 0x30e   : > { %5182 = vst [vmem:[%s10828_s9 + $0x118] sm:$0xff] %v8017_v9  ;;  %v7127_v31 = vpop.f32.mrb[36].mxu1  ;;  %v5316_v30 = vmul.f32 %v8017_v9, %v8017_v9 }
 0x30f   : > { %5181 = vst [vmem:[%s10828_s9 + $0x110] sm:$0xff] %v8018_v58  ;;  %v5244_v60 = vadd.f32 %v8018_v58, %v5243_v14  ;;  %v5315_v49 = vmul.f32 %v8018_v58, %v8018_v58  ;;  %v5377_v50 = vadd.f32 %v5376_v24, %v5314_v59  ;;  %v7639_v26 = vpop.f32.mrb[36].mxu0  ;;  %v3036_v18 = vpop.f32.mrb[37].mxu1 }
 0x310   : > { %v8019_v47 = vadd.f32 %v7639_v26, %v7127_v31  ;;  %v4944_v53 = vpop.f32.mrb[37].mxu0 }
 0x311   : > { %v5378_v36 = vadd.f32 %v5377_v50, %v5315_v49  ;;  %v8020_v19 = vadd.f32 %v4944_v53, %v3036_v18  ;;  %v5245_v23 = vadd.f32 %v8017_v9, %v5244_v60 }
 0x312   : > { %5184 = vst [vmem:[%s10828_s9 + $0x128] sm:$0xff] %v8019_v47  ;;  %v7130_v54 = vpop.f32.mrb[38].mxu1  ;;  %v5318_v5 = vmul.f32 %v8019_v47, %v8019_v47 }
 0x313   : > { %5183 = vst [vmem:[%s10828_s9 + $0x120] sm:$0xff] %v8020_v19  ;;  %v5246_v62 = vadd.f32 %v8020_v19, %v5245_v23  ;;  %v5317_v52 = vmul.f32 %v8020_v19, %v8020_v19  ;;  %v5379_v40 = vadd.f32 %v5378_v36, %v5316_v30  ;;  %v7642_v12 = vpop.f32.mrb[38].mxu0  ;;  %v3046_v20 = vpop.f32.mrb[39].mxu1 }
 0x314   : > { %v8021_v41 = vadd.f32 %v7642_v12, %v7130_v54  ;;  %v4954_v46 = vpop.f32.mrb[39].mxu0 }
 0x315   : > { %v5380_v43 = vadd.f32 %v5379_v40, %v5317_v52  ;;  %v8022_v3 = vadd.f32 %v4954_v46, %v3046_v20  ;;  %v5247_v29 = vadd.f32 %v8019_v47, %v5246_v62 }
 0x316   : > { %5186 = vst [vmem:[%s10828_s9 + $0x138] sm:$0xff] %v8021_v41  ;;  %v7133_v61 = vpop.f32.mrb[40].mxu1  ;;  %v5320_v11 = vmul.f32 %v8021_v41, %v8021_v41 }
 0x317   : > { %5185 = vst [vmem:[%s10828_s9 + $0x130] sm:$0xff] %v8022_v3  ;;  %v5248_v34 = vadd.f32 %v8022_v3, %v5247_v29  ;;  %v5319_v28 = vmul.f32 %v8022_v3, %v8022_v3  ;;  %v5381_v57 = vadd.f32 %v5380_v43, %v5318_v5  ;;  %v7645_v45 = vpop.f32.mrb[40].mxu0  ;;  %v3056_v27 = vpop.f32.mrb[41].mxu1 }
 0x318   : > { %v8023_v17 = vadd.f32 %v7645_v45, %v7133_v61  ;;  %v4964_v0 = vpop.f32.mrb[41].mxu0 }
 0x319   : > { %v5382_v7 = vadd.f32 %v5381_v57, %v5319_v28  ;;  %v8024_v37 = vadd.f32 %v4964_v0, %v3056_v27  ;;  %v5249_v2 = vadd.f32 %v8021_v41, %v5248_v34 }
 0x31a   : > { %5188 = vst [vmem:[%s10828_s9 + $0x148] sm:$0xff] %v8023_v17  ;;  %v7136_v35 = vpop.f32.mrb[42].mxu1  ;;  %v5322_v63 = vmul.f32 %v8023_v17, %v8023_v17 }
 0x31b   : > { %5187 = vst [vmem:[%s10828_s9 + $0x140] sm:$0xff] %v8024_v37  ;;  %v5250_v56 = vadd.f32 %v8024_v37, %v5249_v2  ;;  %v5321_v1 = vmul.f32 %v8024_v37, %v8024_v37  ;;  %v5383_v15 = vadd.f32 %v5382_v7, %v5320_v11  ;;  %v7648_v48 = vpop.f32.mrb[42].mxu0  ;;  %v3066_v38 = vpop.f32.mrb[43].mxu1 }
 0x31c   : > { %v8025_v32 = vadd.f32 %v7648_v48, %v7136_v35  ;;  %v4974_v42 = vpop.f32.mrb[43].mxu0 }
 0x31d   : > { %v5384_v33 = vadd.f32 %v5383_v15, %v5321_v1  ;;  %v8026_v6 = vadd.f32 %v4974_v42, %v3066_v38  ;;  %v5251_v21 = vadd.f32 %v8023_v17, %v5250_v56 }
 0x31e   : > { %5190 = vst [vmem:[%s10828_s9 + $0x158] sm:$0xff] %v8025_v32  ;;  %v7139_v51 = vpop.f32.mrb[44].mxu1  ;;  %v5324_v55 = vmul.f32 %v8025_v32, %v8025_v32 }
 0x31f   : > { %5189 = vst [vmem:[%s10828_s9 + $0x150] sm:$0xff] %v8026_v6  ;;  %v5252_v25 = vadd.f32 %v8026_v6, %v5251_v21  ;;  %v5323_v10 = vmul.f32 %v8026_v6, %v8026_v6  ;;  %v5385_v8 = vadd.f32 %v5384_v33, %v5322_v63  ;;  %v7651_v13 = vpop.f32.mrb[44].mxu0  ;;  %v3076_v4 = vpop.f32.mrb[45].mxu1 }
 0x320   : > { %v8027_v22 = vadd.f32 %v7651_v13, %v7139_v51  ;;  %v4984_v16 = vpop.f32.mrb[45].mxu0 }
 0x321   : > { %v5386_v44 = vadd.f32 %v5385_v8, %v5323_v10  ;;  %v8028_v9 = vadd.f32 %v4984_v16, %v3076_v4  ;;  %v5253_v39 = vadd.f32 %v8025_v32, %v5252_v25 }
 0x322   : > { %5192 = vst [vmem:[%s10828_s9 + $0x168] sm:$0xff] %v8027_v22  ;;  %v7142_v59 = vpop.f32.mrb[46].mxu1  ;;  %v5326_v26 = vmul.f32 %v8027_v22, %v8027_v22 }
 0x323   : > { %5191 = vst [vmem:[%s10828_s9 + $0x160] sm:$0xff] %v8028_v9  ;;  %v5254_v24 = vadd.f32 %v8028_v9, %v5253_v39  ;;  %v5325_v58 = vmul.f32 %v8028_v9, %v8028_v9  ;;  %v5387_v14 = vadd.f32 %v5386_v44, %v5324_v55  ;;  %v7654_v31 = vpop.f32.mrb[46].mxu0  ;;  %v3086_v60 = vpop.f32.mrb[47].mxu1 }
 0x324   : > { %v8029_v49 = vadd.f32 %v7654_v31, %v7142_v59  ;;  %v4994_v50 = vpop.f32.mrb[47].mxu0 }
 0x325   : > { %v5388_v18 = vadd.f32 %v5387_v14, %v5325_v58  ;;  %v8030_v47 = vadd.f32 %v4994_v50, %v3086_v60  ;;  %v5255_v53 = vadd.f32 %v8027_v22, %v5254_v24 }
 0x326   : > { %5194 = vst [vmem:[%s10828_s9 + $0x178] sm:$0xff] %v8029_v49  ;;  %v7145_v30 = vpop.f32.mrb[48].mxu1  ;;  %v5328_v12 = vmul.f32 %v8029_v49, %v8029_v49 }
 0x327   : > { %5193 = vst [vmem:[%s10828_s9 + $0x170] sm:$0xff] %v8030_v47  ;;  %v5256_v36 = vadd.f32 %v8030_v47, %v5255_v53  ;;  %v5327_v19 = vmul.f32 %v8030_v47, %v8030_v47  ;;  %v5389_v23 = vadd.f32 %v5388_v18, %v5326_v26  ;;  %v7657_v54 = vpop.f32.mrb[48].mxu0  ;;  %v3096_v62 = vpop.f32.mrb[49].mxu1 }
 0x328   : > { %v8031_v52 = vadd.f32 %v7657_v54, %v7145_v30  ;;  %v5004_v40 = vpop.f32.mrb[49].mxu0 }
 0x329   : > { %v5390_v20 = vadd.f32 %v5389_v23, %v5327_v19  ;;  %v8032_v41 = vadd.f32 %v5004_v40, %v3096_v62  ;;  %v5257_v46 = vadd.f32 %v8029_v49, %v5256_v36 }
 0x32a   : > { %5196 = vst [vmem:[%s10828_s9 + $0x188] sm:$0xff] %v8031_v52  ;;  %v7148_v5 = vpop.f32.mrb[50].mxu1  ;;  %v5330_v45 = vmul.f32 %v8031_v52, %v8031_v52 }
 0x32b   : > { %5195 = vst [vmem:[%s10828_s9 + $0x180] sm:$0xff] %v8032_v41  ;;  %v5258_v43 = vadd.f32 %v8032_v41, %v5257_v46  ;;  %v5329_v3 = vmul.f32 %v8032_v41, %v8032_v41  ;;  %v5391_v29 = vadd.f32 %v5390_v20, %v5328_v12  ;;  %v7660_v61 = vpop.f32.mrb[50].mxu0  ;;  %v3106_v34 = vpop.f32.mrb[51].mxu1 }
 0x32c   : > { %v8033_v28 = vadd.f32 %v7660_v61, %v7148_v5  ;;  %v5014_v57 = vpop.f32.mrb[51].mxu0 }
 0x32d   : > { %v5392_v27 = vadd.f32 %v5391_v29, %v5329_v3  ;;  %v8034_v17 = vadd.f32 %v5014_v57, %v3106_v34  ;;  %v5259_v0 = vadd.f32 %v8031_v52, %v5258_v43 }
 0x32e   : > { %5198 = vst [vmem:[%s10828_s9 + $0x198] sm:$0xff] %v8033_v28  ;;  %v7151_v11 = vpop.f32.mrb[52].mxu1  ;;  %v5332_v48 = vmul.f32 %v8033_v28, %v8033_v28 }
 0x32f   : > { %5197 = vst [vmem:[%s10828_s9 + $0x190] sm:$0xff] %v8034_v17  ;;  %v5260_v7 = vadd.f32 %v8034_v17, %v5259_v0  ;;  %v5331_v37 = vmul.f32 %v8034_v17, %v8034_v17  ;;  %v5393_v2 = vadd.f32 %v5392_v27, %v5330_v45  ;;  %v7663_v35 = vpop.f32.mrb[52].mxu0  ;;  %v3116_v56 = vpop.f32.mrb[53].mxu1 }
 0x330   : > { %v8035_v1 = vadd.f32 %v7663_v35, %v7151_v11  ;;  %v5024_v15 = vpop.f32.mrb[53].mxu0 }
 0x331   : > { %v5394_v38 = vadd.f32 %v5393_v2, %v5331_v37  ;;  %v8036_v32 = vadd.f32 %v5024_v15, %v3116_v56  ;;  %v5261_v42 = vadd.f32 %v8033_v28, %v5260_v7 }
 0x332   : > { %5200 = vst [vmem:[%s10828_s9 + $0x1a8] sm:$0xff] %v8035_v1  ;;  %v7154_v63 = vpop.f32.mrb[54].mxu1  ;;  %v5334_v13 = vmul.f32 %v8035_v1, %v8035_v1 }
 0x333   : > { %5199 = vst [vmem:[%s10828_s9 + $0x1a0] sm:$0xff] %v8036_v32  ;;  %v5262_v33 = vadd.f32 %v8036_v32, %v5261_v42  ;;  %v5333_v6 = vmul.f32 %v8036_v32, %v8036_v32  ;;  %v5395_v21 = vadd.f32 %v5394_v38, %v5332_v48  ;;  %v7666_v51 = vpop.f32.mrb[54].mxu0  ;;  %v3126_v25 = vpop.f32.mrb[55].mxu1 }
 0x334   : > { %v8037_v10 = vadd.f32 %v7666_v51, %v7154_v63  ;;  %v5034_v8 = vpop.f32.mrb[55].mxu0 }
 0x335   : > { %v5396_v4 = vadd.f32 %v5395_v21, %v5333_v6  ;;  %v8038_v22 = vadd.f32 %v5034_v8, %v3126_v25  ;;  %v5263_v16 = vadd.f32 %v8035_v1, %v5262_v33 }
 0x336   : > { %5202 = vst [vmem:[%s10828_s9 + $0x1b8] sm:$0xff] %v8037_v10  ;;  %v7157_v55 = vpop.f32.mrb[56].mxu1  ;;  %v5336_v31 = vmul.f32 %v8037_v10, %v8037_v10 }
 0x337   : > { %5201 = vst [vmem:[%s10828_s9 + $0x1b0] sm:$0xff] %v8038_v22  ;;  %v5264_v44 = vadd.f32 %v8038_v22, %v5263_v16  ;;  %v5335_v9 = vmul.f32 %v8038_v22, %v8038_v22  ;;  %v5397_v39 = vadd.f32 %v5396_v4, %v5334_v13  ;;  %v7669_v59 = vpop.f32.mrb[56].mxu0  ;;  %v3136_v24 = vpop.f32.mrb[57].mxu1 }
 0x338   : > { %v8039_v58 = vadd.f32 %v7669_v59, %v7157_v55  ;;  %v5044_v14 = vpop.f32.mrb[57].mxu0 }
 0x339   : > { %v5398_v60 = vadd.f32 %v5397_v39, %v5335_v9  ;;  %v8040_v49 = vadd.f32 %v5044_v14, %v3136_v24  ;;  %v5265_v50 = vadd.f32 %v8037_v10, %v5264_v44 }
 0x33a   : > { %5204 = vst [vmem:[%s10828_s9 + $0x1c8] sm:$0xff] %v8039_v58  ;;  %v7160_v26 = vpop.f32.mrb[58].mxu1  ;;  %v5338_v54 = vmul.f32 %v8039_v58, %v8039_v58 }
 0x33b   : > { %5203 = vst [vmem:[%s10828_s9 + $0x1c0] sm:$0xff] %v8040_v49  ;;  %v5266_v18 = vadd.f32 %v8040_v49, %v5265_v50  ;;  %v5337_v47 = vmul.f32 %v8040_v49, %v8040_v49  ;;  %v5399_v53 = vadd.f32 %v5398_v60, %v5336_v31  ;;  %v7672_v30 = vpop.f32.mrb[58].mxu0  ;;  %v3146_v36 = vpop.f32.mrb[59].mxu1 }
 0x33c   : > { %v8041_v19 = vadd.f32 %v7672_v30, %v7160_v26  ;;  %v5054_v23 = vpop.f32.mrb[59].mxu0 }
 0x33d   : > { %v5400_v62 = vadd.f32 %v5399_v53, %v5337_v47  ;;  %v8042_v52 = vadd.f32 %v5054_v23, %v3146_v36  ;;  %v5267_v40 = vadd.f32 %v8039_v58, %v5266_v18 }
 0x33e   : > { %5206 = vst [vmem:[%s10828_s9 + $0x1d8] sm:$0xff] %v8041_v19  ;;  %v7163_v12 = vpop.f32.mrb[60].mxu1  ;;  %v5340_v61 = vmul.f32 %v8041_v19, %v8041_v19 }
 0x33f   : > { %5205 = vst [vmem:[%s10828_s9 + $0x1d0] sm:$0xff] %v8042_v52  ;;  %v5268_v20 = vadd.f32 %v8042_v52, %v5267_v40  ;;  %v5339_v41 = vmul.f32 %v8042_v52, %v8042_v52  ;;  %v5401_v46 = vadd.f32 %v5400_v62, %v5338_v54  ;;  %v7675_v5 = vpop.f32.mrb[60].mxu0  ;;  %v3156_v43 = vpop.f32.mrb[61].mxu1 }
 0x340   : > { %v8043_v3 = vadd.f32 %v7675_v5, %v7163_v12  ;;  %v5064_v29 = vpop.f32.mrb[61].mxu0 }
 0x341   : > { %v5402_v34 = vadd.f32 %v5401_v46, %v5339_v41  ;;  %v8044_v28 = vadd.f32 %v5064_v29, %v3156_v43  ;;  %v5269_v57 = vadd.f32 %v8041_v19, %v5268_v20 }
 0x342   : > { %5208 = vst [vmem:[%s10828_s9 + $0x1e8] sm:$0xff] %v8043_v3  ;;  %v7166_v45 = vpop.f32.mrb[62].mxu1  ;;  %v5342_v35 = vmul.f32 %v8043_v3, %v8043_v3 }
 0x343   : > { %5207 = vst [vmem:[%s10828_s9 + $0x1e0] sm:$0xff] %v8044_v28  ;;  %v5270_v27 = vadd.f32 %v8044_v28, %v5269_v57  ;;  %v5341_v17 = vmul.f32 %v8044_v28, %v8044_v28  ;;  %v5403_v0 = vadd.f32 %v5402_v34, %v5340_v61  ;;  %v7678_v11 = vpop.f32.mrb[62].mxu0  ;;  %v3166_v7 = vpop.f32.mrb[63].mxu1 }
 0x344   : > { %v8045_v37 = vadd.f32 %v7678_v11, %v7166_v45  ;;  %v5074_v2 = vpop.f32.mrb[63].mxu0 }
 0x345   : > { %v5404_v56 = vadd.f32 %v5403_v0, %v5341_v17  ;;  %v8046_v1 = vadd.f32 %v5074_v2, %v3166_v7  ;;  %v5271_v15 = vadd.f32 %v8043_v3, %v5270_v27 }
 0x346   : > { %5210 = vst [vmem:[%s10828_s9 + $0x1f8] sm:$0xff] %v8045_v37  ;;  %v5344_v42 = vmul.f32 %v8045_v37, %v8045_v37 }
 0x347   : > { %5209 = vst [vmem:[%s10828_s9 + $0x1f0] sm:$0xff] %v8046_v1  ;;  %v5272_v48 = vadd.f32 %v8046_v1, %v5271_v15  ;;  %v5343_v38 = vmul.f32 %v8046_v1, %v8046_v1  ;;  %v5405_v32 = vadd.f32 %v5404_v56, %v5342_v35 }
 0x349   : > { %v5273_v63 = vadd.f32 %v8045_v37, %v5272_v48  ;;  %v5406_v33 = vadd.f32 %v5405_v32, %v5343_v38 }
 0x34b   : > { %v5274_v6 = vrot.slane %v5273_v63, 4  ;;  %v5407_v21 = vadd.f32 %v5406_v33, %v5344_v42 }
 0x34d   : > { %v5275_v51 = vadd.f32 %v5274_v6, %v5273_v63  ;;  %v5408_v25 = vrot.slane %v5407_v21, 4 }
 0x34f   : > { %v5276_v10 = vrot.slane %v5275_v51, 2  ;;  %v5409_v8 = vadd.f32 %v5408_v25, %v5407_v21 }
 0x351   : > { %v5277_v13 = vadd.f32 %v5276_v10, %v5275_v51  ;;  %v5410_v4 = vrot.slane %v5409_v8, 2 }
 0x353   : > { %v5278_v22 = vrot.slane %v5277_v13, 1  ;;  %v5411_v16 = vadd.f32 %v5410_v4, %v5409_v8 }
 0x355   : > { %v5279_v55 = vadd.f32 %v5278_v22, %v5277_v13  ;;  %v5412_v44 = vrot.slane %v5411_v16, 1 }
 0x357   : > { %5280 = vst [vmem:[%s419_s13] sm:$0x1] %v5279_v55  ;;  %v5413_v9 = vadd.f32 %v5412_v44, %v5411_v16 }
 0x359   : > { %5414 = vst [vmem:[%s429_s11] sm:$0x1] %v5413_v9 }
 0x35a PF: > { %s16_s22 = sadd.s32 1, %s8641_s22   ;;  %s11549_s18 = smov %s8633_s20 }
 0x35b   : > { %p13_p10 = scmp.ge.s32.totalorder %s16_s22, 6   ;;  %s11550_s19 = smov %s8637_s21 }
 0x35c   : > { %s11551_s20 = smov %s11554_s23  ;;  %s11552_s21 = smov %s11558_s24 }
 0x35d   :  { %15 = sbr.rel (!%p13_p10) target bundleno = 3 (0x3), region = 100 }

// kernel: up_forward.7
= control target key start
LH: loop header
LB: loop body
LE: loop exit
PB: predicated region body
PF: predicated region fallthrough
CT: control target
= control target key end

     0   :  { %s741_s12 = smov 0   ;;  %s1031_s0 = inlined_call_operand.vmem [shape: f32[2048,128], index: 0, kind: input, shape index: {}]   ;;  %s1032_s1 = inlined_call_operand.vmem [shape: f32[1,128], index: 1, kind: input, shape index: {}]   ;;  %s1033_s2 = inlined_call_operand.vmem [shape: f32[1,128], index: 2, kind: input, shape index: {}]   ;;  %s1034_s3 = inlined_call_operand.vmem [shape: f32[2048,128], index: 3, kind: output, shape index: {}]  }
   0x1 LB: > { %s692_s13 = sadd.s32 4294967295, %s719_s12   ;;  %p696_p0 = scmp.ge.s32.totalorder %s719_s12, 1  ;;  %s719_s12 = sphi %s741_s12, %s13_s12  }
   0x2   : > { %p138_p1 = scmp.lt.s32.totalorder %s719_s12, 5 }
   0x4   : > { %p139_p2 = pnand %p696_p0, %p138_p1 }
   0x5   : > { %s697_s14 = sshll.u32 (!%p139_p2), %s692_s13, 6  ;;  %v755_v0 = vld [vmem:[%s1032_s1] ss:$0 sm:$0xff] (!%p139_p2) }
   0x6   : > { %142 = sbr.rel (%p139_p2) target bundleno = 102 (0x66), region = 32  ;;  %p163_p3 = scmp.lt.s32.totalorder (!%p139_p2), %s697_s14, 255  ;;  %v765_v1 = vld [vmem:[%s1033_s2] ss:$0 sm:$0xff] (!%p139_p2) }
   0xd   : > { %s1036_s14 = smov (!%p163_p3, %s697_s14), 255 }
   0xe   : > { %s698_s15 = sshll.u32 %s1036_s14, 3 }
   0xf   : > { %s760_s20 = scalar_lea.vmem %s1031_s0, %s698_s15  ;;  %s793_s25 = scalar_lea.vmem %s1034_s3, %s698_s15 }
  0x10   : > { %v174_v2 = vld [vmem:[%s760_s20] sm:$0xff]  ;;  %v175_v3 = vld [vmem:[%s760_s20 + $0x8] sm:$0xff]  ;;  %v176_v4 = vld [vmem:[%s760_s20 + $0x10] sm:$0xff] }
  0x11   : > { %v245_v5 = vmul.f32 %v755_v0, %v174_v2  ;;  %v246_v6 = vmul.f32 %v755_v0, %v175_v3  ;;  %v247_v7 = vmul.f32 %v755_v0, %v176_v4  ;;  %v177_v8 = vld [vmem:[%s760_s20 + $0x18] sm:$0xff]  ;;  %v178_v9 = vld [vmem:[%s760_s20 + $0x20] sm:$0xff]  ;;  %v179_v10 = vld [vmem:[%s760_s20 + $0x28] sm:$0xff] }
  0x12   : > { %v248_v11 = vmul.f32 %v755_v0, %v177_v8  ;;  %v249_v12 = vmul.f32 %v755_v0, %v178_v9  ;;  %v250_v13 = vmul.f32 %v755_v0, %v179_v10  ;;  %v180_v14 = vld [vmem:[%s760_s20 + $0x30] sm:$0xff]  ;;  %v181_v15 = vld [vmem:[%s760_s20 + $0x38] sm:$0xff]  ;;  %v182_v24 = vld [vmem:[%s760_s20 + $0x40] sm:$0xff] }
  0x13   : > { %v316_v16 = vadd.f32 %v765_v1, %v245_v5  ;;  %v317_v17 = vadd.f32 %v765_v1, %v246_v6  ;;  %v318_v18 = vadd.f32 %v765_v1, %v247_v7  ;;  %v251_v19 = vmul.f32 %v755_v0, %v180_v14  ;;  %v183_v32 = vld [vmem:[%s760_s20 + $0x48] sm:$0xff]  ;;  %v184_v33 = vld [vmem:[%s760_s20 + $0x50] sm:$0xff]  ;;  %v185_v34 = vld [vmem:[%s760_s20 + $0x58] sm:$0xff] }
  0x14   : > { %v319_v20 = vadd.f32 %v765_v1, %v248_v11  ;;  %v320_v21 = vadd.f32 %v765_v1, %v249_v12  ;;  %v321_v22 = vadd.f32 %v765_v1, %v250_v13  ;;  %v252_v23 = vmul.f32 %v755_v0, %v181_v15  ;;  %v186_v46 = vld [vmem:[%s760_s20 + $0x60] sm:$0xff]  ;;  %v187_v47 = vld [vmem:[%s760_s20 + $0x68] sm:$0xff]  ;;  %v188_v58 = vld [vmem:[%s760_s20 + $0x70] sm:$0xff] }
  0x15   : > { %vm380_vm0 = vcmp.ge.f32.partialorder %v316_v16, 0.0  ;;  %v444_v25 = vmul.f32 0.01, %v316_v16  ;;  %vm381_vm1 = vcmp.ge.f32.partialorder %v317_v17, 0.0  ;;  %v445_v26 = vmul.f32 0.01, %v317_v17 }
  0x16   : > { %vm382_vm2 = vcmp.ge.f32.partialorder %v318_v18, 0.0  ;;  %v446_v27 = vmul.f32 0.01, %v318_v18  ;;  %vm383_vm3 = vcmp.ge.f32.partialorder %v319_v20, 0.0  ;;  %v447_v28 = vmul.f32 0.01, %v319_v20 }
  0x17   : > { %v508_v29 = vsel %vm380_vm0, %v316_v16, %v444_v25  ;;  %v509_v30 = vsel %vm381_vm1, %v317_v17, %v445_v26  ;;  %vm384_vm4 = vcmp.ge.f32.partialorder %v320_v21, 0.0  ;;  %v448_v31 = vmul.f32 0.01, %v320_v21  ;;  %v189_v59 = vld [vmem:[%s760_s20 + $0x78] sm:$0xff]  ;;  %v190_v6 = vld [vmem:[%s760_s20 + $0x80] sm:$0xff]  ;;  %v191_v7 = vld [vmem:[%s760_s20 + $0x88] sm:$0xff] }
  0x18   : > { %572 = vst [vmem:[%s793_s25] sm:$0xff] %v508_v29  ;;  %573 = vst [vmem:[%s793_s25 + $0x8] sm:$0xff] %v509_v30  ;;  %v510_v35 = vsel %vm382_vm2, %v318_v18, %v446_v27  ;;  %v511_v36 = vsel %vm383_vm3, %v319_v20, %v447_v28  ;;  %vm385_vm5 = vcmp.ge.f32.partialorder %v321_v22, 0.0  ;;  %v449_v37 = vmul.f32 0.01, %v321_v22  ;;  %v192_v12 = vld [vmem:[%s760_s20 + $0x90] sm:$0xff]  ;;  %v193_v13 = vld [vmem:[%s760_s20 + $0x98] sm:$0xff] }
  0x19   : > { %574 = vst [vmem:[%s793_s25 + $0x10] sm:$0xff] %v510_v35  ;;  %575 = vst [vmem:[%s793_s25 + $0x18] sm:$0xff] %v511_v36  ;;  %v512_v38 = vsel %vm384_vm4, %v320_v21, %v448_v31  ;;  %v322_v39 = vadd.f32 %v765_v1, %v251_v19  ;;  %v323_v40 = vadd.f32 %v765_v1, %v252_v23  ;;  %v195_v25 = vld [vmem:[%s760_s20 + $0xa8] sm:$0xff]  ;;  %v196_v36 = vld [vmem:[%s760_s20 + $0xb0] sm:$0xff] }
  0x1a   : > { %v253_v41 = vmul.f32 %v755_v0, %v182_v24  ;;  %576 = vst [vmem:[%s793_s25 + $0x20] sm:$0xff] %v512_v38  ;;  %v513_v42 = vsel %vm385_vm5, %v321_v22, %v449_v37  ;;  %v254_v43 = vmul.f32 %v755_v0, %v183_v32  ;;  %v255_v44 = vmul.f32 %v755_v0, %v184_v33  ;;  %v194_v24 = vld [vmem:[%s760_s20 + $0xa0] sm:$0xff]  ;;  %v197_v37 = vld [vmem:[%s760_s20 + $0xb8] sm:$0xff] }
  0x1b   : > { %v256_v45 = vmul.f32 %v755_v0, %v185_v34  ;;  %577 = vst [vmem:[%s793_s25 + $0x28] sm:$0xff] %v513_v42  ;;  %vm386_vm6 = vcmp.ge.f32.partialorder %v322_v39, 0.0  ;;  %v450_v48 = vmul.f32 0.01, %v322_v39  ;;  %vm387_vm7 = vcmp.ge.f32.partialorder %v323_v40, 0.0 }
  0x1c   : > { %v451_v49 = vmul.f32 0.01, %v323_v40  ;;  %v324_v50 = vadd.f32 %v765_v1, %v253_v41  ;;  %v325_v51 = vadd.f32 %v765_v1, %v254_v43  ;;  %v326_v52 = vadd.f32 %v765_v1, %v255_v44 }
  0x1d   : > { %v327_v53 = vadd.f32 %v765_v1, %v256_v45  ;;  %v514_v54 = vsel %vm386_vm6, %v322_v39, %v450_v48  ;;  %v257_v56 = vmul.f32 %v755_v0, %v186_v46  ;;  %v258_v57 = vmul.f32 %v755_v0, %v187_v47  ;;  %v198_v46 = vld [vmem:[%s760_s20 + $0xc0] sm:$0xff]  ;;  %v199_v47 = vld [vmem:[%s760_s20 + $0xc8] sm:$0xff] }
  0x1e   : > { %v515_v55 = vsel %vm387_vm7, %v323_v40, %v451_v49  ;;  %578 = vst [vmem:[%s793_s25 + $0x30] sm:$0xff] %v514_v54  ;;  %vm388_vm8 = vcmp.ge.f32.partialorder %v324_v50, 0.0  ;;  %v452_v60 = vmul.f32 0.01, %v324_v50  ;;  %vm389_vm9 = vcmp.ge.f32.partialorder %v325_v51, 0.0 }
  0x1f   : > { %579 = vst [vmem:[%s793_s25 + $0x38] sm:$0xff] %v515_v55  ;;  %v453_v61 = vmul.f32 0.01, %v325_v51  ;;  %vm390_vm10 = vcmp.ge.f32.partialorder %v326_v52, 0.0  ;;  %v454_v62 = vmul.f32 0.01, %v326_v52  ;;  %v328_v4 = vadd.f32 %v765_v1, %v257_v56 }
  0x20   : > { %vm391_vm11 = vcmp.ge.f32.partialorder %v327_v53, 0.0  ;;  %v455_v63 = vmul.f32 0.01, %v327_v53  ;;  %v516_v2 = vsel %vm388_vm8, %v324_v50, %v452_v60  ;;  %v329_v5 = vadd.f32 %v765_v1, %v258_v57 }
  0x21   : > { %v517_v3 = vsel %vm389_vm9, %v325_v51, %v453_v61  ;;  %580 = vst [vmem:[%s793_s25 + $0x40] sm:$0xff] %v516_v2  ;;  %v518_v8 = vsel %vm390_vm10, %v326_v52, %v454_v62  ;;  %v259_v10 = vmul.f32 %v755_v0, %v188_v58  ;;  %v260_v11 = vmul.f32 %v755_v0, %v189_v59  ;;  %v200_v52 = vld [vmem:[%s760_s20 + $0xd0] sm:$0xff]  ;;  %v202_v2 = vld [vmem:[%s760_s20 + $0xe0] sm:$0xff] }
  0x22   : > { %581 = vst [vmem:[%s793_s25 + $0x48] sm:$0xff] %v517_v3  ;;  %v519_v9 = vsel %vm391_vm11, %v327_v53, %v455_v63  ;;  %582 = vst [vmem:[%s793_s25 + $0x50] sm:$0xff] %v518_v8  ;;  %vm392_vm12 = vcmp.ge.f32.partialorder %v328_v4, 0.0  ;;  %v456_v14 = vmul.f32 0.01, %v328_v4  ;;  %vm393_vm13 = vcmp.ge.f32.partialorder %v329_v5, 0.0 }
  0x23   : > { %583 = vst [vmem:[%s793_s25 + $0x58] sm:$0xff] %v519_v9  ;;  %v457_v15 = vmul.f32 0.01, %v329_v5  ;;  %v330_v16 = vadd.f32 %v765_v1, %v259_v10  ;;  %v331_v17 = vadd.f32 %v765_v1, %v260_v11  ;;  %v261_v18 = vmul.f32 %v755_v0, %v190_v6  ;;  %v201_v53 = vld [vmem:[%s760_s20 + $0xd8] sm:$0xff]  ;;  %v203_v3 = vld [vmem:[%s760_s20 + $0xe8] sm:$0xff] }
  0x24   : > { %v262_v19 = vmul.f32 %v755_v0, %v191_v7  ;;  %v520_v20 = vsel %vm392_vm12, %v328_v4, %v456_v14  ;;  %v263_v22 = vmul.f32 %v755_v0, %v192_v12  ;;  %v264_v23 = vmul.f32 %v755_v0, %v193_v13  ;;  %v204_v14 = vld [vmem:[%s760_s20 + $0xf0] sm:$0xff] }
  0x25   : > { %v521_v21 = vsel %vm393_vm13, %v329_v5, %v457_v15  ;;  %584 = vst [vmem:[%s793_s25 + $0x60] sm:$0xff] %v520_v20  ;;  %vm394_vm14 = vcmp.ge.f32.partialorder %v330_v16, 0.0  ;;  %v458_v26 = vmul.f32 0.01, %v330_v16  ;;  %vm395_vm15 = vcmp.ge.f32.partialorder %v331_v17, 0.0  ;;  %v205_v15 = vld [vmem:[%s760_s20 + $0xf8] sm:$0xff] }
  0x26   : > { %585 = vst [vmem:[%s793_s25 + $0x68] sm:$0xff] %v521_v21  ;;  %v459_v27 = vmul.f32 0.01, %v331_v17  ;;  %v332_v28 = vadd.f32 %v765_v1, %v261_v18  ;;  %v333_v29 = vadd.f32 %v765_v1, %v262_v19  ;;  %v334_v30 = vadd.f32 %v765_v1, %v263_v22 }
  0x27   : > { %v335_v31 = vadd.f32 %v765_v1, %v264_v23  ;;  %v522_v32 = vsel %vm394_vm14, %v330_v16, %v458_v26  ;;  %v265_v34 = vmul.f32 %v755_v0, %v194_v24  ;;  %v266_v35 = vmul.f32 %v755_v0, %v195_v25  ;;  %v206_v24 = vld [vmem:[%s760_s20 + $0x100] sm:$0xff]  ;;  %v207_v25 = vld [vmem:[%s760_s20 + $0x108] sm:$0xff] }
  0x28   : > { %v523_v33 = vsel %vm395_vm15, %v331_v17, %v459_v27  ;;  %586 = vst [vmem:[%s793_s25 + $0x70] sm:$0xff] %v522_v32  ;;  %vm396_vm0 = vcmp.ge.f32.partialorder %v332_v28, 0.0  ;;  %v460_v38 = vmul.f32 0.01, %v332_v28  ;;  %vm397_vm1 = vcmp.ge.f32.partialorder %v333_v29, 0.0 }
  0x29   : > { %587 = vst [vmem:[%s793_s25 + $0x78] sm:$0xff] %v523_v33  ;;  %v461_v39 = vmul.f32 0.01, %v333_v29  ;;  %vm398_vm2 = vcmp.ge.f32.partialorder %v334_v30, 0.0  ;;  %v462_v40 = vmul.f32 0.01, %v334_v30  ;;  %v336_v44 = vadd.f32 %v765_v1, %v265_v34 }
  0x2a   : > { %vm399_vm3 = vcmp.ge.f32.partialorder %v335_v31, 0.0  ;;  %v463_v41 = vmul.f32 0.01, %v335_v31  ;;  %v524_v42 = vsel %vm396_vm0, %v332_v28, %v460_v38  ;;  %v337_v45 = vadd.f32 %v765_v1, %v266_v35 }
  0x2b   : > { %v525_v43 = vsel %vm397_vm1, %v333_v29, %v461_v39  ;;  %588 = vst [vmem:[%s793_s25 + $0x80] sm:$0xff] %v524_v42  ;;  %v526_v48 = vsel %vm398_vm2, %v334_v30, %v462_v40  ;;  %v267_v50 = vmul.f32 %v755_v0, %v196_v36  ;;  %v268_v51 = vmul.f32 %v755_v0, %v197_v37  ;;  %v208_v30 = vld [vmem:[%s760_s20 + $0x110] sm:$0xff]  ;;  %v210_v42 = vld [vmem:[%s760_s20 + $0x120] sm:$0xff] }
  0x2c   : > { %589 = vst [vmem:[%s793_s25 + $0x88] sm:$0xff] %v525_v43  ;;  %v527_v49 = vsel %vm399_vm3, %v335_v31, %v463_v41  ;;  %590 = vst [vmem:[%s793_s25 + $0x90] sm:$0xff] %v526_v48  ;;  %vm400_vm4 = vcmp.ge.f32.partialorder %v336_v44, 0.0  ;;  %v464_v54 = vmul.f32 0.01, %v336_v44  ;;  %vm401_vm5 = vcmp.ge.f32.partialorder %v337_v45, 0.0 }
  0x2d   : > { %591 = vst [vmem:[%s793_s25 + $0x98] sm:$0xff] %v527_v49  ;;  %v465_v55 = vmul.f32 0.01, %v337_v45  ;;  %v338_v56 = vadd.f32 %v765_v1, %v267_v50  ;;  %v339_v57 = vadd.f32 %v765_v1, %v268_v51  ;;  %v269_v58 = vmul.f32 %v755_v0, %v198_v46  ;;  %v209_v31 = vld [vmem:[%s760_s20 + $0x118] sm:$0xff]  ;;  %v211_v43 = vld [vmem:[%s760_s20 + $0x128] sm:$0xff] }
  0x2e   : > { %v270_v59 = vmul.f32 %v755_v0, %v199_v47  ;;  %v528_v60 = vsel %vm400_vm4, %v336_v44, %v464_v54  ;;  %v271_v62 = vmul.f32 %v755_v0, %v200_v52  ;;  %v272_v63 = vmul.f32 %v755_v0, %v201_v53  ;;  %v212_v54 = vld [vmem:[%s760_s20 + $0x130] sm:$0xff] }
  0x2f   : > { %v529_v61 = vsel %vm401_vm5, %v337_v45, %v465_v55  ;;  %592 = vst [vmem:[%s793_s25 + $0xa0] sm:$0xff] %v528_v60  ;;  %vm402_vm6 = vcmp.ge.f32.partialorder %v338_v56, 0.0  ;;  %v466_v4 = vmul.f32 0.01, %v338_v56  ;;  %vm403_vm7 = vcmp.ge.f32.partialorder %v339_v57, 0.0  ;;  %v213_v55 = vld [vmem:[%s760_s20 + $0x138] sm:$0xff] }
  0x30   : > { %593 = vst [vmem:[%s793_s25 + $0xa8] sm:$0xff] %v529_v61  ;;  %v467_v5 = vmul.f32 0.01, %v339_v57  ;;  %v340_v6 = vadd.f32 %v765_v1, %v269_v58  ;;  %v341_v7 = vadd.f32 %v765_v1, %v270_v59  ;;  %v342_v8 = vadd.f32 %v765_v1, %v271_v62 }
  0x31   : > { %v343_v9 = vadd.f32 %v765_v1, %v272_v63  ;;  %v530_v10 = vsel %vm402_vm6, %v338_v56, %v466_v4  ;;  %v273_v12 = vmul.f32 %v755_v0, %v202_v2  ;;  %v274_v13 = vmul.f32 %v755_v0, %v203_v3  ;;  %v214_v2 = vld [vmem:[%s760_s20 + $0x140] sm:$0xff]  ;;  %v215_v3 = vld [vmem:[%s760_s20 + $0x148] sm:$0xff] }
  0x32   : > { %v531_v11 = vsel %vm403_vm7, %v339_v57, %v467_v5  ;;  %594 = vst [vmem:[%s793_s25 + $0xb0] sm:$0xff] %v530_v10  ;;  %vm404_vm8 = vcmp.ge.f32.partialorder %v340_v6, 0.0  ;;  %v468_v16 = vmul.f32 0.01, %v340_v6  ;;  %vm405_vm9 = vcmp.ge.f32.partialorder %v341_v7, 0.0 }
  0x33   : > { %595 = vst [vmem:[%s793_s25 + $0xb8] sm:$0xff] %v531_v11  ;;  %v469_v17 = vmul.f32 0.01, %v341_v7  ;;  %vm406_vm10 = vcmp.ge.f32.partialorder %v342_v8, 0.0  ;;  %v470_v18 = vmul.f32 0.01, %v342_v8  ;;  %v344_v22 = vadd.f32 %v765_v1, %v273_v12 }
  0x34   : > { %vm407_vm11 = vcmp.ge.f32.partialorder %v343_v9, 0.0  ;;  %v471_v19 = vmul.f32 0.01, %v343_v9  ;;  %v532_v20 = vsel %vm404_vm8, %v340_v6, %v468_v16  ;;  %v345_v23 = vadd.f32 %v765_v1, %v274_v13 }
  0x35   : > { %v533_v21 = vsel %vm405_vm9, %v341_v7, %v469_v17  ;;  %596 = vst [vmem:[%s793_s25 + $0xc0] sm:$0xff] %v532_v20  ;;  %v534_v26 = vsel %vm406_vm10, %v342_v8, %v470_v18  ;;  %v275_v28 = vmul.f32 %v755_v0, %v204_v14  ;;  %v276_v29 = vmul.f32 %v755_v0, %v205_v15  ;;  %v216_v8 = vld [vmem:[%s760_s20 + $0x150] sm:$0xff]  ;;  %v218_v20 = vld [vmem:[%s760_s20 + $0x160] sm:$0xff] }
  0x36   : > { %597 = vst [vmem:[%s793_s25 + $0xc8] sm:$0xff] %v533_v21  ;;  %v535_v27 = vsel %vm407_vm11, %v343_v9, %v471_v19  ;;  %598 = vst [vmem:[%s793_s25 + $0xd0] sm:$0xff] %v534_v26  ;;  %vm408_vm12 = vcmp.ge.f32.partialorder %v344_v22, 0.0  ;;  %v472_v32 = vmul.f32 0.01, %v344_v22  ;;  %vm409_vm13 = vcmp.ge.f32.partialorder %v345_v23, 0.0 }
  0x37   : > { %599 = vst [vmem:[%s793_s25 + $0xd8] sm:$0xff] %v535_v27  ;;  %v473_v33 = vmul.f32 0.01, %v345_v23  ;;  %v346_v34 = vadd.f32 %v765_v1, %v275_v28  ;;  %v347_v35 = vadd.f32 %v765_v1, %v276_v29  ;;  %v277_v36 = vmul.f32 %v755_v0, %v206_v24  ;;  %v217_v9 = vld [vmem:[%s760_s20 + $0x158] sm:$0xff]  ;;  %v219_v21 = vld [vmem:[%s760_s20 + $0x168] sm:$0xff] }
  0x38   : > { %v278_v37 = vmul.f32 %v755_v0, %v207_v25  ;;  %v536_v38 = vsel %vm408_vm12, %v344_v22, %v472_v32  ;;  %v279_v40 = vmul.f32 %v755_v0, %v208_v30  ;;  %v280_v41 = vmul.f32 %v755_v0, %v209_v31  ;;  %v220_v32 = vld [vmem:[%s760_s20 + $0x170] sm:$0xff] }
  0x39   : > { %v537_v39 = vsel %vm409_vm13, %v345_v23, %v473_v33  ;;  %600 = vst [vmem:[%s793_s25 + $0xe0] sm:$0xff] %v536_v38  ;;  %vm410_vm14 = vcmp.ge.f32.partialorder %v346_v34, 0.0  ;;  %v474_v44 = vmul.f32 0.01, %v346_v34  ;;  %vm411_vm15 = vcmp.ge.f32.partialorder %v347_v35, 0.0  ;;  %v221_v33 = vld [vmem:[%s760_s20 + $0x178] sm:$0xff] }
  0x3a   : > { %601 = vst [vmem:[%s793_s25 + $0xe8] sm:$0xff] %v537_v39  ;;  %v475_v45 = vmul.f32 0.01, %v347_v35  ;;  %v348_v46 = vadd.f32 %v765_v1, %v277_v36  ;;  %v349_v47 = vadd.f32 %v765_v1, %v278_v37  ;;  %v350_v48 = vadd.f32 %v765_v1, %v279_v40 }
  0x3b   : > { %v351_v49 = vadd.f32 %v765_v1, %v280_v41  ;;  %v538_v50 = vsel %vm410_vm14, %v346_v34, %v474_v44  ;;  %v281_v52 = vmul.f32 %v755_v0, %v210_v42  ;;  %v282_v53 = vmul.f32 %v755_v0, %v211_v43  ;;  %v222_v42 = vld [vmem:[%s760_s20 + $0x180] sm:$0xff]  ;;  %v223_v43 = vld [vmem:[%s760_s20 + $0x188] sm:$0xff] }
  0x3c   : > { %v539_v51 = vsel %vm411_vm15, %v347_v35, %v475_v45  ;;  %602 = vst [vmem:[%s793_s25 + $0xf0] sm:$0xff] %v538_v50  ;;  %vm412_vm0 = vcmp.ge.f32.partialorder %v348_v46, 0.0  ;;  %v476_v56 = vmul.f32 0.01, %v348_v46  ;;  %vm413_vm1 = vcmp.ge.f32.partialorder %v349_v47, 0.0 }
  0x3d   : > { %603 = vst [vmem:[%s793_s25 + $0xf8] sm:$0xff] %v539_v51  ;;  %v477_v57 = vmul.f32 0.01, %v349_v47  ;;  %vm414_vm2 = vcmp.ge.f32.partialorder %v350_v48, 0.0  ;;  %v478_v58 = vmul.f32 0.01, %v350_v48  ;;  %v352_v62 = vadd.f32 %v765_v1, %v281_v52 }
  0x3e   : > { %vm415_vm3 = vcmp.ge.f32.partialorder %v351_v49, 0.0  ;;  %v479_v59 = vmul.f32 0.01, %v351_v49  ;;  %v540_v60 = vsel %vm412_vm0, %v348_v46, %v476_v56  ;;  %v353_v63 = vadd.f32 %v765_v1, %v282_v53 }
  0x3f   : > { %v541_v61 = vsel %vm413_vm1, %v349_v47, %v477_v57  ;;  %604 = vst [vmem:[%s793_s25 + $0x100] sm:$0xff] %v540_v60  ;;  %v542_v4 = vsel %vm414_vm2, %v350_v48, %v478_v58  ;;  %v283_v6 = vmul.f32 %v755_v0, %v212_v54  ;;  %v284_v7 = vmul.f32 %v755_v0, %v213_v55  ;;  %v224_v48 = vld [vmem:[%s760_s20 + $0x190] sm:$0xff]  ;;  %v226_v60 = vld [vmem:[%s760_s20 + $0x1a0] sm:$0xff] }
  0x40   : > { %605 = vst [vmem:[%s793_s25 + $0x108] sm:$0xff] %v541_v61  ;;  %v543_v5 = vsel %vm415_vm3, %v351_v49, %v479_v59  ;;  %606 = vst [vmem:[%s793_s25 + $0x110] sm:$0xff] %v542_v4  ;;  %vm416_vm4 = vcmp.ge.f32.partialorder %v352_v62, 0.0  ;;  %v480_v10 = vmul.f32 0.01, %v352_v62  ;;  %vm417_vm5 = vcmp.ge.f32.partialorder %v353_v63, 0.0 }
  0x41   : > { %607 = vst [vmem:[%s793_s25 + $0x118] sm:$0xff] %v543_v5  ;;  %v481_v11 = vmul.f32 0.01, %v353_v63  ;;  %v354_v12 = vadd.f32 %v765_v1, %v283_v6  ;;  %v355_v13 = vadd.f32 %v765_v1, %v284_v7  ;;  %v285_v14 = vmul.f32 %v755_v0, %v214_v2  ;;  %v225_v49 = vld [vmem:[%s760_s20 + $0x198] sm:$0xff]  ;;  %v227_v61 = vld [vmem:[%s760_s20 + $0x1a8] sm:$0xff] }
  0x42   : > { %v286_v15 = vmul.f32 %v755_v0, %v215_v3  ;;  %v544_v16 = vsel %vm416_vm4, %v352_v62, %v480_v10  ;;  %v287_v18 = vmul.f32 %v755_v0, %v216_v8  ;;  %v288_v19 = vmul.f32 %v755_v0, %v217_v9  ;;  %v228_v10 = vld [vmem:[%s760_s20 + $0x1b0] sm:$0xff] }
  0x43   : > { %v545_v17 = vsel %vm417_vm5, %v353_v63, %v481_v11  ;;  %608 = vst [vmem:[%s793_s25 + $0x120] sm:$0xff] %v544_v16  ;;  %vm418_vm6 = vcmp.ge.f32.partialorder %v354_v12, 0.0  ;;  %v482_v22 = vmul.f32 0.01, %v354_v12  ;;  %vm419_vm7 = vcmp.ge.f32.partialorder %v355_v13, 0.0  ;;  %v229_v11 = vld [vmem:[%s760_s20 + $0x1b8] sm:$0xff] }
  0x44   : > { %609 = vst [vmem:[%s793_s25 + $0x128] sm:$0xff] %v545_v17  ;;  %v483_v23 = vmul.f32 0.01, %v355_v13  ;;  %v356_v24 = vadd.f32 %v765_v1, %v285_v14  ;;  %v357_v25 = vadd.f32 %v765_v1, %v286_v15  ;;  %v358_v26 = vadd.f32 %v765_v1, %v287_v18 }
  0x45   : > { %v359_v27 = vadd.f32 %v765_v1, %v288_v19  ;;  %v546_v28 = vsel %vm418_vm6, %v354_v12, %v482_v22  ;;  %v289_v30 = vmul.f32 %v755_v0, %v218_v20  ;;  %v290_v31 = vmul.f32 %v755_v0, %v219_v21  ;;  %v230_v20 = vld [vmem:[%s760_s20 + $0x1c0] sm:$0xff]  ;;  %v231_v21 = vld [vmem:[%s760_s20 + $0x1c8] sm:$0xff] }
  0x46   : > { %v547_v29 = vsel %vm419_vm7, %v355_v13, %v483_v23  ;;  %610 = vst [vmem:[%s793_s25 + $0x130] sm:$0xff] %v546_v28  ;;  %vm420_vm8 = vcmp.ge.f32.partialorder %v356_v24, 0.0  ;;  %v484_v34 = vmul.f32 0.01, %v356_v24  ;;  %vm421_vm9 = vcmp.ge.f32.partialorder %v357_v25, 0.0 }
  0x47   : > { %611 = vst [vmem:[%s793_s25 + $0x138] sm:$0xff] %v547_v29  ;;  %v485_v35 = vmul.f32 0.01, %v357_v25  ;;  %vm422_vm10 = vcmp.ge.f32.partialorder %v358_v26, 0.0  ;;  %v486_v36 = vmul.f32 0.01, %v358_v26  ;;  %v360_v40 = vadd.f32 %v765_v1, %v289_v30 }
  0x48   : > { %vm423_vm11 = vcmp.ge.f32.partialorder %v359_v27, 0.0  ;;  %v487_v37 = vmul.f32 0.01, %v359_v27  ;;  %v548_v38 = vsel %vm420_vm8, %v356_v24, %v484_v34  ;;  %v361_v41 = vadd.f32 %v765_v1, %v290_v31 }
  0x49   : > { %v549_v39 = vsel %vm421_vm9, %v357_v25, %v485_v35  ;;  %612 = vst [vmem:[%s793_s25 + $0x140] sm:$0xff] %v548_v38  ;;  %v550_v44 = vsel %vm422_vm10, %v358_v26, %v486_v36  ;;  %v291_v46 = vmul.f32 %v755_v0, %v220_v32  ;;  %v292_v47 = vmul.f32 %v755_v0, %v221_v33  ;;  %v232_v26 = vld [vmem:[%s760_s20 + $0x1d0] sm:$0xff]  ;;  %v234_v38 = vld [vmem:[%s760_s20 + $0x1e0] sm:$0xff] }
  0x4a   : > { %613 = vst [vmem:[%s793_s25 + $0x148] sm:$0xff] %v549_v39  ;;  %v551_v45 = vsel %vm423_vm11, %v359_v27, %v487_v37  ;;  %614 = vst [vmem:[%s793_s25 + $0x150] sm:$0xff] %v550_v44  ;;  %vm424_vm12 = vcmp.ge.f32.partialorder %v360_v40, 0.0  ;;  %v488_v50 = vmul.f32 0.01, %v360_v40  ;;  %vm425_vm13 = vcmp.ge.f32.partialorder %v361_v41, 0.0 }
  0x4b   : > { %615 = vst [vmem:[%s793_s25 + $0x158] sm:$0xff] %v551_v45  ;;  %v489_v51 = vmul.f32 0.01, %v361_v41  ;;  %v362_v52 = vadd.f32 %v765_v1, %v291_v46  ;;  %v363_v53 = vadd.f32 %v765_v1, %v292_v47  ;;  %v293_v54 = vmul.f32 %v755_v0, %v222_v42  ;;  %v233_v27 = vld [vmem:[%s760_s20 + $0x1d8] sm:$0xff]  ;;  %v235_v39 = vld [vmem:[%s760_s20 + $0x1e8] sm:$0xff] }
  0x4c   : > { %v294_v55 = vmul.f32 %v755_v0, %v223_v43  ;;  %v552_v56 = vsel %vm424_vm12, %v360_v40, %v488_v50  ;;  %v295_v58 = vmul.f32 %v755_v0, %v224_v48  ;;  %v296_v59 = vmul.f32 %v755_v0, %v225_v49  ;;  %v236_v50 = vld [vmem:[%s760_s20 + $0x1f0] sm:$0xff] }
  0x4d   : > { %v553_v57 = vsel %vm425_vm13, %v361_v41, %v489_v51  ;;  %616 = vst [vmem:[%s793_s25 + $0x160] sm:$0xff] %v552_v56  ;;  %vm426_vm14 = vcmp.ge.f32.partialorder %v362_v52, 0.0  ;;  %v490_v62 = vmul.f32 0.01, %v362_v52  ;;  %vm427_vm15 = vcmp.ge.f32.partialorder %v363_v53, 0.0  ;;  %v237_v51 = vld [vmem:[%s760_s20 + $0x1f8] sm:$0xff] }
  0x4e   : > { %617 = vst [vmem:[%s793_s25 + $0x168] sm:$0xff] %v553_v57  ;;  %v491_v63 = vmul.f32 0.01, %v363_v53  ;;  %v364_v2 = vadd.f32 %v765_v1, %v293_v54  ;;  %v365_v3 = vadd.f32 %v765_v1, %v294_v55  ;;  %v366_v4 = vadd.f32 %v765_v1, %v295_v58 }
  0x4f   : > { %v367_v5 = vadd.f32 %v765_v1, %v296_v59  ;;  %v554_v6 = vsel %vm426_vm14, %v362_v52, %v490_v62  ;;  %v297_v8 = vmul.f32 %v755_v0, %v226_v60  ;;  %v298_v9 = vmul.f32 %v755_v0, %v227_v61 }
  0x50   : > { %v555_v7 = vsel %vm427_vm15, %v363_v53, %v491_v63  ;;  %618 = vst [vmem:[%s793_s25 + $0x170] sm:$0xff] %v554_v6  ;;  %vm428_vm0 = vcmp.ge.f32.partialorder %v364_v2, 0.0  ;;  %v492_v12 = vmul.f32 0.01, %v364_v2  ;;  %vm429_vm1 = vcmp.ge.f32.partialorder %v365_v3, 0.0 }
  0x51   : > { %619 = vst [vmem:[%s793_s25 + $0x178] sm:$0xff] %v555_v7  ;;  %v493_v13 = vmul.f32 0.01, %v365_v3  ;;  %vm430_vm2 = vcmp.ge.f32.partialorder %v366_v4, 0.0  ;;  %v494_v14 = vmul.f32 0.01, %v366_v4  ;;  %v368_v18 = vadd.f32 %v765_v1, %v297_v8 }
  0x52   : > { %vm431_vm3 = vcmp.ge.f32.partialorder %v367_v5, 0.0  ;;  %v495_v15 = vmul.f32 0.01, %v367_v5  ;;  %v556_v16 = vsel %vm428_vm0, %v364_v2, %v492_v12  ;;  %v369_v19 = vadd.f32 %v765_v1, %v298_v9 }
  0x53   : > { %v557_v17 = vsel %vm429_vm1, %v365_v3, %v493_v13  ;;  %620 = vst [vmem:[%s793_s25 + $0x180] sm:$0xff] %v556_v16  ;;  %v558_v22 = vsel %vm430_vm2, %v366_v4, %v494_v14  ;;  %v299_v24 = vmul.f32 %v755_v0, %v228_v10  ;;  %v300_v25 = vmul.f32 %v755_v0, %v229_v11 }
  0x54   : > { %621 = vst [vmem:[%s793_s25 + $0x188] sm:$0xff] %v557_v17  ;;  %v559_v23 = vsel %vm431_vm3, %v367_v5, %v495_v15  ;;  %622 = vst [vmem:[%s793_s25 + $0x190] sm:$0xff] %v558_v22  ;;  %vm432_vm4 = vcmp.ge.f32.partialorder %v368_v18, 0.0  ;;  %v496_v28 = vmul.f32 0.01, %v368_v18  ;;  %vm433_vm5 = vcmp.ge.f32.partialorder %v369_v19, 0.0 }
  0x55   : > { %623 = vst [vmem:[%s793_s25 + $0x198] sm:$0xff] %v559_v23  ;;  %v497_v29 = vmul.f32 0.01, %v369_v19  ;;  %v370_v30 = vadd.f32 %v765_v1, %v299_v24  ;;  %v371_v31 = vadd.f32 %v765_v1, %v300_v25  ;;  %v301_v32 = vmul.f32 %v755_v0, %v230_v20 }
  0x56   : > { %v302_v33 = vmul.f32 %v755_v0, %v231_v21  ;;  %v560_v34 = vsel %vm432_vm4, %v368_v18, %v496_v28  ;;  %v303_v36 = vmul.f32 %v755_v0, %v232_v26  ;;  %v304_v37 = vmul.f32 %v755_v0, %v233_v27 }
  0x57   : > { %v561_v35 = vsel %vm433_vm5, %v369_v19, %v497_v29  ;;  %624 = vst [vmem:[%s793_s25 + $0x1a0] sm:$0xff] %v560_v34  ;;  %vm434_vm6 = vcmp.ge.f32.partialorder %v370_v30, 0.0  ;;  %v498_v40 = vmul.f32 0.01, %v370_v30  ;;  %vm435_vm7 = vcmp.ge.f32.partialorder %v371_v31, 0.0 }
  0x58   : > { %625 = vst [vmem:[%s793_s25 + $0x1a8] sm:$0xff] %v561_v35  ;;  %v499_v41 = vmul.f32 0.01, %v371_v31  ;;  %v372_v42 = vadd.f32 %v765_v1, %v301_v32  ;;  %v373_v43 = vadd.f32 %v765_v1, %v302_v33  ;;  %v374_v44 = vadd.f32 %v765_v1, %v303_v36 }
  0x59   : > { %v375_v45 = vadd.f32 %v765_v1, %v304_v37  ;;  %v562_v46 = vsel %vm434_vm6, %v370_v30, %v498_v40  ;;  %v305_v48 = vmul.f32 %v755_v0, %v234_v38  ;;  %v306_v49 = vmul.f32 %v755_v0, %v235_v39 }
  0x5a   : > { %v563_v47 = vsel %vm435_vm7, %v371_v31, %v499_v41  ;;  %626 = vst [vmem:[%s793_s25 + $0x1b0] sm:$0xff] %v562_v46  ;;  %vm436_vm8 = vcmp.ge.f32.partialorder %v372_v42, 0.0  ;;  %v500_v52 = vmul.f32 0.01, %v372_v42  ;;  %vm437_vm9 = vcmp.ge.f32.partialorder %v373_v43, 0.0 }
  0x5b   : > { %627 = vst [vmem:[%s793_s25 + $0x1b8] sm:$0xff] %v563_v47  ;;  %v501_v53 = vmul.f32 0.01, %v373_v43  ;;  %vm438_vm10 = vcmp.ge.f32.partialorder %v374_v44, 0.0  ;;  %v502_v54 = vmul.f32 0.01, %v374_v44  ;;  %v376_v58 = vadd.f32 %v765_v1, %v305_v48 }
  0x5c   : > { %vm439_vm11 = vcmp.ge.f32.partialorder %v375_v45, 0.0  ;;  %v503_v55 = vmul.f32 0.01, %v375_v45  ;;  %v564_v56 = vsel %vm436_vm8, %v372_v42, %v500_v52  ;;  %v377_v59 = vadd.f32 %v765_v1, %v306_v49 }
  0x5d   : > { %v565_v57 = vsel %vm437_vm9, %v373_v43, %v501_v53  ;;  %628 = vst [vmem:[%s793_s25 + $0x1c0] sm:$0xff] %v564_v56  ;;  %v566_v60 = vsel %vm438_vm10, %v374_v44, %v502_v54  ;;  %v307_v62 = vmul.f32 %v755_v0, %v236_v50  ;;  %v308_v63 = vmul.f32 %v755_v0, %v237_v51 }
  0x5e   : > { %629 = vst [vmem:[%s793_s25 + $0x1c8] sm:$0xff] %v565_v57  ;;  %v567_v61 = vsel %vm439_vm11, %v375_v45, %v503_v55  ;;  %630 = vst [vmem:[%s793_s25 + $0x1d0] sm:$0xff] %v566_v60  ;;  %vm440_vm12 = vcmp.ge.f32.partialorder %v376_v58, 0.0  ;;  %v504_v2 = vmul.f32 0.01, %v376_v58  ;;  %vm441_vm13 = vcmp.ge.f32.partialorder %v377_v59, 0.0 }
  0x5f   : > { %631 = vst [vmem:[%s793_s25 + $0x1d8] sm:$0xff] %v567_v61  ;;  %v505_v3 = vmul.f32 0.01, %v377_v59  ;;  %v378_v4 = vadd.f32 %v765_v1, %v307_v62  ;;  %v379_v5 = vadd.f32 %v765_v1, %v308_v63 }
  0x60   : > { %v568_v6 = vsel %vm440_vm12, %v376_v58, %v504_v2 }
  0x61   : > { %v569_v7 = vsel %vm441_vm13, %v377_v59, %v505_v3  ;;  %632 = vst [vmem:[%s793_s25 + $0x1e0] sm:$0xff] %v568_v6  ;;  %vm442_vm14 = vcmp.ge.f32.partialorder %v378_v4, 0.0  ;;  %v506_v8 = vmul.f32 0.01, %v378_v4  ;;  %vm443_vm15 = vcmp.ge.f32.partialorder %v379_v5, 0.0 }
  0x62   : > { %633 = vst [vmem:[%s793_s25 + $0x1e8] sm:$0xff] %v569_v7  ;;  %v507_v0 = vmul.f32 0.01, %v379_v5 }
  0x63   : > { %v570_v9 = vsel %vm442_vm14, %v378_v4, %v506_v8 }
  0x64   : > { %v571_v10 = vsel %vm443_vm15, %v379_v5, %v507_v0  ;;  %634 = vst [vmem:[%s793_s25 + $0x1f0] sm:$0xff] %v570_v9 }
  0x65   : > { %635 = vst [vmem:[%s793_s25 + $0x1f8] sm:$0xff] %v571_v10 }
  0x66 PF: > { %s13_s12 = sadd.s32 1, %s719_s12  }
  0x67   : > { %p10_p4 = scmp.ge.s32.totalorder %s13_s12, 6  }
  0x69   :  { %12 = sbr.rel (!%p10_p4) target bundleno = 1 (0x1), region = 62 }

// kernel: up_forward.6
= control target key start
LH: loop header
LB: loop body
LE: loop exit
PB: predicated region body
PF: predicated region fallthrough
CT: control target
= control target key end

     0   :  { %s9701_s24 = smov 0   ;;  %s9703_s25 = smov 0   ;;  %s13338_s0 = inlined_call_operand.vmem [shape: f32[2,34,34,128], index: 0, kind: input, shape index: {}, may-alias: {0,1}]   ;;  %s13339_s1 = inlined_call_operand.vmem [shape: f32[2,34,34,128], index: 1, kind: input, shape index: {}, may-alias: {0,1}]   ;;  %s13340_s2 = inlined_call_operand.vmem [shape: f32[9,128,128], index: 2, kind: input, shape index: {}]   ;;  %s13341_s3 = inlined_call_operand.vmem [shape: f32[1,128], index: 3, kind: input, shape index: {}]   ;;  %s13342_s4 = inlined_call_operand.vmem [shape: f32[1,128], index: 4, kind: input, shape index: {}]   ;;  %s13343_s5 = inlined_call_operand.vmem [shape: f32[2,32,32,128], index: 5, kind: output, shape index: {0}]   ;;  %s13344_s6 = inlined_call_operand.vmem [shape: f32[4,1,128], index: 6, kind: output, shape index: {1}]   ;;  %s13345_s7 = inlined_call_operand.vmem [shape: f32[4,1,128], index: 7, kind: output, shape index: {2}]  }
   0x1   :  { %s9705_s26 = smov 0   ;;  %s9707_s27 = smov 0  }
   0x2   :  { %s9709_s28 = smov 0  }
   0x3 LB: > { %s33_s29 = sadd.s32 1, %s9651_s26  ;;  %s37_s30 = sadd.s32 1, %s9655_s27  ;;  %s9659_s28 = sphi %s9709_s28, %s18_s28   ;;  %s9655_s27 = sphi %s9707_s27, %s14783_s27   ;;  %s9651_s26 = sphi %s9705_s26, %s14782_s26   ;;  %s9647_s25 = sphi %s9703_s25, %s14781_s25   ;;  %s9643_s24 = sphi %s9701_s24, %s14780_s24  }
   0x4   : > { %p35_p0 = scmp.ge.s32.totalorder %s33_s29, 2  ;;  %p6535_p1 = scmp.ge.s32.totalorder %s9659_s28, 1 }
   0x5   : > { %p330_p2 = scmp.lt.s32.totalorder %s9659_s28, 5 }
   0x6   : > { %s14785_s29 = smov (%p35_p0, %s33_s29), 0  ;;  %s14787_s30 = smov (!%p35_p0, %s37_s30), %s9655_s27 }
   0x7   : > { %p331_p3 = pnand %p6535_p1, %p330_p2  ;;  %p39_p4 = scmp.ge.s32.totalorder %s14787_s30, 2 }
   0x9   : > { %s14789_s30 = smov (%p39_p4, %s14787_s30), 0  ;;  %334 = sbr.rel (%p331_p3) target bundleno = 934 (0x3a6), region = 40 }
  0x10   : > { %v6551_v0 = vld [vmem:[%s13340_s2 + $0x80] sm:$0xff]  ;;  %v6552_v1 = vld [vmem:[%s13340_s2 + $0x88] sm:$0xff]  ;;  %s9745_s14 = sshll.u32 %s9643_s24, 4  ;;  %p418_p5 = scmp.lt.s32.totalorder %s9647_s25, 1  ;;  %v595_v3 = vlaneseq  ;;  %v6553_v6 = vld [vmem:[%s13340_s2 + $0x90] sm:$0xff]  ;;  %vm13400_vm5 = vcmask 1046528  }
  0x11   : > { %v6727_v2 = vld [vmem:[%s13340_s2 + $0x200] sm:$0xff]  ;;  %v8756_v4 = vpack.c.bf16 %v6552_v1, %v6551_v0  ;;  %v6728_v5 = vld [vmem:[%s13340_s2 + $0x208] sm:$0xff]  ;;  %v6554_v7 = vld [vmem:[%s13340_s2 + $0x98] sm:$0xff]  ;;  %p420_p6 = scmp.lt.s32.totalorder %s9745_s14, 33  ;;  %v9773_v13 = vstv %s9745_s14  ;;  %v13900_v0 = vmov 0  ;;  %p455_p8 = scmp.lt.s32.totalorder %s9745_s14, 31 }
  0x12   : > { %v9758_v8 = vpack.c.bf16 %v6728_v5, %v6727_v2  ;;  %v8760_v9 = vpack.c.bf16 %v6554_v7, %v6553_v6  ;;  %v6729_v10 = vld [vmem:[%s13340_s2 + $0x210] sm:$0xff]  ;;  %v6730_v11 = vld [vmem:[%s13340_s2 + $0x218] sm:$0xff]  ;;  %v6555_v12 = vld [vmem:[%s13340_s2 + $0xa0] sm:$0xff]  ;;  %s9770_s11 = scalar_select %p418_p5, %s9647_s25, 1  ;;  %v9798_v21 = vshrl.u32 %v595_v3, 7  ;;  %v9811_v26 = vadd.s32 1, %v9773_v13 }
  0x13   : > { %8757 = vmatprep.subr.bf16.mxu1 %v8756_v4  ;;  %v9775_v14 = vpack.c.bf16 %v6730_v11, %v6729_v10  ;;  %v6556_v15 = vld [vmem:[%s13340_s2 + $0xa8] sm:$0xff]  ;;  %v6731_v16 = vld [vmem:[%s13340_s2 + $0x220] sm:$0xff]  ;;  %s421_s19 = scalar_select %p420_p6, %s9745_s14, 33  ;;  %v6557_v18 = vld [vmem:[%s13340_s2 + $0xb0] sm:$0xff]  ;;  %vm601_vm0 = vcmp.ge.s32.totalorder %v9773_v13, 1  ;;  %vm617_vm1 = vcmp.le.s32.totalorder %v9773_v13, 32 }
  0x14   : > { %13891 = vst [vmem:[#allocation2_spill] sm:$0xff] %v9758_v8  ;;  %v6732_v17 = vld [vmem:[%s13340_s2 + $0x228] sm:$0xff]  ;;  %8885 = vmatprep.subr.bf16.mxu0 %v9758_v8  ;;  %8759 = vmatpush3.bf16.msra.mxu1 %v8756_v4  ;;  %v6558_v19 = vld [vmem:[%s13340_s2 + $0xb8] sm:$0xff]  ;;  %v6733_v20 = vld [vmem:[%s13340_s2 + $0x230] sm:$0xff]  ;;  %s9573_s10 = smul.u32 170, %s9770_s11  ;;  %v8764_v22 = vpack.c.bf16 %v6556_v15, %v6555_v12  ;;  %vm13367_vm2 = vcmp.ge.s32.totalorder %v9798_v21, 1 }
  0x15   : > { %13892 = vst [vmem:[#allocation3_spill] sm:$0xff] %v9775_v14  ;;  %8887 = vmatpush3.bf16.msra.mxu0 %v9758_v8  ;;  %8761 = vmatprep.subr.bf16.mxu1 %v8760_v9  ;;  %v6734_v23 = vld [vmem:[%s13340_s2 + $0x238] sm:$0xff]  ;;  %v6559_v24 = vld [vmem:[%s13340_s2 + $0xc0] sm:$0xff]  ;;  %v6560_v25 = vld [vmem:[%s13340_s2 + $0xc8] sm:$0xff]  ;;  %s9572_s20 = smul.u32 5, %s421_s19  ;;  %v9814_v27 = vpack.c.bf16 %v6732_v17, %v6731_v16  ;;  %v9849_v37 = vadd.s32 32, %v9798_v21  ;;  %v8768_v38 = vpack.c.bf16 %v6558_v19, %v6557_v18 }
  0x16   : > { %8889 = vmatprep.subr.bf16.mxu0 %v9775_v14  ;;  %v6735_v28 = vld [vmem:[%s13340_s2 + $0x240] sm:$0xff]  ;;  %v6736_v29 = vld [vmem:[%s13340_s2 + $0x248] sm:$0xff]  ;;  %v6561_v30 = vld [vmem:[%s13340_s2 + $0xd0] sm:$0xff]  ;;  %v9852_v39 = vpack.c.bf16 %v6734_v23, %v6733_v20  ;;  %vm602_vm3 = vcmp.ge.s32.totalorder %v9811_v26, 1  ;;  %vm618_vm4 = vcmp.le.s32.totalorder %v9811_v26, 32  ;;  %v9871_v43 = vpack.c.bf16 %v6560_v25, %v6559_v24  ;;  %s11811_s19 = sadd.s32 16, %s9745_s14 }
  0x17   : > { %13893 = vst [vmem:[#allocation4_spill] sm:$0xff] %v9814_v27  ;;  %v6562_v31 = vld [vmem:[%s13340_s2 + $0xd8] sm:$0xff]  ;;  %v6737_v32 = vld [vmem:[%s13340_s2 + $0x250] sm:$0xff]  ;;  %s424_s21 = sadd.s32 %s9573_s10, %s9572_s20  ;;  %v6563_v34 = vld [vmem:[%s13340_s2 + $0xe0] sm:$0xff]  ;;  %v9873_v44 = vpack.c.bf16 %v6736_v29, %v6735_v28  ;;  %v9883_v48 = vadd.s32 2, %v9773_v13  ;;  %v9886_v49 = vadd.s32 3, %v9773_v13 }
  0x18   : > { %v6738_v33 = vld [vmem:[%s13340_s2 + $0x258] sm:$0xff]  ;;  %8763 = vmatpush3.bf16.msra.mxu1 %v8760_v9  ;;  %v6564_v35 = vld [vmem:[%s13340_s2 + $0xe8] sm:$0xff]  ;;  %v6739_v36 = vld [vmem:[%s13340_s2 + $0x260] sm:$0xff]  ;;  %s6537_s13 = sshll.u32 %s424_s21, 3  ;;  %13894 = vst [vmem:[#allocation5_spill] sm:$0xff] %v9849_v37  ;;  %v9888_v50 = vpack.c.bf16 %v6562_v31, %v6561_v30  ;;  %v9906_v56 = vadd.s32 4, %v9773_v13 }
  0x19   : > { %8891 = vmatpush3.bf16.msra.mxu0 %v9775_v14  ;;  %8765 = vmatprep.subr.bf16.mxu1 %v8764_v22  ;;  %13895 = vst [vmem:[#allocation6_spill] sm:$0xff] %v9852_v39  ;;  %v6740_v40 = vld [vmem:[%s13340_s2 + $0x268] sm:$0xff]  ;;  %v6565_v41 = vld [vmem:[%s13340_s2 + $0xf0] sm:$0xff]  ;;  %v6566_v42 = vld [vmem:[%s13340_s2 + $0xf8] sm:$0xff]  ;;  %s9866_s8 = scalar_lea.vmem %s13338_s0, %s6537_s13  ;;  %v9890_v51 = vpack.c.bf16 %v6738_v33, %v6737_v32  ;;  %v9892_v52 = vpack.c.bf16 %v6564_v35, %v6563_v34  ;;  %v9931_v4 = vadd.s32 5, %v9773_v13  ;;  %v13903_v7 = vmov 0 }
  0x1a   : > { %8893 = vmatprep.subr.bf16.mxu0 %v9814_v27  ;;  %13896 = vst [vmem:[#allocation7_spill] sm:$0xff] %v9873_v44  ;;  %v6741_v45 = vld [vmem:[%s13340_s2 + $0x270] sm:$0xff]  ;;  %v6742_v46 = vld [vmem:[%s13340_s2 + $0x278] sm:$0xff]  ;;  %v486_v47 = vld [vmem:[%s9866_s8] sm:$0xff]  ;;  %v9908_v57 = vpack.c.bf16 %v6740_v40, %v6739_v36  ;;  %v9910_v58 = vpack.c.bf16 %v6566_v42, %v6565_v41  ;;  %v9947_v11 = vadd.s32 6, %v9773_v13  ;;  %v9953_v17 = vadd.s32 7, %v9773_v13 }
  0x1b   : > { %13897 = vst [vmem:[#allocation8_spill] sm:$0xff] %v9890_v51  ;;  %v487_v53 = vld [vmem:[%s9866_s8 + $0x8] sm:$0xff]  ;;  %v9898_v54 = vld [vmem:[%s13341_s3] ss:$0 sm:$0xff]  ;;  %v492_v62 = vld [vmem:[%s9866_s8 + $0x30] sm:$0xff]  ;;  %v9917_v63 = vpack.c.bf16 %v6742_v46, %v6741_v45  ;;  %vm13368_vm14 = vcmp.le.s32.totalorder %v9849_v37, 32 }
  0x1c   : > { %v9903_v55 = vld [vmem:[%s13342_s4] ss:$0 sm:$0xff]  ;;  %8767 = vmatpush3.bf16.msra.mxu1 %v8764_v22  ;;  %13898 = vst [vmem:[#allocation9_spill] sm:$0xff] %v9908_v57  ;;  %v825_v59 = vmul.f32 %v9898_v54, %v486_v47  ;;  %v826_v60 = vmul.f32 %v9898_v54, %v487_v53  ;;  %v491_v61 = vld [vmem:[%s9866_s8 + $0x28] sm:$0xff]  ;;  %vm9923_vm6 = vmand %vm601_vm0, %vm617_vm1  ;;  %v831_v2 = vmul.f32 %v9898_v54, %v492_v62  ;;  %v13908_v22 = vmov 0  ;;  %p438_p7 = scmp.lt.s32.totalorder %s11811_s19, 33 }
  0x1d   : > { %8895 = vmatpush3.bf16.msra.mxu0 %v9814_v27  ;;  %8769 = vmatprep.subr.bf16.mxu1 %v8768_v38  ;;  %13899 = vst [vmem:[#allocation10_spill] sm:$0xff] %v9917_v63  ;;  %v13901_v0 = vsel %vm9923_vm6, 4294967295, %v13900_v0  ;;  %v830_v1 = vmul.f32 %v9898_v54, %v491_v61  ;;  %v488_v3 = vld [vmem:[%s9866_s8 + $0x10] sm:$0xff]  ;;  %vm9940_vm7 = vmand %vm602_vm3, %vm618_vm4  ;;  %v493_v10 = vld [vmem:[%s9866_s8 + $0x38] sm:$0xff]  ;;  %vm603_vm15 = vcmp.ge.s32.totalorder %v9883_v48, 1  ;;  %vm619_vm0 = vcmp.le.s32.totalorder %v9883_v48, 32 }
  0x1e   : > { %13902 = vst [vmem:[#allocation11_spill] sm:$0xff] %v13901_v0  ;;  %8897 = vmatprep.subr.bf16.mxu0 %v9852_v39  ;;  %v911_v5 = vadd.f32 %v9903_v55, %v825_v59  ;;  %v912_v6 = vadd.f32 %v9903_v55, %v826_v60  ;;  %v13904_v7 = vsel %vm9940_vm7, 4294967295, %v13903_v7  ;;  %v827_v9 = vmul.f32 %v9898_v54, %v488_v3  ;;  %vm9959_vm8 = vmand %vm9923_vm6, %vm13367_vm2  ;;  %v489_v34 = vld [vmem:[%s9866_s8 + $0x18] sm:$0xff]  ;;  %v494_v35 = vld [vmem:[%s9866_s8 + $0x40] sm:$0xff]  ;;  %s439_s23 = scalar_select %p438_p7, %s11811_s19, 33 }
  0x1f   : > { %13905 = vst [vmem:[#allocation12_spill] sm:$0xff] %v13904_v7  ;;  %v916_v12 = vadd.f32 %v9903_v55, %v830_v1  ;;  %v917_v15 = vadd.f32 %v9903_v55, %v831_v2  ;;  %v832_v16 = vmul.f32 %v9898_v54, %v493_v10  ;;  %vm9969_vm11 = vmand %vm9940_vm7, %vm13367_vm2  ;;  %v490_v36 = vld [vmem:[%s9866_s8 + $0x20] sm:$0x3]  ;;  %v495_v45 = vld [vmem:[%s9866_s8 + $0x48] sm:$0x3]  ;;  %v10027_v62 = vadd.s32 8, %v9773_v13 }
  0x20   : > { %8771 = vmatpush3.bf16.msra.mxu1 %v8768_v38  ;;  %vm991_vm9 = vcmp.ge.f32.partialorder %v911_v5, 0.0  ;;  %vm992_vm10 = vcmp.ge.f32.partialorder %v912_v6, 0.0  ;;  %v1071_v19 = vmul.f32 0.01, %v911_v5  ;;  %v1072_v20 = vmul.f32 0.01, %v912_v6 }
  0x21   : > { %8899 = vmatpush3.bf16.msra.mxu0 %v9852_v39  ;;  %8773 = vmatprep.subr.bf16.mxu1 %v9871_v43  ;;  %v13909_v22 = vsel %vm9969_vm11, 4294967295, %v13908_v22  ;;  %vm996_vm12 = vcmp.ge.f32.partialorder %v916_v12, 0.0  ;;  %vm997_vm13 = vcmp.ge.f32.partialorder %v917_v15, 0.0  ;;  %v1076_v23 = vmul.f32 0.01, %v916_v12  ;;  %v1401_v59 = vld [vmem:[%s13340_s2] sm:$0xff] }
  0x22   : > { %13910 = vst [vmem:[#allocation13_spill] sm:$0xff] %v13909_v22  ;;  %v1077_v24 = vmul.f32 0.01, %v917_v15  ;;  %8901 = vmatprep.subr.bf16.mxu0 %v9873_v44  ;;  %v9975_v25 = vsel %vm991_vm9, %v911_v5, %v1071_v19  ;;  %v9977_v26 = vsel %vm992_vm10, %v912_v6, %v1072_v20  ;;  %v913_v28 = vadd.f32 %v9903_v55, %v827_v9  ;;  %v1402_v60 = vld [vmem:[%s13340_s2 + $0x8] sm:$0xff]  ;;  %v6743_v3 = vld [vmem:[%s13340_s2 + $0x280] sm:$0xff]  ;;  %vm10082_vm10 = vmand %vm9923_vm6, %vm13368_vm14  ;;  %s9574_s18 = smul.u32 5, %s439_s23 }
  0x23   : > { %13911 = vst [vmem:[#allocation14_spill] sm:$0xff] %v9977_v26  ;;  %v918_v29 = vadd.f32 %v9903_v55, %v832_v16  ;;  %v9984_v30 = vsel %vm9959_vm8, %v9975_v25, 0.0  ;;  %v9989_v31 = vsel %vm9923_vm6, %v9977_v26, 0.0  ;;  %v9991_v32 = vsel %vm996_vm12, %v916_v12, %v1076_v23  ;;  %v6744_v5 = vld [vmem:[%s13340_s2 + $0x288] sm:$0xff]  ;;  %v501_v39 = vld [vmem:[%s9866_s8 + $0x78] sm:$0xff]  ;;  %s14791_s14 = smov (!%p455_p8, %s9745_s14), 31 }
  0x24   : > { %13912 = vst [vmem:[#allocation15_spill] sm:$0xff] %v9984_v30  ;;  %13913 = vst [vmem:[#allocation16_spill] sm:$0xff] %v9989_v31  ;;  %v9993_v33 = vsel %vm997_vm13, %v917_v15, %v1077_v24  ;;  %8775 = vmatpush3.bf16.msra.mxu1 %v9871_v43  ;;  %v1498_v38 = vrot.slane %v9984_v30, 1  ;;  %v1499_v40 = vrot.slane %v9989_v31, 1  ;;  %v10004_v41 = vsel %vm9969_vm11, %v9991_v32, 0.0  ;;  %v529_v0 = vld [vmem:[%s9866_s8 + $0x158] sm:$0xff]  ;;  %s442_s23 = sadd.s32 %s9574_s18, %s9573_s10 }
  0x25   : > { %13914 = vst [vmem:[#allocation17_spill] sm:$0xff] %v9991_v32  ;;  %13915 = vst [vmem:[#allocation18_spill] sm:$0xff] %v9993_v33  ;;  %v10009_v42 = vsel %vm9940_vm7, %v9993_v33, 0.0  ;;  %8903 = vmatpush3.bf16.msra.mxu0 %v9873_v44  ;;  %8777 = vmatprep.subr.bf16.mxu1 %v9888_v50  ;;  %v1507_v43 = vrot.slane %v10004_v41, 1  ;;  %vm993_vm1 = vcmp.ge.f32.partialorder %v913_v28, 0.0  ;;  %vm998_vm3 = vcmp.ge.f32.partialorder %v918_v29, 0.0 }
  0x26   : > { %v1508_v46 = vrot.slane %v10009_v42, 1  ;;  %v1073_v47 = vmul.f32 0.01, %v913_v28  ;;  %8905 = vmatprep.subr.bf16.mxu0 %v9890_v51  ;;  %v1500_v53 = vsel %vm13400_vm5, %v1498_v38, %v1499_v40  ;;  %v1078_v61 = vmul.f32 0.01, %v918_v29  ;;  %vm10094_vm13 = vmand %vm9940_vm7, %vm13368_vm14  ;;  %s6540_s10 = sshll.u32 %s442_s23, 3 }
  0x27   : > { %7636 = vmatprep.mubr.f32.mxu1 %v1500_v53  ;;  %v828_v6 = vmul.f32 %v9898_v54, %v489_v34  ;;  %v833_v9 = vmul.f32 %v9898_v54, %v494_v35  ;;  %v829_v15 = vmul.f32 %v9898_v54, %v490_v36  ;;  %v834_v16 = vmul.f32 %v9898_v54, %v495_v45  ;;  %v496_v45 = vld [vmem:[%s9866_s8 + $0x50] sm:$0xff]  ;;  %s11956_s9 = scalar_lea.vmem %s13339_s1, %s6540_s10  ;;  %s6543_s23 = sshll.u32 %s9770_s11, 7 }
  0x28   : > { %v10030_v1 = vsel %vm13400_vm5, %v1507_v43, %v1508_v46  ;;  %v10032_v2 = vsel %vm993_vm1, %v913_v28, %v1073_v47  ;;  %8779 = vmatpush3.bf16.msra.mxu1 %v9888_v50  ;;  %v10049_v12 = vsel %vm998_vm3, %v918_v29, %v1078_v61  ;;  %v10056_v19 = vpack.c.bf16 %v1402_v60, %v1401_v59  ;;  %v497_v43 = vld [vmem:[%s9866_s8 + $0x58] sm:$0xff]  ;;  %vm10118_vm3 = vmand %vm603_vm15, %vm619_vm0 }
  0x29   : > { %13916 = vst [vmem:[#allocation19_spill] sm:$0xff] %v10032_v2  ;;  %8148 = vmatprep.mubr.f32.mxu0 %v10030_v1  ;;  %v10047_v10 = vsel %vm9923_vm6, %v10032_v2, 0.0  ;;  %13918 = vst [vmem:[#allocation21_spill] sm:$0xff] %v10049_v12  ;;  %8907 = vmatpush3.bf16.msra.mxu0 %v9890_v51  ;;  %v10061_v20 = vsel %vm9940_vm7, %v10049_v12, 0.0  ;;  %v914_v23 = vadd.f32 %v9903_v55, %v828_v6  ;;  %v13962_v30 = vmov 0  ;;  %v521_v12 = vld [vmem:[%s9866_s8 + $0x118] sm:$0xff] }
  0x2a   : > { %13917 = vst [vmem:[#allocation20_spill] sm:$0xff] %v10047_v10  ;;  %8781 = vmatprep.subr.bf16.mxu1 %v9892_v52  ;;  %v1501_v50 = vrot.slane %v10047_v10, 1  ;;  %8909 = vmatprep.subr.bf16.mxu0 %v9908_v57  ;;  %v1510_v24 = vrot.slane %v10061_v20, 1  ;;  %v10066_v28 = vpack.c.bf16 %v6744_v5, %v6743_v3  ;;  %v919_v29 = vadd.f32 %v9903_v55, %v833_v9  ;;  %vm10156_vm15 = vmand %vm10118_vm3, %vm13367_vm2  ;;  %v524_v2 = vld [vmem:[%s9866_s8 + $0x130] sm:$0xff] }
  0x2b   : > { %v915_v34 = vadd.f32 %v9903_v55, %v829_v15  ;;  %vm994_vm4 = vcmp.ge.f32.partialorder %v914_v23, 0.0  ;;  %v1074_v36 = vmul.f32 0.01, %v914_v23  ;;  %v920_v38 = vadd.f32 %v9903_v55, %v834_v16 }
  0x2c   : > { %v1502_v35 = vsel %vm13400_vm5, %v1499_v40, %v1501_v50  ;;  %8783 = vmatpush3.bf16.msra.mxu1 %v9892_v52  ;;  %v10076_v47 = vsel %vm13400_vm5, %v1508_v46, %v1510_v24  ;;  %vm999_vm9 = vcmp.ge.f32.partialorder %v919_v29, 0.0  ;;  %v1079_v53 = vmul.f32 0.01, %v919_v29  ;;  %v6746_v46 = vld [vmem:[%s13340_s2 + $0x298] sm:$0xff] }
  0x2d   : > { %vm995_vm12 = vcmp.ge.f32.partialorder %v915_v34, 0.0  ;;  %8911 = vmatpush3.bf16.msra.mxu0 %v9908_v57  ;;  %8785 = vmatprep.subr.bf16.mxu1 %v9910_v58  ;;  %v10088_v52 = vsel %vm994_vm4, %v914_v23, %v1074_v36  ;;  %v1075_v40 = vmul.f32 0.01, %v915_v34  ;;  %vm1000_vm1 = vcmp.ge.f32.partialorder %v920_v38, 0.0  ;;  %v498_v36 = vld [vmem:[%s9866_s8 + $0x60] sm:$0xff] }
  0x2e   : > { %13921 = vst [vmem:[#allocation22_spill] sm:$0xff] %v10088_v52  ;;  %v1080_v60 = vmul.f32 0.01, %v920_v38  ;;  %8913 = vmatprep.subr.bf16.mxu0 %v9917_v63  ;;  %v10102_v61 = vsel %vm9923_vm6, %v10088_v52, 0.0  ;;  %v10104_v3 = vsel %vm999_vm9, %v919_v29, %v1079_v53  ;;  %v835_v5 = vmul.f32 %v9898_v54, %v496_v45 }
  0x2f   : > { %13924 = vst [vmem:[#allocation23_spill] sm:$0xff] %v10102_v61  ;;  %13925 = vst [vmem:[#allocation24_spill] sm:$0xff] %v10104_v3  ;;  %v836_v6 = vmul.f32 %v9898_v54, %v497_v43  ;;  %v1503_v9 = vrot.slane %v10102_v61, 1  ;;  %v10112_v15 = vsel %vm9940_vm7, %v10104_v3, 0.0  ;;  %v1155_v16 = vsel %vm995_vm12, %v915_v34, %v1075_v40  ;;  %v6745_v40 = vld [vmem:[%s13340_s2 + $0x290] sm:$0xff] }
  0x30   : > { %v1160_v23 = vsel %vm1000_vm1, %v920_v38, %v1080_v60  ;;  %v13926_v29 = vmov 0  ;;  %vm604_vm4 = vcmp.ge.s32.totalorder %v9886_v49, 1  ;;  %vm620_vm9 = vcmp.le.s32.totalorder %v9886_v49, 32  ;;  %8787 = vmatpush3.bf16.msra.mxu1 %v9910_v58  ;;  %v504_v61 = vld [vmem:[%s9866_s8 + $0x90] sm:$0xff] }
  0x31   : > { %v13927_v29 = vsel %vm10118_vm3, 4294967295, %v13926_v29  ;;  %v1512_v45 = vrot.slane %v10112_v15, 1  ;;  %v10129_v34 = vsel %vm10082_vm10, %v1155_v16, 0.0  ;;  %v10133_v48 = vsel %vm10094_vm13, %v1160_v23, 0.0  ;;  %8915 = vmatpush3.bf16.msra.mxu0 %v9917_v63  ;;  %8789 = vmatprep.subr.bf16.mxu1 %v10056_v19  ;;  %v499_v16 = vld [vmem:[%s9866_s8 + $0x68] sm:$0xff]  ;;  %vm10241_vm13 = vmand %vm604_vm4, %vm620_vm9 }
  0x32   : > { %13928 = vst [vmem:[#allocation25_spill] sm:$0xff] %v13927_v29  ;;  %13929 = vst [vmem:[#allocation26_spill] sm:$0xff] %v10129_v34  ;;  %v921_v38 = vadd.f32 %v9903_v55, %v835_v5  ;;  %v1504_v58 = vsel %vm13400_vm5, %v1501_v50, %v1503_v9  ;;  %v1505_v43 = vrot.slane %v10129_v34, 1  ;;  %v1514_v53 = vrot.slane %v10133_v48, 1  ;;  %8917 = vmatprep.subr.bf16.mxu0 %v10066_v28  ;;  %v500_v23 = vld [vmem:[%s9866_s8 + $0x70] sm:$0x3] }
  0x33   : > { %v922_v59 = vadd.f32 %v9903_v55, %v836_v6  ;;  %v10150_v60 = vsel %vm13400_vm5, %v1510_v24, %v1512_v45  ;;  %v13930_v50 = vmov 0  ;;  %v837_v6 = vmul.f32 %v9898_v54, %v498_v36  ;;  %7637 = vmatmul.mubr.f32.vlgmr.msra.gmra.mrb[0].mxu1 %v1502_v35  ;;  %vm10273_vm9 = vmand %vm10241_vm13, %vm13367_vm2  ;;  %v514_v29 = vld [vmem:[%s9866_s8 + $0xe0] sm:$0xff] }
  0x34   : > { %v13931_v50 = vsel %vm10156_vm15, 4294967295, %v13930_v50  ;;  %vm1001_vm0 = vcmp.ge.f32.partialorder %v921_v38, 0.0  ;;  %v1081_v5 = vmul.f32 0.01, %v921_v38  ;;  %v1506_v63 = vsel %vm13400_vm5, %v1503_v9, %v1505_v43  ;;  %8149 = vmatmul.mubr.f32.vlgmr.msra.gmra.mrb[0].mxu0 %v10076_v47  ;;  %8791 = vmatpush3.bf16.msra.mxu1 %v10056_v19  ;;  %v502_v43 = vld [vmem:[%s9866_s8 + $0x80] sm:$0xff] }
  0x35   : > { %13932 = vst [vmem:[#allocation27_spill] sm:$0xff] %v13931_v50  ;;  %v10165_v24 = vsel %vm13400_vm5, %v1512_v45, %v1514_v53  ;;  %vm1002_vm10 = vcmp.ge.f32.partialorder %v922_v59, 0.0  ;;  %v1082_v57 = vmul.f32 0.01, %v922_v59  ;;  %v923_v44 = vadd.f32 %v9903_v55, %v837_v6  ;;  %8919 = vmatpush3.bf16.msra.mxu0 %v10066_v28  ;;  %7639 = vmatprep.mubr.f32.mxu1 %v1504_v58  ;;  %v1403_v53 = vld [vmem:[%s13340_s2 + $0x10] sm:$0xff]  ;;  %v1404_v28 = vld [vmem:[%s13340_s2 + $0x18] sm:$0xff] }
  0x36   : > { %v10169_v51 = vsel %vm1001_vm0, %v921_v38, %v1081_v5  ;;  %v8920_v36 = vpack.c.bf16 %v6746_v46, %v6745_v40  ;;  %v10174_v35 = vadd.s32 9, %v9773_v13  ;;  %v838_v19 = vmul.f32 %v9898_v54, %v499_v16  ;;  %8151 = vmatprep.mubr.f32.mxu0 %v10150_v60 }
  0x37   : > { %13933 = vst [vmem:[#allocation28_spill] sm:$0xff] %v10169_v51  ;;  %v10177_v9 = vsel %vm1002_vm10, %v922_v59, %v1082_v57  ;;  %v10182_v45 = vsel %vm10156_vm15, %v10169_v51, 0.0  ;;  %v839_v38 = vmul.f32 %v9898_v54, %v500_v23  ;;  %vm1003_vm12 = vcmp.ge.f32.partialorder %v923_v44, 0.0  ;;  %7640 = vmatmul.mubr.f32.gmra.mrb[2].mxu1 %v1506_v63  ;;  %v503_v63 = vld [vmem:[%s9866_s8 + $0x88] sm:$0xff]  ;;  %vm10231_vm10 = vmand %vm10118_vm3, %vm13368_vm14 }
  0x38   : > { %13934 = vst [vmem:[#allocation29_spill] sm:$0xff] %v10177_v9  ;;  %v10197_v57 = vsel %vm10118_vm3, %v10177_v9, 0.0  ;;  %v1516_v58 = vrot.slane %v10182_v45, 1  ;;  %v1083_v59 = vmul.f32 0.01, %v923_v44  ;;  %8921 = vmatprep.subr.bf16.mxu0 %v8920_v36  ;;  %v924_v46 = vadd.f32 %v9903_v55, %v838_v19  ;;  %8152 = vmatmul.mubr.f32.gmra.mrb[2].mxu0 %v10165_v24  ;;  %v6747_v19 = vld [vmem:[%s13340_s2 + $0x2a0] sm:$0xff] }
  0x39   : > { %v1517_v40 = vrot.slane %v10197_v57, 1  ;;  %v925_v5 = vadd.f32 %v9903_v55, %v839_v38  ;;  %v840_v6 = vmul.f32 %v9898_v54, %v501_v39  ;;  %7642 = vmatprep.mubr.f32.mxu1 %v10030_v1  ;;  %v841_v27 = vmul.f32 %v9898_v54, %v502_v43  ;;  %v6748_v39 = vld [vmem:[%s13340_s2 + $0x2a8] sm:$0xff]  ;;  %8923 = vmatpush3.bf16.msra.mxu0 %v8920_v36 }
  0x3a   : > { %v10207_v23 = vsel %vm1003_vm12, %v923_v44, %v1083_v59  ;;  %v8792_v14 = vpack.c.bf16 %v1404_v28, %v1403_v53  ;;  %vm621_vm1 = vcmp.le.s32.totalorder %v9906_v56, 32  ;;  %vm1004_vm0 = vcmp.ge.f32.partialorder %v924_v46, 0.0 }
  0x3b   : > { %13935 = vst [vmem:[#allocation30_spill] sm:$0xff] %v10207_v23  ;;  %v10220_v1 = vsel %vm13400_vm5, %v1516_v58, %v1517_v40  ;;  %v10225_v44 = vsel %vm10118_vm3, %v10207_v23, 0.0  ;;  %v1084_v38 = vmul.f32 0.01, %v924_v46  ;;  %vm1005_vm12 = vcmp.ge.f32.partialorder %v925_v5, 0.0  ;;  %7643 = vmatmul.mubr.f32.gmra.mrb[4].mxu1 %v10076_v47  ;;  %v512_v23 = vld [vmem:[%s9866_s8 + $0xd0] sm:$0xff] }
  0x3c   : > { %13936 = vst [vmem:[#allocation31_spill] sm:$0xff] %v10220_v1  ;;  %8154 = vmatprep.mubr.f32.mxu0 %v10220_v1  ;;  %v1519_v53 = vrot.slane %v10225_v44, 1  ;;  %v1085_v28 = vmul.f32 0.01, %v925_v5  ;;  %v13939_v36 = vmov 0  ;;  %v926_v58 = vadd.f32 %v9903_v55, %v840_v6  ;;  %8793 = vmatprep.subr.bf16.mxu1 %v8792_v14 }
  0x3d   : > { %v13940_v36 = vsel %vm10241_vm13, 4294967295, %v13939_v36  ;;  %v10247_v59 = vsel %vm1004_vm0, %v924_v46, %v1084_v38  ;;  %v927_v16 = vadd.f32 %v9903_v55, %v841_v27  ;;  %v842_v8 = vmul.f32 %v9898_v54, %v503_v63  ;;  %7645 = vmatprep.mubr.f32.mxu1 %v10150_v60  ;;  %8795 = vmatpush3.bf16.msra.mxu1 %v8792_v14  ;;  %v505_v47 = vld [vmem:[%s9866_s8 + $0x98] sm:$0x3]  ;;  %v506_v46 = vld [vmem:[%s9866_s8 + $0xa0] sm:$0xff] }
  0x3e   : > { %13941 = vst [vmem:[#allocation32_spill] sm:$0xff] %v13940_v36  ;;  %13942 = vst [vmem:[#allocation33_spill] sm:$0xff] %v10247_v59  ;;  %v8924_v34 = vpack.c.bf16 %v6748_v39, %v6747_v19  ;;  %v10253_v49 = vsel %vm13400_vm5, %v1517_v40, %v1519_v53  ;;  %v10259_v6 = vsel %vm10118_vm3, %v10247_v59, 0.0  ;;  %v1165_v10 = vsel %vm1005_vm12, %v925_v5, %v1085_v28  ;;  %v507_v28 = vld [vmem:[%s9866_s8 + $0xa8] sm:$0xff]  ;;  %v510_v36 = vld [vmem:[%s9866_s8 + $0xc0] sm:$0x3] }
  0x3f   : > { %13943 = vst [vmem:[#allocation34_spill] sm:$0xff] %v10253_v49  ;;  %vm1006_vm4 = vcmp.ge.f32.partialorder %v926_v58, 0.0  ;;  %8155 = vmatmul.mubr.f32.gmra.mrb[4].mxu0 %v10253_v49  ;;  %v1521_v27 = vrot.slane %v10259_v6, 1  ;;  %v10267_v40 = vsel %vm10231_vm10, %v1165_v10, 0.0  ;;  %v13944_v60 = vmov 0  ;;  %7646 = vmatmul.mubr.f32.gmra.mrb[6].mxu1 %v10165_v24  ;;  %v508_v24 = vld [vmem:[%s9866_s8 + $0xb0] sm:$0xff] }
  0x40   : > { %v13945_v60 = vsel %vm10273_vm9, 4294967295, %v13944_v60  ;;  %vm1007_vm0 = vcmp.ge.f32.partialorder %v927_v16, 0.0  ;;  %v1086_v14 = vmul.f32 0.01, %v926_v58  ;;  %8925 = vmatprep.subr.bf16.mxu0 %v8924_v34  ;;  %v1523_v5 = vrot.slane %v10267_v40, 1  ;;  %7648 = vmatprep.mubr.f32.mxu1 %v10220_v1 }
  0x41   : > { %13946 = vst [vmem:[#allocation35_spill] sm:$0xff] %v13945_v60  ;;  %v1087_v63 = vmul.f32 0.01, %v927_v16  ;;  %v928_v19 = vadd.f32 %v9903_v55, %v842_v8  ;;  %8927 = vmatpush3.bf16.msra.mxu0 %v8924_v34  ;;  %v843_v10 = vmul.f32 %v9898_v54, %v504_v61  ;;  %v10281_v39 = vsel %vm13400_vm5, %v1519_v53, %v1521_v27 }
  0x42   : > { %13947 = vst [vmem:[#allocation36_spill] sm:$0xff] %v10281_v39  ;;  %v10285_v38 = vsel %vm1006_vm4, %v926_v58, %v1086_v14  ;;  %v844_v43 = vmul.f32 %v9898_v54, %v505_v47  ;;  %v845_v31 = vmul.f32 %v9898_v54, %v506_v46  ;;  %8157 = vmatprep.mubr.f32.mxu0 %v10281_v39  ;;  %vm13952_vm2 = vcmp.ge.s32.totalorder %v9906_v56, 1 }
  0x43   : > { %13948 = vst [vmem:[#allocation37_spill] sm:$0xff] %v10285_v38  ;;  %v10292_v8 = vsel %vm13400_vm5, %v1521_v27, %v1523_v5  ;;  %v10296_v61 = vsel %vm1007_vm0, %v927_v16, %v1087_v63  ;;  %v10301_v34 = vsel %vm10273_vm9, %v10285_v38, 0.0  ;;  %vm1008_vm10 = vcmp.ge.f32.partialorder %v928_v19, 0.0  ;;  %7649 = vmatmul.mubr.f32.gmra.mrb[8].mxu1 %v10253_v49  ;;  %vm10325_vm14 = vmand %vm13952_vm2, %vm621_vm1 }
  0x44   : > { %13949 = vst [vmem:[#allocation38_spill] sm:$0xff] %v10292_v8  ;;  %13950 = vst [vmem:[#allocation39_spill] sm:$0xff] %v10296_v61  ;;  %8158 = vmatmul.mubr.f32.gmra.mrb[6].mxu0 %v10292_v8  ;;  %v10308_v53 = vsel %vm10241_vm13, %v10296_v61, 0.0  ;;  %v1525_v58 = vrot.slane %v10301_v34, 1  ;;  %v1088_v47 = vmul.f32 0.01, %v928_v19  ;;  %v929_v16 = vadd.f32 %v9903_v55, %v843_v10  ;;  %7651 = vmatprep.mubr.f32.mxu1 %v10281_v39 }
  0x45   : > { %v1526_v46 = vrot.slane %v10308_v53, 1  ;;  %v930_v27 = vadd.f32 %v9903_v55, %v844_v43  ;;  %v846_v14 = vmul.f32 %v9898_v54, %v507_v28  ;;  %v931_v5 = vadd.f32 %v9903_v55, %v845_v31 }
  0x46   : > { %v10319_v63 = vsel %vm1008_vm10, %v928_v19, %v1088_v47  ;;  %vm1009_vm0 = vcmp.ge.f32.partialorder %v929_v16, 0.0  ;;  %v1089_v1 = vmul.f32 0.01, %v929_v16  ;;  %v13953_v10 = vmov 0 }
  0x47   : > { %13951 = vst [vmem:[#allocation40_spill] sm:$0xff] %v10319_v63  ;;  %v13954_v10 = vsel %vm10325_vm14, 4294967295, %v13953_v10  ;;  %v847_v31 = vmul.f32 %v9898_v54, %v508_v24  ;;  %v10331_v43 = vsel %vm13400_vm5, %v1525_v58, %v1526_v46  ;;  %v10336_v19 = vsel %vm10241_vm13, %v10319_v63, 0.0  ;;  %7652 = vmatmul.mubr.f32.gmra.mrb[10].mxu1 %v10292_v8  ;;  %v509_v63 = vld [vmem:[%s9866_s8 + $0xb8] sm:$0xff]  ;;  %v511_v8 = vld [vmem:[%s9866_s8 + $0xc8] sm:$0xff] }
  0x48   : > { %13955 = vst [vmem:[#allocation41_spill] sm:$0xff] %v13954_v10  ;;  %13956 = vst [vmem:[#allocation42_spill] sm:$0xff] %v10331_v43  ;;  %vm13957_vm10 = vcmp.le.s32.totalorder %v9849_v37, 32  ;;  %vm1010_vm1 = vcmp.ge.f32.partialorder %v930_v27, 0.0  ;;  %v1090_v28 = vmul.f32 0.01, %v930_v27  ;;  %8160 = vmatprep.mubr.f32.mxu0 %v10331_v43  ;;  %v10349_v58 = vsel %vm1009_vm0, %v929_v16, %v1089_v1  ;;  %7654 = vmatprep.mubr.f32.mxu1 %v10331_v43 }
  0x49   : > { %vm10343_vm2 = vmand %vm10241_vm13, %vm13957_vm10  ;;  %v1528_v24 = vrot.slane %v10336_v19, 1  ;;  %13960 = vst [vmem:[#allocation43_spill] sm:$0xff] %v10349_v58  ;;  %v932_v47 = vadd.f32 %v9903_v55, %v846_v14  ;;  %vm1011_vm12 = vcmp.ge.f32.partialorder %v931_v5, 0.0  ;;  %v10355_v39 = vsel %vm10241_vm13, %v10349_v58, 0.0  ;;  %v6749_v14 = vld [vmem:[%s13340_s2 + $0x2b0] sm:$0xff] }
  0x4a   : > { %v1170_v49 = vsel %vm1010_vm1, %v930_v27, %v1090_v28  ;;  %vm13961_vm10 = vcmp.ge.s32.totalorder %v9798_v21, 1  ;;  %v1091_v1 = vmul.f32 0.01, %v931_v5  ;;  %v933_v16 = vadd.f32 %v9903_v55, %v847_v31  ;;  %v6750_v27 = vld [vmem:[%s13340_s2 + $0x2b8] sm:$0xff] }
  0x4b   : > { %vm10361_vm4 = vmand %vm10325_vm14, %vm13961_vm10  ;;  %v10373_v28 = vsel %vm13400_vm5, %v1526_v46, %v1528_v24  ;;  %v1530_v58 = vrot.slane %v10355_v39, 1  ;;  %v10379_v31 = vsel %vm10343_vm2, %v1170_v49, 0.0  ;;  %vm1012_vm0 = vcmp.ge.f32.partialorder %v932_v47, 0.0 }
  0x4c   : > { %v13963_v30 = vsel %vm10361_vm4, 4294967295, %v13962_v30  ;;  %13965 = vst [vmem:[#allocation45_spill] sm:$0xff] %v10373_v28  ;;  %8161 = vmatmul.mubr.f32.gmra.mrb[8].mxu0 %v10373_v28  ;;  %v1532_v61 = vrot.slane %v10379_v31, 1  ;;  %v1092_v46 = vmul.f32 0.01, %v932_v47  ;;  %v10387_v60 = vsel %vm1011_vm12, %v931_v5, %v1091_v1  ;;  %7655 = vmatmul.mubr.f32.gmra.mrb[12].mxu1 %v10373_v28 }
  0x4d   : > { %13964 = vst [vmem:[#allocation44_spill] sm:$0xff] %v13963_v30  ;;  %13966 = vst [vmem:[#allocation46_spill] sm:$0xff] %v10387_v60  ;;  %vm1013_vm1 = vcmp.ge.f32.partialorder %v933_v16, 0.0  ;;  %v10391_v56 = vsel %vm13400_vm5, %v1528_v24, %v1530_v58  ;;  %v10396_v49 = vsel %vm10361_vm4, %v10387_v60, 0.0  ;;  %v1093_v38 = vmul.f32 0.01, %v933_v16 }
  0x4e   : > { %13967 = vst [vmem:[#allocation47_spill] sm:$0xff] %v10391_v56  ;;  %v8928_v59 = vpack.c.bf16 %v6750_v27, %v6749_v14  ;;  %8163 = vmatprep.mubr.f32.mxu0 %v10391_v56  ;;  %v10401_v43 = vsel %vm13400_vm5, %v1530_v58, %v1532_v61  ;;  %v10404_v5 = vsel %vm1012_vm0, %v932_v47, %v1092_v46  ;;  %v1534_v1 = vrot.slane %v10396_v49, 1  ;;  %v1405_v30 = vld [vmem:[%s13340_s2 + $0x20] sm:$0xff]  ;;  %v1406_v14 = vld [vmem:[%s13340_s2 + $0x28] sm:$0xff] }
  0x4f   : > { %13968 = vst [vmem:[#allocation48_spill] sm:$0xff] %v10401_v43  ;;  %13969 = vst [vmem:[#allocation49_spill] sm:$0xff] %v10404_v5  ;;  %v848_v24 = vmul.f32 %v9898_v54, %v509_v63  ;;  %v10417_v61 = vsel %vm10325_vm14, %v10404_v5, 0.0  ;;  %v10421_v58 = vsel %vm1013_vm1, %v933_v16, %v1093_v38  ;;  %v849_v63 = vmul.f32 %v9898_v54, %v510_v36  ;;  %v513_v5 = vld [vmem:[%s9866_s8 + $0xd8] sm:$0xff] }
  0x50   : > { %13970 = vst [vmem:[#allocation50_spill] sm:$0xff] %v10421_v58  ;;  %8929 = vmatprep.subr.bf16.mxu0 %v8928_v59  ;;  %v850_v47 = vmul.f32 %v9898_v54, %v511_v8  ;;  %8164 = vmatmul.mubr.f32.gmra.mrb[10].mxu0 %v10401_v43  ;;  %v1535_v27 = vrot.slane %v10417_v61, 1  ;;  %v10430_v46 = vsel %vm10325_vm14, %v10421_v58, 0.0  ;;  %v851_v16 = vmul.f32 %v9898_v54, %v512_v23 }
  0x51   : > { %7657 = vmatprep.mubr.f32.mxu1 %v10391_v56  ;;  %v934_v38 = vadd.f32 %v9903_v55, %v848_v24  ;;  %v1537_v36 = vrot.slane %v10430_v46, 1  ;;  %8931 = vmatpush3.bf16.msra.mxu0 %v8928_v59  ;;  %v935_v8 = vadd.f32 %v9903_v55, %v849_v63  ;;  %vm13971_vm10 = vcmp.le.s32.totalorder %v9931_v4, 32  ;;  %v6751_v63 = vld [vmem:[%s13340_s2 + $0x2c0] sm:$0xff] }
  0x52   : > { %vm13972_vm0 = vcmp.ge.s32.totalorder %v9931_v4, 1  ;;  %v13973_v28 = vmov 0  ;;  %v936_v24 = vadd.f32 %v9903_v55, %v850_v47  ;;  %v8796_v23 = vpack.c.bf16 %v1406_v14, %v1405_v30  ;;  %v6752_v4 = vld [vmem:[%s13340_s2 + $0x2c8] sm:$0xff]  ;;  %7658 = vmatmul.mubr.f32.gmra.mrb[14].mxu1 %v10401_v43 }
  0x53   : > { %vm10443_vm1 = vmand %vm13972_vm0, %vm13971_vm10  ;;  %v10449_v56 = vsel %vm13400_vm5, %v1534_v1, %v1535_v27  ;;  %vm1014_vm12 = vcmp.ge.f32.partialorder %v934_v38, 0.0  ;;  %v1094_v58 = vmul.f32 0.01, %v934_v38  ;;  %v937_v59 = vadd.f32 %v9903_v55, %v851_v16 }
  0x54   : > { %v13974_v28 = vsel %vm10443_vm1, 4294967295, %v13973_v28  ;;  %13976 = vst [vmem:[#allocation52_spill] sm:$0xff] %v10449_v56  ;;  %8166 = vmatprep.mubr.f32.mxu0 %v10449_v56  ;;  %v10461_v30 = vsel %vm13400_vm5, %v1535_v27, %v1537_v36  ;;  %vm13978_vm10 = vcmp.le.s32.totalorder %v9849_v37, 32  ;;  %vm1015_vm2 = vcmp.ge.f32.partialorder %v935_v8, 0.0  ;;  %7660 = vmatprep.mubr.f32.mxu1 %v10449_v56 }
  0x55   : > { %13975 = vst [vmem:[#allocation51_spill] sm:$0xff] %v13974_v28  ;;  %13977 = vst [vmem:[#allocation53_spill] sm:$0xff] %v10461_v30  ;;  %v1095_v14 = vmul.f32 0.01, %v935_v8  ;;  %vm1016_vm4 = vcmp.ge.f32.partialorder %v936_v24, 0.0  ;;  %8167 = vmatmul.mubr.f32.gmra.mrb[12].mxu0 %v10461_v30  ;;  %v10473_v47 = vsel %vm1014_vm12, %v934_v38, %v1094_v58  ;;  %vm13982_vm5 = vcmp.ge.s32.totalorder %v9798_v21, 1  ;;  %8797 = vmatprep.subr.bf16.mxu1 %v8796_v23 }
  0x56   : > { %vm10468_vm0 = vmand %vm10325_vm14, %vm13978_vm10  ;;  %13981 = vst [vmem:[#allocation54_spill] sm:$0xff] %v10473_v47  ;;  %v13983_v27 = vmov 0  ;;  %vm1017_vm10 = vcmp.ge.f32.partialorder %v937_v59, 0.0  ;;  %v1096_v16 = vmul.f32 0.01, %v936_v24  ;;  %v10487_v60 = vsel %vm10325_vm14, %v10473_v47, 0.0  ;;  %8799 = vmatpush3.bf16.msra.mxu1 %v8796_v23 }
  0x57   : > { %vm10480_vm13 = vmand %vm10443_vm1, %vm13982_vm5  ;;  %v1097_v43 = vmul.f32 0.01, %v937_v59  ;;  %v1175_v58 = vsel %vm1015_vm2, %v935_v8, %v1095_v14  ;;  %v852_v38 = vmul.f32 %v9898_v54, %v513_v5  ;;  %v8932_v56 = vpack.c.bf16 %v6752_v4, %v6751_v63  ;;  %v515_v8 = vld [vmem:[%s9866_s8 + $0xe8] sm:$0x3]  ;;  %7661 = vmatmul.mubr.f32.gmra.mrb[16].mxu1 %v10461_v30  ;;  %v517_v23 = vld [vmem:[%s9866_s8 + $0xf8] sm:$0xff] }
  0x58   : > { %v13984_v27 = vsel %vm10480_vm13, 4294967295, %v13983_v27  ;;  %v1539_v9 = vrot.slane %v10487_v60, 1  ;;  %v10494_v50 = vsel %vm10468_vm0, %v1175_v58, 0.0  ;;  %v10497_v51 = vsel %vm1016_vm4, %v936_v24, %v1096_v16  ;;  %v516_v24 = vld [vmem:[%s9866_s8 + $0xf0] sm:$0xff]  ;;  %v518_v58 = vld [vmem:[%s9866_s8 + $0x100] sm:$0xff] }
  0x59   : > { %13985 = vst [vmem:[#allocation55_spill] sm:$0xff] %v13984_v27  ;;  %13986 = vst [vmem:[#allocation56_spill] sm:$0xff] %v10497_v51  ;;  %v10499_v10 = vsel %vm1017_vm10, %v937_v59, %v1097_v43  ;;  %v1541_v14 = vrot.slane %v10494_v50, 1  ;;  %v10506_v5 = vsel %vm10480_vm13, %v10497_v51, 0.0  ;;  %v938_v43 = vadd.f32 %v9903_v55, %v852_v38  ;;  %8933 = vmatprep.subr.bf16.mxu0 %v8932_v56  ;;  %v520_v28 = vld [vmem:[%s9866_s8 + $0x110] sm:$0x3] }
  0x5a   : > { %13987 = vst [vmem:[#allocation57_spill] sm:$0xff] %v10499_v10  ;;  %v10511_v63 = vsel %vm10443_vm1, %v10499_v10, 0.0  ;;  %vm13988_vm5 = vcmask 1046528   ;;  %v1543_v4 = vrot.slane %v10506_v5, 1  ;;  %8935 = vmatpush3.bf16.msra.mxu0 %v8932_v56  ;;  %v853_v16 = vmul.f32 %v9898_v54, %v514_v29 }
  0x5b   : > { %v10518_v59 = vsel %vm13988_vm5, %v1537_v36, %v1539_v9  ;;  %v1544_v1 = vrot.slane %v10511_v63, 1  ;;  %vm13990_vm4 = vmmov %vm13988_vm5  ;;  %vm1018_vm12 = vcmp.ge.f32.partialorder %v938_v43, 0.0  ;;  %v1098_v38 = vmul.f32 0.01, %v938_v43 }
  0x5c   : > { %13989 = vst [vmem:[#allocation58_spill] sm:$0xff] %v10518_v59  ;;  %8169 = vmatprep.mubr.f32.mxu0 %v10518_v59  ;;  %v10526_v30 = vsel %vm13990_vm4, %v1539_v9, %v1541_v14  ;;  %7663 = vmatprep.mubr.f32.mxu1 %v10518_v59  ;;  %v854_v36 = vmul.f32 %v9898_v54, %v515_v8  ;;  %vm13992_vm2 = vmmov %vm13990_vm4  ;;  %vm13995_vm10 = vcmp.le.s32.totalorder %v9947_v11, 32  ;;  %vm13996_vm5 = vcmp.ge.s32.totalorder %v9947_v11, 1 }
  0x5d   : > { %13991 = vst [vmem:[#allocation59_spill] sm:$0xff] %v10526_v30  ;;  %8170 = vmatmul.mubr.f32.gmra.mrb[14].mxu0 %v10526_v30  ;;  %v10532_v10 = vsel %vm13992_vm2, %v1543_v4, %v1544_v1  ;;  %v939_v56 = vadd.f32 %v9903_v55, %v853_v16  ;;  %v855_v29 = vmul.f32 %v9898_v54, %v516_v24  ;;  %vm10547_vm4 = vmand %vm13996_vm5, %vm13995_vm10  ;;  %v13997_v14 = vmov 0 }
  0x5e   : > { %13993 = vst [vmem:[#allocation60_spill] sm:$0xff] %v10532_v10  ;;  %v856_v27 = vmul.f32 %v9898_v54, %v517_v23  ;;  %8172 = vmatprep.mubr.f32.mxu0 %v10532_v10  ;;  %v10539_v9 = vsel %vm1018_vm12, %v938_v43, %v1098_v38  ;;  %7664 = vmatmul.mubr.f32.gmra.mrb[18].mxu1 %v10526_v30  ;;  %v13998_v14 = vsel %vm10547_vm4, 4294967295, %v13997_v14  ;;  %vm14000_vm10 = vcmp.le.s32.totalorder %v9849_v37, 32 }
  0x5f   : > { %13994 = vst [vmem:[#allocation61_spill] sm:$0xff] %v10539_v9  ;;  %v940_v8 = vadd.f32 %v9903_v55, %v854_v36  ;;  %13999 = vst [vmem:[#allocation62_spill] sm:$0xff] %v13998_v14  ;;  %v857_v24 = vmul.f32 %v9898_v54, %v518_v58  ;;  %v10556_v43 = vsel %vm10443_vm1, %v10539_v9, 0.0  ;;  %vm1019_vm12 = vcmp.ge.f32.partialorder %v939_v56, 0.0  ;;  %7666 = vmatprep.mubr.f32.mxu1 %v10532_v10  ;;  %v6754_v9 = vld [vmem:[%s13340_s2 + $0x2d8] sm:$0xff] }
  0x60   : > { %v1099_v23 = vmul.f32 0.01, %v939_v56  ;;  %v941_v4 = vadd.f32 %v9903_v55, %v855_v29  ;;  %v1546_v11 = vrot.slane %v10556_v43, 1  ;;  %vm10565_vm5 = vmand %vm10443_vm1, %vm14000_vm10  ;;  %v942_v38 = vadd.f32 %v9903_v55, %v856_v27 }
  0x61   : > { %vm1020_vm0 = vcmp.ge.f32.partialorder %v940_v8, 0.0  ;;  %v1100_v58 = vmul.f32 0.01, %v940_v8  ;;  %vm14004_vm2 = vcmp.ge.s32.totalorder %v9798_v21, 1  ;;  %v14005_v29 = vmov 0 }
  0x62   : > { %v10570_v36 = vsel %vm1019_vm12, %v939_v56, %v1099_v23  ;;  %vm10576_vm13 = vmand %vm10547_vm4, %vm14004_vm2  ;;  %vm1021_vm14 = vcmp.ge.f32.partialorder %v941_v4, 0.0  ;;  %v1101_v10 = vmul.f32 0.01, %v941_v4  ;;  %v943_v30 = vadd.f32 %v9903_v55, %v857_v24  ;;  %v6753_v23 = vld [vmem:[%s13340_s2 + $0x2d0] sm:$0xff]  ;;  %v519_v24 = vld [vmem:[%s9866_s8 + $0x108] sm:$0xff] }
  0x63   : > { %14003 = vst [vmem:[#allocation63_spill] sm:$0xff] %v10570_v36  ;;  %v14006_v29 = vsel %vm10576_vm13, 4294967295, %v14005_v29  ;;  %vm14008_vm10 = vcmask 1046528   ;;  %v10587_v27 = vsel %vm10443_vm1, %v10570_v36, 0.0  ;;  %v1180_v56 = vsel %vm1020_vm0, %v940_v8, %v1100_v58 }
  0x64   : > { %14007 = vst [vmem:[#allocation64_spill] sm:$0xff] %v14006_v29  ;;  %v10582_v59 = vsel %vm14008_vm10, %v1544_v1, %v1546_v11  ;;  %vm1022_vm12 = vcmp.ge.f32.partialorder %v942_v38, 0.0  ;;  %v1548_v1 = vrot.slane %v10587_v27, 1  ;;  %v10600_v36 = vsel %vm10565_vm5, %v1180_v56, 0.0  ;;  %vm14011_vm2 = vmmov %vm14008_vm10  ;;  %v1407_v29 = vld [vmem:[%s13340_s2 + $0x30] sm:$0xff] }
  0x65   : > { %14009 = vst [vmem:[#allocation65_spill] sm:$0xff] %v10582_v59  ;;  %8173 = vmatmul.mubr.f32.gmra.mrb[16].mxu0 %v10582_v59  ;;  %v1102_v8 = vmul.f32 0.01, %v942_v38  ;;  %v10602_v58 = vsel %vm1021_vm14, %v941_v4, %v1101_v10  ;;  %7667 = vmatmul.mubr.f32.gmra.mrb[20].mxu1 %v10582_v59  ;;  %v1550_v51 = vrot.slane %v10600_v36, 1  ;;  %vm1023_vm0 = vcmp.ge.f32.partialorder %v943_v30, 0.0  ;;  %v522_v59 = vld [vmem:[%s9866_s8 + $0x120] sm:$0xff]  ;;  %vm14014_vm14 = vmmov %vm14011_vm2 }
  0x66   : > { %14010 = vst [vmem:[#allocation66_spill] sm:$0xff] %v10602_v58  ;;  %v10610_v47 = vsel %vm10576_vm13, %v10602_v58, 0.0  ;;  %v1103_v3 = vmul.f32 0.01, %v943_v30  ;;  %v10614_v16 = vsel %vm14011_vm2, %v1546_v11, %v1548_v1  ;;  %v8936_v56 = vpack.c.bf16 %v6754_v9, %v6753_v23  ;;  %v1408_v58 = vld [vmem:[%s13340_s2 + $0x38] sm:$0xff] }
  0x67   : > { %14012 = vst [vmem:[#allocation67_spill] sm:$0xff] %v10614_v16  ;;  %v10617_v10 = vsel %vm1022_vm12, %v942_v38, %v1102_v8  ;;  %v1552_v4 = vrot.slane %v10610_v47, 1  ;;  %8175 = vmatprep.mubr.f32.mxu0 %v10614_v16  ;;  %v10629_v11 = vsel %vm14014_vm14, %v1548_v1, %v1550_v51  ;;  %7669 = vmatprep.mubr.f32.mxu1 %v10614_v16  ;;  %v523_v8 = vld [vmem:[%s9866_s8 + $0x128] sm:$0xff]  ;;  %vm14017_vm5 = vcmp.le.s32.totalorder %v9953_v17, 32 }
  0x68   : > { %14013 = vst [vmem:[#allocation68_spill] sm:$0xff] %v10617_v10  ;;  %14015 = vst [vmem:[#allocation69_spill] sm:$0xff] %v10629_v11  ;;  %v10634_v38 = vsel %vm10547_vm4, %v10617_v10, 0.0  ;;  %v10636_v9 = vsel %vm1023_vm0, %v943_v30, %v1103_v3  ;;  %v858_v23 = vmul.f32 %v9898_v54, %v519_v24  ;;  %8937 = vmatprep.subr.bf16.mxu0 %v8936_v56  ;;  %vm14018_vm10 = vcmp.ge.s32.totalorder %v9953_v17, 1 }
  0x69   : > { %14016 = vst [vmem:[#allocation70_spill] sm:$0xff] %v10636_v9  ;;  %8176 = vmatmul.mubr.f32.gmra.mrb[18].mxu0 %v10629_v11  ;;  %v1553_v7 = vrot.slane %v10634_v38, 1  ;;  %v10646_v51 = vsel %vm10547_vm4, %v10636_v9, 0.0  ;;  %v859_v1 = vmul.f32 %v9898_v54, %v520_v28  ;;  %v860_v3 = vmul.f32 %v9898_v54, %v521_v12  ;;  %7670 = vmatmul.mubr.f32.gmra.mrb[22].mxu1 %v10629_v11  ;;  %vm10657_vm12 = vmand %vm14018_vm10, %vm14017_vm5 }
  0x6a   : > { %v1555_v30 = vrot.slane %v10646_v51, 1  ;;  %8939 = vmatpush3.bf16.msra.mxu0 %v8936_v56  ;;  %v944_v24 = vadd.f32 %v9903_v55, %v858_v23  ;;  %v14019_v16 = vmov 0  ;;  %v861_v9 = vmul.f32 %v9898_v54, %v522_v59  ;;  %vm14022_vm0 = vmmov %vm14011_vm2 }
  0x6b   : > { %v14020_v16 = vsel %vm10657_vm12, 4294967295, %v14019_v16  ;;  %v8800_v28 = vpack.c.bf16 %v1408_v58, %v1407_v29  ;;  %v10663_v12 = vsel %vm14022_vm0, %v1552_v4, %v1553_v7  ;;  %v945_v56 = vadd.f32 %v9903_v55, %v859_v1  ;;  %vm14024_vm2 = vmmov %vm14022_vm0  ;;  %v6755_v58 = vld [vmem:[%s13340_s2 + $0x2e0] sm:$0xff] }
  0x6c   : > { %14021 = vst [vmem:[#allocation71_spill] sm:$0xff] %v14020_v16  ;;  %14023 = vst [vmem:[#allocation72_spill] sm:$0xff] %v10663_v12  ;;  %v946_v23 = vadd.f32 %v9903_v55, %v860_v3  ;;  %v862_v11 = vmul.f32 %v9898_v54, %v523_v8  ;;  %8178 = vmatprep.mubr.f32.mxu0 %v10663_v12  ;;  %v10670_v17 = vsel %vm14024_vm2, %v1553_v7, %v1555_v30  ;;  %v6756_v7 = vld [vmem:[%s13340_s2 + $0x2e8] sm:$0xff]  ;;  %v14030_v8 = vmov 0 }
  0x6d   : > { %14025 = vst [vmem:[#allocation73_spill] sm:$0xff] %v10670_v17  ;;  %vm1024_vm14 = vcmp.ge.f32.partialorder %v944_v24, 0.0  ;;  %v1104_v10 = vmul.f32 0.01, %v944_v24  ;;  %vm14026_vm5 = vcmp.le.s32.totalorder %v9849_v37, 32  ;;  %7672 = vmatprep.mubr.f32.mxu1 %v10663_v12  ;;  %v947_v29 = vadd.f32 %v9903_v55, %v861_v9  ;;  %8179 = vmatmul.mubr.f32.gmra.mrb[20].mxu0 %v10670_v17 }
  0x6e   : > { %vm10676_vm10 = vmand %vm10547_vm4, %vm14026_vm5  ;;  %vm1025_vm0 = vcmp.ge.f32.partialorder %v945_v56, 0.0  ;;  %v1105_v4 = vmul.f32 0.01, %v945_v56  ;;  %vm14029_vm2 = vcmp.ge.s32.totalorder %v9798_v21, 1  ;;  %vm1026_vm13 = vcmp.ge.f32.partialorder %v946_v23, 0.0  ;;  %8801 = vmatprep.subr.bf16.mxu1 %v8800_v28  ;;  %7673 = vmatmul.mubr.f32.gmra.mrb[24].mxu1 %v10670_v17 }
  0x6f   : > { %vm10693_vm5 = vmand %vm10657_vm12, %vm14029_vm2  ;;  %v1106_v9 = vmul.f32 0.01, %v946_v23  ;;  %v10697_v1 = vsel %vm1024_vm14, %v944_v24, %v1104_v10  ;;  %vm1027_vm1 = vcmp.ge.f32.partialorder %v947_v29, 0.0  ;;  %v1107_v3 = vmul.f32 0.01, %v947_v29  ;;  %8803 = vmatpush3.bf16.msra.mxu1 %v8800_v28 }
  0x70   : > { %v14031_v8 = vsel %vm10693_vm5, 4294967295, %v14030_v8  ;;  %14033 = vst [vmem:[#allocation75_spill] sm:$0xff] %v10697_v1  ;;  %v948_v12 = vadd.f32 %v9903_v55, %v862_v11  ;;  %v10704_v33 = vsel %vm10547_vm4, %v10697_v1, 0.0  ;;  %v1185_v22 = vsel %vm1025_vm0, %v945_v56, %v1105_v4  ;;  %v525_v56 = vld [vmem:[%s9866_s8 + $0x138] sm:$0x3]  ;;  %v526_v4 = vld [vmem:[%s9866_s8 + $0x140] sm:$0xff] }
  0x71   : > { %14032 = vst [vmem:[#allocation74_spill] sm:$0xff] %v14031_v8  ;;  %v10706_v32 = vsel %vm1026_vm13, %v946_v23, %v1106_v9  ;;  %v8940_v52 = vpack.c.bf16 %v6756_v7, %v6755_v58  ;;  %v1557_v10 = vrot.slane %v10704_v33, 1  ;;  %v10712_v24 = vsel %vm10676_vm10, %v1185_v22, 0.0  ;;  %v527_v9 = vld [vmem:[%s9866_s8 + $0x148] sm:$0xff] }
  0x72   : > { %14034 = vst [vmem:[#allocation76_spill] sm:$0xff] %v10706_v32  ;;  %v10714_v55 = vsel %vm1027_vm1, %v947_v29, %v1107_v3  ;;  %v10719_v11 = vsel %vm10693_vm5, %v10706_v32, 0.0  ;;  %v1559_v23 = vrot.slane %v10712_v24, 1  ;;  %vm1028_vm13 = vcmp.ge.f32.partialorder %v948_v12, 0.0 }
  0x73   : > { %14035 = vst [vmem:[#allocation77_spill] sm:$0xff] %v10714_v55  ;;  %v10726_v28 = vsel %vm10657_vm12, %v10714_v55, 0.0  ;;  %v1561_v59 = vrot.slane %v10719_v11, 1  ;;  %8941 = vmatprep.subr.bf16.mxu0 %v8940_v52  ;;  %vm14036_vm1 = vcmask 1046528   ;;  %v1108_v58 = vmul.f32 0.01, %v948_v12 }
  0x74   : > { %v10730_v22 = vsel %vm14036_vm1, %v1555_v30, %v1557_v10  ;;  %v1562_v29 = vrot.slane %v10726_v28, 1  ;;  %8943 = vmatpush3.bf16.msra.mxu0 %v8940_v52  ;;  %v863_v7 = vmul.f32 %v9898_v54, %v524_v2  ;;  %vm14038_vm14 = vmmov %vm14036_vm1  ;;  %v864_v17 = vmul.f32 %v9898_v54, %v525_v56  ;;  %v528_v30 = vld [vmem:[%s9866_s8 + $0x150] sm:$0xff] }
  0x75   : > { %14037 = vst [vmem:[#allocation78_spill] sm:$0xff] %v10730_v22  ;;  %8181 = vmatprep.mubr.f32.mxu0 %v10730_v22  ;;  %v10738_v3 = vsel %vm14038_vm14, %v1557_v10, %v1559_v23  ;;  %7675 = vmatprep.mubr.f32.mxu1 %v10730_v22  ;;  %vm625_vm0 = vcmp.le.s32.totalorder %v10027_v62, 32  ;;  %vm14040_vm2 = vmmov %vm14036_vm1  ;;  %v10750_v52 = vsel %vm1028_vm13, %v948_v12, %v1108_v58  ;;  %v10755_v10 = vld [vmem:[%s13342_s4] ss:$0 sm:$0xff]  ;;  %v6757_v56 = vld [vmem:[%s13340_s2 + $0x2f0] sm:$0xff]  ;;  %vm14043_vm1 = vcmp.le.s32.totalorder %v9849_v37, 32 }
  0x76   : > { %14039 = vst [vmem:[#allocation79_spill] sm:$0xff] %v10738_v3  ;;  %8182 = vmatmul.mubr.f32.gmra.mrb[22].mxu0 %v10738_v3  ;;  %v10747_v2 = vsel %vm14040_vm2, %v1561_v59, %v1562_v29  ;;  %14042 = vst [vmem:[#allocation81_spill] sm:$0xff] %v10750_v52  ;;  %v949_v54 = vadd.f32 %v10755_v10, %v863_v7  ;;  %7676 = vmatmul.mubr.f32.gmra.mrb[26].mxu1 %v10738_v3  ;;  %v10764_v23 = vsel %vm10657_vm12, %v10750_v52, 0.0  ;;  %v10771_v59 = vld [vmem:[%s13341_s3] ss:$0 sm:$0xff]  ;;  %v6758_v3 = vld [vmem:[%s13340_s2 + $0x2f8] sm:$0xff] }
  0x77   : > { %14041 = vst [vmem:[#allocation80_spill] sm:$0xff] %v10747_v2  ;;  %8184 = vmatprep.mubr.f32.mxu0 %v10747_v2  ;;  %v950_v12 = vadd.f32 %v10755_v10, %v864_v17  ;;  %7678 = vmatprep.mubr.f32.mxu1 %v10747_v2  ;;  %v865_v58 = vmul.f32 %v10771_v59, %v526_v4  ;;  %v1564_v17 = vrot.slane %v10764_v23, 1  ;;  %vm10786_vm14 = vmand %vm10657_vm12, %vm14043_vm1  ;;  %vm13509_vm2 = vcmask 1045504  }
  0x78   : > { %v866_v7 = vmul.f32 %v10771_v59, %v527_v9  ;;  %vm1029_vm13 = vcmp.ge.f32.partialorder %v949_v54, 0.0  ;;  %v1109_v2 = vmul.f32 0.01, %v949_v54  ;;  %v867_v9 = vmul.f32 %v10771_v59, %v528_v30 }
  0x79   : > { %vm1030_vm10 = vcmp.ge.f32.partialorder %v950_v12, 0.0  ;;  %v1110_v22 = vmul.f32 0.01, %v950_v12  ;;  %vm14046_vm5 = vcmp.ge.s32.totalorder %v10027_v62, 1  ;;  %v14047_v52 = vmov 0 }
  0x7a   : > { %vm10795_vm4 = vmand %vm14046_vm5, %vm625_vm0  ;;  %v951_v55 = vadd.f32 %v10755_v10, %v865_v58  ;;  %v952_v8 = vadd.f32 %v10755_v10, %v866_v7  ;;  %vm14050_vm1 = vcmask 1046528   ;;  %v10804_v30 = vsel %vm1029_vm13, %v949_v54, %v1109_v2 }
  0x7b   : > { %v14048_v52 = vsel %vm10795_vm4, 4294967295, %v14047_v52  ;;  %v10802_v32 = vsel %vm14050_vm1, %v1562_v29, %v1564_v17  ;;  %14052 = vst [vmem:[#allocation84_spill] sm:$0xff] %v10804_v30  ;;  %v953_v1 = vadd.f32 %v10755_v10, %v867_v9  ;;  %v8944_v14 = vpack.c.bf16 %v6758_v3, %v6757_v56  ;;  %v530_v29 = vld [vmem:[%s9866_s8 + $0x160] sm:$0x3] }
  0x7c   : > { %14049 = vst [vmem:[#allocation82_spill] sm:$0xff] %v14048_v52  ;;  %14051 = vst [vmem:[#allocation83_spill] sm:$0xff] %v10802_v32  ;;  %8185 = vmatmul.mubr.f32.gmra.mrb[24].mxu0 %v10802_v32  ;;  %v10812_v62 = vsel %vm10657_vm12, %v10804_v30, 0.0  ;;  %v1190_v26 = vsel %vm1030_vm10, %v950_v12, %v1110_v22  ;;  %vm1031_vm5 = vcmp.ge.f32.partialorder %v951_v55, 0.0  ;;  %vm1032_vm0 = vcmp.ge.f32.partialorder %v952_v8, 0.0  ;;  %7679 = vmatmul.mubr.f32.gmra.mrb[28].mxu1 %v10802_v32  ;;  %v1409_v30 = vld [vmem:[%s13340_s2 + $0x40] sm:$0xff] }
  0x7d   : > { %v1566_v2 = vrot.slane %v10812_v62, 1  ;;  %v10819_v54 = vsel %vm10786_vm14, %v1190_v26, 0.0  ;;  %vm14053_vm13 = vcmp.ge.s32.totalorder %v9798_v21, 1  ;;  %v14054_v3 = vmov 0  ;;  %8945 = vmatprep.subr.bf16.mxu0 %v8944_v14 }
  0x7e   : > { %vm10825_vm1 = vmand %vm10795_vm4, %vm14053_vm13  ;;  %v1111_v22 = vmul.f32 0.01, %v951_v55  ;;  %v1112_v56 = vmul.f32 0.01, %v952_v8  ;;  %v1568_v12 = vrot.slane %v10819_v54, 1  ;;  %vm1033_vm10 = vcmp.ge.f32.partialorder %v953_v1, 0.0  ;;  %8947 = vmatpush3.bf16.msra.mxu0 %v8944_v14 }
  0x7f   : > { %v14055_v3 = vsel %vm10825_vm1, 4294967295, %v14054_v3  ;;  %v1113_v58 = vmul.f32 0.01, %v953_v1  ;;  %v868_v7 = vmul.f32 %v10771_v59, %v529_v0  ;;  %vm14057_vm14 = vcmask 1046528   ;;  %v1410_v14 = vld [vmem:[%s13340_s2 + $0x48] sm:$0xff] }
  0x80   : > { %14056 = vst [vmem:[#allocation85_spill] sm:$0xff] %v14055_v3  ;;  %v10832_v26 = vsel %vm14057_vm14, %v1564_v17, %v1566_v2  ;;  %v10835_v4 = vsel %vm1031_vm5, %v951_v55, %v1111_v22  ;;  %v10838_v9 = vsel %vm1032_vm0, %v952_v8, %v1112_v56  ;;  %v869_v32 = vmul.f32 %v10771_v59, %v530_v29  ;;  %vm14061_vm13 = vmmov %vm14057_vm14  ;;  %v6759_v29 = vld [vmem:[%s13340_s2 + $0x300] sm:$0xff] }
  0x81   : > { %14058 = vst [vmem:[#allocation86_spill] sm:$0xff] %v10832_v26  ;;  %14059 = vst [vmem:[#allocation87_spill] sm:$0xff] %v10835_v4  ;;  %8187 = vmatprep.mubr.f32.mxu0 %v10832_v26  ;;  %v10849_v0 = vsel %vm14061_vm13, %v1566_v2, %v1568_v12  ;;  %v10854_v8 = vsel %vm10825_vm1, %v10835_v4, 0.0  ;;  %v10859_v55 = vsel %vm10795_vm4, %v10838_v9, 0.0  ;;  %v10861_v17 = vsel %vm1033_vm10, %v953_v1, %v1113_v58  ;;  %v6760_v2 = vld [vmem:[%s13340_s2 + $0x308] sm:$0xff] }
  0x82   : > { %14060 = vst [vmem:[#allocation88_spill] sm:$0xff] %v10838_v9  ;;  %14062 = vst [vmem:[#allocation89_spill] sm:$0xff] %v10849_v0  ;;  %7681 = vmatprep.mubr.f32.mxu1 %v10832_v26  ;;  %8188 = vmatmul.mubr.f32.gmra.mrb[26].mxu0 %v10849_v0  ;;  %v1570_v22 = vrot.slane %v10854_v8, 1  ;;  %v1571_v56 = vrot.slane %v10859_v55, 1  ;;  %v10876_v1 = vsel %vm10795_vm4, %v10861_v17, 0.0  ;;  %v954_v12 = vadd.f32 %v10755_v10, %v868_v7 }
  0x83   : > { %14063 = vst [vmem:[#allocation90_spill] sm:$0xff] %v10861_v17  ;;  %7682 = vmatmul.mubr.f32.gmra.mrb[30].mxu1 %v10849_v0  ;;  %v1573_v58 = vrot.slane %v10876_v1, 1  ;;  %v955_v26 = vadd.f32 %v10755_v10, %v869_v32  ;;  %v2504_v9 = vrot.slane %v10009_v42, 2  ;;  %v8804_v3 = vpack.c.bf16 %v1410_v14, %v1409_v30  ;;  %vm14064_vm5 = vmmov %vm14061_vm13  ;;  %v532_v0 = vld [vmem:[%s9866_s8 + $0x170] sm:$0xff] }
  0x84   : > { %v10884_v4 = vsel %vm14064_vm5, %v1570_v22, %v1571_v56  ;;  %vm1034_vm0 = vcmp.ge.f32.partialorder %v954_v12, 0.0  ;;  %v1114_v16 = vmul.f32 0.01, %v954_v12  ;;  %v10886_v17 = vpack.c.bf16 %v6760_v2, %v6759_v29  ;;  %vm14066_vm10 = vmmov %vm14064_vm5 }
  0x85   : > { %14065 = vst [vmem:[#allocation91_spill] sm:$0xff] %v10884_v4  ;;  %8190 = vmatprep.mubr.f32.mxu0 %v10884_v4  ;;  %v10890_v7 = vsel %vm14066_vm10, %v1571_v56, %v1573_v58  ;;  %vm14068_vm14 = vcmp.le.s32.totalorder %v9849_v37, 32  ;;  %vm1035_vm5 = vcmp.ge.f32.partialorder %v955_v26, 0.0  ;;  %v1115_v42 = vmul.f32 0.01, %v955_v26  ;;  %7684 = vmatprep.mubr.f32.mxu1 %v10884_v4 }
  0x86   : > { %14067 = vst [vmem:[#allocation92_spill] sm:$0xff] %v10890_v7  ;;  %vm10896_vm13 = vmand %vm10795_vm4, %vm14068_vm14  ;;  %v14071_v30 = vrot.slane %v10004_v41, 2  ;;  %8191 = vmatmul.mubr.f32.gmra.mrb[28].mxu0 %v10890_v7  ;;  %v10907_v29 = vsel %vm1034_vm0, %v954_v12, %v1114_v16  ;;  %v14074_v2 = vrot.slane %v10061_v20, 2  ;;  %v2508_v56 = vrot.slane %v10112_v15, 2  ;;  %v531_v41 = vld [vmem:[%s9866_s8 + $0x168] sm:$0xff]  ;;  %8805 = vmatprep.subr.bf16.mxu1 %v8804_v3 }
  0x87   : > { %14073 = vst [vmem:[#allocation94_spill] sm:$0xff] %v10907_v29  ;;  %7685 = vmatmul.mubr.f32.gmra.mrb[32].mxu1 %v10890_v7  ;;  %v2510_v4 = vrot.slane %v10133_v48, 2  ;;  %v1195_v16 = vsel %vm1035_vm5, %v955_v26, %v1115_v42  ;;  %8949 = vmatprep.subr.bf16.mxu0 %v10886_v17  ;;  %vm610_vm0 = vcmp.ge.s32.totalorder %v10174_v35, 1  ;;  %vm626_vm10 = vcmp.le.s32.totalorder %v10174_v35, 32 }
  0x88   : > { %v10904_v14 = vsel %vm13509_vm2, %v14071_v30, %v2504_v9  ;;  %v10913_v22 = vsel %vm13509_vm2, %v2504_v9, %v14074_v2  ;;  %v10922_v30 = vsel %vm10795_vm4, %v10907_v29, 0.0  ;;  %v533_v9 = vld [vmem:[%s9866_s8 + $0x178] sm:$0xff]  ;;  %v10931_v48 = vsel %vm10896_vm13, %v1195_v16, 0.0  ;;  %8807 = vmatpush3.bf16.msra.mxu1 %v8804_v3  ;;  %vm10948_vm13 = vmand %vm610_vm0, %vm626_vm10 }
  0x89   : > { %14072 = vst [vmem:[#allocation93_spill] sm:$0xff] %v10904_v14  ;;  %14075 = vst [vmem:[#allocation95_spill] sm:$0xff] %v10913_v22  ;;  %v1575_v15 = vrot.slane %v10922_v30, 1  ;;  %v14076_v12 = vmov %v14074_v2  ;;  %v10939_v26 = vsel %vm13509_vm2, %v2508_v56, %v2510_v4  ;;  %v1577_v42 = vrot.slane %v10931_v48, 1 }
  0x8a   : > { %v10936_v2 = vsel %vm13509_vm2, %v14076_v12, %v2508_v56  ;;  %14078 = vst [vmem:[#allocation97_spill] sm:$0xff] %v10939_v26  ;;  %v870_v35 = vmul.f32 %v10771_v59, %v531_v41  ;;  %v871_v7 = vmul.f32 %v10771_v59, %v532_v0  ;;  %v2512_v32 = vrot.slane %v10182_v45, 2  ;;  %v534_v41 = vld [vmem:[%s9866_s8 + $0x180] sm:$0xff] }
  0x8b   : > { %14077 = vst [vmem:[#allocation96_spill] sm:$0xff] %v10936_v2  ;;  %vm14079_vm14 = vcmask 1046528   ;;  %v14081_v20 = vmov 0  ;;  %v2513_v3 = vrot.slane %v10197_v57, 2  ;;  %v872_v4 = vmul.f32 %v10771_v59, %v533_v9 }
  0x8c   : > { %v10946_v16 = vsel %vm14079_vm14, %v1573_v58, %v1575_v15  ;;  %v14082_v20 = vsel %vm10948_vm13, 4294967295, %v14081_v20  ;;  %v2515_v56 = vrot.slane %v10225_v44, 2  ;;  %vm14084_vm5 = vmmov %vm14079_vm14  ;;  %v956_v45 = vadd.f32 %v10755_v10, %v870_v35 }
  0x8d   : > { %14080 = vst [vmem:[#allocation98_spill] sm:$0xff] %v10946_v16  ;;  %14083 = vst [vmem:[#allocation99_spill] sm:$0xff] %v14082_v20  ;;  %8193 = vmatprep.mubr.f32.mxu0 %v10946_v16  ;;  %v10957_v0 = vsel %vm14084_vm5, %v1575_v15, %v1577_v42  ;;  %7687 = vmatprep.mubr.f32.mxu1 %v10946_v16  ;;  %v957_v58 = vadd.f32 %v10755_v10, %v871_v7  ;;  %v2517_v12 = vrot.slane %v10259_v6, 2  ;;  %v535_v15 = vld [vmem:[%s9866_s8 + $0x188] sm:$0x3]  ;;  %v14089_v6 = vmov 0 }
  0x8e   : > { %14085 = vst [vmem:[#allocation100_spill] sm:$0xff] %v10957_v0  ;;  %8194 = vmatmul.mubr.f32.gmra.mrb[30].mxu0 %v10957_v0  ;;  %7688 = vmatmul.mubr.f32.gmra.mrb[34].mxu1 %v10957_v0  ;;  %v10967_v57 = vsel %vm13509_vm2, %v2512_v32, %v2513_v3  ;;  %v958_v44 = vadd.f32 %v10755_v10, %v872_v4  ;;  %v2519_v42 = vrot.slane %v10267_v40, 2  ;;  %vm14088_vm0 = vcmp.ge.s32.totalorder %v9798_v21, 1 }
  0x8f   : > { %14086 = vst [vmem:[#allocation101_spill] sm:$0xff] %v10967_v57  ;;  %v10971_v9 = vsel %vm13509_vm2, %v2513_v3, %v2515_v56  ;;  %8276 = vmatprep.mubr.f32.mxu0 %v10904_v14  ;;  %vm10980_vm10 = vmand %vm10948_vm13, %vm14088_vm0  ;;  %vm1036_vm14 = vcmp.ge.f32.partialorder %v956_v45, 0.0  ;;  %vm1037_vm5 = vcmp.ge.f32.partialorder %v957_v58, 0.0  ;;  %v1116_v7 = vmul.f32 0.01, %v956_v45 }
  0x90   : > { %14087 = vst [vmem:[#allocation102_spill] sm:$0xff] %v10971_v9  ;;  %v14090_v6 = vsel %vm10980_vm10, 4294967295, %v14089_v6  ;;  %v1117_v35 = vmul.f32 0.01, %v957_v58  ;;  %vm1038_vm2 = vcmp.ge.f32.partialorder %v958_v44, 0.0  ;;  %v873_v3 = vmul.f32 %v10771_v59, %v534_v41  ;;  %v536_v41 = vld [vmem:[%s9866_s8 + $0x190] sm:$0xff] }
  0x91   : > { %14091 = vst [vmem:[#allocation103_spill] sm:$0xff] %v14090_v6  ;;  %v1118_v32 = vmul.f32 0.01, %v958_v44  ;;  %vm14092_vm4 = vcmask 1045504   ;;  %v10988_v4 = vsel %vm1036_vm14, %v956_v45, %v1116_v7  ;;  %v874_v16 = vmul.f32 %v10771_v59, %v535_v15 }
  0x92   : > { %v10986_v40 = vsel %vm14092_vm4, %v2515_v56, %v2517_v12  ;;  %14094 = vst [vmem:[#allocation105_spill] sm:$0xff] %v10988_v4  ;;  %v10990_v0 = vsel %vm1037_vm5, %v957_v58, %v1117_v35  ;;  %vm14096_vm0 = vmmov %vm14092_vm4  ;;  %8277 = vmatmul.mubr.f32.vlgmr.msra.gmra.mrb[0].mxu0 %v10913_v22  ;;  %v11000_v29 = vsel %vm10980_vm10, %v10988_v4, 0.0  ;;  %v959_v58 = vadd.f32 %v10755_v10, %v873_v3  ;;  %v539_v4 = vld [vmem:[%s9866_s8 + $0x1a8] sm:$0xff] }
  0x93   : > { %14093 = vst [vmem:[#allocation104_spill] sm:$0xff] %v10986_v40  ;;  %14095 = vst [vmem:[#allocation106_spill] sm:$0xff] %v10990_v0  ;;  %v10994_v14 = vsel %vm14096_vm0, %v2517_v12, %v2519_v42  ;;  %v11005_v56 = vsel %vm10948_vm13, %v10990_v0, 0.0  ;;  %v11007_v45 = vsel %vm1038_vm2, %v958_v44, %v1118_v32  ;;  %8951 = vmatpush3.bf16.msra.mxu0 %v10886_v17  ;;  %8279 = vmatprep.mubr.f32.mxu0 %v10936_v2  ;;  %v537_v32 = vld [vmem:[%s9866_s8 + $0x198] sm:$0xff]  ;;  %vm14099_vm2 = vcmask 1046528   ;;  %v538_v0 = vld [vmem:[%s9866_s8 + $0x1a0] sm:$0xff] }
  0x94   : > { %14097 = vst [vmem:[#allocation107_spill] sm:$0xff] %v10994_v14  ;;  %14098 = vst [vmem:[#allocation108_spill] sm:$0xff] %v11007_v45  ;;  %v1579_v12 = vrot.slane %v11000_v29, 1  ;;  %v1580_v15 = vrot.slane %v11005_v56, 1  ;;  %v11018_v42 = vsel %vm10948_vm13, %v11007_v45, 0.0  ;;  %v960_v7 = vadd.f32 %v10755_v10, %v874_v16 }
  0x95   : > { %v1582_v44 = vrot.slane %v11018_v42, 1  ;;  %vm1039_vm4 = vcmp.ge.f32.partialorder %v959_v58, 0.0  ;;  %v1119_v35 = vmul.f32 0.01, %v959_v58  ;;  %v589_v17 = vadd.s32 10, %v9773_v13  ;;  %vm14104_vm10 = vmmov %vm14099_vm2 }
  0x96   : > { %v11025_v3 = vsel %vm14099_vm2, %v1579_v12, %v1580_v15  ;;  %vm14101_vm14 = vcmp.le.s32.totalorder %v9849_v37, 32  ;;  %vm1040_vm0 = vcmp.ge.f32.partialorder %v960_v7, 0.0  ;;  %v1120_v16 = vmul.f32 0.01, %v960_v7  ;;  %8280 = vmatmul.mubr.f32.gmra.mrb[2].mxu0 %v10939_v26 }
  0x97   : > { %14100 = vst [vmem:[#allocation109_spill] sm:$0xff] %v11025_v3  ;;  %vm11031_vm5 = vmand %vm10948_vm13, %vm14101_vm14  ;;  %v875_v22 = vmul.f32 %v10771_v59, %v536_v41  ;;  %7690 = vmatprep.mubr.f32.mxu1 %v11025_v3  ;;  %v11039_v45 = vsel %vm14104_vm10, %v1580_v15, %v1582_v44  ;;  %v11041_v12 = vsel %vm1039_vm4, %v959_v58, %v1119_v35  ;;  %vm611_vm2 = vcmp.ge.s32.totalorder %v589_v17, 1  ;;  %v1411_v35 = vld [vmem:[%s13340_s2 + $0x50] sm:$0xff] }
  0x98   : > { %14105 = vst [vmem:[#allocation110_spill] sm:$0xff] %v11039_v45  ;;  %14106 = vst [vmem:[#allocation111_spill] sm:$0xff] %v11041_v12  ;;  %vm627_vm1 = vcmp.le.s32.totalorder %v589_v17, 32  ;;  %8282 = vmatprep.mubr.f32.mxu0 %v10967_v57  ;;  %7691 = vmatmul.mubr.f32.gmra.mrb[36].mxu1 %v11039_v45  ;;  %v11049_v41 = vsel %vm10948_vm13, %v11041_v12, 0.0  ;;  %v1200_v26 = vsel %vm1040_vm0, %v960_v7, %v1120_v16  ;;  %v14107_v3 = vmov 0  ;;  %v1412_v17 = vld [vmem:[%s13340_s2 + $0x58] sm:$0xff] }
  0x99   : > { %vm11051_vm14 = vmand %vm611_vm2, %vm627_vm1  ;;  %v876_v58 = vmul.f32 %v10771_v59, %v537_v32  ;;  %v961_v15 = vadd.f32 %v10755_v10, %v875_v22  ;;  %v1584_v45 = vrot.slane %v11049_v41, 1  ;;  %v11066_v7 = vsel %vm11031_vm5, %v1200_v26, 0.0 }
  0x9a   : > { %v14108_v3 = vsel %vm11051_vm14, 4294967295, %v14107_v3  ;;  %v2521_v16 = vrot.slane %v10301_v34, 2  ;;  %v2522_v32 = vrot.slane %v10308_v53, 2  ;;  %v1586_v22 = vrot.slane %v11066_v7, 1  ;;  %v6761_v34 = vld [vmem:[%s13340_s2 + $0x310] sm:$0xff]  ;;  %v6762_v53 = vld [vmem:[%s13340_s2 + $0x318] sm:$0xff]  ;;  %8283 = vmatmul.mubr.f32.gmra.mrb[4].mxu0 %v10971_v9 }
  0x9b   : > { %14109 = vst [vmem:[#allocation112_spill] sm:$0xff] %v14108_v3  ;;  %vm14110_vm1 = vcmp.ge.s32.totalorder %v9798_v21, 1  ;;  %v14111_v57 = vmov 0  ;;  %v962_v12 = vadd.f32 %v10755_v10, %v876_v58  ;;  %vm1041_vm4 = vcmp.ge.f32.partialorder %v961_v15, 0.0  ;;  %8285 = vmatprep.mubr.f32.mxu0 %v10986_v40 }
  0x9c   : > { %vm11075_vm10 = vmand %vm11051_vm14, %vm14110_vm1  ;;  %v1121_v2 = vmul.f32 0.01, %v961_v15  ;;  %vm14114_vm5 = vcmask 1046528   ;;  %vm14116_vm0 = vcmask 1045504   ;;  %v877_v58 = vmul.f32 %v10771_v59, %v538_v0 }
  0x9d   : > { %v14112_v57 = vsel %vm11075_vm10, 4294967295, %v14111_v57  ;;  %v11088_v26 = vsel %vm14114_vm5, %v1582_v44, %v1584_v45  ;;  %v11091_v20 = vsel %vm14116_vm0, %v2521_v16, %v2522_v32  ;;  %v8808_v6 = vpack.c.bf16 %v1412_v17, %v1411_v35  ;;  %vm14118_vm2 = vmmov %vm14114_vm5 }
  0x9e   : > { %14113 = vst [vmem:[#allocation113_spill] sm:$0xff] %v14112_v57  ;;  %14115 = vst [vmem:[#allocation114_spill] sm:$0xff] %v11088_v26  ;;  %7693 = vmatprep.mubr.f32.mxu1 %v11088_v26  ;;  %v11098_v52 = vsel %vm14118_vm2, %v1584_v45, %v1586_v22  ;;  %vm1042_vm1 = vcmp.ge.f32.partialorder %v962_v12, 0.0  ;;  %v1122_v9 = vmul.f32 0.01, %v962_v12  ;;  %v11100_v44 = vsel %vm1041_vm4, %v961_v15, %v1121_v2 }
  0x9f   : > { %14117 = vst [vmem:[#allocation115_spill] sm:$0xff] %v11091_v20  ;;  %14119 = vst [vmem:[#allocation116_spill] sm:$0xff] %v11098_v52  ;;  %7694 = vmatmul.mubr.f32.gmra.mrb[38].mxu1 %v11098_v52  ;;  %v11106_v0 = vsel %vm11075_vm10, %v11100_v44, 0.0  ;;  %v963_v35 = vadd.f32 %v10755_v10, %v877_v58  ;;  %8809 = vmatprep.subr.bf16.mxu1 %v8808_v6  ;;  %v2524_v17 = vrot.slane %v10336_v19, 2  ;;  %v540_v45 = vld [vmem:[%s9866_s8 + $0x1b0] sm:$0x3] }
  0xa0   : > { %14120 = vst [vmem:[#allocation117_spill] sm:$0xff] %v11100_v44  ;;  %v8952_v16 = vpack.c.bf16 %v6762_v53, %v6761_v34  ;;  %v11111_v22 = vsel %vm1042_vm1, %v962_v12, %v1122_v9  ;;  %v1588_v26 = vrot.slane %v11106_v0, 1  ;;  %8811 = vmatpush3.bf16.msra.mxu1 %v8808_v6  ;;  %v878_v15 = vmul.f32 %v10771_v59, %v539_v4  ;;  %v541_v52 = vld [vmem:[%s9866_s8 + $0x1b8] sm:$0xff]  ;;  %vm14122_vm5 = vmmov %vm14116_vm0 }
  0xa1   : > { %14121 = vst [vmem:[#allocation118_spill] sm:$0xff] %v11111_v22  ;;  %v2526_v2 = vrot.slane %v10355_v39, 2  ;;  %8286 = vmatmul.mubr.f32.gmra.mrb[6].mxu0 %v10994_v14  ;;  %v11121_v58 = vsel %vm11051_vm14, %v11111_v22, 0.0  ;;  %vm1043_vm4 = vcmp.ge.f32.partialorder %v963_v35, 0.0  ;;  %v1123_v19 = vmul.f32 0.01, %v963_v35 }
  0xa2   : > { %v11124_v9 = vsel %vm14122_vm5, %v2522_v32, %v2524_v17  ;;  %8953 = vmatprep.subr.bf16.mxu0 %v8952_v16  ;;  %v1589_v6 = vrot.slane %v11121_v58, 1  ;;  %8288 = vmatprep.mubr.f32.mxu0 %v11091_v20  ;;  %v964_v39 = vadd.f32 %v10755_v10, %v878_v15  ;;  %v879_v12 = vmul.f32 %v10771_v59, %v540_v45  ;;  %v542_v14 = vld [vmem:[%s9866_s8 + $0x1c0] sm:$0xff] }
  0xa3   : > { %14123 = vst [vmem:[#allocation119_spill] sm:$0xff] %v11124_v9  ;;  %8955 = vmatpush3.bf16.msra.mxu0 %v8952_v16  ;;  %v11130_v4 = vsel %vm14116_vm0, %v2524_v17, %v2526_v2  ;;  %v11133_v34 = vsel %vm1043_vm4, %v963_v35, %v1123_v19  ;;  %v2528_v53 = vrot.slane %v10379_v31, 2  ;;  %v590_v32 = vadd.s32 11, %v9773_v13  ;;  %vm14127_vm4 = vmmov %vm14116_vm0 }
  0xa4   : > { %14124 = vst [vmem:[#allocation120_spill] sm:$0xff] %v11130_v4  ;;  %14125 = vst [vmem:[#allocation121_spill] sm:$0xff] %v11133_v34  ;;  %v880_v40 = vmul.f32 %v10771_v59, %v541_v52  ;;  %v11140_v22 = vsel %vm14118_vm2, %v1588_v26, %v1589_v6  ;;  %v11145_v17 = vsel %vm11051_vm14, %v11133_v34, 0.0  ;;  %vm1044_vm1 = vcmp.ge.f32.partialorder %v964_v39, 0.0 }
  0xa5   : > { %14126 = vst [vmem:[#allocation122_spill] sm:$0xff] %v11140_v22  ;;  %v1124_v16 = vmul.f32 0.01, %v964_v39  ;;  %7696 = vmatprep.mubr.f32.mxu1 %v11140_v22  ;;  %v1591_v31 = vrot.slane %v11145_v17, 1  ;;  %8289 = vmatmul.mubr.f32.gmra.mrb[8].mxu0 %v11124_v9  ;;  %v965_v35 = vadd.f32 %v10755_v10, %v879_v12  ;;  %v11152_v52 = vsel %vm14127_vm4, %v2526_v2, %v2528_v53  ;;  %v543_v2 = vld [vmem:[%s9866_s8 + $0x1c8] sm:$0xff] }
  0xa6   : > { %14128 = vst [vmem:[#allocation123_spill] sm:$0xff] %v11152_v52  ;;  %vm612_vm5 = vcmp.ge.s32.totalorder %v590_v32, 1  ;;  %8291 = vmatprep.mubr.f32.mxu0 %v11130_v4  ;;  %vm14130_vm0 = vcmp.le.s32.totalorder %v9849_v37, 32  ;;  %vm628_vm10 = vcmp.le.s32.totalorder %v590_v32, 32  ;;  %v881_v15 = vmul.f32 %v10771_v59, %v542_v14 }
  0xa7   : > { %v11154_v26 = vsel %vm1044_vm1, %v964_v39, %v1124_v16  ;;  %vm11161_vm2 = vmand %vm11051_vm14, %vm14130_vm0  ;;  %v966_v19 = vadd.f32 %v10755_v10, %v880_v40  ;;  %vm14133_vm4 = vcmask 1046528   ;;  %vm1045_vm1 = vcmp.ge.f32.partialorder %v965_v35, 0.0 }
  0xa8   : > { %14129 = vst [vmem:[#allocation124_spill] sm:$0xff] %v11154_v26  ;;  %v11169_v12 = vsel %vm14133_vm4, %v1589_v6, %v1591_v31  ;;  %v11174_v39 = vsel %vm11051_vm14, %v11154_v26, 0.0  ;;  %v1125_v53 = vmul.f32 0.01, %v965_v35  ;;  %vm11176_vm0 = vmand %vm612_vm5, %vm628_vm10  ;;  %v14135_v16 = vmov 0 }
  0xa9   : > { %14134 = vst [vmem:[#allocation125_spill] sm:$0xff] %v11169_v12  ;;  %v14136_v16 = vsel %vm11176_vm0, 4294967295, %v14135_v16  ;;  %7697 = vmatmul.mubr.f32.gmra.mrb[40].mxu1 %v11169_v12  ;;  %v1593_v14 = vrot.slane %v11174_v39, 1  ;;  %v967_v40 = vadd.f32 %v10755_v10, %v881_v15  ;;  %vm1046_vm4 = vcmp.ge.f32.partialorder %v966_v19, 0.0  ;;  %8292 = vmatmul.mubr.f32.gmra.mrb[10].mxu0 %v11152_v52  ;;  %v544_v15 = vld [vmem:[%s9866_s8 + $0x1d0] sm:$0xff] }
  0xaa   : > { %14137 = vst [vmem:[#allocation126_spill] sm:$0xff] %v14136_v16  ;;  %v1126_v6 = vmul.f32 0.01, %v966_v19  ;;  %v1205_v32 = vsel %vm1045_vm1, %v965_v35, %v1125_v53  ;;  %vm14138_vm14 = vcmp.ge.s32.totalorder %v9798_v21, 1  ;;  %v14139_v22 = vmov 0 }
  0xab   : > { %vm11188_vm13 = vmand %vm11176_vm0, %vm14138_vm14  ;;  %v2530_v4 = vrot.slane %v10396_v49, 2  ;;  %v2531_v12 = vrot.slane %v10417_v61, 2  ;;  %v882_v9 = vmul.f32 %v10771_v59, %v543_v2  ;;  %vm14142_vm10 = vcmask 1046528  }
  0xac   : > { %v14140_v22 = vsel %vm11188_vm13, 4294967295, %v14139_v22  ;;  %v11197_v35 = vsel %vm14142_vm10, %v1591_v31, %v1593_v14  ;;  %v11201_v53 = vsel %vm11161_vm2, %v1205_v32, 0.0  ;;  %vm1047_vm5 = vcmp.ge.f32.partialorder %v967_v40, 0.0  ;;  %vm14148_vm2 = vmmov %vm14142_vm10 }
  0xad   : > { %14141 = vst [vmem:[#allocation127_spill] sm:$0xff] %v14140_v22  ;;  %14143 = vst [vmem:[#allocation128_spill] sm:$0xff] %v11197_v35  ;;  %v1127_v52 = vmul.f32 0.01, %v967_v40  ;;  %7699 = vmatprep.mubr.f32.mxu1 %v11197_v35  ;;  %v1595_v20 = vrot.slane %v11201_v53, 1  ;;  %v11205_v49 = vsel %vm1046_vm4, %v966_v19, %v1126_v6  ;;  %vm14145_vm14 = vcmask 1045504  }
  0xae   : > { %14144 = vst [vmem:[#allocation129_spill] sm:$0xff] %v11205_v49  ;;  %v11208_v61 = vsel %vm14145_vm14, %v2530_v4, %v2531_v12  ;;  %v968_v2 = vadd.f32 %v10755_v10, %v882_v9  ;;  %v11216_v31 = vsel %vm11188_vm13, %v11205_v49, 0.0  ;;  %v2533_v45 = vrot.slane %v10430_v46, 2  ;;  %v545_v19 = vld [vmem:[%s9866_s8 + $0x1d8] sm:$0x3]  ;;  %vm14150_vm4 = vmmov %vm14145_vm14 }
  0xaf   : > { %14146 = vst [vmem:[#allocation130_spill] sm:$0xff] %v11208_v61  ;;  %v11211_v26 = vsel %vm1047_vm5, %v967_v40, %v1127_v52  ;;  %8294 = vmatprep.mubr.f32.mxu0 %v11208_v61  ;;  %v883_v32 = vmul.f32 %v10771_v59, %v544_v15  ;;  %v11223_v6 = vsel %vm14148_vm2, %v1593_v14, %v1595_v20  ;;  %v1597_v4 = vrot.slane %v11216_v31, 1  ;;  %vm14152_vm10 = vmmov %vm14148_vm2 }
  0xb0   : > { %14147 = vst [vmem:[#allocation131_spill] sm:$0xff] %v11211_v26  ;;  %14149 = vst [vmem:[#allocation132_spill] sm:$0xff] %v11223_v6  ;;  %v11228_v9 = vsel %vm11176_vm0, %v11211_v26, 0.0  ;;  %vm1048_vm1 = vcmp.ge.f32.partialorder %v968_v2, 0.0  ;;  %7700 = vmatmul.mubr.f32.gmra.mrb[42].mxu1 %v11223_v6  ;;  %v1128_v46 = vmul.f32 0.01, %v968_v2  ;;  %v11234_v40 = vsel %vm14150_vm4, %v2531_v12, %v2533_v45 }
  0xb1   : > { %v1598_v52 = vrot.slane %v11228_v9, 1  ;;  %14151 = vst [vmem:[#allocation133_spill] sm:$0xff] %v11234_v40  ;;  %v969_v20 = vadd.f32 %v10755_v10, %v883_v32  ;;  %8295 = vmatmul.mubr.f32.gmra.mrb[12].mxu0 %v11234_v40  ;;  %v2535_v14 = vrot.slane %v10487_v60, 2  ;;  %v884_v15 = vmul.f32 %v10771_v59, %v545_v19  ;;  %v546_v32 = vld [vmem:[%s9866_s8 + $0x1e0] sm:$0xff]  ;;  %vm14155_vm14 = vmmov %vm14150_vm4 }
  0xb2   : > { %v2537_v35 = vrot.slane %v10494_v50, 2  ;;  %v591_v61 = vadd.s32 12, %v9773_v13  ;;  %v11245_v26 = vsel %vm1048_vm1, %v968_v2, %v1128_v46  ;;  %vm14157_vm2 = vmmov %vm14150_vm4  ;;  %v547_v2 = vld [vmem:[%s9866_s8 + $0x1e8] sm:$0xff]  ;;  %v2540_v22 = vrot.slane %v10511_v63, 2 }
  0xb3   : > { %v11243_v6 = vsel %vm14152_vm10, %v1597_v4, %v1598_v52  ;;  %14154 = vst [vmem:[#allocation135_spill] sm:$0xff] %v11245_v26  ;;  %vm1049_vm5 = vcmp.ge.f32.partialorder %v969_v20, 0.0  ;;  %v1129_v12 = vmul.f32 0.01, %v969_v20  ;;  %v11252_v60 = vsel %vm11176_vm0, %v11245_v26, 0.0  ;;  %v6764_v63 = vld [vmem:[%s13340_s2 + $0x328] sm:$0xff] }
  0xb4   : > { %14153 = vst [vmem:[#allocation134_spill] sm:$0xff] %v11243_v6  ;;  %7702 = vmatprep.mubr.f32.mxu1 %v11243_v6  ;;  %v11255_v50 = vsel %vm14155_vm14, %v2533_v45, %v2535_v14  ;;  %v970_v19 = vadd.f32 %v10755_v10, %v884_v15  ;;  %v11259_v4 = vsel %vm14157_vm2, %v2535_v14, %v2537_v35  ;;  %v1600_v46 = vrot.slane %v11252_v60, 1  ;;  %v548_v6 = vld [vmem:[%s9866_s8 + $0x1f0] sm:$0xff]  ;;  %v1413_v14 = vld [vmem:[%s13340_s2 + $0x60] sm:$0xff]  ;;  %v1414_v15 = vld [vmem:[%s13340_s2 + $0x68] sm:$0xff] }
  0xb5   : > { %14156 = vst [vmem:[#allocation136_spill] sm:$0xff] %v11255_v50  ;;  %14158 = vst [vmem:[#allocation137_spill] sm:$0xff] %v11259_v4  ;;  %v11263_v40 = vsel %vm1049_vm5, %v969_v20, %v1129_v12  ;;  %8297 = vmatprep.mubr.f32.mxu0 %v11255_v50  ;;  %vm613_vm1 = vcmp.ge.s32.totalorder %v591_v61, 1  ;;  %vm629_vm4 = vcmp.le.s32.totalorder %v591_v61, 32  ;;  %vm14160_vm10 = vcmp.le.s32.totalorder %v9849_v37, 32 }
  0xb6   : > { %14159 = vst [vmem:[#allocation138_spill] sm:$0xff] %v11263_v40  ;;  %v11270_v45 = vsel %vm11176_vm0, %v11263_v40, 0.0  ;;  %vm11276_vm14 = vmand %vm11176_vm0, %vm14160_vm10  ;;  %vm1050_vm5 = vcmp.ge.f32.partialorder %v970_v19, 0.0  ;;  %v1130_v20 = vmul.f32 0.01, %v970_v19  ;;  %8298 = vmatmul.mubr.f32.gmra.mrb[14].mxu0 %v11259_v4  ;;  %v885_v61 = vmul.f32 %v10771_v59, %v546_v32 }
  0xb7   : > { %vm14163_vm2 = vcmask 1046528   ;;  %v1602_v50 = vrot.slane %v11270_v45, 1  ;;  %vm11292_vm10 = vmand %vm613_vm1, %vm629_vm4  ;;  %v14165_v40 = vmov 0  ;;  %v886_v32 = vmul.f32 %v10771_v59, %v547_v2 }
  0xb8   : > { %v11289_v12 = vsel %vm14163_vm2, %v1598_v52, %v1600_v46  ;;  %v14166_v40 = vsel %vm11292_vm10, 4294967295, %v14165_v40  ;;  %v2539_v4 = vrot.slane %v10506_v5, 2  ;;  %v1210_v26 = vsel %vm1050_vm5, %v970_v19, %v1130_v20  ;;  %v6763_v5 = vld [vmem:[%s13340_s2 + $0x320] sm:$0xff]  ;;  %v549_v19 = vld [vmem:[%s9866_s8 + $0x1f8] sm:$0xff] }
  0xb9   : > { %14164 = vst [vmem:[#allocation139_spill] sm:$0xff] %v11289_v12  ;;  %14167 = vst [vmem:[#allocation140_spill] sm:$0xff] %v14166_v40  ;;  %7703 = vmatmul.mubr.f32.gmra.mrb[44].mxu1 %v11289_v12  ;;  %v971_v16 = vadd.f32 %v10755_v10, %v885_v61  ;;  %v887_v52 = vmul.f32 %v10771_v59, %v548_v6  ;;  %v11303_v49 = vsel %vm14163_vm2, %v1600_v46, %v1602_v50  ;;  %vm14173_vm5 = vcmask 1045504  }
  0xba   : > { %14168 = vst [vmem:[#allocation141_spill] sm:$0xff] %v11303_v49  ;;  %v11307_v34 = vsel %vm11276_vm14, %v1210_v26, 0.0  ;;  %v972_v2 = vadd.f32 %v10755_v10, %v886_v32  ;;  %v8812_v3 = vpack.c.bf16 %v1414_v15, %v1413_v14  ;;  %7705 = vmatprep.mubr.f32.mxu1 %v11303_v49  ;;  %vm14169_vm1 = vcmp.ge.s32.totalorder %v9798_v21, 1 }
  0xbb   : > { %v1604_v6 = vrot.slane %v11307_v34, 1  ;;  %vm11323_vm4 = vmand %vm11292_vm10, %vm14169_vm1  ;;  %v14170_v26 = vmov 0  ;;  %vm1051_vm14 = vcmp.ge.f32.partialorder %v971_v16, 0.0  ;;  %v1131_v46 = vmul.f32 0.01, %v971_v16 }
  0xbc   : > { %v14171_v26 = vsel %vm11323_vm4, 4294967295, %v14170_v26  ;;  %v11328_v35 = vsel %vm14173_vm5, %v2539_v4, %v2540_v22  ;;  %vm1052_vm2 = vcmp.ge.f32.partialorder %v972_v2, 0.0  ;;  %v1132_v20 = vmul.f32 0.01, %v972_v2  ;;  %8813 = vmatprep.subr.bf16.mxu1 %v8812_v3  ;;  %v550_v4 = vld [vmem:[%s9866_s8 + $0x200] sm:$0x3] }
  0xbd   : > { %14172 = vst [vmem:[#allocation142_spill] sm:$0xff] %v14171_v26  ;;  %14174 = vst [vmem:[#allocation143_spill] sm:$0xff] %v11328_v35  ;;  %8300 = vmatprep.mubr.f32.mxu0 %v11328_v35  ;;  %v973_v61 = vadd.f32 %v10755_v10, %v887_v52  ;;  %v2542_v14 = vrot.slane %v10556_v43, 2  ;;  %vm14175_vm0 = vcmask 1046528   ;;  %v11336_v32 = vsel %vm1051_vm14, %v971_v16, %v1131_v46  ;;  %8815 = vmatpush3.bf16.msra.mxu1 %v8812_v3  ;;  %v551_v46 = vld [vmem:[%s9866_s8 + $0x208] sm:$0xff] }
  0xbe   : > { %v11334_v15 = vsel %vm14175_vm0, %v1602_v50, %v1604_v6  ;;  %14177 = vst [vmem:[#allocation145_spill] sm:$0xff] %v11336_v32  ;;  %v8956_v49 = vpack.c.bf16 %v6764_v63, %v6763_v5  ;;  %v888_v12 = vmul.f32 %v10771_v59, %v549_v19  ;;  %v11341_v57 = vsel %vm1052_vm2, %v972_v2, %v1132_v20  ;;  %vm14179_vm0 = vmmov %vm14173_vm5  ;;  %v559_v26 = vld [vmem:[%s9866_s8 + $0x248] sm:$0xff] }
  0xbf   : > { %14176 = vst [vmem:[#allocation144_spill] sm:$0xff] %v11334_v15  ;;  %7706 = vmatmul.mubr.f32.gmra.mrb[46].mxu1 %v11334_v15  ;;  %14178 = vst [vmem:[#allocation146_spill] sm:$0xff] %v11341_v57  ;;  %v11346_v52 = vsel %vm11323_vm4, %v11336_v32, 0.0  ;;  %vm1053_vm1 = vcmp.ge.f32.partialorder %v973_v61, 0.0  ;;  %v1133_v43 = vmul.f32 0.01, %v973_v61  ;;  %v11355_v50 = vsel %vm14179_vm0, %v2540_v22, %v2542_v14 }
  0xc0   : > { %v11351_v16 = vsel %vm11292_vm10, %v11341_v57, 0.0  ;;  %v1606_v3 = vrot.slane %v11346_v52, 1  ;;  %14180 = vst [vmem:[#allocation147_spill] sm:$0xff] %v11355_v50  ;;  %8957 = vmatprep.subr.bf16.mxu0 %v8956_v49  ;;  %v974_v2 = vadd.f32 %v10755_v10, %v888_v12  ;;  %8301 = vmatmul.mubr.f32.gmra.mrb[16].mxu0 %v11355_v50  ;;  %v2544_v19 = vrot.slane %v10587_v27, 2  ;;  %vm14184_vm2 = vmmov %vm14179_vm0  ;;  %v552_v15 = vld [vmem:[%s9866_s8 + $0x210] sm:$0xff] }
  0xc1   : > { %v1607_v5 = vrot.slane %v11351_v16, 1  ;;  %v11359_v63 = vsel %vm1053_vm1, %v973_v61, %v1133_v43  ;;  %v889_v6 = vmul.f32 %v10771_v59, %v550_v4  ;;  %8959 = vmatpush3.bf16.msra.mxu0 %v8956_v49  ;;  %v2546_v20 = vrot.slane %v10600_v36, 2  ;;  %vm14187_vm1 = vmmov %vm14179_vm0  ;;  %v560_v32 = vld [vmem:[%s9866_s8 + $0x250] sm:$0x3] }
  0xc2   : > { %14181 = vst [vmem:[#allocation148_spill] sm:$0xff] %v11359_v63  ;;  %v11368_v22 = vsel %vm11292_vm10, %v11359_v63, 0.0  ;;  %vm1054_vm14 = vcmp.ge.f32.partialorder %v974_v2, 0.0  ;;  %v1134_v12 = vmul.f32 0.01, %v974_v2  ;;  %vm14182_vm5 = vcmask 1046528  }
  0xc3   : > { %v11372_v61 = vsel %vm14182_vm5, %v1606_v3, %v1607_v5  ;;  %v1609_v43 = vrot.slane %v11368_v22, 1  ;;  %v11376_v27 = vsel %vm14184_vm2, %v2542_v14, %v2544_v19  ;;  %v975_v4 = vadd.f32 %v10755_v10, %v889_v6  ;;  %vm14189_vm0 = vmmov %vm14182_vm5 }
  0xc4   : > { %14183 = vst [vmem:[#allocation149_spill] sm:$0xff] %v11372_v61  ;;  %14185 = vst [vmem:[#allocation150_spill] sm:$0xff] %v11376_v27  ;;  %7708 = vmatprep.mubr.f32.mxu1 %v11372_v61  ;;  %v11381_v50 = vsel %vm1054_vm14, %v974_v2, %v1134_v12  ;;  %8303 = vmatprep.mubr.f32.mxu0 %v11376_v27  ;;  %v11385_v36 = vsel %vm14187_vm1, %v2544_v19, %v2546_v20  ;;  %v592_v49 = vadd.s32 13, %v9773_v13  ;;  %v14194_v20 = vmov 0 }
  0xc5   : > { %14186 = vst [vmem:[#allocation151_spill] sm:$0xff] %v11381_v50  ;;  %14188 = vst [vmem:[#allocation152_spill] sm:$0xff] %v11385_v36  ;;  %v890_v3 = vmul.f32 %v10771_v59, %v551_v46  ;;  %v11390_v35 = vsel %vm14189_vm0, %v1607_v5, %v1609_v43  ;;  %v11395_v14 = vsel %vm11292_vm10, %v11381_v50, 0.0  ;;  %vm14191_vm14 = vcmp.le.s32.totalorder %v9849_v37, 32  ;;  %8304 = vmatmul.mubr.f32.gmra.mrb[18].mxu0 %v11385_v36  ;;  %v553_v5 = vld [vmem:[%s9866_s8 + $0x218] sm:$0xff] }
  0xc6   : > { %14190 = vst [vmem:[#allocation153_spill] sm:$0xff] %v11390_v35  ;;  %vm11401_vm5 = vmand %vm11292_vm10, %vm14191_vm14  ;;  %vm1055_vm2 = vcmp.ge.f32.partialorder %v975_v4, 0.0  ;;  %v1135_v19 = vmul.f32 0.01, %v975_v4  ;;  %7709 = vmatmul.mubr.f32.gmra.mrb[48].mxu1 %v11390_v35  ;;  %v1611_v6 = vrot.slane %v11395_v14, 1  ;;  %vm614_vm1 = vcmp.ge.s32.totalorder %v592_v49, 1 }
  0xc7   : > { %vm630_vm0 = vcmp.le.s32.totalorder %v592_v49, 32  ;;  %v891_v46 = vmul.f32 %v10771_v59, %v552_v15  ;;  %v976_v61 = vadd.f32 %v10755_v10, %v890_v3  ;;  %v2548_v27 = vrot.slane %v10610_v47, 2  ;;  %v554_v49 = vld [vmem:[%s9866_s8 + $0x220] sm:$0xff] }
  0xc8   : > { %v1215_v12 = vsel %vm1055_vm2, %v975_v4, %v1135_v19  ;;  %vm11410_vm4 = vmand %vm614_vm1, %vm630_vm0  ;;  %v2549_v36 = vrot.slane %v10634_v38, 2  ;;  %vm14197_vm14 = vcmask 1046528   ;;  %v892_v4 = vmul.f32 %v10771_v59, %v553_v5 }
  0xc9   : > { %v14195_v20 = vsel %vm11410_vm4, 4294967295, %v14194_v20  ;;  %v11418_v50 = vsel %vm14197_vm14, %v1609_v43, %v1611_v6  ;;  %v11422_v35 = vsel %vm11401_vm5, %v1215_v12, 0.0  ;;  %v977_v15 = vadd.f32 %v10755_v10, %v891_v46 }
  0xca   : > { %14196 = vst [vmem:[#allocation154_spill] sm:$0xff] %v14195_v20  ;;  %14198 = vst [vmem:[#allocation155_spill] sm:$0xff] %v11418_v50  ;;  %7711 = vmatprep.mubr.f32.mxu1 %v11418_v50  ;;  %v1613_v3 = vrot.slane %v11422_v35, 1  ;;  %vm14199_vm2 = vcmp.ge.s32.totalorder %v9798_v21, 1  ;;  %v14200_v47 = vmov 0  ;;  %vm1056_vm5 = vcmp.ge.f32.partialorder %v976_v61, 0.0 }
  0xcb   : > { %vm11433_vm1 = vmand %vm11410_vm4, %vm14199_vm2  ;;  %v1136_v38 = vmul.f32 0.01, %v976_v61  ;;  %vm14203_vm0 = vcmask 1045504   ;;  %vm1057_vm14 = vcmp.ge.f32.partialorder %v977_v15, 0.0  ;;  %v1137_v2 = vmul.f32 0.01, %v977_v15 }
  0xcc   : > { %v14201_v47 = vsel %vm11433_vm1, 4294967295, %v14200_v47  ;;  %v11438_v43 = vsel %vm14203_vm0, %v2548_v27, %v2549_v36  ;;  %v978_v19 = vadd.f32 %v10755_v10, %v892_v4  ;;  %v2551_v5 = vrot.slane %v10646_v51, 2  ;;  %v555_v27 = vld [vmem:[%s9866_s8 + $0x228] sm:$0x3]  ;;  %vm14209_vm2 = vmmov %vm14203_vm0 }
  0xcd   : > { %14202 = vst [vmem:[#allocation156_spill] sm:$0xff] %v14201_v47  ;;  %14204 = vst [vmem:[#allocation157_spill] sm:$0xff] %v11438_v43  ;;  %8306 = vmatprep.mubr.f32.mxu0 %v11438_v43  ;;  %vm14205_vm10 = vcmask 1046528   ;;  %v11446_v12 = vsel %vm1056_vm5, %v976_v61, %v1136_v38  ;;  %v893_v50 = vmul.f32 %v10771_v59, %v554_v49  ;;  %v2553_v63 = vrot.slane %v10704_v33, 2  ;;  %v557_v43 = vld [vmem:[%s9866_s8 + $0x238] sm:$0xff] }
  0xce   : > { %v11444_v46 = vsel %vm14205_vm10, %v1611_v6, %v1613_v3  ;;  %14207 = vst [vmem:[#allocation159_spill] sm:$0xff] %v11446_v12  ;;  %v11452_v40 = vsel %vm1057_vm14, %v977_v15, %v1137_v2  ;;  %v11457_v51 = vsel %vm11433_vm1, %v11446_v12, 0.0  ;;  %vm1058_vm10 = vcmp.ge.f32.partialorder %v978_v19, 0.0  ;;  %vm14212_vm5 = vmmov %vm14203_vm0 }
  0xcf   : > { %14206 = vst [vmem:[#allocation158_spill] sm:$0xff] %v11444_v46  ;;  %7712 = vmatmul.mubr.f32.gmra.mrb[50].mxu1 %v11444_v46  ;;  %14208 = vst [vmem:[#allocation160_spill] sm:$0xff] %v11452_v40  ;;  %v1138_v6 = vmul.f32 0.01, %v978_v19  ;;  %v11462_v61 = vsel %vm11410_vm4, %v11452_v40, 0.0  ;;  %v1615_v33 = vrot.slane %v11457_v51, 1  ;;  %v11466_v4 = vsel %vm14209_vm2, %v2549_v36, %v2551_v5 }
  0xd0   : > { %14210 = vst [vmem:[#allocation161_spill] sm:$0xff] %v11466_v4  ;;  %v979_v15 = vadd.f32 %v10755_v10, %v893_v50  ;;  %v1616_v49 = vrot.slane %v11462_v61, 1  ;;  %8307 = vmatmul.mubr.f32.gmra.mrb[20].mxu0 %v11466_v4  ;;  %v11474_v38 = vsel %vm14212_vm5, %v2551_v5, %v2553_v63  ;;  %v894_v2 = vmul.f32 %v10771_v59, %v555_v27  ;;  %v556_v46 = vld [vmem:[%s9866_s8 + $0x230] sm:$0xff] }
  0xd1   : > { %v11470_v3 = vsel %vm1058_vm10, %v978_v19, %v1138_v6  ;;  %14213 = vst [vmem:[#allocation163_spill] sm:$0xff] %v11474_v38  ;;  %8309 = vmatprep.mubr.f32.mxu0 %v11474_v38  ;;  %v2555_v19 = vrot.slane %v10712_v24, 2  ;;  %vm14214_vm14 = vcmask 1046528   ;;  %v593_v4 = vadd.s32 14, %v9773_v13  ;;  %vm14217_vm10 = vmmov %vm14209_vm2 }
  0xd2   : > { %14211 = vst [vmem:[#allocation162_spill] sm:$0xff] %v11470_v3  ;;  %v11482_v36 = vsel %vm11410_vm4, %v11470_v3, 0.0  ;;  %vm1059_vm0 = vcmp.ge.f32.partialorder %v979_v15, 0.0  ;;  %v1139_v50 = vmul.f32 0.01, %v979_v15  ;;  %v11487_v6 = vsel %vm14214_vm14, %v1615_v33, %v1616_v49  ;;  %vm14219_vm2 = vmmov %vm14214_vm14 }
  0xd3   : > { %14215 = vst [vmem:[#allocation164_spill] sm:$0xff] %v11487_v6  ;;  %v1618_v5 = vrot.slane %v11482_v36, 1  ;;  %v980_v27 = vadd.f32 %v10755_v10, %v894_v2  ;;  %7714 = vmatprep.mubr.f32.mxu1 %v11487_v6  ;;  %v11496_v40 = vsel %vm14217_vm10, %v2553_v63, %v2555_v19  ;;  %v895_v38 = vmul.f32 %v10771_v59, %v556_v46 }
  0xd4   : > { %v11493_v3 = vsel %vm1059_vm0, %v979_v15, %v1139_v50  ;;  %14218 = vst [vmem:[#allocation166_spill] sm:$0xff] %v11496_v40  ;;  %v896_v24 = vmul.f32 %v10771_v59, %v557_v43  ;;  %vm14221_vm5 = vcmp.le.s32.totalorder %v9849_v37, 32  ;;  %8310 = vmatmul.mubr.f32.gmra.mrb[22].mxu0 %v11496_v40  ;;  %vm615_vm10 = vcmp.ge.s32.totalorder %v593_v4, 1 }
  0xd5   : > { %14216 = vst [vmem:[#allocation165_spill] sm:$0xff] %v11493_v3  ;;  %v11501_v33 = vsel %vm14219_vm2, %v1616_v49, %v1618_v5  ;;  %v11506_v2 = vsel %vm11410_vm4, %v11493_v3, 0.0  ;;  %vm11512_vm0 = vmand %vm11410_vm4, %vm14221_vm5  ;;  %vm1060_vm14 = vcmp.ge.f32.partialorder %v980_v27, 0.0  ;;  %v1140_v63 = vmul.f32 0.01, %v980_v27  ;;  %v558_v49 = vld [vmem:[%s9866_s8 + $0x240] sm:$0xff] }
  0xd6   : > { %14220 = vst [vmem:[#allocation167_spill] sm:$0xff] %v11501_v33  ;;  %7715 = vmatmul.mubr.f32.gmra.mrb[52].mxu1 %v11501_v33  ;;  %v1620_v43 = vrot.slane %v11506_v2, 1  ;;  %vm631_vm2 = vcmp.le.s32.totalorder %v593_v4, 32  ;;  %v981_v46 = vadd.f32 %v10755_v10, %v895_v38  ;;  %v14224_v19 = vmov 0  ;;  %v1415_v33 = vld [vmem:[%s13340_s2 + $0x70] sm:$0xff]  ;;  %v1416_v4 = vld [vmem:[%s13340_s2 + $0x78] sm:$0xff] }
  0xd7   : > { %v1220_v50 = vsel %vm1060_vm14, %v980_v27, %v1140_v63  ;;  %vm11521_vm1 = vmand %vm615_vm10, %vm631_vm2  ;;  %v982_v6 = vadd.f32 %v10755_v10, %v896_v24  ;;  %v2557_v3 = vrot.slane %v10719_v11, 2  ;;  %v2558_v40 = vrot.slane %v10726_v28, 2  ;;  %v6766_v24 = vld [vmem:[%s13340_s2 + $0x338] sm:$0xff] }
  0xd8   : > { %v14225_v19 = vsel %vm11521_vm1, 4294967295, %v14224_v19  ;;  %vm14227_vm5 = vcmask 1046528   ;;  %v11539_v27 = vsel %vm11512_vm0, %v1220_v50, 0.0  ;;  %vm14229_vm14 = vcmp.ge.s32.totalorder %v9798_v21, 1 }
  0xd9   : > { %14226 = vst [vmem:[#allocation168_spill] sm:$0xff] %v14225_v19  ;;  %v11535_v38 = vsel %vm14227_vm5, %v1618_v5, %v1620_v43  ;;  %vm11545_vm10 = vmand %vm11521_vm1, %vm14229_vm14  ;;  %v14230_v11 = vmov 0  ;;  %vm1061_vm2 = vcmp.ge.f32.partialorder %v981_v46, 0.0  ;;  %v1141_v28 = vmul.f32 0.01, %v981_v46  ;;  %v6765_v5 = vld [vmem:[%s13340_s2 + $0x330] sm:$0xff] }
  0xda   : > { %14228 = vst [vmem:[#allocation169_spill] sm:$0xff] %v11535_v38  ;;  %v14231_v11 = vsel %vm11545_vm10, 4294967295, %v14230_v11  ;;  %7717 = vmatprep.mubr.f32.mxu1 %v11535_v38  ;;  %v1622_v15 = vrot.slane %v11539_v27, 1  ;;  %vm1062_vm0 = vcmp.ge.f32.partialorder %v982_v6, 0.0  ;;  %v1142_v63 = vmul.f32 0.01, %v982_v6 }
  0xdb   : > { %14232 = vst [vmem:[#allocation170_spill] sm:$0xff] %v14231_v11  ;;  %vm14233_vm5 = vcmask 1045504   ;;  %v11560_v20 = vsel %vm1061_vm2, %v981_v46, %v1141_v28  ;;  %v897_v47 = vmul.f32 %v10771_v59, %v558_v49  ;;  %v8816_v12 = vpack.c.bf16 %v1416_v4, %v1415_v33  ;;  %v14491_v19 = vld [vmem:[#allocation137_spill] sm:$0xff] }
  0xdc   : > { %v11558_v50 = vsel %vm14233_vm5, %v2557_v3, %v2558_v40  ;;  %14235 = vst [vmem:[#allocation172_spill] sm:$0xff] %v11560_v20  ;;  %v2560_v57 = vrot.slane %v10764_v23, 2  ;;  %vm14236_vm14 = vcmask 1046528   ;;  %v11570_v44 = vsel %vm1062_vm0, %v982_v6, %v1142_v63  ;;  %vm14239_vm2 = vmmov %vm14233_vm5  ;;  %v563_v63 = vld [vmem:[%s9866_s8 + $0x268] sm:$0xff] }
  0xdd   : > { %14234 = vst [vmem:[#allocation171_spill] sm:$0xff] %v11558_v50  ;;  %8312 = vmatprep.mubr.f32.mxu0 %v11558_v50  ;;  %v11568_v38 = vsel %vm14236_vm14, %v1620_v43, %v1622_v15  ;;  %14238 = vst [vmem:[#allocation174_spill] sm:$0xff] %v11570_v44  ;;  %v11575_v3 = vsel %vm11545_vm10, %v11560_v20, 0.0  ;;  %v8960_v46 = vpack.c.bf16 %v6766_v24, %v6765_v5  ;;  %v11581_v33 = vsel %vm11521_vm1, %v11570_v44, 0.0  ;;  %v562_v15 = vld [vmem:[%s9866_s8 + $0x260] sm:$0xff] }
  0xde   : > { %14237 = vst [vmem:[#allocation173_spill] sm:$0xff] %v11568_v38  ;;  %7718 = vmatmul.mubr.f32.gmra.mrb[54].mxu1 %v11568_v38  ;;  %v1624_v23 = vrot.slane %v11575_v3, 1  ;;  %v983_v43 = vadd.f32 %v10755_v10, %v897_v47  ;;  %8817 = vmatprep.subr.bf16.mxu1 %v8816_v12  ;;  %v11586_v6 = vsel %vm14239_vm2, %v2558_v40, %v2560_v57  ;;  %v1625_v49 = vrot.slane %v11581_v33, 1  ;;  %vm14241_vm5 = vmmov %vm14236_vm14 }
  0xdf   : > { %14240 = vst [vmem:[#allocation175_spill] sm:$0xff] %v11586_v6  ;;  %8313 = vmatmul.mubr.f32.gmra.mrb[24].mxu0 %v11586_v6  ;;  %8961 = vmatprep.subr.bf16.mxu0 %v8960_v46  ;;  %v898_v4 = vmul.f32 %v10771_v59, %v559_v26  ;;  %v2562_v28 = vrot.slane %v10812_v62, 2  ;;  %v899_v5 = vmul.f32 %v10771_v59, %v560_v32  ;;  %v2564_v10 = vrot.slane %v10819_v54, 2  ;;  %v11601_v26 = vld [vmem:[%s13342_s4] ss:$0 sm:$0xff]  ;;  %vm14243_vm14 = vmmov %vm14239_vm2 }
  0xe0   : > { %vm1063_vm0 = vcmp.ge.f32.partialorder %v983_v43, 0.0  ;;  %v1143_v24 = vmul.f32 0.01, %v983_v43  ;;  %8819 = vmatpush3.bf16.msra.mxu1 %v8816_v12  ;;  %8963 = vmatpush3.bf16.msra.mxu0 %v8960_v46  ;;  %v594_v40 = vadd.s32 15, %v9773_v13  ;;  %v11596_v47 = vsel %vm14241_vm5, %v1624_v23, %v1625_v49  ;;  %v561_v12 = vld [vmem:[%s9866_s8 + $0x258] sm:$0xff] }
  0xe1   : > { %14242 = vst [vmem:[#allocation176_spill] sm:$0xff] %v11596_v47  ;;  %v984_v62 = vadd.f32 %v11601_v26, %v898_v4  ;;  %v11605_v59 = vsel %vm14243_vm14, %v2560_v57, %v2562_v28  ;;  %v985_v32 = vadd.f32 %v11601_v26, %v899_v5  ;;  %7720 = vmatprep.mubr.f32.mxu1 %v11596_v47  ;;  %v14251_v47 = vmov 0 }
  0xe2   : > { %14244 = vst [vmem:[#allocation177_spill] sm:$0xff] %v11605_v59  ;;  %v11611_v13 = vsel %vm1063_vm0, %v983_v43, %v1143_v24  ;;  %8315 = vmatprep.mubr.f32.mxu0 %v11605_v59  ;;  %v11615_v54 = vsel %vm14239_vm2, %v2562_v28, %v2564_v10  ;;  %vm616_vm5 = vcmp.ge.s32.totalorder %v594_v40, 1  ;;  %vm632_vm10 = vcmp.le.s32.totalorder %v594_v40, 32  ;;  %v11636_v28 = vld [vmem:[%s13341_s3] ss:$0 sm:$0xff] }
  0xe3   : > { %14245 = vst [vmem:[#allocation178_spill] sm:$0xff] %v11611_v13  ;;  %14246 = vst [vmem:[#allocation179_spill] sm:$0xff] %v11615_v54  ;;  %v11621_v57 = vsel %vm11521_vm1, %v11611_v13, 0.0  ;;  %vm1064_vm14 = vcmp.ge.f32.partialorder %v984_v62, 0.0  ;;  %v1144_v46 = vmul.f32 0.01, %v984_v62  ;;  %8316 = vmatmul.mubr.f32.gmra.mrb[26].mxu0 %v11615_v54  ;;  %v900_v5 = vmul.f32 %v11636_v28, %v561_v12 }
  0xe4   : > { %vm1065_vm4 = vcmp.ge.f32.partialorder %v985_v32, 0.0  ;;  %v1627_v23 = vrot.slane %v11621_v57, 1  ;;  %vm14247_vm0 = vcmp.le.s32.totalorder %v9849_v37, 32  ;;  %v1145_v4 = vmul.f32 0.01, %v985_v32  ;;  %vm11643_vm13 = vmand %vm616_vm5, %vm632_vm10 }
  0xe5   : > { %vm11629_vm2 = vmand %vm11521_vm1, %vm14247_vm0  ;;  %v901_v24 = vmul.f32 %v11636_v28, %v562_v15  ;;  %v11640_v10 = vsel %vm1064_vm14, %v984_v62, %v1144_v46  ;;  %v14252_v47 = vsel %vm11643_vm13, 4294967295, %v14251_v47  ;;  %v2566_v38 = vrot.slane %v10854_v8, 2 }
  0xe6   : > { %14250 = vst [vmem:[#allocation180_spill] sm:$0xff] %v11640_v10  ;;  %14253 = vst [vmem:[#allocation181_spill] sm:$0xff] %v14252_v47  ;;  %v2567_v54 = vrot.slane %v10859_v55, 2  ;;  %v902_v59 = vmul.f32 %v11636_v28, %v563_v63  ;;  %vm14254_vm0 = vcmask 1046528   ;;  %v11656_v62 = vsel %vm11521_vm1, %v11640_v10, 0.0 }
  0xe7   : > { %v11651_v6 = vsel %vm14254_vm0, %v1625_v49, %v1627_v23  ;;  %v1225_v40 = vsel %vm1065_vm4, %v985_v32, %v1145_v4  ;;  %v986_v12 = vadd.f32 %v11601_v26, %v900_v5  ;;  %v1629_v8 = vrot.slane %v11656_v62, 1  ;;  %v564_v4 = vld [vmem:[%s9866_s8 + $0x270] sm:$0xff] }
  0xe8   : > { %14255 = vst [vmem:[#allocation182_spill] sm:$0xff] %v11651_v6  ;;  %7721 = vmatmul.mubr.f32.gmra.mrb[56].mxu1 %v11651_v6  ;;  %v11663_v55 = vsel %vm11629_vm2, %v1225_v40, 0.0  ;;  %v987_v15 = vadd.f32 %v11601_v26, %v901_v24  ;;  %vm14256_vm10 = vcmask 1045504   ;;  %vm14258_vm5 = vcmp.ge.s32.totalorder %v9798_v21, 1  ;;  %vm14262_vm2 = vmmov %vm14254_vm0 }
  0xe9   : > { %v11667_v49 = vsel %vm14256_vm10, %v2566_v38, %v2567_v54  ;;  %v1631_v63 = vrot.slane %v11663_v55, 1  ;;  %vm11674_vm4 = vmand %vm11643_vm13, %vm14258_vm5  ;;  %v14259_v32 = vmov 0  ;;  %vm1066_vm14 = vcmp.ge.f32.partialorder %v986_v12, 0.0 }
  0xea   : > { %14257 = vst [vmem:[#allocation183_spill] sm:$0xff] %v11667_v49  ;;  %v14260_v32 = vsel %vm11674_vm4, 4294967295, %v14259_v32  ;;  %v1146_v46 = vmul.f32 0.01, %v986_v12  ;;  %8318 = vmatprep.mubr.f32.mxu0 %v11667_v49  ;;  %v988_v43 = vadd.f32 %v11601_v26, %v902_v59  ;;  %v11682_v38 = vsel %vm14262_vm2, %v1627_v23, %v1629_v8  ;;  %vm14264_vm10 = vmmov %vm14262_vm2  ;;  %v565_v49 = vld [vmem:[%s9866_s8 + $0x278] sm:$0x3] }
  0xeb   : > { %14261 = vst [vmem:[#allocation184_spill] sm:$0xff] %v14260_v32  ;;  %14263 = vst [vmem:[#allocation185_spill] sm:$0xff] %v11682_v38  ;;  %vm1067_vm0 = vcmp.ge.f32.partialorder %v987_v15, 0.0  ;;  %v1147_v5 = vmul.f32 0.01, %v987_v15  ;;  %v2569_v24 = vrot.slane %v10876_v1, 2  ;;  %7723 = vmatprep.mubr.f32.mxu1 %v11682_v38  ;;  %v11687_v40 = vsel %vm14264_vm10, %v1629_v8, %v1631_v63 }
  0xec   : > { %14265 = vst [vmem:[#allocation186_spill] sm:$0xff] %v11687_v40  ;;  %v11689_v6 = vsel %vm1066_vm14, %v986_v12, %v1146_v46  ;;  %vm1068_vm5 = vcmp.ge.f32.partialorder %v988_v43, 0.0  ;;  %v1148_v50 = vmul.f32 0.01, %v988_v43  ;;  %7724 = vmatmul.mubr.f32.gmra.mrb[58].mxu1 %v11687_v40  ;;  %vm14268_vm2 = vcmask 1045504   ;;  %v6767_v32 = vld [vmem:[%s13340_s2 + $0x340] sm:$0xff] }
  0xed   : > { %14266 = vst [vmem:[#allocation187_spill] sm:$0xff] %v11689_v6  ;;  %v11693_v59 = vsel %vm1067_vm0, %v987_v15, %v1147_v5  ;;  %v11698_v23 = vsel %vm11674_vm4, %v11689_v6, 0.0  ;;  %v11701_v1 = vsel %vm14268_vm2, %v2567_v54, %v2569_v24  ;;  %v903_v8 = vmul.f32 %v11636_v28, %v564_v4  ;;  %vm14271_vm14 = vmmov %vm14268_vm2 }
  0xee   : > { %14267 = vst [vmem:[#allocation188_spill] sm:$0xff] %v11693_v59  ;;  %14269 = vst [vmem:[#allocation189_spill] sm:$0xff] %v11701_v1  ;;  %v11707_v12 = vsel %vm11643_vm13, %v11693_v59, 0.0  ;;  %v1633_v63 = vrot.slane %v11698_v23, 1  ;;  %v11710_v46 = vsel %vm1068_vm5, %v988_v43, %v1148_v50  ;;  %8319 = vmatmul.mubr.f32.gmra.mrb[28].mxu0 %v11701_v1  ;;  %v2571_v15 = vrot.slane %v10922_v30, 2  ;;  %v6631_v50 = vld [vmem:[%s13340_s2 + $0x100] sm:$0xff] }
  0xef   : > { %14270 = vst [vmem:[#allocation190_spill] sm:$0xff] %v11710_v46  ;;  %v1634_v5 = vrot.slane %v11707_v12, 1  ;;  %v11718_v54 = vsel %vm11643_vm13, %v11710_v46, 0.0  ;;  %v989_v4 = vadd.f32 %v11601_v26, %v903_v8  ;;  %v904_v40 = vmul.f32 %v11636_v28, %v565_v49  ;;  %v6632_v43 = vld [vmem:[%s13340_s2 + $0x108] sm:$0xff]  ;;  %vm14273_vm0 = vmmov %vm14264_vm10 }
  0xf0   : > { %v1636_v30 = vrot.slane %v11718_v54, 1  ;;  %v11730_v38 = vsel %vm14271_vm14, %v2569_v24, %v2571_v15  ;;  %v2573_v1 = vrot.slane %v10931_v48, 2  ;;  %v2575_v46 = vrot.slane %v11000_v29, 2  ;;  %v6768_v24 = vld [vmem:[%s13340_s2 + $0x348] sm:$0xff]  ;;  %vm14275_vm5 = vmmov %vm14273_vm0 }
  0xf1   : > { %14272 = vst [vmem:[#allocation191_spill] sm:$0xff] %v11730_v38  ;;  %v11735_v8 = vsel %vm14273_vm0, %v1633_v63, %v1634_v5  ;;  %vm1069_vm10 = vcmp.ge.f32.partialorder %v989_v4, 0.0  ;;  %v1149_v49 = vmul.f32 0.01, %v989_v4  ;;  %8321 = vmatprep.mubr.f32.mxu0 %v11730_v38  ;;  %v990_v59 = vadd.f32 %v11601_v26, %v904_v40 }
  0xf2   : > { %14274 = vst [vmem:[#allocation192_spill] sm:$0xff] %v11735_v8  ;;  %7726 = vmatprep.mubr.f32.mxu1 %v11735_v8  ;;  %v11747_v29 = vsel %vm14275_vm5, %v1634_v5, %v1636_v30  ;;  %v11750_v48 = vsel %vm14268_vm2, %v2571_v15, %v2573_v1  ;;  %v2576_v63 = vrot.slane %v11005_v56, 2  ;;  %v11753_v38 = vpack.c.bf16 %v6632_v43, %v6631_v50  ;;  %vm14279_vm5 = vmmov %vm14268_vm2 }
  0xf3   : > { %14276 = vst [vmem:[#allocation193_spill] sm:$0xff] %v11747_v29  ;;  %7727 = vmatmul.mubr.f32.gmra.mrb[60].mxu1 %v11747_v29  ;;  %v11756_v40 = vsel %vm1069_vm10, %v989_v4, %v1149_v49  ;;  %vm14278_vm14 = vcmp.le.s32.totalorder %v9849_v37, 32  ;;  %vm1070_vm4 = vcmp.ge.f32.partialorder %v990_v59, 0.0  ;;  %v1150_v8 = vmul.f32 0.01, %v990_v59  ;;  %8322 = vmatmul.mubr.f32.gmra.mrb[30].mxu0 %v11750_v48  ;;  %vm14281_vm10 = vmmov %vm14268_vm2 }
  0xf4   : > { %14277 = vst [vmem:[#allocation194_spill] sm:$0xff] %v11756_v40  ;;  %vm818_vm0 = vmand %vm11643_vm13, %vm14278_vm14  ;;  %v2578_v1 = vrot.slane %v11018_v42, 2  ;;  %v11767_v56 = vsel %vm11643_vm13, %v11756_v40, 0.0  ;;  %v11770_v15 = vsel %vm14279_vm5, %v2575_v46, %v2576_v63  ;;  %8821 = vmatprep.subr.bf16.mxu1 %v11753_v38  ;;  %v8964_v5 = vpack.c.bf16 %v6768_v24, %v6767_v32  ;;  %v6634_v24 = vld [vmem:[%s13340_s2 + $0x118] sm:$0xff] }
  0xf5   : > { %14280 = vst [vmem:[#allocation195_spill] sm:$0xff] %v11770_v15  ;;  %v2580_v4 = vrot.slane %v11049_v41, 2  ;;  %v1638_v50 = vrot.slane %v11767_v56, 1  ;;  %v1230_v43 = vsel %vm1070_vm4, %v990_v59, %v1150_v8  ;;  %8324 = vmatprep.mubr.f32.mxu0 %v11770_v15  ;;  %v2582_v49 = vrot.slane %v11066_v7, 2  ;;  %v6633_v59 = vld [vmem:[%s13340_s2 + $0x110] sm:$0xff]  ;;  %vm14286_vm14 = vmmov %vm14268_vm2 }
  0xf6   : > { %v11777_v42 = vsel %vm14281_vm10, %v2576_v63, %v2578_v1  ;;  %v11780_v29 = vsel %vm818_vm0, %v1230_v43, 0.0  ;;  %8965 = vmatprep.subr.bf16.mxu0 %v8964_v5  ;;  %v2584_v32 = vrot.slane %v11106_v0, 2  ;;  %v2585_v41 = vrot.slane %v11121_v58, 2  ;;  %v6769_v0 = vld [vmem:[%s13340_s2 + $0x350] sm:$0xff]  ;;  %v6770_v58 = vld [vmem:[%s13340_s2 + $0x358] sm:$0xff]  ;;  %vm14290_vm5 = vmmov %vm14268_vm2 }
  0xf7   : > { %14282 = vst [vmem:[#allocation196_spill] sm:$0xff] %v11777_v42  ;;  %v11783_v46 = vsel %vm14268_vm2, %v2578_v1, %v2580_v4  ;;  %vm14284_vm4 = vcmask 1046528   ;;  %v1640_v7 = vrot.slane %v11780_v29, 1  ;;  %8325 = vmatmul.mubr.f32.gmra.mrb[32].mxu0 %v11777_v42  ;;  %v2587_v63 = vrot.slane %v11145_v17, 2  ;;  %vm14292_vm10 = vmmov %vm14268_vm2 }
  0xf8   : > { %14283 = vst [vmem:[#allocation197_spill] sm:$0xff] %v11783_v46  ;;  %v11791_v8 = vsel %vm14284_vm4, %v1636_v30, %v1638_v50  ;;  %8967 = vmatpush3.bf16.msra.mxu0 %v8964_v5  ;;  %v11806_v30 = vsel %vm14286_vm14, %v2580_v4, %v2582_v49  ;;  %v2593_v1 = vrot.slane %v11216_v31, 2  ;;  %vm14288_vm0 = vmmov %vm14284_vm4  ;;  %8327 = vmatprep.mubr.f32.mxu0 %v11783_v46  ;;  %v2589_v5 = vrot.slane %v11174_v39, 2 }
  0xf9   : > { %14285 = vst [vmem:[#allocation198_spill] sm:$0xff] %v11791_v8  ;;  %7729 = vmatprep.mubr.f32.mxu1 %v11791_v8  ;;  %14287 = vst [vmem:[#allocation199_spill] sm:$0xff] %v11806_v30  ;;  %v11814_v43 = vsel %vm14288_vm0, %v1638_v50, %v1640_v7  ;;  %v11818_v42 = vsel %vm14290_vm5, %v2584_v32, %v2585_v41  ;;  %v2594_v4 = vrot.slane %v11228_v9, 2  ;;  %v2591_v17 = vrot.slane %v11201_v53, 2  ;;  %v14301_v7 = vld [vmem:[#allocation14_spill] sm:$0xff] }
  0xfa   : > { %14289 = vst [vmem:[#allocation200_spill] sm:$0xff] %v11814_v43  ;;  %14291 = vst [vmem:[#allocation201_spill] sm:$0xff] %v11818_v42  ;;  %7730 = vmatmul.mubr.f32.gmra.mrb[62].mxu1 %v11814_v43  ;;  %v8824_v31 = vpack.c.bf16 %v6634_v24, %v6633_v59  ;;  %v2596_v49 = vrot.slane %v11252_v60, 2  ;;  %v8968_v8 = vpack.c.bf16 %v6770_v58, %v6769_v0  ;;  %v2598_v39 = vrot.slane %v11270_v45, 2  ;;  %v6771_v45 = vld [vmem:[%s13340_s2 + $0x360] sm:$0xff]  ;;  %v6840_v24 = vld [vmem:[%s13340_s2 + $0x388] sm:$0xff] }
  0xfb   : > { %7764 = vmatprep.mubr.msk.f32.mxu1 %vm9959_vm8, %v9975_v25  ;;  %8328 = vmatmul.mubr.f32.gmra.mrb[34].mxu0 %v11806_v30  ;;  %v11830_v50 = vsel %vm14292_vm10, %v2593_v1, %v2594_v4  ;;  %v2600_v9 = vrot.slane %v11307_v34, 2  ;;  %v2602_v32 = vrot.slane %v11346_v52, 2  ;;  %v2603_v18 = vrot.slane %v11351_v16, 2  ;;  %v6772_v34 = vld [vmem:[%s13340_s2 + $0x368] sm:$0xff]  ;;  %vm14295_vm8 = vmmov %vm14268_vm2  ;;  %v6635_v59 = vld [vmem:[%s13340_s2 + $0x120] sm:$0xff] }
  0xfc   : > { %14293 = vst [vmem:[#allocation202_spill] sm:$0xff] %v11830_v50  ;;  %8330 = vmatprep.mubr.f32.mxu0 %v11818_v42  ;;  %v11838_v53 = vsel %vm14268_vm2, %v2594_v4, %v2596_v49  ;;  %8969 = vmatprep.subr.bf16.mxu0 %v8968_v8  ;;  %v2605_v25 = vrot.slane %v11368_v22, 2  ;;  %v2607_v60 = vrot.slane %v11395_v14, 2  ;;  %v11850_v52 = vsel %vm14295_vm8, %v2585_v41, %v2587_v63  ;;  %vm14297_vm4 = vmmov %vm14268_vm2  ;;  %v6636_v41 = vld [vmem:[%s13340_s2 + $0x128] sm:$0xff]  ;;  %v14420_v42 = vld [vmem:[#allocation90_spill] sm:$0xff] }
  0xfd   : > { %14294 = vst [vmem:[#allocation203_spill] sm:$0xff] %v11838_v53  ;;  %14296 = vst [vmem:[#allocation204_spill] sm:$0xff] %v11850_v52  ;;  %8971 = vmatpush3.bf16.msra.mxu0 %v8968_v8  ;;  %v11853_v16 = vsel %vm14297_vm4, %v2596_v49, %v2598_v39  ;;  %v2609_v14 = vrot.slane %v11422_v35, 2  ;;  %v14311_v1 = vld [vmem:[#allocation19_spill] sm:$0xff]  ;;  %v8828_v49 = vpack.c.bf16 %v6636_v41, %v6635_v59  ;;  %v6639_v59 = vld [vmem:[%s13340_s2 + $0x140] sm:$0xff] }
  0xfe   : > { %14298 = vst [vmem:[#allocation205_spill] sm:$0xff] %v11853_v16  ;;  %vm14299_vm14 = vmmov %vm14268_vm2  ;;  %7765 = vmatmul.mubr.msk.f32.vlgmr.msra.gmra.mrb[0].mxu1 %vm9923_vm6, %v14301_v7  ;;  %v14321_v41 = vld [vmem:[#allocation21_spill] sm:$0xff]  ;;  %v6839_v7 = vld [vmem:[%s13340_s2 + $0x380] sm:$0xff] }
  0xff   : > { %v11856_v22 = vsel %vm14299_vm14, %v2598_v39, %v2600_v9  ;;  %vm14303_vm0 = vmmov %vm14268_vm2  ;;  %8823 = vmatpush3.bf16.msra.mxu1 %v11753_v38  ;;  %7767 = vmatprep.mubr.msk.f32.mxu1 %vm9923_vm6, %v14311_v1  ;;  %v6637_v39 = vld [vmem:[%s13340_s2 + $0x130] sm:$0xff]  ;;  %v6638_v9 = vld [vmem:[%s13340_s2 + $0x138] sm:$0xff] }
 0x100   : > { %14300 = vst [vmem:[#allocation206_spill] sm:$0xff] %v11856_v22  ;;  %v11869_v8 = vsel %vm14303_vm0, %v2587_v63, %v2589_v5  ;;  %vm14305_vm5 = vmmov %vm14303_vm0  ;;  %v8972_v63 = vpack.c.bf16 %v6772_v34, %v6771_v45  ;;  %8331 = vmatmul.mubr.f32.gmra.mrb[36].mxu0 %v11850_v52  ;;  %8825 = vmatprep.subr.bf16.mxu1 %v8824_v31  ;;  %v14319_v34 = vld [vmem:[#allocation18_spill] sm:$0xff] }
 0x101   : > { %14304 = vst [vmem:[#allocation14_spill] sm:$0xff] %v11869_v8  ;;  %v11872_v0 = vsel %vm14305_vm5, %v2602_v32, %v2603_v18  ;;  %vm14307_vm10 = vmmov %vm14303_vm0  ;;  %8333 = vmatprep.mubr.f32.mxu0 %v11869_v8  ;;  %v6773_v32 = vld [vmem:[%s13340_s2 + $0x370] sm:$0xff]  ;;  %v14379_v8 = vld [vmem:[#allocation51_spill] sm:$0xff] }
 0x102   : > { %14306 = vst [vmem:[#allocation11_spill] sm:$0xff] %v11872_v0  ;;  %v11875_v35 = vsel %vm14307_vm10, %v2603_v18, %v2605_v25  ;;  %vm14309_vm2 = vmmov %vm14303_vm0  ;;  %8973 = vmatprep.subr.bf16.mxu0 %v8972_v63  ;;  %v6774_v18 = vld [vmem:[%s13340_s2 + $0x378] sm:$0xff] }
 0x103   : > { %14308 = vst [vmem:[#allocation207_spill] sm:$0xff] %v11875_v35  ;;  %v11878_v58 = vsel %vm14309_vm2, %v2605_v25, %v2607_v60  ;;  %vm14312_vm8 = vmmov %vm14303_vm0  ;;  %v14316_v25 = vld [vmem:[#allocation22_spill] sm:$0xff]  ;;  %8975 = vmatpush3.bf16.msra.mxu0 %v8972_v63  ;;  %8827 = vmatpush3.bf16.msra.mxu1 %v8824_v31  ;;  %v8976_v45 = vpack.c.bf16 %v6774_v18, %v6773_v32  ;;  %v6640_v31 = vld [vmem:[%s13340_s2 + $0x148] sm:$0xff] }
 0x104   : > { %14310 = vst [vmem:[#allocation208_spill] sm:$0xff] %v11878_v58  ;;  %v11885_v4 = vsel %vm14312_vm8, %v2607_v60, %v2609_v14  ;;  %vm14314_vm4 = vmmov %vm14303_vm0  ;;  %7768 = vmatmul.mubr.msk.f32.gmra.mrb[2].mxu1 %vm9923_vm6, %v14316_v25  ;;  %8829 = vmatprep.subr.bf16.mxu1 %v8828_v49  ;;  %v8832_v60 = vpack.c.bf16 %v6638_v9, %v6637_v39  ;;  %v14322_v63 = vld [vmem:[#allocation24_spill] sm:$0xff]  ;;  %v6642_v18 = vld [vmem:[%s13340_s2 + $0x158] sm:$0xff] }
 0x105   : > { %14313 = vst [vmem:[#allocation19_spill] sm:$0xff] %v11885_v4  ;;  %v11896_v38 = vsel %vm14314_vm4, %v2589_v5, %v2591_v17  ;;  %v14317_v5 = vld [vmem:[#allocation17_spill] sm:$0xff]  ;;  %8977 = vmatprep.subr.bf16.mxu0 %v8976_v45  ;;  %v8836_v1 = vpack.c.bf16 %v6640_v31, %v6639_v59  ;;  %v11943_v9 = vpack.c.bf16 %v6840_v24, %v6839_v7  ;;  %v6641_v32 = vld [vmem:[%s13340_s2 + $0x150] sm:$0xff]  ;;  %v2612_v59 = vrot.slane %v11462_v61, 2  ;;  %v6643_v31 = vld [vmem:[%s13340_s2 + $0x160] sm:$0xff] }
 0x106   : > { %14315 = vst [vmem:[#allocation209_spill] sm:$0xff] %v11896_v38  ;;  %7770 = vmatprep.mubr.msk.f32.mxu1 %vm9969_vm11, %v14317_v5  ;;  %8334 = vmatmul.mubr.f32.gmra.mrb[38].mxu0 %v11896_v38  ;;  %v14325_v25 = vld [vmem:[#allocation29_spill] sm:$0xff]  ;;  %v6644_v7 = vld [vmem:[%s13340_s2 + $0x168] sm:$0xff]  ;;  %v14327_v24 = vld [vmem:[#allocation30_spill] sm:$0xff]  ;;  %v8840_v43 = vpack.c.bf16 %v6642_v18, %v6641_v32 }
 0x107   : > { %8336 = vmatprep.mubr.f32.mxu0 %v11830_v50  ;;  %8831 = vmatpush3.bf16.msra.mxu1 %v8828_v49  ;;  %v14323_v49 = vld [vmem:[#allocation28_spill] sm:$0xff]  ;;  %v567_v61 = vld [vmem:[%s11956_s9 + $0x8] sm:$0xff]  ;;  %v14328_v32 = vld [vmem:[#allocation33_spill] sm:$0xff] }
 0x108   : > { %7771 = vmatmul.mubr.msk.f32.gmra.mrb[4].mxu1 %vm9940_vm7, %v14319_v34  ;;  %8833 = vmatprep.subr.bf16.mxu1 %v8832_v60  ;;  %v6645_v14 = vld [vmem:[%s13340_s2 + $0x170] sm:$0xff]  ;;  %vm14329_vm6 = vmmov %vm14303_vm0  ;;  %v14331_v34 = vld [vmem:[#allocation37_spill] sm:$0xff]  ;;  %v1342_v17 = vmul.f32 %v11636_v28, %v567_v61 }
 0x109   : > { %7773 = vmatprep.mubr.msk.f32.mxu1 %vm9940_vm7, %v14321_v41  ;;  %8979 = vmatpush3.bf16.msra.mxu0 %v8976_v45  ;;  %v2611_v45 = vrot.slane %v11457_v51, 2  ;;  %v2614_v51 = vrot.slane %v11482_v36, 2  ;;  %v8844_v41 = vpack.c.bf16 %v6644_v7, %v6643_v31  ;;  %v2616_v36 = vrot.slane %v11506_v2, 2  ;;  %v568_v5 = vld [vmem:[%s11956_s9 + $0x10] sm:$0xff]  ;;  %vm14333_vm14 = vmmov %vm14303_vm0  ;;  %v14335_v61 = vld [vmem:[#allocation39_spill] sm:$0xff] }
 0x10a   : > { %8337 = vmatmul.mubr.f32.gmra.mrb[40].mxu0 %v11838_v53  ;;  %8981 = vmatprep.subr.bf16.mxu0 %v11943_v9  ;;  %v2618_v2 = vrot.slane %v11539_v27, 2  ;;  %vm14338_vm5 = vmmov %vm14309_vm2  ;;  %v2621_v27 = vrot.slane %v11581_v33, 2  ;;  %v14343_v50 = vld [vmem:[#allocation43_spill] sm:$0xff]  ;;  %v14378_v38 = vld [vmem:[#allocation57_spill] sm:$0xff] }
 0x10b   : > { %8339 = vmatprep.mubr.f32.mxu0 %v11853_v16  ;;  %8835 = vmatpush3.bf16.msra.mxu1 %v8832_v60  ;;  %v11988_v18 = vsel %vm14329_vm6, %v2611_v45, %v2612_v59  ;;  %v12000_v45 = vsel %vm14333_vm14, %v2612_v59, %v2614_v51  ;;  %v2620_v59 = vrot.slane %v11575_v3, 2  ;;  %v570_v3 = vld [vmem:[%s11956_s9 + $0x20] sm:$0x3]  ;;  %vm14341_vm10 = vmmov %vm14309_vm2  ;;  %v14414_v39 = vld [vmem:[#allocation87_spill] sm:$0xff] }
 0x10c   : > { %7774 = vmatmul.mubr.msk.f32.gmra.mrb[6].mxu1 %vm9940_vm7, %v14322_v63  ;;  %8837 = vmatprep.subr.bf16.mxu1 %v8836_v1  ;;  %v566_v63 = vld [vmem:[%s11956_s9] sm:$0xff]  ;;  %14330 = vst [vmem:[#allocation22_spill] sm:$0xff] %v11988_v18  ;;  %14334 = vst [vmem:[#allocation210_spill] sm:$0xff] %v12000_v45  ;;  %v12034_v53 = vsel %vm14341_vm10, %v2616_v36, %v2618_v2  ;;  %v6848_v31 = vld [vmem:[%s13340_s2 + $0x3c8] sm:$0xff] }
 0x10d   : > { %7776 = vmatprep.mubr.msk.f32.mxu1 %vm10156_vm15, %v14323_v49  ;;  %v1341_v7 = vmul.f32 %v11636_v28, %v566_v63  ;;  %v6648_v63 = vld [vmem:[%s13340_s2 + $0x188] sm:$0xff]  ;;  %14342 = vst [vmem:[#allocation212_spill] sm:$0xff] %v12034_v53  ;;  %vm14348_vm14 = vmmov %vm14309_vm2  ;;  %v6847_v60 = vld [vmem:[%s13340_s2 + $0x3c0] sm:$0xff] }
 0x10e   : > { %8340 = vmatmul.mubr.f32.gmra.mrb[42].mxu0 %v11856_v22  ;;  %v1343_v22 = vmul.f32 %v11636_v28, %v568_v5  ;;  %v12041_v5 = vsel %vm14309_vm2, %v2620_v59, %v2621_v27  ;;  %v2627_v59 = vrot.slane %v11663_v55, 2  ;;  %vm14356_vm11 = vmmov %vm14348_vm14 }
 0x10f   : > { %8342 = vmatprep.mubr.f32.mxu0 %v11872_v0  ;;  %8839 = vmatpush3.bf16.msra.mxu1 %v8836_v1  ;;  %v6646_v1 = vld [vmem:[%s13340_s2 + $0x178] sm:$0xff]  ;;  %v1351_v0 = vadd.f32 %v11601_v26, %v1341_v7  ;;  %v2623_v7 = vrot.slane %v11621_v57, 2  ;;  %14344 = vst [vmem:[#allocation213_spill] sm:$0xff] %v12041_v5  ;;  %v1345_v57 = vmul.f32 %v11636_v28, %v570_v3  ;;  %v2629_v3 = vrot.slane %v11698_v23, 2 }
 0x110   : > { %7777 = vmatmul.mubr.msk.f32.gmra.mrb[8].mxu1 %vm10118_vm3, %v14325_v25  ;;  %8841 = vmatprep.subr.bf16.mxu1 %v8840_v43 }
 0x111   : > { %7779 = vmatprep.mubr.msk.f32.mxu1 %vm10118_vm3, %v14327_v24  ;;  %v1371_v2 = vmul.f32 0.01, %v1351_v0  ;;  %vm1361_vm10 = vcmp.ge.f32.partialorder %v1351_v0, 0.0 }
 0x112   : > { %8343 = vmatmul.mubr.f32.gmra.mrb[44].mxu0 %v11875_v35  ;;  %v569_v35 = vld [vmem:[%s11956_s9 + $0x18] sm:$0xff] }
 0x113   : > { %8345 = vmatprep.mubr.f32.mxu0 %v11878_v58  ;;  %8843 = vmatpush3.bf16.msra.mxu1 %v8840_v43  ;;  %v8848_v58 = vpack.c.bf16 %v6646_v1, %v6645_v14  ;;  %v6647_v43 = vld [vmem:[%s13340_s2 + $0x180] sm:$0xff]  ;;  %v12014_v14 = vsel %vm14338_vm5, %v2614_v51, %v2616_v36  ;;  %v14340_v1 = vld [vmem:[#allocation40_spill] sm:$0xff]  ;;  %v1352_v51 = vadd.f32 %v11601_v26, %v1342_v17 }
 0x114   : > { %7780 = vmatmul.mubr.msk.f32.gmra.mrb[10].mxu1 %vm10118_vm3, %v14328_v32  ;;  %8845 = vmatprep.subr.bf16.mxu1 %v8844_v41  ;;  %14339 = vst [vmem:[#allocation211_spill] sm:$0xff] %v12014_v14  ;;  %v1344_v16 = vmul.f32 %v11636_v28, %v569_v35  ;;  %v12030_v33 = vpack.c.bf16 %v6648_v63, %v6647_v43  ;;  %v2625_v35 = vrot.slane %v11656_v62, 2  ;;  %v14345_v17 = vld [vmem:[#allocation46_spill] sm:$0xff]  ;;  %v14353_v28 = vld [vmem:[#allocation49_spill] sm:$0xff] }
 0x115   : > { %7782 = vmatprep.mubr.msk.f32.mxu1 %vm10273_vm9, %v14331_v34  ;;  %v1353_v36 = vadd.f32 %v11601_v26, %v1343_v22  ;;  %v1372_v43 = vmul.f32 0.01, %v1352_v51  ;;  %v12056_v62 = vsel %vm14348_vm14, %v2621_v27, %v2623_v7  ;;  %v14350_v22 = vmov 0 }
 0x116   : > { %8346 = vmatmul.mubr.f32.gmra.mrb[46].mxu0 %v11885_v4  ;;  %v14336_v4 = vld [vmem:[#allocation32_spill] sm:$0xff]  ;;  %v1354_v63 = vadd.f32 %v11601_v26, %v1344_v16  ;;  %14349 = vst [vmem:[#allocation214_spill] sm:$0xff] %v12056_v62  ;;  %vm1362_vm2 = vcmp.ge.f32.partialorder %v1352_v51, 0.0  ;;  %v12067_v16 = vsel %vm14356_vm11, %v2623_v7, %v2625_v35  ;;  %v2630_v27 = vrot.slane %v11707_v12, 2 }
 0x117   : > { %8348 = vmatprep.mubr.f32.mxu0 %v11988_v18  ;;  %vm14337_vm0 = vnez %v14336_v4  ;;  %v12022_v18 = vstv %s11811_s19  ;;  %8847 = vmatpush3.bf16.msra.mxu1 %v8844_v41  ;;  %v14346_v41 = vld [vmem:[#allocation44_spill] sm:$0xff]  ;;  %14357 = vst [vmem:[#allocation216_spill] sm:$0xff] %v12067_v16  ;;  %v1373_v55 = vmul.f32 0.01, %v1353_v36  ;;  %v14360_v7 = vmov 0  ;;  %v6851_v4 = vld [vmem:[%s13340_s2 + $0x3e0] sm:$0xff] }
 0x118   : > { %7783 = vmatmul.mubr.msk.f32.gmra.mrb[12].mxu1 %vm14337_vm0, %v14335_v61  ;;  %8849 = vmatprep.subr.bf16.mxu1 %v8848_v58  ;;  %vm1315_vm8 = vcmp.ge.s32.totalorder %v12022_v18, 1  ;;  %vm1317_vm4 = vcmp.le.s32.totalorder %v12022_v18, 32  ;;  %vm14347_vm6 = vnez %v14346_v41  ;;  %v12084_v23 = vsel %vm1361_vm10, %v1351_v0, %v1371_v2  ;;  %v14370_v2 = vld [vmem:[#allocation55_spill] sm:$0xff] }
 0x119   : > { %7785 = vmatprep.mubr.msk.f32.mxu1 %vm14337_vm0, %v14340_v1  ;;  %vm12059_vm5 = vmand %vm1315_vm8, %vm1317_vm4  ;;  %vm14359_vm8 = vcmp.ge.s32.totalorder %v9798_v21, 1  ;;  %14363 = vst [vmem:[#allocation218_spill] sm:$0xff] %v12084_v23  ;;  %v12086_v12 = vsel %vm1362_vm2, %v1352_v51, %v1372_v43  ;;  %vm1363_vm11 = vcmp.ge.f32.partialorder %v1353_v36, 0.0  ;;  %vm1364_vm13 = vcmp.ge.f32.partialorder %v1354_v63, 0.0  ;;  %v14369_v51 = vld [vmem:[#allocation56_spill] sm:$0xff]  ;;  %v6852_v41 = vld [vmem:[%s13340_s2 + $0x3e8] sm:$0xff] }
 0x11a   : > { %8349 = vmatmul.mubr.f32.gmra.mrb[48].mxu0 %v12000_v45  ;;  %v14351_v22 = vsel %vm12059_vm5, 4294967295, %v14350_v22  ;;  %vm12080_vm4 = vmand %vm12059_vm5, %vm14359_vm8  ;;  %14364 = vst [vmem:[#allocation219_spill] sm:$0xff] %v12086_v12  ;;  %v2634_v0 = vrot.slane %v11767_v56, 2  ;;  %vm14371_vm10 = vnez %v14370_v2  ;;  %v12113_v43 = vsel %vm1363_vm11, %v1353_v36, %v1373_v55  ;;  %v6856_v2 = vld [vmem:[%s13340_s2 + $0x408] sm:$0xff] }
 0x11b   : > { %8351 = vmatprep.mubr.f32.mxu0 %v12014_v14  ;;  %8851 = vmatpush3.bf16.msra.mxu1 %v8848_v58  ;;  %14352 = vst [vmem:[#allocation215_spill] sm:$0xff] %v14351_v22  ;;  %v14354_v58 = vld [vmem:[#allocation41_spill] sm:$0xff]  ;;  %v14361_v7 = vsel %vm12080_vm4, 4294967295, %v14360_v7  ;;  %v1374_v14 = vmul.f32 0.01, %v1354_v63  ;;  %vm14367_vm8 = vmmov %vm14348_vm14  ;;  %v14507_v22 = vld [vmem:[#allocation31_spill] sm:$0xff] }
 0x11c   : > { %7786 = vmatmul.mubr.msk.f32.gmra.mrb[14].mxu1 %vm14337_vm0, %v14343_v50  ;;  %8853 = vmatprep.subr.bf16.mxu1 %v12030_v33  ;;  %vm14355_vm7 = vnez %v14354_v58  ;;  %14362 = vst [vmem:[#allocation217_spill] sm:$0xff] %v14361_v7  ;;  %v12097_v45 = vsel %vm14367_vm8, %v2629_v3, %v2630_v27  ;;  %14374 = vst [vmem:[#allocation223_spill] sm:$0xff] %v12113_v43  ;;  %v6855_v58 = vld [vmem:[%s13340_s2 + $0x400] sm:$0xff] }
 0x11d   : > { %7788 = vmatprep.mubr.msk.f32.mxu1 %vm14347_vm6, %v14345_v17  ;;  %v12116_v56 = vsel %vm1364_vm13, %v1354_v63, %v1374_v14  ;;  %v12134_v63 = vsel %vm12059_vm5, %v12113_v43, 0.0  ;;  %vm14386_vm13 = vcmp.le.s32.totalorder %v9849_v37, 32 }
 0x11e   : > { %8352 = vmatmul.mubr.f32.gmra.mrb[50].mxu0 %v12034_v53  ;;  %v1355_v53 = vadd.f32 %v11601_v26, %v1345_v57  ;;  %v12090_v26 = vsel %vm14348_vm14, %v2625_v35, %v2627_v59  ;;  %v2632_v57 = vrot.slane %v11718_v54, 2  ;;  %v12106_v35 = vsel %vm12080_vm4, %v12084_v23, 0.0  ;;  %14375 = vst [vmem:[#allocation224_spill] sm:$0xff] %v12116_v56  ;;  %vm14376_vm14 = vmmov %vm14367_vm8 }
 0x11f   : > { %8354 = vmatprep.mubr.f32.mxu0 %v12041_v5  ;;  %v14358_v5 = vld [vmem:[#allocation50_spill] sm:$0xff]  ;;  %14365 = vst [vmem:[#allocation220_spill] sm:$0xff] %v12090_v26  ;;  %14372 = vst [vmem:[#allocation221_spill] sm:$0xff] %v12106_v35  ;;  %v12111_v54 = vsel %vm12059_vm5, %v12086_v12, 0.0  ;;  %vm14380_vm8 = vnez %v14379_v8  ;;  %v4118_v55 = vrot.slane %v12106_v35, 2  ;;  %v4121_v35 = vrot.slane %v12134_v63, 2 }
 0x120   : > { %7789 = vmatmul.mubr.msk.f32.gmra.mrb[16].mxu1 %vm14355_vm7, %v14353_v28  ;;  %14373 = vst [vmem:[#allocation222_spill] sm:$0xff] %v12111_v54  ;;  %v1375_v59 = vmul.f32 0.01, %v1355_v53  ;;  %vm1365_vm2 = vcmp.ge.f32.partialorder %v1355_v53, 0.0  ;;  %v12120_v3 = vsel %vm14376_vm14, %v2630_v27, %v2632_v57  ;;  %vm14381_vm4 = vmmov %vm14376_vm14  ;;  %v4119_v14 = vrot.slane %v12111_v54, 2  ;;  %v14384_v27 = vld [vmem:[#allocation61_spill] sm:$0xff] }
 0x121   : > { %7791 = vmatprep.mubr.msk.f32.mxu1 %vm14355_vm7, %v14358_v5  ;;  %14377 = vst [vmem:[#allocation225_spill] sm:$0xff] %v12120_v3  ;;  %v12127_v36 = vsel %vm14381_vm4, %v2632_v57, %v2634_v0  ;;  %14383 = vst [vmem:[#allocation51_spill] sm:$0xff] %v12134_v63  ;;  %v14398_v63 = vld [vmem:[#allocation68_spill] sm:$0xff] }
 0x122   : > { %8355 = vmatmul.mubr.f32.gmra.mrb[52].mxu0 %v12056_v62  ;;  %v14366_v62 = vld [vmem:[#allocation54_spill] sm:$0xff]  ;;  %14382 = vst [vmem:[#allocation57_spill] sm:$0xff] %v12127_v36  ;;  %vm1335_vm4 = vmand %vm12059_vm5, %vm14386_vm13  ;;  %v1385_v57 = vsel %vm1365_vm2, %v1355_v53, %v1375_v59  ;;  %v14394_v59 = vld [vmem:[#allocation64_spill] sm:$0xff] }
 0x123   : > { %8357 = vmatprep.mubr.f32.mxu0 %v12067_v16  ;;  %14368 = vst [vmem:[#allocation54_spill] sm:$0xff] %v12097_v45  ;;  %v2636_v16 = vrot.slane %v11780_v29, 2  ;;  %v12142_v29 = vsel %vm12059_vm5, %v12116_v56, 0.0  ;;  %vm14387_vm11 = vmmov %vm14376_vm14  ;;  %v12161_v52 = vsel %vm1335_vm4, %v1385_v57, 0.0  ;;  %v14393_v53 = vld [vmem:[#allocation66_spill] sm:$0xff]  ;;  %vm14395_vm2 = vnez %v14394_v59 }
 0x124   : > { %7792 = vmatmul.mubr.msk.f32.gmra.mrb[18].mxu1 %vm14355_vm7, %v14366_v62  ;;  %14385 = vst [vmem:[#allocation226_spill] sm:$0xff] %v12142_v29  ;;  %vm14390_vm14 = vmmov %vm14387_vm11  ;;  %v4123_v37 = vrot.slane %v12142_v29, 2  ;;  %v14403_v29 = vld [vmem:[#allocation70_spill] sm:$0xff] }
 0x125   : > { %7794 = vmatprep.mubr.msk.f32.mxu1 %vm14371_vm10, %v14369_v51  ;;  %v12151_v54 = vsel %vm14387_vm11, %v2634_v0, %v2636_v16  ;;  %14392 = vst [vmem:[#allocation228_spill] sm:$0xff] %v12161_v52  ;;  %vm14396_vm13 = vmmov %vm14387_vm11  ;;  %v4125_v0 = vrot.slane %v12161_v52, 2  ;;  %v14407_v52 = vld [vmem:[#allocation76_spill] sm:$0xff]  ;;  %v14447_v59 = vld [vmem:[#allocation142_spill] sm:$0xff] }
 0x126   : > { %8358 = vmatmul.mubr.f32.gmra.mrb[54].mxu0 %v12090_v26  ;;  %14388 = vst [vmem:[#allocation227_spill] sm:$0xff] %v12151_v54  ;;  %v12158_v26 = vsel %vm14390_vm14, %v4118_v55, %v4119_v14  ;;  %v12169_v16 = vsel %vm14396_vm13, %v4119_v14, %v4121_v35  ;;  %v14399_v55 = vld [vmem:[#allocation62_spill] sm:$0xff]  ;;  %vm14401_vm14 = vmmov %vm14396_vm13 }
 0x127   : > { %8360 = vmatprep.mubr.f32.mxu0 %v12097_v45  ;;  %v14389_v45 = vld [vmem:[#allocation63_spill] sm:$0xff]  ;;  %14397 = vst [vmem:[#allocation229_spill] sm:$0xff] %v12169_v16  ;;  %vm14400_vm11 = vnez %v14399_v55  ;;  %v12176_v57 = vsel %vm14401_vm14, %v4121_v35, %v4123_v37  ;;  %vm14404_vm4 = vmmov %vm14396_vm13  ;;  %v6841_v35 = vld [vmem:[%s13340_s2 + $0x390] sm:$0xff] }
 0x128   : > { %7795 = vmatmul.mubr.msk.f32.gmra.mrb[20].mxu1 %vm14380_vm8, %v14378_v38  ;;  %14391 = vst [vmem:[#allocation63_spill] sm:$0xff] %v12158_v26  ;;  %14402 = vst [vmem:[#allocation230_spill] sm:$0xff] %v12176_v57  ;;  %v12184_v14 = vsel %vm14404_vm4, %v4123_v37, %v4125_v0  ;;  %v14410_v37 = vld [vmem:[#allocation77_spill] sm:$0xff]  ;;  %v14411_v0 = vld [vmem:[#allocation71_spill] sm:$0xff] }
 0x129   : > { %7797 = vmatprep.mubr.msk.f32.mxu1 %vm14380_vm8, %v14384_v27  ;;  %14405 = vst [vmem:[#allocation231_spill] sm:$0xff] %v12184_v14  ;;  %v14458_v55 = vld [vmem:[#allocation154_spill] sm:$0xff] }
 0x12a   : > { %8361 = vmatmul.mubr.f32.gmra.mrb[56].mxu0 %v12120_v3  ;;  %v6843_v3 = vld [vmem:[%s13340_s2 + $0x3a0] sm:$0xff] }
 0x12b   : > { %8363 = vmatprep.mubr.f32.mxu0 %v12127_v36  ;;  %v14412_v36 = vld [vmem:[#allocation81_spill] sm:$0xff] }
 0x12c   : > { %7798 = vmatmul.mubr.msk.f32.gmra.mrb[22].mxu1 %vm14380_vm8, %v14389_v45 }
 0x12d   : > { %7800 = vmatprep.mubr.msk.f32.mxu1 %vm14395_vm2, %v14393_v53 }
 0x12e   : > { %8364 = vmatmul.mubr.f32.gmra.mrb[58].mxu0 %v12151_v54  ;;  %v14408_v54 = vld [vmem:[#allocation74_spill] sm:$0xff] }
 0x12f   : > { %8366 = vmatprep.mubr.f32.mxu0 %v12158_v26  ;;  %v14406_v26 = vld [vmem:[#allocation75_spill] sm:$0xff]  ;;  %vm14409_vm13 = vnez %v14408_v54 }
 0x130   : > { %7801 = vmatmul.mubr.msk.f32.gmra.mrb[24].mxu1 %vm14400_vm11, %v14398_v63  ;;  %v14454_v54 = vld [vmem:[#allocation159_spill] sm:$0xff] }
 0x131   : > { %7803 = vmatprep.mubr.msk.f32.mxu1 %vm14400_vm11, %v14403_v29 }
 0x132   : > { %8367 = vmatmul.mubr.f32.gmra.mrb[60].mxu0 %v12169_v16  ;;  %v6842_v16 = vld [vmem:[%s13340_s2 + $0x398] sm:$0xff] }
 0x133   : > { %8369 = vmatprep.mubr.f32.mxu0 %v12176_v57  ;;  %v8984_v57 = vpack.c.bf16 %v6842_v16, %v6841_v35  ;;  %v14413_v16 = vld [vmem:[#allocation84_spill] sm:$0xff] }
 0x134   : > { %7804 = vmatmul.mubr.msk.f32.gmra.mrb[26].mxu1 %vm14400_vm11, %v14406_v26 }
 0x135   : > { %7806 = vmatprep.mubr.msk.f32.mxu1 %vm14409_vm13, %v14407_v52 }
 0x136   : > { %8370 = vmatmul.mubr.f32.gmra.mrb[62].mxu0 %v12184_v14  ;;  %v6844_v14 = vld [vmem:[%s13340_s2 + $0x3a8] sm:$0xff] }
 0x137   : > { %8404 = vmatprep.mubr.msk.f32.mxu0 %vm10156_vm15, %v14323_v49  ;;  %v8988_v35 = vpack.c.bf16 %v6844_v14, %v6843_v3  ;;  %v14415_v49 = vld [vmem:[#allocation85_spill] sm:$0xff]  ;;  %v14417_v3 = vld [vmem:[#allocation88_spill] sm:$0xff]  ;;  %v14418_v14 = vld [vmem:[#allocation82_spill] sm:$0xff] }
 0x138   : > { %7807 = vmatmul.mubr.msk.f32.gmra.mrb[28].mxu1 %vm10657_vm12, %v14410_v37  ;;  %vm14416_vm14 = vnez %v14415_v49  ;;  %vm14419_vm4 = vnez %v14418_v14  ;;  %v14469_v14 = vld [vmem:[#allocation20_spill] sm:$0xff]  ;;  %v14470_v49 = vld [vmem:[#allocation190_spill] sm:$0xff] }
 0x139   : > { %7809 = vmatprep.mubr.msk.f32.mxu1 %vm10657_vm12, %v14412_v36 }
 0x13a   : > { %8405 = vmatmul.mubr.msk.f32.vlgmr.msra.gmra.mrb[0].mxu0 %vm10118_vm3, %v14325_v25  ;;  %v6845_v25 = vld [vmem:[%s13340_s2 + $0x3b0] sm:$0xff] }
 0x13b   : > { %8983 = vmatpush3.bf16.msra.mxu0 %v11943_v9  ;;  %8407 = vmatprep.mubr.msk.f32.mxu0 %vm10118_vm3, %v14327_v24  ;;  %v6846_v9 = vld [vmem:[%s13340_s2 + $0x3b8] sm:$0xff] }
 0x13c   : > { %7810 = vmatmul.mubr.msk.f32.gmra.mrb[30].mxu1 %vm10657_vm12, %v14413_v16  ;;  %8985 = vmatprep.subr.bf16.mxu0 %v8984_v57  ;;  %v8992_v24 = vpack.c.bf16 %v6846_v9, %v6845_v25  ;;  %v14421_v25 = vld [vmem:[#allocation94_spill] sm:$0xff]  ;;  %v14422_v9 = vld [vmem:[#allocation105_spill] sm:$0xff] }
 0x13d   : > { %7812 = vmatprep.mubr.msk.f32.mxu1 %vm14416_vm14, %v14414_v39 }
 0x13e   : > { %8408 = vmatmul.mubr.msk.f32.gmra.mrb[2].mxu0 %vm10118_vm3, %v14328_v32  ;;  %v6849_v32 = vld [vmem:[%s13340_s2 + $0x3d0] sm:$0xff] }
 0x13f   : > { %8410 = vmatprep.mubr.msk.f32.mxu0 %vm10273_vm9, %v14331_v34  ;;  %8987 = vmatpush3.bf16.msra.mxu0 %v8984_v57  ;;  %v8996_v57 = vpack.c.bf16 %v6848_v31, %v6847_v60  ;;  %v14423_v34 = vld [vmem:[#allocation103_spill] sm:$0xff]  ;;  %v14425_v60 = vld [vmem:[#allocation106_spill] sm:$0xff] }
 0x140   : > { %7813 = vmatmul.mubr.msk.f32.gmra.mrb[32].mxu1 %vm14419_vm4, %v14417_v3  ;;  %8989 = vmatprep.subr.bf16.mxu0 %v8988_v35  ;;  %vm14424_vm9 = vnez %v14423_v34  ;;  %v14426_v31 = vld [vmem:[#allocation99_spill] sm:$0xff]  ;;  %v14463_v34 = vld [vmem:[#allocation184_spill] sm:$0xff] }
 0x141   : > { %7815 = vmatprep.mubr.msk.f32.mxu1 %vm14419_vm4, %v14420_v42  ;;  %vm14427_vm3 = vnez %v14426_v31  ;;  %v6651_v31 = vld [vmem:[%s13340_s2 + $0x1a0] sm:$0xff] }
 0x142   : > { %8411 = vmatmul.mubr.msk.f32.gmra.mrb[4].mxu0 %vm14337_vm0, %v14335_v61  ;;  %v6850_v61 = vld [vmem:[%s13340_s2 + $0x3d8] sm:$0xff] }
 0x143   : > { %8413 = vmatprep.mubr.msk.f32.mxu0 %vm14337_vm0, %v14340_v1  ;;  %8991 = vmatpush3.bf16.msra.mxu0 %v8988_v35  ;;  %v9000_v35 = vpack.c.bf16 %v6850_v61, %v6849_v32  ;;  %v14428_v1 = vld [vmem:[#allocation108_spill] sm:$0xff]  ;;  %v9004_v32 = vpack.c.bf16 %v6852_v41, %v6851_v4  ;;  %v14430_v61 = vld [vmem:[#allocation117_spill] sm:$0xff]  ;;  %v14433_v4 = vld [vmem:[#allocation118_spill] sm:$0xff] }
 0x144   : > { %7816 = vmatmul.mubr.msk.f32.gmra.mrb[34].mxu1 %vm14419_vm4, %v14421_v25  ;;  %8993 = vmatprep.subr.bf16.mxu0 %v8992_v24  ;;  %v14434_v41 = vld [vmem:[#allocation112_spill] sm:$0xff] }
 0x145   : > { %7818 = vmatprep.mubr.msk.f32.mxu1 %vm14424_vm9, %v14422_v9 }
 0x146   : > { %8414 = vmatmul.mubr.msk.f32.gmra.mrb[6].mxu0 %vm14337_vm0, %v14343_v50  ;;  %v6853_v50 = vld [vmem:[%s13340_s2 + $0x3f0] sm:$0xff]  ;;  %vm14435_vm0 = vnez %v14434_v41  ;;  %v14702_v41 = vld [vmem:[#allocation183_spill] sm:$0xff] }
 0x147   : > { %8416 = vmatprep.mubr.msk.f32.mxu0 %vm14347_vm6, %v14345_v17  ;;  %8995 = vmatpush3.bf16.msra.mxu0 %v8992_v24  ;;  %v14429_v24 = vld [vmem:[#allocation111_spill] sm:$0xff]  ;;  %v14431_v17 = vld [vmem:[#allocation113_spill] sm:$0xff] }
 0x148   : > { %7819 = vmatmul.mubr.msk.f32.gmra.mrb[36].mxu1 %vm14427_vm3, %v14425_v60  ;;  %8997 = vmatprep.subr.bf16.mxu0 %v8996_v57  ;;  %vm14432_vm6 = vnez %v14431_v17  ;;  %v6650_v17 = vld [vmem:[%s13340_s2 + $0x198] sm:$0xff] }
 0x149   : > { %7821 = vmatprep.mubr.msk.f32.mxu1 %vm14427_vm3, %v14428_v1 }
 0x14a   : > { %8417 = vmatmul.mubr.msk.f32.gmra.mrb[8].mxu0 %vm14355_vm7, %v14353_v28  ;;  %v6854_v28 = vld [vmem:[%s13340_s2 + $0x3f8] sm:$0xff] }
 0x14b   : > { %8419 = vmatprep.mubr.msk.f32.mxu0 %vm14355_vm7, %v14358_v5  ;;  %8999 = vmatpush3.bf16.msra.mxu0 %v8996_v57  ;;  %v9008_v57 = vpack.c.bf16 %v6854_v28, %v6853_v50  ;;  %v14436_v5 = vld [vmem:[#allocation121_spill] sm:$0xff]  ;;  %v14437_v50 = vld [vmem:[#allocation124_spill] sm:$0xff]  ;;  %v12332_v28 = vpack.c.bf16 %v6856_v2, %v6855_v58  ;;  %v14444_v58 = vld [vmem:[#allocation135_spill] sm:$0xff] }
 0x14c   : > { %7822 = vmatmul.mubr.msk.f32.gmra.mrb[38].mxu1 %vm14427_vm3, %v14429_v24  ;;  %9001 = vmatprep.subr.bf16.mxu0 %v9000_v35  ;;  %v14445_v2 = vld [vmem:[#allocation138_spill] sm:$0xff] }
 0x14d   : > { %7824 = vmatprep.mubr.msk.f32.mxu1 %vm14432_vm6, %v14430_v61 }
 0x14e   : > { %8420 = vmatmul.mubr.msk.f32.gmra.mrb[10].mxu0 %vm14355_vm7, %v14366_v62 }
 0x14f   : > { %8422 = vmatprep.mubr.msk.f32.mxu0 %vm14371_vm10, %v14369_v51  ;;  %9003 = vmatpush3.bf16.msra.mxu0 %v9000_v35  ;;  %v14438_v35 = vld [vmem:[#allocation129_spill] sm:$0xff]  ;;  %v14439_v51 = vld [vmem:[#allocation127_spill] sm:$0xff] }
 0x150   : > { %7825 = vmatmul.mubr.msk.f32.gmra.mrb[40].mxu1 %vm14435_vm0, %v14433_v4  ;;  %9005 = vmatprep.subr.bf16.mxu0 %v9004_v32  ;;  %vm14440_vm10 = vnez %v14439_v51  ;;  %v14691_v51 = vld [vmem:[#allocation171_spill] sm:$0xff] }
 0x151   : > { %7827 = vmatprep.mubr.msk.f32.mxu1 %vm14435_vm0, %v14436_v5 }
 0x152   : > { %8423 = vmatmul.mubr.msk.f32.gmra.mrb[12].mxu0 %vm14380_vm8, %v14378_v38 }
 0x153   : > { %8425 = vmatprep.mubr.msk.f32.mxu0 %vm14380_vm8, %v14384_v27  ;;  %9007 = vmatpush3.bf16.msra.mxu0 %v9004_v32  ;;  %v14441_v32 = vld [vmem:[#allocation131_spill] sm:$0xff]  ;;  %v14442_v27 = vld [vmem:[#allocation126_spill] sm:$0xff] }
 0x154   : > { %7828 = vmatmul.mubr.msk.f32.gmra.mrb[42].mxu1 %vm14435_vm0, %v14437_v50  ;;  %9009 = vmatprep.subr.bf16.mxu0 %v9008_v57  ;;  %vm14443_vm7 = vnez %v14442_v27  ;;  %v14694_v27 = vld [vmem:[#allocation162_spill] sm:$0xff] }
 0x155   : > { %7830 = vmatprep.mubr.msk.f32.mxu1 %vm14440_vm10, %v14438_v35 }
 0x156   : > { %8426 = vmatmul.mubr.msk.f32.gmra.mrb[14].mxu0 %vm14380_vm8, %v14389_v45 }
 0x157   : > { %8428 = vmatprep.mubr.msk.f32.mxu0 %vm14395_vm2, %v14393_v53  ;;  %9011 = vmatpush3.bf16.msra.mxu0 %v9008_v57  ;;  %v14446_v57 = vld [vmem:[#allocation145_spill] sm:$0xff]  ;;  %vm14448_vm2 = vnez %v14447_v59  ;;  %v14450_v53 = vld [vmem:[#allocation140_spill] sm:$0xff]  ;;  %v14699_v59 = vld [vmem:[#allocation170_spill] sm:$0xff] }
 0x158   : > { %7831 = vmatmul.mubr.msk.f32.gmra.mrb[44].mxu1 %vm14443_vm7, %v14441_v32  ;;  %9013 = vmatprep.subr.bf16.mxu0 %v12332_v28  ;;  %vm14451_vm8 = vnez %v14450_v53  ;;  %v14698_v53 = vld [vmem:[#allocation172_spill] sm:$0xff] }
 0x159   : > { %7833 = vmatprep.mubr.msk.f32.mxu1 %vm14443_vm7, %v14444_v58 }
 0x15a   : > { %8429 = vmatmul.mubr.msk.f32.gmra.mrb[16].mxu0 %vm14400_vm11, %v14398_v63  ;;  %v14449_v63 = vld [vmem:[#allocation146_spill] sm:$0xff] }
 0x15b   : > { %8431 = vmatprep.mubr.msk.f32.mxu0 %vm14400_vm11, %v14403_v29  ;;  %v14452_v29 = vld [vmem:[#allocation148_spill] sm:$0xff] }
 0x15c   : > { %7834 = vmatmul.mubr.msk.f32.gmra.mrb[46].mxu1 %vm14443_vm7, %v14445_v2 }
 0x15d   : > { %7836 = vmatprep.mubr.msk.f32.mxu1 %vm14448_vm2, %v14446_v57 }
 0x15e   : > { %8432 = vmatmul.mubr.msk.f32.gmra.mrb[18].mxu0 %vm14400_vm11, %v14406_v26  ;;  %v14453_v26 = vld [vmem:[#allocation151_spill] sm:$0xff]  ;;  %vm14459_vm11 = vnez %v14458_v55  ;;  %v14495_v55 = vld [vmem:[#allocation150_spill] sm:$0xff] }
 0x15f   : > { %8434 = vmatprep.mubr.msk.f32.mxu0 %vm14409_vm13, %v14407_v52  ;;  %v14455_v52 = vld [vmem:[#allocation156_spill] sm:$0xff] }
 0x160   : > { %7837 = vmatmul.mubr.msk.f32.gmra.mrb[48].mxu1 %vm14451_vm8, %v14449_v63  ;;  %vm14456_vm13 = vnez %v14455_v52  ;;  %v14511_v52 = vld [vmem:[#allocation36_spill] sm:$0xff] }
 0x161   : > { %7839 = vmatprep.mubr.msk.f32.mxu1 %vm14451_vm8, %v14452_v29 }
 0x162   : > { %8435 = vmatmul.mubr.msk.f32.gmra.mrb[20].mxu0 %vm10657_vm12, %v14410_v37  ;;  %v14457_v37 = vld [vmem:[#allocation160_spill] sm:$0xff] }
 0x163   : > { %8437 = vmatprep.mubr.msk.f32.mxu0 %vm10657_vm12, %v14412_v36  ;;  %v14460_v36 = vld [vmem:[#allocation162_spill] sm:$0xff] }
 0x164   : > { %7840 = vmatmul.mubr.msk.f32.gmra.mrb[50].mxu1 %vm14451_vm8, %v14453_v26 }
 0x165   : > { %7842 = vmatprep.mubr.msk.f32.mxu1 %vm14456_vm13, %v14454_v54 }
 0x166   : > { %8438 = vmatmul.mubr.msk.f32.gmra.mrb[22].mxu0 %vm10657_vm12, %v14413_v16  ;;  %v14461_v16 = vld [vmem:[#allocation165_spill] sm:$0xff]  ;;  %vm14471_vm12 = vcmask 1045504  }
 0x167   : > { %8440 = vmatprep.mubr.msk.f32.mxu0 %vm14416_vm14, %v14414_v39  ;;  %vm14462_vm14 = vnez %v14231_v11  ;;  %v14490_v11 = vld [vmem:[#allocation136_spill] sm:$0xff] }
 0x168   : > { %7843 = vmatmul.mubr.msk.f32.gmra.mrb[52].mxu1 %vm14459_vm11, %v14457_v37 }
 0x169   : > { %7845 = vmatprep.mubr.msk.f32.mxu1 %vm14459_vm11, %v14460_v36 }
 0x16a   : > { %8441 = vmatmul.mubr.msk.f32.gmra.mrb[24].mxu0 %vm14419_vm4, %v14417_v3  ;;  %v2497_v3 = vrot.slane %v14469_v14, 2  ;;  %v6649_v14 = vld [vmem:[%s13340_s2 + $0x190] sm:$0xff] }
 0x16b   : > { %8443 = vmatprep.mubr.msk.f32.mxu0 %vm14419_vm4, %v14420_v42  ;;  %v14466_v42 = vld [vmem:[#allocation16_spill] sm:$0xff] }
 0x16c   : > { %7846 = vmatmul.mubr.msk.f32.gmra.mrb[54].mxu1 %vm14459_vm11, %v14461_v16 }
 0x16d   : > { %7848 = vmatprep.mubr.msk.f32.mxu1 %vm14462_vm14, %v11560_v20 }
 0x16e   : > { %8444 = vmatmul.mubr.msk.f32.gmra.mrb[26].mxu0 %vm14419_vm4, %v14421_v25  ;;  %vm14468_vm4 = vnez %v14252_v47  ;;  %v14656_v47 = vld [vmem:[#allocation76_spill] sm:$0xff] }
 0x16f   : > { %8446 = vmatprep.mubr.msk.f32.mxu0 %vm14424_vm9, %v14422_v9  ;;  %vm14464_vm9 = vnez %v14463_v34  ;;  %v14465_v9 = vld [vmem:[#allocation15_spill] sm:$0xff]  ;;  %v1314_v34 = vadd.s32 1, %v12022_v18 }
 0x170   : > { %7849 = vmatmul.mubr.msk.f32.gmra.mrb[56].mxu1 %vm11521_vm1, %v11570_v44  ;;  %v2494_v25 = vrot.slane %v14465_v9, 2 }
 0x171   : > { %7851 = vmatprep.mubr.msk.f32.mxu1 %vm11521_vm1, %v11611_v13 }
 0x172   : > { %8447 = vmatmul.mubr.msk.f32.gmra.mrb[28].mxu0 %vm14427_vm3, %v14425_v60  ;;  %v2495_v60 = vrot.slane %v14466_v42, 2  ;;  %v14472_v42 = vld [vmem:[#allocation23_spill] sm:$0xff] }
 0x173   : > { %8449 = vmatprep.mubr.msk.f32.mxu0 %vm14427_vm3, %v14428_v1  ;;  %v14467_v1 = vld [vmem:[#allocation188_spill] sm:$0xff]  ;;  %v2499_v9 = vrot.slane %v14472_v42, 2  ;;  %v14473_v42 = vld [vmem:[#allocation26_spill] sm:$0xff] }
 0x174   : > { %7852 = vmatmul.mubr.msk.f32.gmra.mrb[58].mxu1 %vm11521_vm1, %v11640_v10 }
 0x175   : > { %7854 = vmatprep.mubr.msk.f32.mxu1 %vm14464_vm9, %v11689_v6 }
 0x176   : > { %8450 = vmatmul.mubr.msk.f32.gmra.mrb[30].mxu0 %vm14427_vm3, %v14429_v24  ;;  %v2496_v24 = vsel %vm14471_vm12, %v2494_v25, %v2495_v60  ;;  %v2498_v25 = vsel %vm14471_vm12, %v2495_v60, %v2497_v3  ;;  %v6652_v60 = vld [vmem:[%s13340_s2 + $0x1a8] sm:$0xff] }
 0x177   : > { %8452 = vmatprep.mubr.msk.f32.mxu0 %vm14432_vm6, %v14430_v61  ;;  %vm14474_vm6 = vmmov %vm14471_vm12  ;;  %vm1316_vm12 = vcmp.ge.s32.totalorder %v1314_v34, 1 }
 0x178   : > { %7855 = vmatmul.mubr.msk.f32.gmra.mrb[60].mxu1 %vm14468_vm4, %v14467_v1  ;;  %v2500_v61 = vsel %vm14474_vm6, %v2497_v3, %v2499_v9 }
 0x179   : > { %7857 = vmatprep.mubr.msk.f32.mxu1 %vm14468_vm4, %v14470_v49 }
 0x17a   : > { %8453 = vmatmul.mubr.msk.f32.gmra.mrb[32].mxu0 %vm14435_vm0, %v14433_v4  ;;  %v2501_v4 = vrot.slane %v14473_v42, 2  ;;  %v6657_v42 = vld [vmem:[%s13340_s2 + $0x1d0] sm:$0xff] }
 0x17b   : > { %8455 = vmatprep.mubr.msk.f32.mxu0 %vm14435_vm0, %v14436_v5  ;;  %v8856_v5 = vpack.c.bf16 %v6650_v17, %v6649_v14  ;;  %v8860_v17 = vpack.c.bf16 %v6652_v60, %v6651_v31  ;;  %v14476_v14 = vld [vmem:[#allocation95_spill] sm:$0xff]  ;;  %v6658_v60 = vld [vmem:[%s13340_s2 + $0x1d8] sm:$0xff] }
 0x17c   : > { %7858 = vmatmul.mubr.msk.f32.gmra.mrb[62].mxu1 %vm14468_vm4, %v11756_v40  ;;  %v2502_v3 = vsel %vm14474_vm6, %v2499_v9, %v2501_v4  ;;  %v6655_v4 = vld [vmem:[%s13340_s2 + $0x1c0] sm:$0xff]  ;;  %v6656_v9 = vld [vmem:[%s13340_s2 + $0x1c8] sm:$0xff]  ;;  %vm1318_vm6 = vcmp.le.s32.totalorder %v1314_v34, 32 }
 0x17d   : > { %7892 = vmatprep.mubr.f32.mxu1 %v2496_v24  ;;  %v6653_v24 = vld [vmem:[%s13340_s2 + $0x1b0] sm:$0xff] }
 0x17e   : > { %8456 = vmatmul.mubr.msk.f32.gmra.mrb[34].mxu0 %vm14435_vm0, %v14437_v50 }
 0x17f   : > { %8458 = vmatprep.mubr.msk.f32.mxu0 %vm14440_vm10, %v14438_v35 }
 0x180   : > { %7893 = vmatmul.mubr.f32.vlgmr.msra.gmra.mrb[0].mxu1 %v2498_v25  ;;  %v8868_v25 = vpack.c.bf16 %v6656_v9, %v6655_v4  ;;  %v14480_v4 = vld [vmem:[#allocation102_spill] sm:$0xff] }
 0x181   : > { %8855 = vmatpush3.bf16.msra.mxu1 %v12030_v33  ;;  %7895 = vmatprep.mubr.f32.mxu1 %v2500_v61  ;;  %v6654_v33 = vld [vmem:[%s13340_s2 + $0x1b8] sm:$0xff] }
 0x182   : > { %8459 = vmatmul.mubr.msk.f32.gmra.mrb[36].mxu0 %vm14443_vm7, %v14441_v32  ;;  %8857 = vmatprep.subr.bf16.mxu1 %v8856_v5  ;;  %v14475_v61 = vld [vmem:[#allocation93_spill] sm:$0xff]  ;;  %v8864_v31 = vpack.c.bf16 %v6654_v33, %v6653_v24  ;;  %v8872_v24 = vpack.c.bf16 %v6658_v60, %v6657_v42  ;;  %v6659_v33 = vld [vmem:[%s13340_s2 + $0x1e0] sm:$0xff]  ;;  %v14482_v42 = vld [vmem:[#allocation107_spill] sm:$0xff] }
 0x183   : > { %8461 = vmatprep.mubr.msk.f32.mxu0 %vm14443_vm7, %v14444_v58 }
 0x184   : > { %7896 = vmatmul.mubr.f32.gmra.mrb[2].mxu1 %v2502_v3  ;;  %v14478_v3 = vld [vmem:[#allocation97_spill] sm:$0xff] }
 0x185   : > { %7898 = vmatprep.mubr.f32.mxu1 %v14475_v61  ;;  %8859 = vmatpush3.bf16.msra.mxu1 %v8856_v5  ;;  %v14477_v5 = vld [vmem:[#allocation96_spill] sm:$0xff]  ;;  %v6660_v61 = vld [vmem:[%s13340_s2 + $0x1e8] sm:$0xff] }
 0x186   : > { %8462 = vmatmul.mubr.msk.f32.gmra.mrb[38].mxu0 %vm14443_vm7, %v14445_v2  ;;  %8861 = vmatprep.subr.bf16.mxu1 %v8860_v17  ;;  %v8876_v9 = vpack.c.bf16 %v6660_v61, %v6659_v33  ;;  %v14485_v33 = vld [vmem:[#allocation120_spill] sm:$0xff]  ;;  %v14487_v61 = vld [vmem:[#allocation130_spill] sm:$0xff] }
 0x187   : > { %8464 = vmatprep.mubr.msk.f32.mxu0 %vm14448_vm2, %v14446_v57 }
 0x188   : > { %7899 = vmatmul.mubr.f32.gmra.mrb[4].mxu1 %v14476_v14  ;;  %v6661_v14 = vld [vmem:[%s13340_s2 + $0x1f0] sm:$0xff] }
 0x189   : > { %7901 = vmatprep.mubr.f32.mxu1 %v14477_v5  ;;  %8863 = vmatpush3.bf16.msra.mxu1 %v8860_v17  ;;  %v14479_v17 = vld [vmem:[#allocation101_spill] sm:$0xff] }
 0x18a   : > { %8465 = vmatmul.mubr.msk.f32.gmra.mrb[40].mxu0 %vm14451_vm8, %v14449_v63  ;;  %8865 = vmatprep.subr.bf16.mxu1 %v8864_v31  ;;  %v6662_v5 = vld [vmem:[%s13340_s2 + $0x1f8] sm:$0xff] }
 0x18b   : > { %8467 = vmatprep.mubr.msk.f32.mxu0 %vm14451_vm8, %v14452_v29  ;;  %v8880_v60 = vpack.c.bf16 %v6662_v5, %v6661_v14  ;;  %v571_v14 = vld [vmem:[%s11956_s9 + $0x28] sm:$0xff]  ;;  %v14489_v5 = vld [vmem:[#allocation133_spill] sm:$0xff] }
 0x18c   : > { %7902 = vmatmul.mubr.f32.gmra.mrb[6].mxu1 %v14478_v3  ;;  %v14484_v3 = vld [vmem:[#allocation119_spill] sm:$0xff] }
 0x18d   : > { %7904 = vmatprep.mubr.f32.mxu1 %v14479_v17  ;;  %8867 = vmatpush3.bf16.msra.mxu1 %v8864_v31  ;;  %v14481_v31 = vld [vmem:[#allocation104_spill] sm:$0xff] }
 0x18e   : > { %8468 = vmatmul.mubr.msk.f32.gmra.mrb[42].mxu0 %vm14451_vm8, %v14453_v26  ;;  %8869 = vmatprep.subr.bf16.mxu1 %v8868_v25 }
 0x18f   : > { %8470 = vmatprep.mubr.msk.f32.mxu0 %vm14456_vm13, %v14454_v54  ;;  %v14514_v54 = vld [vmem:[#allocation38_spill] sm:$0xff] }
 0x190   : > { %7905 = vmatmul.mubr.f32.gmra.mrb[8].mxu1 %v14480_v4 }
 0x191   : > { %7907 = vmatprep.mubr.f32.mxu1 %v14481_v31  ;;  %8871 = vmatpush3.bf16.msra.mxu1 %v8868_v25  ;;  %v14483_v25 = vld [vmem:[#allocation115_spill] sm:$0xff] }
 0x192   : > { %8471 = vmatmul.mubr.msk.f32.gmra.mrb[44].mxu0 %vm14459_vm11, %v14457_v37  ;;  %8873 = vmatprep.subr.bf16.mxu1 %v8872_v24  ;;  %v6859_v37 = vld [vmem:[%s13340_s2 + $0x420] sm:$0xff] }
 0x193   : > { %8473 = vmatprep.mubr.msk.f32.mxu0 %vm14459_vm11, %v14460_v36  ;;  %v14492_v36 = vld [vmem:[#allocation143_spill] sm:$0xff] }
 0x194   : > { %7908 = vmatmul.mubr.f32.gmra.mrb[10].mxu1 %v14482_v42 }
 0x195   : > { %7910 = vmatprep.mubr.f32.mxu1 %v14483_v25  ;;  %8875 = vmatpush3.bf16.msra.mxu1 %v8872_v24  ;;  %v14486_v24 = vld [vmem:[#allocation123_spill] sm:$0xff] }
 0x196   : > { %8474 = vmatmul.mubr.msk.f32.gmra.mrb[46].mxu0 %vm14459_vm11, %v14461_v16  ;;  %8877 = vmatprep.subr.bf16.mxu1 %v8876_v9 }
 0x197   : > { %8476 = vmatprep.mubr.msk.f32.mxu0 %vm14462_vm14, %v11560_v20 }
 0x198   : > { %7911 = vmatmul.mubr.f32.gmra.mrb[12].mxu1 %v14484_v3 }
 0x199   : > { %7913 = vmatprep.mubr.f32.mxu1 %v14485_v33  ;;  %8879 = vmatpush3.bf16.msra.mxu1 %v8876_v9  ;;  %v14488_v9 = vld [vmem:[#allocation2_spill] sm:$0xff] }
 0x19a   : > { %8477 = vmatmul.mubr.msk.f32.gmra.mrb[48].mxu0 %vm11521_vm1, %v11570_v44  ;;  %8881 = vmatprep.subr.bf16.mxu1 %v8880_v60  ;;  %v572_v44 = vld [vmem:[%s11956_s9 + $0x30] sm:$0xff] }
 0x19b   : > { %8479 = vmatprep.mubr.msk.f32.mxu0 %vm11521_vm1, %v11611_v13  ;;  %v12580_v13 = vld [vmem:[%s13341_s3] ss:$0 sm:$0xff] }
 0x19c   : > { %7914 = vmatmul.mubr.f32.gmra.mrb[14].mxu1 %v14486_v24 }
 0x19d   : > { %7916 = vmatprep.mubr.f32.mxu1 %v14487_v61  ;;  %8883 = vmatpush3.bf16.msra.mxu1 %v8880_v60  ;;  %v1346_v60 = vmul.f32 %v12580_v13, %v571_v14  ;;  %v12598_v14 = vld [vmem:[%s13342_s4] ss:$0 sm:$0xff] }
 0x19e   : > { %8480 = vmatmul.mubr.msk.f32.gmra.mrb[50].mxu0 %vm11521_vm1, %v11640_v10  ;;  %9044 = vmatprep.subr.bf16.mxu1 %v14488_v9  ;;  %v573_v10 = vld [vmem:[%s11956_s9 + $0x38] sm:$0xff]  ;;  %vm12615_vm1 = vmand %vm1316_vm12, %vm1318_vm6 }
 0x19f   : > { %8482 = vmatprep.mubr.msk.f32.mxu0 %vm14464_vm9, %v11689_v6  ;;  %v1347_v6 = vmul.f32 %v12580_v13, %v572_v44  ;;  %v1356_v20 = vadd.f32 %v12598_v14, %v1346_v60  ;;  %v1348_v16 = vmul.f32 %v12580_v13, %v573_v10  ;;  %vm14493_vm9 = vnez %v14361_v7  ;;  %v14494_v60 = vld [vmem:[#allocation147_spill] sm:$0xff] }
 0x1a0   : > { %7917 = vmatmul.mubr.f32.gmra.mrb[16].mxu1 %v14489_v5 }
 0x1a1   : > { %7919 = vmatprep.mubr.f32.mxu1 %v14490_v11  ;;  %v1357_v44 = vadd.f32 %v12598_v14, %v1347_v6  ;;  %v1376_v10 = vmul.f32 0.01, %v1356_v20 }
 0x1a2   : > { %8483 = vmatmul.mubr.msk.f32.gmra.mrb[52].mxu0 %vm14468_vm4, %v14467_v1  ;;  %v574_v1 = vld [vmem:[%s11956_s9 + $0x40] sm:$0xff] }
 0x1a3   : > { %8485 = vmatprep.mubr.msk.f32.mxu0 %vm14468_vm4, %v14470_v49  ;;  %v1349_v18 = vmul.f32 %v12580_v13, %v574_v1  ;;  %v1358_v49 = vadd.f32 %v12598_v14, %v1348_v16  ;;  %v1377_v6 = vmul.f32 0.01, %v1357_v44  ;;  %v14498_v1 = vld [vmem:[#allocation152_spill] sm:$0xff]  ;;  %vm1367_vm6 = vcmp.ge.f32.partialorder %v1357_v44, 0.0 }
 0x1a4   : > { %7920 = vmatmul.mubr.f32.gmra.mrb[18].mxu1 %v14491_v19 }
 0x1a5   : > { %7922 = vmatprep.mubr.f32.mxu1 %v14492_v36  ;;  %v1359_v34 = vadd.f32 %v12598_v14, %v1349_v18  ;;  %vm1368_vm14 = vcmp.ge.f32.partialorder %v1358_v49, 0.0 }
 0x1a6   : > { %8486 = vmatmul.mubr.msk.f32.gmra.mrb[54].mxu0 %vm14468_vm4, %v11756_v40  ;;  %vm1366_vm4 = vcmp.ge.f32.partialorder %v1356_v20, 0.0  ;;  %v14509_v40 = vld [vmem:[#allocation177_spill] sm:$0xff] }
 0x1a7   : > { %8488 = vmatprep.mubr.msk.f32.mxu0 %vm14493_vm9, %v12084_v23  ;;  %vm14499_vm9 = vcmp.ge.s32.totalorder %v9798_v21, 1  ;;  %v12635_v7 = vsel %vm1366_vm4, %v1356_v20, %v1376_v10  ;;  %v14502_v23 = vld [vmem:[#allocation157_spill] sm:$0xff]  ;;  %v12644_v21 = vsel %vm1367_vm6, %v1357_v44, %v1377_v6  ;;  %v1379_v18 = vmul.f32 0.01, %v1359_v34  ;;  %v14504_v10 = vld [vmem:[#allocation163_spill] sm:$0xff]  ;;  %v14505_v44 = vld [vmem:[#allocation166_spill] sm:$0xff] }
 0x1a8   : > { %7923 = vmatmul.mubr.f32.gmra.mrb[20].mxu1 %v14494_v60  ;;  %vm12631_vm12 = vmand %vm12615_vm1, %vm14499_vm9  ;;  %vm1369_vm9 = vcmp.ge.f32.partialorder %v1359_v34, 0.0  ;;  %v14506_v6 = vld [vmem:[#allocation171_spill] sm:$0xff] }
 0x1a9   : > { %7925 = vmatprep.mubr.f32.mxu1 %v14495_v55 }
 0x1aa   : > { %8489 = vmatmul.mubr.msk.f32.gmra.mrb[56].mxu0 %vm12059_vm5, %v12086_v12  ;;  %v1378_v12 = vmul.f32 0.01, %v1358_v49 }
 0x1ab   : > { %8491 = vmatprep.mubr.msk.f32.mxu0 %vm12059_vm5, %v12113_v43  ;;  %v14503_v43 = vld [vmem:[#allocation161_spill] sm:$0xff] }
 0x1ac   : > { %7926 = vmatmul.mubr.f32.gmra.mrb[22].mxu1 %v14498_v1  ;;  %v12647_v20 = vsel %vm1368_vm14, %v1358_v49, %v1378_v12  ;;  %v6857_v49 = vld [vmem:[%s13340_s2 + $0x410] sm:$0xff]  ;;  %v6858_v12 = vld [vmem:[%s13340_s2 + $0x418] sm:$0xff] }
 0x1ad   : > { %7928 = vmatprep.mubr.f32.mxu1 %v14502_v23 }
 0x1ae   : > { %8492 = vmatmul.mubr.msk.f32.gmra.mrb[58].mxu0 %vm12059_vm5, %v12116_v56  ;;  %v12656_v56 = vsel %vm1369_vm9, %v1359_v34, %v1379_v18  ;;  %v14508_v34 = vld [vmem:[#allocation175_spill] sm:$0xff]  ;;  %v9016_v18 = vpack.c.bf16 %v6858_v12, %v6857_v49 }
 0x1af   : > { %8494 = vmatprep.mubr.msk.f32.mxu0 %vm12631_vm12, %v12635_v7  ;;  %v14513_v12 = vld [vmem:[#allocation183_spill] sm:$0xff] }
 0x1b0   : > { %7929 = vmatmul.mubr.f32.gmra.mrb[24].mxu1 %v14503_v43 }
 0x1b1   : > { %7931 = vmatprep.mubr.f32.mxu1 %v14504_v10 }
 0x1b2   : > { %8495 = vmatmul.mubr.msk.f32.gmra.mrb[60].mxu0 %vm12615_vm1, %v12644_v21 }
 0x1b3   : > { %8497 = vmatprep.mubr.msk.f32.mxu0 %vm12615_vm1, %v12647_v20 }
 0x1b4   : > { %7932 = vmatmul.mubr.f32.gmra.mrb[26].mxu1 %v14505_v44  ;;  %v14510_v44 = vld [vmem:[#allocation34_spill] sm:$0xff] }
 0x1b5   : > { %7934 = vmatprep.mubr.f32.mxu1 %v14506_v6  ;;  %v6860_v6 = vld [vmem:[%s13340_s2 + $0x428] sm:$0xff] }
 0x1b6   : > { %8498 = vmatmul.mubr.msk.f32.gmra.mrb[62].mxu0 %vm12615_vm1, %v12656_v56  ;;  %v9020_v49 = vpack.c.bf16 %v6860_v6, %v6859_v37  ;;  %v14517_v37 = vld [vmem:[#allocation191_spill] sm:$0xff]  ;;  %v6863_v6 = vld [vmem:[%s13340_s2 + $0x440] sm:$0xff] }
 0x1b7   : > { %8532 = vmatprep.mubr.f32.mxu0 %v14507_v22  ;;  %v14512_v22 = vld [vmem:[#allocation179_spill] sm:$0xff] }
 0x1b8   : > { %7935 = vmatmul.mubr.f32.gmra.mrb[28].mxu1 %v14508_v34  ;;  %v6862_v34 = vld [vmem:[%s13340_s2 + $0x438] sm:$0xff] }
 0x1b9   : > { %7937 = vmatprep.mubr.f32.mxu1 %v14509_v40  ;;  %v6861_v40 = vld [vmem:[%s13340_s2 + $0x430] sm:$0xff] }
 0x1ba   : > { %8533 = vmatmul.mubr.f32.vlgmr.msra.gmra.mrb[0].mxu0 %v14510_v44  ;;  %v14515_v44 = vld [vmem:[#allocation42_spill] sm:$0xff] }
 0x1bb   : > { %9015 = vmatpush3.bf16.msra.mxu0 %v12332_v28  ;;  %8535 = vmatprep.mubr.f32.mxu0 %v14511_v52  ;;  %v14516_v52 = vld [vmem:[#allocation189_spill] sm:$0xff]  ;;  %v9024_v28 = vpack.c.bf16 %v6862_v34, %v6861_v40  ;;  %v6865_v40 = vld [vmem:[%s13340_s2 + $0x450] sm:$0xff] }
 0x1bc   : > { %7938 = vmatmul.mubr.f32.gmra.mrb[30].mxu1 %v14512_v22  ;;  %9017 = vmatprep.subr.bf16.mxu0 %v9016_v18  ;;  %v14518_v22 = vld [vmem:[#allocation45_spill] sm:$0xff] }
 0x1bd   : > { %7940 = vmatprep.mubr.f32.mxu1 %v14513_v12  ;;  %v6864_v12 = vld [vmem:[%s13340_s2 + $0x448] sm:$0xff]  ;;  %v6866_v34 = vld [vmem:[%s13340_s2 + $0x458] sm:$0xff] }
 0x1be   : > { %8536 = vmatmul.mubr.f32.gmra.mrb[2].mxu0 %v14514_v54  ;;  %v14519_v54 = vld [vmem:[#allocation47_spill] sm:$0xff] }
 0x1bf   : > { %8538 = vmatprep.mubr.f32.mxu0 %v14515_v44  ;;  %9019 = vmatpush3.bf16.msra.mxu0 %v9016_v18  ;;  %v9028_v18 = vpack.c.bf16 %v6864_v12, %v6863_v6  ;;  %v14520_v44 = vld [vmem:[#allocation48_spill] sm:$0xff]  ;;  %v6867_v12 = vld [vmem:[%s13340_s2 + $0x460] sm:$0xff]  ;;  %v6868_v6 = vld [vmem:[%s13340_s2 + $0x468] sm:$0xff] }
 0x1c0   : > { %7941 = vmatmul.mubr.f32.gmra.mrb[32].mxu1 %v14516_v52  ;;  %9021 = vmatprep.subr.bf16.mxu0 %v9020_v49 }
 0x1c1   : > { %7943 = vmatprep.mubr.f32.mxu1 %v14517_v37 }
 0x1c2   : > { %8539 = vmatmul.mubr.f32.gmra.mrb[4].mxu0 %v14518_v22  ;;  %v14521_v22 = vld [vmem:[#allocation52_spill] sm:$0xff] }
 0x1c3   : > { %8541 = vmatprep.mubr.f32.mxu0 %v14519_v54  ;;  %9023 = vmatpush3.bf16.msra.mxu0 %v9020_v49  ;;  %v14522_v49 = vld [vmem:[#allocation196_spill] sm:$0xff]  ;;  %v9032_v54 = vpack.c.bf16 %v6866_v34, %v6865_v40  ;;  %v14525_v40 = vld [vmem:[#allocation201_spill] sm:$0xff] }
 0x1c4   : > { %7944 = vmatmul.mubr.f32.gmra.mrb[34].mxu1 %v11750_v48  ;;  %9025 = vmatprep.subr.bf16.mxu0 %v9024_v28  ;;  %v6869_v34 = vld [vmem:[%s13340_s2 + $0x470] sm:$0xff] }
 0x1c5   : > { %7946 = vmatprep.mubr.f32.mxu1 %v11770_v15  ;;  %v14523_v15 = vld [vmem:[#allocation53_spill] sm:$0xff] }
 0x1c6   : > { %8542 = vmatmul.mubr.f32.gmra.mrb[6].mxu0 %v14520_v44  ;;  %v14524_v44 = vld [vmem:[#allocation58_spill] sm:$0xff] }
 0x1c7   : > { %8544 = vmatprep.mubr.f32.mxu0 %v14521_v22  ;;  %9027 = vmatpush3.bf16.msra.mxu0 %v9024_v28  ;;  %v9036_v28 = vpack.c.bf16 %v6868_v6, %v6867_v12  ;;  %v6870_v22 = vld [vmem:[%s13340_s2 + $0x478] sm:$0xff]  ;;  %v14529_v12 = vld [vmem:[#allocation14_spill] sm:$0xff] }
 0x1c8   : > { %7947 = vmatmul.mubr.f32.gmra.mrb[36].mxu1 %v14522_v49  ;;  %9029 = vmatprep.subr.bf16.mxu0 %v9028_v18  ;;  %v14530_v6 = vld [vmem:[#allocation65_spill] sm:$0xff]  ;;  %v14533_v49 = vld [vmem:[#allocation202_spill] sm:$0xff] }
 0x1c9   : > { %7949 = vmatprep.mubr.f32.mxu1 %v11783_v46  ;;  %v14526_v46 = vld [vmem:[#allocation59_spill] sm:$0xff] }
 0x1ca   : > { %8545 = vmatmul.mubr.f32.gmra.mrb[8].mxu0 %v14523_v15  ;;  %v14527_v15 = vld [vmem:[#allocation60_spill] sm:$0xff] }
 0x1cb   : > { %8547 = vmatprep.mubr.f32.mxu0 %v14524_v44  ;;  %9031 = vmatpush3.bf16.msra.mxu0 %v9028_v18  ;;  %v14528_v18 = vld [vmem:[#allocation204_spill] sm:$0xff]  ;;  %v9040_v44 = vpack.c.bf16 %v6870_v22, %v6869_v34  ;;  %v14537_v34 = vld [vmem:[#allocation205_spill] sm:$0xff] }
 0x1cc   : > { %7950 = vmatmul.mubr.f32.gmra.mrb[38].mxu1 %v11806_v30  ;;  %9033 = vmatprep.subr.bf16.mxu0 %v9032_v54  ;;  %v14532_v30 = vld [vmem:[#allocation209_spill] sm:$0xff] }
 0x1cd   : > { %7952 = vmatprep.mubr.f32.mxu1 %v14525_v40  ;;  %v14531_v40 = vld [vmem:[#allocation67_spill] sm:$0xff]  ;;  %v14538_v22 = vld [vmem:[#allocation73_spill] sm:$0xff] }
 0x1ce   : > { %8548 = vmatmul.mubr.f32.gmra.mrb[10].mxu0 %v14526_v46  ;;  %v14534_v46 = vld [vmem:[#allocation69_spill] sm:$0xff] }
 0x1cf   : > { %8550 = vmatprep.mubr.f32.mxu0 %v14527_v15  ;;  %9035 = vmatpush3.bf16.msra.mxu0 %v9032_v54  ;;  %v14535_v15 = vld [vmem:[#allocation72_spill] sm:$0xff]  ;;  %v14536_v54 = vld [vmem:[#allocation203_spill] sm:$0xff] }
 0x1d0   : > { %7953 = vmatmul.mubr.f32.gmra.mrb[40].mxu1 %v14528_v18  ;;  %9037 = vmatprep.subr.bf16.mxu0 %v9036_v28 }
 0x1d1   : > { %7955 = vmatprep.mubr.f32.mxu1 %v14529_v12 }
 0x1d2   : > { %8551 = vmatmul.mubr.f32.gmra.mrb[12].mxu0 %v14530_v6  ;;  %v14539_v6 = vld [vmem:[#allocation78_spill] sm:$0xff] }
 0x1d3   : > { %8553 = vmatprep.mubr.f32.mxu0 %v14531_v40  ;;  %9039 = vmatpush3.bf16.msra.mxu0 %v9036_v28  ;;  %v14540_v40 = vld [vmem:[#allocation206_spill] sm:$0xff]  ;;  %v14541_v28 = vld [vmem:[#allocation11_spill] sm:$0xff] }
 0x1d4   : > { %7956 = vmatmul.mubr.f32.gmra.mrb[42].mxu1 %v14532_v30  ;;  %9041 = vmatprep.subr.bf16.mxu0 %v9040_v44  ;;  %v14542_v30 = vld [vmem:[#allocation79_spill] sm:$0xff] }
 0x1d5   : > { %7958 = vmatprep.mubr.f32.mxu1 %v14533_v49  ;;  %v14543_v49 = vld [vmem:[#allocation80_spill] sm:$0xff] }
 0x1d6   : > { %8554 = vmatmul.mubr.f32.gmra.mrb[14].mxu0 %v14534_v46  ;;  %v14544_v46 = vld [vmem:[#allocation207_spill] sm:$0xff] }
 0x1d7   : > { %8556 = vmatprep.mubr.f32.mxu0 %v14535_v15  ;;  %9043 = vmatpush3.bf16.msra.mxu0 %v9040_v44  ;;  %v14545_v15 = vld [vmem:[#allocation208_spill] sm:$0xff]  ;;  %v14546_v44 = vld [vmem:[#allocation83_spill] sm:$0xff] }
 0x1d8   : > { %7959 = vmatmul.mubr.f32.gmra.mrb[44].mxu1 %v14536_v54  ;;  %v14547_v54 = vld [vmem:[#allocation86_spill] sm:$0xff] }
 0x1d9   : > { %7961 = vmatprep.mubr.f32.mxu1 %v14537_v34  ;;  %v14548_v34 = vld [vmem:[#allocation19_spill] sm:$0xff] }
 0x1da   : > { %8557 = vmatmul.mubr.f32.gmra.mrb[16].mxu0 %v14538_v22  ;;  %v14549_v22 = vld [vmem:[#allocation22_spill] sm:$0xff] }
 0x1db   : > { %8559 = vmatprep.mubr.f32.mxu0 %v14539_v6  ;;  %v14550_v6 = vld [vmem:[#allocation89_spill] sm:$0xff] }
 0x1dc   : > { %7962 = vmatmul.mubr.f32.gmra.mrb[46].mxu1 %v14540_v40  ;;  %v14551_v40 = vld [vmem:[#allocation91_spill] sm:$0xff] }
 0x1dd   : > { %7964 = vmatprep.mubr.f32.mxu1 %v14541_v28  ;;  %v14552_v28 = vld [vmem:[#allocation210_spill] sm:$0xff] }
 0x1de   : > { %8560 = vmatmul.mubr.f32.gmra.mrb[18].mxu0 %v14542_v30  ;;  %v14553_v30 = vld [vmem:[#allocation211_spill] sm:$0xff] }
 0x1df   : > { %8562 = vmatprep.mubr.f32.mxu0 %v14543_v49  ;;  %v14554_v49 = vld [vmem:[#allocation92_spill] sm:$0xff] }
 0x1e0   : > { %7965 = vmatmul.mubr.f32.gmra.mrb[48].mxu1 %v14544_v46  ;;  %v14555_v46 = vld [vmem:[#allocation98_spill] sm:$0xff] }
 0x1e1   : > { %7967 = vmatprep.mubr.f32.mxu1 %v14545_v15  ;;  %v14556_v15 = vld [vmem:[#allocation212_spill] sm:$0xff] }
 0x1e2   : > { %8563 = vmatmul.mubr.f32.gmra.mrb[20].mxu0 %v14546_v44  ;;  %v14557_v44 = vld [vmem:[#allocation213_spill] sm:$0xff] }
 0x1e3   : > { %8565 = vmatprep.mubr.f32.mxu0 %v14547_v54  ;;  %v14558_v54 = vld [vmem:[#allocation100_spill] sm:$0xff] }
 0x1e4   : > { %7968 = vmatmul.mubr.f32.gmra.mrb[50].mxu1 %v14548_v34  ;;  %v14559_v34 = vld [vmem:[#allocation109_spill] sm:$0xff] }
 0x1e5   : > { %7970 = vmatprep.mubr.f32.mxu1 %v14549_v22  ;;  %v14560_v22 = vld [vmem:[#allocation214_spill] sm:$0xff] }
 0x1e6   : > { %8566 = vmatmul.mubr.f32.gmra.mrb[22].mxu0 %v14550_v6  ;;  %v14561_v6 = vld [vmem:[#allocation216_spill] sm:$0xff] }
 0x1e7   : > { %8568 = vmatprep.mubr.f32.mxu0 %v14551_v40  ;;  %v14562_v40 = vld [vmem:[#allocation110_spill] sm:$0xff] }
 0x1e8   : > { %7971 = vmatmul.mubr.f32.gmra.mrb[52].mxu1 %v14552_v28  ;;  %v14563_v28 = vld [vmem:[#allocation114_spill] sm:$0xff] }
 0x1e9   : > { %7973 = vmatprep.mubr.f32.mxu1 %v14553_v30  ;;  %v14564_v30 = vld [vmem:[#allocation220_spill] sm:$0xff] }
 0x1ea   : > { %8569 = vmatmul.mubr.f32.gmra.mrb[24].mxu0 %v14554_v49  ;;  %v14565_v49 = vld [vmem:[#allocation54_spill] sm:$0xff] }
 0x1eb   : > { %8571 = vmatprep.mubr.f32.mxu0 %v14555_v46  ;;  %v14566_v46 = vld [vmem:[#allocation116_spill] sm:$0xff] }
 0x1ec   : > { %7974 = vmatmul.mubr.f32.gmra.mrb[54].mxu1 %v14556_v15  ;;  %v14567_v15 = vld [vmem:[#allocation122_spill] sm:$0xff] }
 0x1ed   : > { %7976 = vmatprep.mubr.f32.mxu1 %v14557_v44  ;;  %v14568_v44 = vld [vmem:[#allocation225_spill] sm:$0xff] }
 0x1ee   : > { %8572 = vmatmul.mubr.f32.gmra.mrb[26].mxu0 %v14558_v54  ;;  %v14569_v54 = vld [vmem:[#allocation57_spill] sm:$0xff] }
 0x1ef   : > { %8574 = vmatprep.mubr.f32.mxu0 %v14559_v34  ;;  %v14570_v34 = vld [vmem:[#allocation125_spill] sm:$0xff] }
 0x1f0   : > { %7977 = vmatmul.mubr.f32.gmra.mrb[56].mxu1 %v14560_v22  ;;  %v14571_v22 = vld [vmem:[#allocation128_spill] sm:$0xff] }
 0x1f1   : > { %7979 = vmatprep.mubr.f32.mxu1 %v14561_v6  ;;  %v14572_v6 = vld [vmem:[#allocation227_spill] sm:$0xff] }
 0x1f2   : > { %8575 = vmatmul.mubr.f32.gmra.mrb[28].mxu0 %v14562_v40  ;;  %v14573_v40 = vld [vmem:[#allocation17_spill] sm:$0xff] }
 0x1f3   : > { %8577 = vmatprep.mubr.f32.mxu0 %v14563_v28  ;;  %v14574_v28 = vld [vmem:[#allocation13_spill] sm:$0xff] }
 0x1f4   : > { %7980 = vmatmul.mubr.f32.gmra.mrb[58].mxu1 %v14564_v30  ;;  %vm14575_vm14 = vnez %v14574_v28  ;;  %v14576_v30 = vld [vmem:[#allocation132_spill] sm:$0xff]  ;;  %v14584_v28 = vld [vmem:[#allocation141_spill] sm:$0xff] }
 0x1f5   : > { %7982 = vmatprep.mubr.f32.mxu1 %v14565_v49  ;;  %v14577_v49 = vld [vmem:[#allocation134_spill] sm:$0xff] }
 0x1f6   : > { %8578 = vmatmul.mubr.f32.gmra.mrb[30].mxu0 %v14566_v46  ;;  %v14578_v46 = vld [vmem:[#allocation18_spill] sm:$0xff] }
 0x1f7   : > { %8580 = vmatprep.mubr.f32.mxu0 %v14567_v15  ;;  %v14579_v15 = vld [vmem:[#allocation12_spill] sm:$0xff] }
 0x1f8   : > { %7983 = vmatmul.mubr.f32.gmra.mrb[60].mxu1 %v14568_v44  ;;  %vm14580_vm4 = vnez %v14579_v15  ;;  %v14582_v44 = vld [vmem:[#allocation139_spill] sm:$0xff]  ;;  %v14595_v15 = vld [vmem:[#allocation153_spill] sm:$0xff] }
 0x1f9   : > { %7985 = vmatprep.mubr.f32.mxu1 %v14569_v54  ;;  %v14581_v54 = vld [vmem:[#allocation21_spill] sm:$0xff] }
 0x1fa   : > { %8581 = vmatmul.mubr.f32.gmra.mrb[32].mxu0 %v14570_v34 }
 0x1fb   : > { %8583 = vmatprep.mubr.f32.mxu0 %v14571_v22  ;;  %v14592_v22 = vld [vmem:[#allocation25_spill] sm:$0xff] }
 0x1fc   : > { %7986 = vmatmul.mubr.f32.gmra.mrb[62].mxu1 %v14572_v6  ;;  %v14583_v6 = vld [vmem:[#allocation3_spill] sm:$0xff]  ;;  %vm14593_vm6 = vnez %v14592_v22 }
 0x1fd   : > { %8020 = vmatprep.mubr.msk.f32.mxu1 %vm14575_vm14, %v14573_v40  ;;  %v14585_v40 = vld [vmem:[#allocation24_spill] sm:$0xff]  ;;  %v14609_v22 = vld [vmem:[#allocation167_spill] sm:$0xff] }
 0x1fe   : > { %8584 = vmatmul.mubr.f32.gmra.mrb[34].mxu0 %v14576_v30  ;;  %v14596_v30 = vld [vmem:[#allocation6_spill] sm:$0xff] }
 0x1ff   : > { %8586 = vmatprep.mubr.f32.mxu0 %v14577_v49  ;;  %v14586_v49 = vld [vmem:[#allocation28_spill] sm:$0xff] }
 0x200   : > { %8021 = vmatmul.mubr.msk.f32.vlgmr.msra.gmra.mrb[0].mxu1 %vm14580_vm4, %v14578_v46  ;;  %v14589_v46 = vld [vmem:[#allocation4_spill] sm:$0xff] }
 0x201   : > { %9052 = vmatpush3.bf16.msra.mxu1 %v14488_v9  ;;  %8023 = vmatprep.mubr.msk.f32.mxu1 %vm14580_vm4, %v14581_v54  ;;  %v14588_v9 = vld [vmem:[#allocation144_spill] sm:$0xff]  ;;  %v14590_v54 = vld [vmem:[#allocation149_spill] sm:$0xff] }
 0x202   : > { %8587 = vmatmul.mubr.f32.gmra.mrb[36].mxu0 %v14582_v44  ;;  %9045 = vmatprep.subr.bf16.mxu1 %v14583_v6  ;;  %v14591_v44 = vld [vmem:[#allocation29_spill] sm:$0xff] }
 0x203   : > { %8589 = vmatprep.mubr.f32.mxu0 %v14584_v28  ;;  %v14594_v28 = vld [vmem:[#allocation30_spill] sm:$0xff] }
 0x204   : > { %8024 = vmatmul.mubr.msk.f32.gmra.mrb[2].mxu1 %vm14580_vm4, %v14585_v40  ;;  %v14599_v40 = vld [vmem:[#allocation37_spill] sm:$0xff] }
 0x205   : > { %8026 = vmatprep.mubr.msk.f32.mxu1 %vm10156_vm15, %v14586_v49  ;;  %9053 = vmatpush3.bf16.msra.mxu1 %v14583_v6  ;;  %v14597_v6 = vld [vmem:[#allocation155_spill] sm:$0xff]  ;;  %v14598_v49 = vld [vmem:[#allocation33_spill] sm:$0xff] }
 0x206   : > { %8590 = vmatmul.mubr.f32.gmra.mrb[38].mxu0 %v14588_v9  ;;  %9046 = vmatprep.subr.bf16.mxu1 %v14589_v46  ;;  %v14606_v9 = vld [vmem:[#allocation32_spill] sm:$0xff] }
 0x207   : > { %8592 = vmatprep.mubr.f32.mxu0 %v14590_v54  ;;  %v14600_v54 = vld [vmem:[#allocation35_spill] sm:$0xff]  ;;  %vm14607_vm9 = vnez %v14606_v9  ;;  %v14623_v9 = vld [vmem:[#allocation182_spill] sm:$0xff] }
 0x208   : > { %8027 = vmatmul.mubr.msk.f32.gmra.mrb[4].mxu1 %vm14593_vm6, %v14591_v44  ;;  %vm14601_vm15 = vnez %v14600_v54  ;;  %v14602_v44 = vld [vmem:[#allocation158_spill] sm:$0xff]  ;;  %v14610_v54 = vld [vmem:[#allocation8_spill] sm:$0xff] }
 0x209   : > { %8029 = vmatprep.mubr.msk.f32.mxu1 %vm14593_vm6, %v14594_v28  ;;  %9054 = vmatpush3.bf16.msra.mxu1 %v14589_v46  ;;  %v14603_v28 = vld [vmem:[#allocation7_spill] sm:$0xff]  ;;  %v14604_v46 = vld [vmem:[#allocation164_spill] sm:$0xff] }
 0x20a   : > { %8593 = vmatmul.mubr.f32.gmra.mrb[40].mxu0 %v14595_v15  ;;  %9047 = vmatprep.subr.bf16.mxu1 %v14596_v30  ;;  %v14605_v15 = vld [vmem:[#allocation39_spill] sm:$0xff] }
 0x20b   : > { %8595 = vmatprep.mubr.f32.mxu0 %v14597_v6  ;;  %v14608_v6 = vld [vmem:[#allocation40_spill] sm:$0xff] }
 0x20c   : > { %8030 = vmatmul.mubr.msk.f32.gmra.mrb[6].mxu1 %vm14593_vm6, %v14598_v49  ;;  %v14612_v49 = vld [vmem:[#allocation43_spill] sm:$0xff] }
 0x20d   : > { %8032 = vmatprep.mubr.msk.f32.mxu1 %vm14601_vm15, %v14599_v40  ;;  %9055 = vmatpush3.bf16.msra.mxu1 %v14596_v30  ;;  %v14611_v30 = vld [vmem:[#allocation169_spill] sm:$0xff]  ;;  %v14613_v40 = vld [vmem:[#allocation46_spill] sm:$0xff]  ;;  %vm14631_vm15 = vnez %v14379_v8  ;;  %v14644_v8 = vld [vmem:[#allocation200_spill] sm:$0xff] }
 0x20e   : > { %8596 = vmatmul.mubr.f32.gmra.mrb[42].mxu0 %v14602_v44  ;;  %9048 = vmatprep.subr.bf16.mxu1 %v14603_v28  ;;  %v14620_v44 = vld [vmem:[#allocation41_spill] sm:$0xff] }
 0x20f   : > { %8598 = vmatprep.mubr.f32.mxu0 %v14604_v46  ;;  %v14614_v46 = vld [vmem:[#allocation44_spill] sm:$0xff]  ;;  %vm14621_vm4 = vnez %v14620_v44  ;;  %v14633_v44 = vld [vmem:[#allocation222_spill] sm:$0xff] }
 0x210   : > { %8033 = vmatmul.mubr.msk.f32.gmra.mrb[8].mxu1 %vm14607_vm9, %v14605_v15  ;;  %vm14615_vm14 = vnez %v14614_v46  ;;  %v14616_v15 = vld [vmem:[#allocation173_spill] sm:$0xff]  ;;  %v575_v46 = vld [vmem:[%s11956_s9 + $0x48] sm:$0x3]  ;;  %s6542_s9 = sshll.u32 %s14791_s14, 2  ;;  %s6545_s14 = sshll.u32 %s9647_s25, 1 }
 0x211   : > { %8035 = vmatprep.mubr.msk.f32.mxu1 %vm14607_vm9, %v14608_v6  ;;  %9056 = vmatpush3.bf16.msra.mxu1 %v14603_v28  ;;  %v14617_v6 = vld [vmem:[#allocation9_spill] sm:$0xff]  ;;  %v14618_v28 = vld [vmem:[#allocation176_spill] sm:$0xff]  ;;  %s462_s12 = sadd.s32 %s6543_s23, %s6542_s9  ;;  %s467_s11 = sadd.s32 %s9643_s24, %s6545_s14 }
 0x212   : > { %8599 = vmatmul.mubr.f32.gmra.mrb[44].mxu0 %v14609_v22  ;;  %9049 = vmatprep.subr.bf16.mxu1 %v14610_v54  ;;  %v14619_v22 = vld [vmem:[#allocation49_spill] sm:$0xff]  ;;  %s6544_s20 = sshll.u32 %s462_s12, 3  ;;  %p468_p9 = scmp.lt.s32.totalorder %s467_s11, 3 }
 0x213   : > { %8601 = vmatprep.mubr.f32.mxu0 %v14611_v30  ;;  %v14622_v30 = vld [vmem:[#allocation50_spill] sm:$0xff]  ;;  %s13219_s10 = scalar_lea.vmem %s13343_s5, %s6544_s20 }
 0x214   : > { %8036 = vmatmul.mubr.msk.f32.gmra.mrb[10].mxu1 %vm14607_vm9, %v14612_v49  ;;  %v14625_v49 = vld [vmem:[#allocation185_spill] sm:$0xff]  ;;  %vm14638_vm9 = vcmask 1046528   ;;  %s14793_s11 = smov (!%p468_p9, %s467_s11), 3 }
 0x215   : > { %8038 = vmatprep.mubr.msk.f32.mxu1 %vm14615_vm14, %v14613_v40  ;;  %9057 = vmatpush3.bf16.msra.mxu1 %v14610_v54  ;;  %v14624_v54 = vld [vmem:[#allocation10_spill] sm:$0xff]  ;;  %v14626_v40 = vld [vmem:[#allocation56_spill] sm:$0xff]  ;;  %s473_s17 = scalar_lea.vmem %s13344_s6, %s14793_s11  ;;  %s483_s21 = scalar_lea.vmem %s13345_s7, %s14793_s11 }
 0x216   : > { %8602 = vmatmul.mubr.f32.gmra.mrb[46].mxu0 %v14616_v15  ;;  %9050 = vmatprep.subr.bf16.mxu1 %v14617_v6  ;;  %v14634_v15 = vld [vmem:[#allocation61_spill] sm:$0xff] }
 0x217   : > { %8604 = vmatprep.mubr.f32.mxu0 %v14618_v28  ;;  %v14627_v28 = vld [vmem:[#allocation55_spill] sm:$0xff] }
 0x218   : > { %8039 = vmatmul.mubr.msk.f32.gmra.mrb[12].mxu1 %vm14621_vm4, %v14619_v22  ;;  %vm14628_vm6 = vnez %v14627_v28  ;;  %v1350_v22 = vmul.f32 %v12580_v13, %v575_v46  ;;  %v14635_v28 = vld [vmem:[#allocation193_spill] sm:$0xff]  ;;  %v14636_v46 = vld [vmem:[#allocation198_spill] sm:$0xff] }
 0x219   : > { %8041 = vmatprep.mubr.msk.f32.mxu1 %vm14621_vm4, %v14622_v30  ;;  %9058 = vmatpush3.bf16.msra.mxu1 %v14617_v6  ;;  %v14629_v30 = vld [vmem:[#allocation186_spill] sm:$0xff]  ;;  %v14630_v6 = vld [vmem:[#allocation192_spill] sm:$0xff] }
 0x21a   : > { %8605 = vmatmul.mubr.f32.gmra.mrb[48].mxu0 %v14623_v9  ;;  %9051 = vmatprep.subr.bf16.mxu1 %v14624_v54  ;;  %v1360_v13 = vadd.f32 %v12598_v14, %v1350_v22  ;;  %v1397_v14 = vsel %vm12615_vm1, %v12644_v21, 0.0  ;;  %v14641_v22 = vld [vmem:[#allocation66_spill] sm:$0xff]  ;;  %v1398_v21 = vsel %vm12615_vm1, %v12647_v20, 0.0 }
 0x21b   : > { %8607 = vmatprep.mubr.f32.mxu0 %v14625_v49  ;;  %v14632_v49 = vld [vmem:[#allocation221_spill] sm:$0xff] }
 0x21c   : > { %8042 = vmatmul.mubr.msk.f32.gmra.mrb[14].mxu1 %vm14621_vm4, %v14366_v62  ;;  %v3639_v9 = vrot.slane %v14632_v49, 1  ;;  %v3640_v62 = vrot.slane %v14633_v44, 1  ;;  %v14640_v49 = vld [vmem:[#allocation226_spill] sm:$0xff]  ;;  %vm1370_vm4 = vcmp.ge.f32.partialorder %v1360_v13, 0.0 }
 0x21d   : > { %8044 = vmatprep.mubr.msk.f32.mxu1 %vm14628_vm6, %v14626_v40  ;;  %9059 = vmatpush3.bf16.msra.mxu1 %v14624_v54  ;;  %v14637_v54 = vld [vmem:[#allocation51_spill] sm:$0xff]  ;;  %v3644_v44 = vrot.slane %v14640_v49, 1  ;;  %vm14645_vm6 = vmmov %vm14638_vm9  ;;  %v5069_v49 = vrot.slane %v1397_v14, 1 }
 0x21e   : > { %8608 = vmatmul.mubr.f32.gmra.mrb[50].mxu0 %v14629_v30  ;;  %v3642_v40 = vrot.slane %v14637_v54, 1  ;;  %v1380_v54 = vmul.f32 0.01, %v1360_v13 }
 0x21f   : > { %8610 = vmatprep.mubr.f32.mxu0 %v14630_v6 }
 0x220   : > { %8045 = vmatmul.mubr.msk.f32.gmra.mrb[16].mxu1 %vm14631_vm15, %v14378_v38  ;;  %v12878_v38 = vsel %vm14638_vm9, %v3639_v9, %v3640_v62  ;;  %v14646_v9 = vld [vmem:[#allocation228_spill] sm:$0xff]  ;;  %v1390_v20 = vsel %vm1370_vm4, %v1360_v13, %v1380_v54  ;;  %v14657_v13 = vld [vmem:[#allocation74_spill] sm:$0xff]  ;;  %vm14659_vm4 = vmmov %vm14645_vm6 }
 0x221   : > { %8047 = vmatprep.mubr.msk.f32.mxu1 %vm14631_vm15, %v14634_v15  ;;  %14639 = vst [vmem:[#allocation71_spill] sm:$0xff] %v12878_v38  ;;  %v1396_v15 = vsel %vm12631_vm12, %v12635_v7, 0.0  ;;  %v3646_v16 = vrot.slane %v14646_v9, 1  ;;  %v14652_v9 = vld [vmem:[#allocation5_spill] sm:$0xff] }
 0x222   : > { %8611 = vmatmul.mubr.f32.gmra.mrb[52].mxu0 %v14635_v28  ;;  %v5068_v7 = vrot.slane %v1396_v15, 1  ;;  %v14647_v28 = vld [vmem:[#allocation68_spill] sm:$0xff]  ;;  %vm14653_vm9 = vcmp.le.s32.totalorder %v14652_v9, 32 }
 0x223   : > { %8613 = vmatprep.mubr.f32.mxu0 %v14636_v46  ;;  %v14642_v46 = vld [vmem:[#allocation64_spill] sm:$0xff] }
 0x224   : > { %8048 = vmatmul.mubr.msk.f32.gmra.mrb[18].mxu1 %vm14631_vm15, %v14389_v45  ;;  %vm14643_vm14 = vnez %v14642_v46  ;;  %v12893_v45 = vsel %vm14645_vm6, %v3640_v62, %v3642_v40  ;;  %v14648_v46 = vld [vmem:[#allocation62_spill] sm:$0xff]  ;;  %vm14650_vm15 = vmmov %vm14645_vm6  ;;  %v12908_v62 = vsel %vm12615_vm1, %v12656_v56, 0.0 }
 0x225   : > { %8050 = vmatprep.mubr.msk.f32.mxu1 %vm14643_vm14, %v14641_v22  ;;  %vm14649_vm12 = vnez %v14648_v46  ;;  %v12903_v22 = vsel %vm14650_vm15, %v3642_v40, %v3644_v44  ;;  %vm1340_vm14 = vmand %vm12615_vm1, %vm14653_vm9  ;;  %v12920_v40 = vsel %vm14645_vm6, %v3644_v44, %v3646_v16  ;;  %v5073_v56 = vrot.slane %v12908_v62, 1  ;;  %v14660_v16 = vld [vmem:[#allocation77_spill] sm:$0xff] }
 0x226   : > { %8614 = vmatmul.mubr.f32.gmra.mrb[54].mxu0 %v14644_v8  ;;  %v14654_v8 = vld [vmem:[#allocation75_spill] sm:$0xff]  ;;  %vm14655_vm15 = vmmov %vm14645_vm6  ;;  %v12927_v9 = vsel %vm1340_vm14, %v1390_v20, 0.0  ;;  %vm14658_vm1 = vnez %v14657_v13  ;;  %vm14661_vm9 = vnez %v14411_v0  ;;  %v5548_v46 = vrot.slane %v1397_v14, 2  ;;  %v14663_v20 = vld [vmem:[#allocation81_spill] sm:$0xff] }
 0x227   : > { %8616 = vmatprep.mubr.f32.mxu0 %v12878_v38  ;;  %v14651_v38 = vld [vmem:[#allocation70_spill] sm:$0xff]  ;;  %v5075_v54 = vrot.slane %v12927_v9, 1  ;;  %vm14664_vm14 = vmmov %vm14659_vm4  ;;  %v5552_v13 = vrot.slane %v12908_v62, 2 }
 0x228   : > { %8051 = vmatmul.mubr.msk.f32.gmra.mrb[20].mxu1 %vm14649_vm12, %v14647_v28  ;;  %v5071_v28 = vrot.slane %v1398_v21, 1  ;;  %v14673_v0 = vld [vmem:[#allocation90_spill] sm:$0xff] }
 0x229   : > { %8053 = vmatprep.mubr.msk.f32.mxu1 %vm14649_vm12, %v14651_v38  ;;  %v5070_v38 = vsel %vm14655_vm15, %v5068_v7, %v5069_v49  ;;  %v5547_v7 = vrot.slane %v1396_v15, 2  ;;  %vm14668_vm15 = vcmask 1045504  }
 0x22a   : > { %8617 = vmatmul.mubr.f32.gmra.mrb[56].mxu0 %v12893_v45  ;;  %v5072_v44 = vsel %vm14659_vm4, %v5069_v49, %v5071_v28  ;;  %v14665_v49 = vld [vmem:[#allocation84_spill] sm:$0xff] }
 0x22b   : > { %8619 = vmatprep.mubr.f32.mxu0 %v12903_v22  ;;  %v12951_v15 = vsel %vm14668_vm15, %v5547_v7, %v5548_v46  ;;  %v14681_v7 = vld [vmem:[#allocation108_spill] sm:$0xff] }
 0x22c   : > { %8054 = vmatmul.mubr.msk.f32.gmra.mrb[22].mxu1 %vm14649_vm12, %v14654_v8  ;;  %vm14662_vm12 = vmmov %vm14659_vm4 }
 0x22d   : > { %8056 = vmatprep.mubr.msk.f32.mxu1 %vm14658_vm1, %v14656_v47  ;;  %v5074_v8 = vsel %vm14662_vm12, %v5071_v28, %v5073_v56  ;;  %v5550_v47 = vrot.slane %v1398_v21, 2  ;;  %vm14669_vm1 = vmmov %vm14668_vm15  ;;  %v14670_v21 = vld [vmem:[#allocation88_spill] sm:$0xff]  ;;  %v14671_v28 = vld [vmem:[#allocation82_spill] sm:$0xff] }
 0x22e   : > { %8620 = vmatmul.mubr.f32.gmra.mrb[58].mxu0 %v12920_v40  ;;  %vm14672_vm4 = vnez %v14671_v28  ;;  %v14730_v28 = vld [vmem:[#allocation202_spill] sm:$0xff] }
 0x22f   : > { %8622 = vmatprep.mubr.f32.mxu0 %v5070_v38  ;;  %v5076_v38 = vsel %vm14664_vm14, %v5073_v56, %v5075_v54  ;;  %v12955_v14 = vsel %vm14669_vm1, %v5548_v46, %v5550_v47  ;;  %v14676_v56 = vld [vmem:[#allocation105_spill] sm:$0xff]  ;;  %v14679_v54 = vld [vmem:[#allocation106_spill] sm:$0xff] }
 0x230   : > { %8057 = vmatmul.mubr.msk.f32.gmra.mrb[24].mxu1 %vm14661_vm9, %v14660_v16  ;;  %v14666_v16 = vld [vmem:[#allocation85_spill] sm:$0xff] }
 0x231   : > { %8059 = vmatprep.mubr.msk.f32.mxu1 %vm14661_vm9, %v14663_v20  ;;  %vm14667_vm6 = vnez %v14666_v16  ;;  %v14687_v46 = vld [vmem:[#allocation121_spill] sm:$0xff]  ;;  %v14724_v20 = vld [vmem:[#allocation219_spill] sm:$0xff] }
 0x232   : > { %8623 = vmatmul.mubr.f32.gmra.mrb[60].mxu0 %v5072_v44  ;;  %v14677_v44 = vld [vmem:[#allocation103_spill] sm:$0xff]  ;;  %v14728_v16 = vld [vmem:[#allocation109_spill] sm:$0xff] }
 0x233   : > { %8625 = vmatprep.mubr.f32.mxu0 %v5074_v8  ;;  %vm14678_vm12 = vnez %v14677_v44  ;;  %v14734_v44 = vld [vmem:[#allocation205_spill] sm:$0xff]  ;;  %v14738_v8 = vld [vmem:[#allocation11_spill] sm:$0xff] }
 0x234   : > { %8060 = vmatmul.mubr.msk.f32.gmra.mrb[26].mxu1 %vm14661_vm9, %v14665_v49  ;;  %vm14674_vm9 = vmmov %vm14669_vm1  ;;  %v14727_v49 = vld [vmem:[#allocation224_spill] sm:$0xff] }
 0x235   : > { %8062 = vmatprep.mubr.msk.f32.mxu1 %vm14667_vm6, %v14414_v39  ;;  %v12966_v39 = vsel %vm14674_vm9, %v5550_v47, %v5552_v13  ;;  %v14778_v47 = vld [vmem:[#allocation200_spill] sm:$0xff] }
 0x236   : > { %8626 = vmatmul.mubr.f32.gmra.mrb[62].mxu0 %v5076_v38  ;;  %v14726_v38 = vld [vmem:[#allocation223_spill] sm:$0xff] }
 0x237   : > { %8660 = vmatprep.mubr.f32.mxu0 %v14479_v17  ;;  %v14675_v17 = vld [vmem:[#allocation94_spill] sm:$0xff] }
 0x238   : > { %8063 = vmatmul.mubr.msk.f32.gmra.mrb[28].mxu1 %vm14672_vm4, %v14670_v21  ;;  %v14729_v21 = vld [vmem:[#allocation209_spill] sm:$0xff] }
 0x239   : > { %8065 = vmatprep.mubr.msk.f32.mxu1 %vm14672_vm4, %v14673_v0  ;;  %v14731_v0 = vld [vmem:[#allocation110_spill] sm:$0xff] }
 0x23a   : > { %8661 = vmatmul.mubr.f32.vlgmr.msra.gmra.mrb[0].mxu0 %v14480_v4  ;;  %v14682_v4 = vld [vmem:[#allocation111_spill] sm:$0xff] }
 0x23b   : > { %8663 = vmatprep.mubr.f32.mxu0 %v14481_v31  ;;  %v14683_v31 = vld [vmem:[#allocation117_spill] sm:$0xff] }
 0x23c   : > { %8066 = vmatmul.mubr.msk.f32.gmra.mrb[30].mxu1 %vm14672_vm4, %v14675_v17  ;;  %v14732_v17 = vld [vmem:[#allocation114_spill] sm:$0xff] }
 0x23d   : > { %8068 = vmatprep.mubr.msk.f32.mxu1 %vm14678_vm12, %v14676_v56  ;;  %v14733_v56 = vld [vmem:[#allocation203_spill] sm:$0xff] }
 0x23e   : > { %8664 = vmatmul.mubr.f32.gmra.mrb[2].mxu0 %v14482_v42  ;;  %v14684_v42 = vld [vmem:[#allocation113_spill] sm:$0xff] }
 0x23f   : > { %8666 = vmatprep.mubr.f32.mxu0 %v14483_v25  ;;  %vm14685_vm14 = vnez %v14684_v42  ;;  %v14686_v25 = vld [vmem:[#allocation118_spill] sm:$0xff]  ;;  %v14742_v42 = vld [vmem:[#allocation132_spill] sm:$0xff] }
 0x240   : > { %8069 = vmatmul.mubr.msk.f32.gmra.mrb[32].mxu1 %vm14427_vm3, %v14679_v54  ;;  %v14737_v54 = vld [vmem:[#allocation206_spill] sm:$0xff] }
 0x241   : > { %8071 = vmatprep.mubr.msk.f32.mxu1 %vm14427_vm3, %v14681_v7  ;;  %v14739_v7 = vld [vmem:[#allocation128_spill] sm:$0xff] }
 0x242   : > { %8667 = vmatmul.mubr.f32.gmra.mrb[4].mxu0 %v14484_v3  ;;  %v14711_v3 = vld [vmem:[#allocation195_spill] sm:$0xff] }
 0x243   : > { %8669 = vmatprep.mubr.f32.mxu0 %v14485_v33  ;;  %v14712_v33 = vld [vmem:[#allocation188_spill] sm:$0xff] }
 0x244   : > { %8072 = vmatmul.mubr.msk.f32.gmra.mrb[34].mxu1 %vm14427_vm3, %v14682_v4  ;;  %v14740_v4 = vld [vmem:[#allocation207_spill] sm:$0xff] }
 0x245   : > { %8074 = vmatprep.mubr.msk.f32.mxu1 %vm14685_vm14, %v14683_v31  ;;  %v14741_v31 = vld [vmem:[#allocation208_spill] sm:$0xff] }
 0x246   : > { %8670 = vmatmul.mubr.f32.gmra.mrb[6].mxu0 %v14486_v24  ;;  %v14713_v24 = vld [vmem:[#allocation181_spill] sm:$0xff] }
 0x247   : > { %8672 = vmatprep.mubr.f32.mxu0 %v14487_v61  ;;  %v14715_v61 = vld [vmem:[#allocation190_spill] sm:$0xff] }
 0x248   : > { %8075 = vmatmul.mubr.msk.f32.gmra.mrb[36].mxu1 %vm14435_vm0, %v14686_v25  ;;  %v14743_v25 = vld [vmem:[#allocation134_spill] sm:$0xff] }
 0x249   : > { %8077 = vmatprep.mubr.msk.f32.mxu1 %vm14435_vm0, %v14687_v46  ;;  %v14744_v46 = vld [vmem:[#allocation19_spill] sm:$0xff] }
 0x24a   : > { %8673 = vmatmul.mubr.f32.gmra.mrb[8].mxu0 %v14489_v5  ;;  %v14716_v5 = vld [vmem:[#allocation196_spill] sm:$0xff] }
 0x24b   : > { %8675 = vmatprep.mubr.f32.mxu0 %v14490_v11  ;;  %v14746_v11 = vld [vmem:[#allocation139_spill] sm:$0xff] }
 0x24c   : > { %8078 = vmatmul.mubr.msk.f32.gmra.mrb[38].mxu1 %vm14435_vm0, %v14437_v50  ;;  %v14703_v50 = vld [vmem:[#allocation174_spill] sm:$0xff] }
 0x24d   : > { %8080 = vmatprep.mubr.msk.f32.mxu1 %vm14440_vm10, %v14438_v35  ;;  %v14704_v35 = vld [vmem:[#allocation168_spill] sm:$0xff]  ;;  %vm14714_vm10 = vnez %v14713_v24  ;;  %v14768_v24 = vld [vmem:[#allocation227_spill] sm:$0xff] }
 0x24e   : > { %8676 = vmatmul.mubr.f32.gmra.mrb[10].mxu0 %v14491_v19  ;;  %v14688_v19 = vld [vmem:[#allocation159_spill] sm:$0xff]  ;;  %vm14705_vm3 = vnez %v14704_v35  ;;  %v14761_v35 = vld [vmem:[#allocation54_spill] sm:$0xff] }
 0x24f   : > { %8678 = vmatprep.mubr.f32.mxu0 %v14492_v36  ;;  %v14692_v36 = vld [vmem:[#allocation160_spill] sm:$0xff] }
 0x250   : > { %8081 = vmatmul.mubr.msk.f32.gmra.mrb[40].mxu1 %vm14443_vm7, %v14441_v32  ;;  %v14706_v32 = vld [vmem:[#allocation178_spill] sm:$0xff] }
 0x251   : > { %8083 = vmatprep.mubr.msk.f32.mxu1 %vm14443_vm7, %v14444_v58  ;;  %v14707_v58 = vld [vmem:[#allocation180_spill] sm:$0xff] }
 0x252   : > { %8679 = vmatmul.mubr.f32.gmra.mrb[12].mxu0 %v14494_v60  ;;  %v14717_v60 = vld [vmem:[#allocation197_spill] sm:$0xff] }
 0x253   : > { %8681 = vmatprep.mubr.f32.mxu0 %v14495_v55  ;;  %v14701_v55 = vld [vmem:[#allocation179_spill] sm:$0xff] }
 0x254   : > { %8084 = vmatmul.mubr.msk.f32.gmra.mrb[42].mxu1 %vm14443_vm7, %v14445_v2  ;;  %vm14700_vm7 = vnez %v14699_v59  ;;  %v14708_v2 = vld [vmem:[#allocation187_spill] sm:$0xff]  ;;  %v14757_v59 = vld [vmem:[#allocation216_spill] sm:$0xff] }
 0x255   : > { %8086 = vmatprep.mubr.msk.f32.mxu1 %vm14448_vm2, %v14446_v57  ;;  %v14709_v57 = vld [vmem:[#allocation184_spill] sm:$0xff] }
 0x256   : > { %8682 = vmatmul.mubr.f32.gmra.mrb[14].mxu0 %v14498_v1  ;;  %vm14710_vm0 = vnez %v14709_v57  ;;  %v14718_v1 = vld [vmem:[#allocation194_spill] sm:$0xff]  ;;  %v14765_v57 = vld [vmem:[#allocation57_spill] sm:$0xff] }
 0x257   : > { %8684 = vmatprep.mubr.f32.mxu0 %v14502_v23  ;;  %v14690_v23 = vld [vmem:[#allocation166_spill] sm:$0xff] }
 0x258   : > { %8087 = vmatmul.mubr.msk.f32.gmra.mrb[44].mxu1 %vm14451_vm8, %v14449_v63  ;;  %v14751_v63 = vld [vmem:[#allocation149_spill] sm:$0xff] }
 0x259   : > { %8089 = vmatprep.mubr.msk.f32.mxu1 %vm14451_vm8, %v14452_v29  ;;  %v14696_v29 = vld [vmem:[#allocation177_spill] sm:$0xff] }
 0x25a   : > { %8685 = vmatmul.mubr.f32.gmra.mrb[16].mxu0 %v14503_v43  ;;  %v14695_v43 = vld [vmem:[#allocation175_spill] sm:$0xff] }
 0x25b   : > { %8687 = vmatprep.mubr.f32.mxu0 %v14504_v10  ;;  %v14719_v10 = vld [vmem:[#allocation218_spill] sm:$0xff] }
 0x25c   : > { %8090 = vmatmul.mubr.msk.f32.gmra.mrb[46].mxu1 %vm14451_vm8, %v14453_v26  ;;  %v14697_v26 = vld [vmem:[#allocation165_spill] sm:$0xff] }
 0x25d   : > { %8092 = vmatprep.mubr.msk.f32.mxu1 %vm14456_vm13, %v14688_v19  ;;  %v14745_v19 = vld [vmem:[#allocation22_spill] sm:$0xff] }
 0x25e   : > { %8688 = vmatmul.mubr.f32.gmra.mrb[18].mxu0 %v14690_v23  ;;  %v14747_v23 = vld [vmem:[#allocation141_spill] sm:$0xff] }
 0x25f   : > { %8690 = vmatprep.mubr.f32.mxu0 %v14691_v51  ;;  %v14748_v51 = vld [vmem:[#allocation210_spill] sm:$0xff] }
 0x260   : > { %8093 = vmatmul.mubr.msk.f32.gmra.mrb[48].mxu1 %vm14459_vm11, %v14692_v36  ;;  %v14750_v36 = vld [vmem:[#allocation144_spill] sm:$0xff] }
 0x261   : > { %8095 = vmatprep.mubr.msk.f32.mxu1 %vm14459_vm11, %v14694_v27  ;;  %v14752_v27 = vld [vmem:[#allocation212_spill] sm:$0xff] }
 0x262   : > { %8691 = vmatmul.mubr.f32.gmra.mrb[20].mxu0 %v14695_v43  ;;  %v14753_v43 = vld [vmem:[#allocation213_spill] sm:$0xff] }
 0x263   : > { %8693 = vmatprep.mubr.f32.mxu0 %v14696_v29  ;;  %v14754_v29 = vld [vmem:[#allocation153_spill] sm:$0xff] }
 0x264   : > { %8096 = vmatmul.mubr.msk.f32.gmra.mrb[50].mxu1 %vm14459_vm11, %v14697_v26  ;;  %v14755_v26 = vld [vmem:[#allocation155_spill] sm:$0xff] }
 0x265   : > { %8098 = vmatprep.mubr.msk.f32.mxu1 %vm14700_vm7, %v14698_v53  ;;  %v14756_v53 = vld [vmem:[#allocation214_spill] sm:$0xff] }
 0x266   : > { %8694 = vmatmul.mubr.f32.gmra.mrb[22].mxu0 %v14701_v55  ;;  %v14758_v55 = vld [vmem:[#allocation158_spill] sm:$0xff] }
 0x267   : > { %8696 = vmatprep.mubr.f32.mxu0 %v14702_v41  ;;  %v14759_v41 = vld [vmem:[#allocation164_spill] sm:$0xff] }
 0x268   : > { %8099 = vmatmul.mubr.msk.f32.gmra.mrb[52].mxu1 %vm14705_vm3, %v14703_v50  ;;  %v14760_v50 = vld [vmem:[#allocation220_spill] sm:$0xff] }
 0x269   : > { %8101 = vmatprep.mubr.msk.f32.mxu1 %vm14705_vm3, %v14706_v32  ;;  %v14762_v32 = vld [vmem:[#allocation167_spill] sm:$0xff] }
 0x26a   : > { %8697 = vmatmul.mubr.f32.gmra.mrb[24].mxu0 %v14516_v52  ;;  %v14722_v52 = vld [vmem:[#allocation199_spill] sm:$0xff] }
 0x26b   : > { %8699 = vmatprep.mubr.f32.mxu0 %v14517_v37  ;;  %v14723_v37 = vld [vmem:[#allocation201_spill] sm:$0xff] }
 0x26c   : > { %8102 = vmatmul.mubr.msk.f32.gmra.mrb[54].mxu1 %vm14705_vm3, %v14707_v58  ;;  %v14763_v58 = vld [vmem:[#allocation169_spill] sm:$0xff] }
 0x26d   : > { %8104 = vmatprep.mubr.msk.f32.mxu1 %vm14710_vm0, %v14708_v2  ;;  %v14764_v2 = vld [vmem:[#allocation225_spill] sm:$0xff] }
 0x26e   : > { %8700 = vmatmul.mubr.f32.gmra.mrb[26].mxu0 %v11750_v48  ;;  %v14720_v48 = vld [vmem:[#allocation217_spill] sm:$0xff] }
 0x26f   : > { %8702 = vmatprep.mubr.f32.mxu0 %v14711_v3  ;;  %vm14721_vm8 = vnez %v14720_v48  ;;  %v14766_v3 = vld [vmem:[#allocation173_spill] sm:$0xff]  ;;  %v14774_v48 = vld [vmem:[#allocation231_spill] sm:$0xff] }
 0x270   : > { %8105 = vmatmul.mubr.msk.f32.gmra.mrb[56].mxu1 %vm14714_vm10, %v14712_v33  ;;  %v14767_v33 = vld [vmem:[#allocation176_spill] sm:$0xff] }
 0x271   : > { %8107 = vmatprep.mubr.msk.f32.mxu1 %vm14714_vm10, %v14715_v61  ;;  %v14769_v61 = vld [vmem:[#allocation63_spill] sm:$0xff] }
 0x272   : > { %8703 = vmatmul.mubr.f32.gmra.mrb[28].mxu0 %v14716_v5  ;;  %v14770_v5 = vld [vmem:[#allocation182_spill] sm:$0xff] }
 0x273   : > { %8705 = vmatprep.mubr.f32.mxu0 %v14717_v60  ;;  %v14771_v60 = vld [vmem:[#allocation185_spill] sm:$0xff] }
 0x274   : > { %8108 = vmatmul.mubr.msk.f32.gmra.mrb[58].mxu1 %vm14714_vm10, %v14718_v1  ;;  %v14772_v1 = vld [vmem:[#allocation229_spill] sm:$0xff] }
 0x275   : > { %8110 = vmatprep.mubr.msk.f32.mxu1 %vm14721_vm8, %v14719_v10  ;;  %v14773_v10 = vld [vmem:[#allocation230_spill] sm:$0xff] }
 0x276   : > { %8706 = vmatmul.mubr.f32.gmra.mrb[30].mxu0 %v14722_v52  ;;  %v5554_v52 = vrot.slane %v12927_v9, 2 }
 0x277   : > { %8708 = vmatprep.mubr.f32.mxu0 %v14723_v37  ;;  %v14775_v37 = vld [vmem:[#allocation193_spill] sm:$0xff] }
 0x278   : > { %8111 = vmatmul.mubr.msk.f32.gmra.mrb[60].mxu1 %vm12059_vm5, %v14724_v20  ;;  %v14776_v20 = vld [vmem:[#allocation198_spill] sm:$0xff] }
 0x279   : > { %8113 = vmatprep.mubr.msk.f32.mxu1 %vm12059_vm5, %v14726_v38 }
 0x27a   : > { %8709 = vmatmul.mubr.f32.gmra.mrb[32].mxu0 %v14528_v18  ;;  %v14735_v18 = vld [vmem:[#allocation116_spill] sm:$0xff] }
 0x27b   : > { %8711 = vmatprep.mubr.f32.mxu0 %v14529_v12  ;;  %v14736_v12 = vld [vmem:[#allocation122_spill] sm:$0xff] }
 0x27c   : > { %8114 = vmatmul.mubr.msk.f32.gmra.mrb[62].mxu1 %vm12059_vm5, %v14727_v49  ;;  %vm14777_vm5 = vmmov %vm14669_vm1 }
 0x27d   : > { %8196 = vmatprep.mubr.f32.mxu1 %v14728_v16 }
 0x27e   : > { %8712 = vmatmul.mubr.f32.gmra.mrb[34].mxu0 %v14729_v21 }
 0x27f   : > { %8714 = vmatprep.mubr.f32.mxu0 %v14730_v28 }
 0x280   : > { %8197 = vmatmul.mubr.f32.vlgmr.msra.gmra.mrb[32].mxu1 %v14731_v0 }
 0x281   : > { %8199 = vmatprep.mubr.f32.mxu1 %v14732_v17 }
 0x282   : > { %8715 = vmatmul.mubr.f32.gmra.mrb[36].mxu0 %v14733_v56 }
 0x283   : > { %8717 = vmatprep.mubr.f32.mxu0 %v14734_v44 }
 0x284   : > { %8200 = vmatmul.mubr.f32.gmra.mrb[34].mxu1 %v14735_v18 }
 0x285   : > { %8202 = vmatprep.mubr.f32.mxu1 %v14736_v12 }
 0x286   : > { %8718 = vmatmul.mubr.f32.gmra.mrb[38].mxu0 %v14737_v54 }
 0x287   : > { %8720 = vmatprep.mubr.f32.mxu0 %v14738_v8 }
 0x288   : > { %8203 = vmatmul.mubr.f32.gmra.mrb[36].mxu1 %v14570_v34  ;;  %v14749_v34 = vld [vmem:[#allocation211_spill] sm:$0xff] }
 0x289   : > { %8205 = vmatprep.mubr.f32.mxu1 %v14739_v7 }
 0x28a   : > { %8721 = vmatmul.mubr.f32.gmra.mrb[40].mxu0 %v14740_v4 }
 0x28b   : > { %8723 = vmatprep.mubr.f32.mxu0 %v14741_v31 }
 0x28c   : > { %8206 = vmatmul.mubr.f32.gmra.mrb[38].mxu1 %v14742_v42 }
 0x28d   : > { %8208 = vmatprep.mubr.f32.mxu1 %v14743_v25 }
 0x28e   : > { %8724 = vmatmul.mubr.f32.gmra.mrb[42].mxu0 %v14744_v46 }
 0x28f   : > { %8726 = vmatprep.mubr.f32.mxu0 %v14745_v19 }
 0x290   : > { %8209 = vmatmul.mubr.f32.gmra.mrb[40].mxu1 %v14746_v11 }
 0x291   : > { %8211 = vmatprep.mubr.f32.mxu1 %v14747_v23 }
 0x292   : > { %8727 = vmatmul.mubr.f32.gmra.mrb[44].mxu0 %v14748_v51 }
 0x293   : > { %8729 = vmatprep.mubr.f32.mxu0 %v14749_v34 }
 0x294   : > { %8212 = vmatmul.mubr.f32.gmra.mrb[42].mxu1 %v14750_v36 }
 0x295   : > { %8214 = vmatprep.mubr.f32.mxu1 %v14751_v63 }
 0x296   : > { %8730 = vmatmul.mubr.f32.gmra.mrb[46].mxu0 %v14752_v27 }
 0x297   : > { %8732 = vmatprep.mubr.f32.mxu0 %v14753_v43 }
 0x298   : > { %8215 = vmatmul.mubr.f32.gmra.mrb[44].mxu1 %v14754_v29 }
 0x299   : > { %8217 = vmatprep.mubr.f32.mxu1 %v14755_v26 }
 0x29a   : > { %8733 = vmatmul.mubr.f32.gmra.mrb[48].mxu0 %v14756_v53 }
 0x29b   : > { %8735 = vmatprep.mubr.f32.mxu0 %v14757_v59 }
 0x29c   : > { %8218 = vmatmul.mubr.f32.gmra.mrb[46].mxu1 %v14758_v55 }
 0x29d   : > { %8220 = vmatprep.mubr.f32.mxu1 %v14759_v41 }
 0x29e   : > { %8736 = vmatmul.mubr.f32.gmra.mrb[50].mxu0 %v14760_v50 }
 0x29f   : > { %8738 = vmatprep.mubr.f32.mxu0 %v14761_v35 }
 0x2a0   : > { %8221 = vmatmul.mubr.f32.gmra.mrb[48].mxu1 %v14762_v32 }
 0x2a1   : > { %8223 = vmatprep.mubr.f32.mxu1 %v14763_v58 }
 0x2a2   : > { %8739 = vmatmul.mubr.f32.gmra.mrb[52].mxu0 %v14764_v2 }
 0x2a3   : > { %8741 = vmatprep.mubr.f32.mxu0 %v14765_v57 }
 0x2a4   : > { %8224 = vmatmul.mubr.f32.gmra.mrb[50].mxu1 %v14766_v3 }
 0x2a5   : > { %8226 = vmatprep.mubr.f32.mxu1 %v14767_v33 }
 0x2a6   : > { %8742 = vmatmul.mubr.f32.gmra.mrb[54].mxu0 %v14768_v24 }
 0x2a7   : > { %8744 = vmatprep.mubr.f32.mxu0 %v14769_v61 }
 0x2a8   : > { %8227 = vmatmul.mubr.f32.gmra.mrb[52].mxu1 %v14770_v5 }
 0x2a9   : > { %8229 = vmatprep.mubr.f32.mxu1 %v14771_v60 }
 0x2aa   : > { %8745 = vmatmul.mubr.f32.gmra.mrb[56].mxu0 %v14772_v1 }
 0x2ab   : > { %8747 = vmatprep.mubr.f32.mxu0 %v14773_v10 }
 0x2ac   : > { %8230 = vmatmul.mubr.f32.gmra.mrb[54].mxu1 %v14629_v30  ;;  %v5555_v30 = vsel %vm14777_vm5, %v5552_v13, %v5554_v52 }
 0x2ad   : > { %8232 = vmatprep.mubr.f32.mxu1 %v14630_v6  ;;  %v14779_v6 = vld [vmem:[#allocation71_spill] sm:$0xff] }
 0x2ae   : > { %8748 = vmatmul.mubr.f32.gmra.mrb[58].mxu0 %v14774_v48 }
 0x2af   : > { %8750 = vmatprep.mubr.f32.mxu0 %v12951_v15 }
 0x2b0   : > { %8233 = vmatmul.mubr.f32.gmra.mrb[56].mxu1 %v14775_v37 }
 0x2b1   : > { %8235 = vmatprep.mubr.f32.mxu1 %v14776_v20 }
 0x2b2   : > { %8751 = vmatmul.mubr.f32.gmra.mrb[60].mxu0 %v12955_v14 }
 0x2b3   : > { %8753 = vmatprep.mubr.f32.mxu0 %v12966_v39 }
 0x2b4   : > { %8236 = vmatmul.mubr.f32.gmra.mrb[58].mxu1 %v14778_v47 }
 0x2b5   : > { %8238 = vmatprep.mubr.f32.mxu1 %v14779_v6 }
 0x2b6   : > { %8754 = vmatmul.mubr.f32.gmra.mrb[62].mxu0 %v5555_v30 }
 0x2b8   : > { %8239 = vmatmul.mubr.f32.gmra.mrb[60].mxu1 %v12893_v45 }
 0x2b9   : > { %8241 = vmatprep.mubr.f32.mxu1 %v12903_v22 }
 0x2bc   : > { %8242 = vmatmul.mubr.f32.gmra.mrb[62].mxu1 %v12920_v40 }
 0x2d3   : > { %v8022_v9 = vpop.f32.mrb[0].mxu1 }
 0x2d4   : > { %v3251_v15 = vpop.f32.mrb[1].mxu1 }
 0x2d7   : > { %v8025_v14 = vpop.f32.mrb[2].mxu1 }
 0x2d8   : > { %v3261_v38 = vpop.f32.mrb[3].mxu1 }
 0x2db   : > { %v8028_v39 = vpop.f32.mrb[4].mxu1 }
 0x2dc   : > { %v3271_v49 = vpop.f32.mrb[5].mxu1 }
 0x2df   : > { %v13165_v62 = vpop.f32.mrb[6].mxu1 }
 0x2e0   : > { %v13167_v13 = vpop.f32.mrb[7].mxu1 }
 0x2e3   : > { %v13169_v16 = vpop.f32.mrb[8].mxu1 }
 0x2e4   : > { %v13171_v21 = vpop.f32.mrb[9].mxu1 }
 0x2e7   : > { %v13173_v45 = vpop.f32.mrb[10].mxu1 }
 0x2e8   : > { %v13175_v22 = vpop.f32.mrb[11].mxu1 }
 0x2eb   : > { %v13177_v40 = vpop.f32.mrb[12].mxu1 }
 0x2ec   : > { %v13179_v28 = vpop.f32.mrb[13].mxu1 }
 0x2ef   : > { %v13181_v0 = vpop.f32.mrb[14].mxu1 }
 0x2f0   : > { %v13183_v17 = vpop.f32.mrb[15].mxu1 }
 0x2f3   : > { %v13185_v56 = vpop.f32.mrb[16].mxu1 }
 0x2f4   : > { %v13187_v44 = vpop.f32.mrb[17].mxu1 }
 0x2f7   : > { %v13189_v18 = vpop.f32.mrb[18].mxu1 }
 0x2f8   : > { %v13191_v12 = vpop.f32.mrb[19].mxu1 }
 0x2fb   : > { %v13193_v54 = vpop.f32.mrb[20].mxu1 }
 0x2fc   : > { %v13195_v8 = vpop.f32.mrb[21].mxu1 }
 0x2ff   : > { %v13198_v7 = vpop.f32.mrb[22].mxu1 }
 0x300   : > { %v13200_v4 = vpop.f32.mrb[23].mxu1 }
 0x303   : > { %v13203_v31 = vpop.f32.mrb[24].mxu1 }
 0x304   : > { %v13205_v42 = vpop.f32.mrb[25].mxu1 }
 0x307   : > { %v13208_v25 = vpop.f32.mrb[26].mxu1 }
 0x308   : > { %v13210_v46 = vpop.f32.mrb[27].mxu1 }
 0x30b   : > { %v13212_v19 = vpop.f32.mrb[28].mxu1 }
 0x30c   : > { %v13214_v11 = vpop.f32.mrb[29].mxu1 }
 0x30d   : > { %v8662_v23 = vpop.f32.mrb[0].mxu0 }
 0x30e   : > { %v9060_v51 = vadd.f32 %v8662_v23, %v8022_v9  ;;  %v5643_v34 = vpop.f32.mrb[1].mxu0 }
 0x30f   : > { %v13221_v36 = vpop.f32.mrb[30].mxu1  ;;  %v9061_v63 = vadd.f32 %v5643_v34, %v3251_v15 }
 0x310   : > { %v13223_v27 = vpop.f32.mrb[31].mxu1  ;;  %6027 = vst [vmem:[%s13219_s10 + $0x8] sm:$0xff] %v9060_v51  ;;  %v6161_v43 = vmul.f32 %v9060_v51, %v9060_v51 }
 0x311   : > { %6026 = vst [vmem:[%s13219_s10] sm:$0xff] %v9061_v63  ;;  %v6090_v29 = vadd.f32 %v9061_v63, %v9060_v51  ;;  %v6160_v26 = vmul.f32 %v9061_v63, %v9061_v63  ;;  %v8665_v53 = vpop.f32.mrb[2].mxu0 }
 0x312   : > { %v9062_v59 = vadd.f32 %v8665_v53, %v8025_v14  ;;  %v5653_v55 = vpop.f32.mrb[3].mxu0 }
 0x313   : > { %v6224_v41 = vadd.f32 %v6161_v43, %v6160_v26  ;;  %v9063_v50 = vadd.f32 %v5653_v55, %v3261_v38 }
 0x314   : > { %6029 = vst [vmem:[%s13219_s10 + $0x18] sm:$0xff] %v9062_v59  ;;  %v6163_v3 = vmul.f32 %v9062_v59, %v9062_v59 }
 0x315   : > { %6028 = vst [vmem:[%s13219_s10 + $0x10] sm:$0xff] %v9063_v50  ;;  %v6091_v35 = vadd.f32 %v9063_v50, %v6090_v29  ;;  %v6162_v32 = vmul.f32 %v9063_v50, %v9063_v50  ;;  %v8668_v58 = vpop.f32.mrb[4].mxu0 }
 0x316   : > { %v9064_v2 = vadd.f32 %v8668_v58, %v8028_v39  ;;  %v5663_v57 = vpop.f32.mrb[5].mxu0 }
 0x317   : > { %v6225_v33 = vadd.f32 %v6224_v41, %v6162_v32  ;;  %v9065_v24 = vadd.f32 %v5663_v57, %v3271_v49  ;;  %v6092_v61 = vadd.f32 %v9062_v59, %v6091_v35 }
 0x318   : > { %6031 = vst [vmem:[%s13219_s10 + $0x28] sm:$0xff] %v9064_v2  ;;  %v6165_v37 = vmul.f32 %v9064_v2, %v9064_v2 }
 0x319   : > { %6030 = vst [vmem:[%s13219_s10 + $0x20] sm:$0xff] %v9065_v24  ;;  %v6093_v5 = vadd.f32 %v9065_v24, %v6092_v61  ;;  %v6164_v60 = vmul.f32 %v9065_v24, %v9065_v24  ;;  %v6226_v1 = vadd.f32 %v6225_v33, %v6163_v3  ;;  %v8671_v10 = vpop.f32.mrb[6].mxu0 }
 0x31a   : > { %v9066_v48 = vadd.f32 %v8671_v10, %v13165_v62  ;;  %v5673_v52 = vpop.f32.mrb[7].mxu0 }
 0x31b   : > { %v6227_v20 = vadd.f32 %v6226_v1, %v6164_v60  ;;  %v9067_v30 = vadd.f32 %v5673_v52, %v13167_v13  ;;  %v6094_v47 = vadd.f32 %v9064_v2, %v6093_v5 }
 0x31c   : > { %6033 = vst [vmem:[%s13219_s10 + $0x38] sm:$0xff] %v9066_v48  ;;  %v6167_v49 = vmul.f32 %v9066_v48, %v9066_v48 }
 0x31d   : > { %6032 = vst [vmem:[%s13219_s10 + $0x30] sm:$0xff] %v9067_v30  ;;  %v6095_v6 = vadd.f32 %v9067_v30, %v6094_v47  ;;  %v6166_v9 = vmul.f32 %v9067_v30, %v9067_v30  ;;  %v6228_v15 = vadd.f32 %v6227_v20, %v6165_v37  ;;  %v8674_v14 = vpop.f32.mrb[8].mxu0 }
 0x31e   : > { %v9068_v38 = vadd.f32 %v8674_v14, %v13169_v16  ;;  %v5683_v39 = vpop.f32.mrb[9].mxu0 }
 0x31f   : > { %v6229_v62 = vadd.f32 %v6228_v15, %v6166_v9  ;;  %v9069_v23 = vadd.f32 %v5683_v39, %v13171_v21  ;;  %v6096_v51 = vadd.f32 %v9066_v48, %v6095_v6 }
 0x320   : > { %6035 = vst [vmem:[%s13219_s10 + $0x48] sm:$0xff] %v9068_v38  ;;  %v6169_v53 = vmul.f32 %v9068_v38, %v9068_v38 }
 0x321   : > { %6034 = vst [vmem:[%s13219_s10 + $0x40] sm:$0xff] %v9069_v23  ;;  %v6097_v13 = vadd.f32 %v9069_v23, %v6096_v51  ;;  %v6168_v34 = vmul.f32 %v9069_v23, %v9069_v23  ;;  %v6230_v63 = vadd.f32 %v6229_v62, %v6167_v49  ;;  %v8677_v43 = vpop.f32.mrb[10].mxu0 }
 0x322   : > { %v9070_v29 = vadd.f32 %v8677_v43, %v13173_v45  ;;  %v5693_v26 = vpop.f32.mrb[11].mxu0 }
 0x323   : > { %v6231_v16 = vadd.f32 %v6230_v63, %v6168_v34  ;;  %v9071_v59 = vadd.f32 %v5693_v26, %v13175_v22  ;;  %v6098_v55 = vadd.f32 %v9068_v38, %v6097_v13 }
 0x324   : > { %6037 = vst [vmem:[%s13219_s10 + $0x58] sm:$0xff] %v9070_v29  ;;  %v6171_v2 = vmul.f32 %v9070_v29, %v9070_v29 }
 0x325   : > { %6036 = vst [vmem:[%s13219_s10 + $0x50] sm:$0xff] %v9071_v59  ;;  %v6099_v21 = vadd.f32 %v9071_v59, %v6098_v55  ;;  %v6170_v41 = vmul.f32 %v9071_v59, %v9071_v59  ;;  %v6232_v50 = vadd.f32 %v6231_v16, %v6169_v53  ;;  %v8680_v35 = vpop.f32.mrb[12].mxu0 }
 0x326   : > { %v9072_v32 = vadd.f32 %v8680_v35, %v13177_v40  ;;  %v5703_v58 = vpop.f32.mrb[13].mxu0 }
 0x327   : > { %v6233_v45 = vadd.f32 %v6232_v50, %v6170_v41  ;;  %v9073_v57 = vadd.f32 %v5703_v58, %v13179_v28  ;;  %v6100_v3 = vadd.f32 %v9070_v29, %v6099_v21 }
 0x328   : > { %6039 = vst [vmem:[%s13219_s10 + $0x68] sm:$0xff] %v9072_v32  ;;  %v6173_v1 = vmul.f32 %v9072_v32, %v9072_v32 }
 0x329   : > { %6038 = vst [vmem:[%s13219_s10 + $0x60] sm:$0xff] %v9073_v57  ;;  %v6101_v22 = vadd.f32 %v9073_v57, %v6100_v3  ;;  %v6172_v33 = vmul.f32 %v9073_v57, %v9073_v57  ;;  %v6234_v24 = vadd.f32 %v6233_v45, %v6171_v2  ;;  %v8683_v61 = vpop.f32.mrb[14].mxu0 }
 0x32a   : > { %v9074_v5 = vadd.f32 %v8683_v61, %v13181_v0  ;;  %v5713_v60 = vpop.f32.mrb[15].mxu0 }
 0x32b   : > { %v6235_v40 = vadd.f32 %v6234_v24, %v6172_v33  ;;  %v9075_v10 = vadd.f32 %v5713_v60, %v13183_v17  ;;  %v6102_v48 = vadd.f32 %v9072_v32, %v6101_v22 }
 0x32c   : > { %6041 = vst [vmem:[%s13219_s10 + $0x78] sm:$0xff] %v9074_v5  ;;  %v6175_v6 = vmul.f32 %v9074_v5, %v9074_v5 }
 0x32d   : > { %6040 = vst [vmem:[%s13219_s10 + $0x70] sm:$0xff] %v9075_v10  ;;  %v6103_v28 = vadd.f32 %v9075_v10, %v6102_v48  ;;  %v6174_v52 = vmul.f32 %v9075_v10, %v9075_v10  ;;  %v6236_v37 = vadd.f32 %v6235_v40, %v6173_v1  ;;  %v8686_v20 = vpop.f32.mrb[16].mxu0 }
 0x32e   : > { %v9076_v30 = vadd.f32 %v8686_v20, %v13185_v56  ;;  %v5723_v47 = vpop.f32.mrb[17].mxu0 }
 0x32f   : > { %v6237_v0 = vadd.f32 %v6236_v37, %v6174_v52  ;;  %v9077_v9 = vadd.f32 %v5723_v47, %v13187_v44  ;;  %v6104_v15 = vadd.f32 %v9074_v5, %v6103_v28 }
 0x330   : > { %6043 = vst [vmem:[%s13219_s10 + $0x88] sm:$0xff] %v9076_v30  ;;  %v6177_v23 = vmul.f32 %v9076_v30, %v9076_v30 }
 0x331   : > { %6042 = vst [vmem:[%s13219_s10 + $0x80] sm:$0xff] %v9077_v9  ;;  %v6105_v17 = vadd.f32 %v9077_v9, %v6104_v15  ;;  %v6176_v14 = vmul.f32 %v9077_v9, %v9077_v9  ;;  %v6238_v38 = vadd.f32 %v6237_v0, %v6175_v6  ;;  %v8689_v39 = vpop.f32.mrb[18].mxu0 }
 0x332   : > { %v9078_v49 = vadd.f32 %v8689_v39, %v13189_v18  ;;  %v5733_v62 = vpop.f32.mrb[19].mxu0 }
 0x333   : > { %v6239_v56 = vadd.f32 %v6238_v38, %v6176_v14  ;;  %v9079_v51 = vadd.f32 %v5733_v62, %v13191_v12  ;;  %v6106_v13 = vadd.f32 %v9076_v30, %v6105_v17 }
 0x334   : > { %6045 = vst [vmem:[%s13219_s10 + $0x98] sm:$0xff] %v9078_v49  ;;  %v6179_v53 = vmul.f32 %v9078_v49, %v9078_v49 }
 0x335   : > { %6044 = vst [vmem:[%s13219_s10 + $0x90] sm:$0xff] %v9079_v51  ;;  %v6107_v44 = vadd.f32 %v9079_v51, %v6106_v13  ;;  %v6178_v34 = vmul.f32 %v9079_v51, %v9079_v51  ;;  %v6240_v63 = vadd.f32 %v6239_v56, %v6177_v23  ;;  %v8692_v43 = vpop.f32.mrb[20].mxu0 }
 0x336   : > { %v9080_v29 = vadd.f32 %v8692_v43, %v13193_v54  ;;  %v5743_v26 = vpop.f32.mrb[21].mxu0 }
 0x337   : > { %v6241_v18 = vadd.f32 %v6240_v63, %v6178_v34  ;;  %v9081_v16 = vadd.f32 %v5743_v26, %v13195_v8  ;;  %v6108_v59 = vadd.f32 %v9078_v49, %v6107_v44 }
 0x338   : > { %6047 = vst [vmem:[%s13219_s10 + $0xa8] sm:$0xff] %v9080_v29  ;;  %v6181_v32 = vmul.f32 %v9080_v29, %v9080_v29 }
 0x339   : > { %6046 = vst [vmem:[%s13219_s10 + $0xa0] sm:$0xff] %v9081_v16  ;;  %v6109_v12 = vadd.f32 %v9081_v16, %v6108_v59  ;;  %v6180_v55 = vmul.f32 %v9081_v16, %v9081_v16  ;;  %v6242_v21 = vadd.f32 %v6241_v18, %v6179_v53  ;;  %v8695_v41 = vpop.f32.mrb[22].mxu0 }
 0x33a   : > { %v9082_v50 = vadd.f32 %v8695_v41, %v13198_v7  ;;  %v5753_v35 = vpop.f32.mrb[23].mxu0 }
 0x33b   : > { %v6243_v54 = vadd.f32 %v6242_v21, %v6180_v55  ;;  %v9083_v58 = vadd.f32 %v5753_v35, %v13200_v4  ;;  %v6110_v2 = vadd.f32 %v9080_v29, %v6109_v12 }
 0x33c   : > { %6049 = vst [vmem:[%s13219_s10 + $0xb8] sm:$0xff] %v9082_v50  ;;  %v6183_v24 = vmul.f32 %v9082_v50, %v9082_v50 }
 0x33d   : > { %6048 = vst [vmem:[%s13219_s10 + $0xb0] sm:$0xff] %v9083_v58  ;;  %v6111_v8 = vadd.f32 %v9083_v58, %v6110_v2  ;;  %v6182_v45 = vmul.f32 %v9083_v58, %v9083_v58  ;;  %v6244_v57 = vadd.f32 %v6243_v54, %v6181_v32  ;;  %v8698_v3 = vpop.f32.mrb[24].mxu0 }
 0x33e   : > { %v9084_v22 = vadd.f32 %v8698_v3, %v13203_v31  ;;  %v5763_v33 = vpop.f32.mrb[25].mxu0 }
 0x33f   : > { %v6245_v7 = vadd.f32 %v6244_v57, %v6182_v45  ;;  %v9085_v61 = vadd.f32 %v5763_v33, %v13205_v42  ;;  %v6112_v5 = vadd.f32 %v9082_v50, %v6111_v8 }
 0x340   : > { %6051 = vst [vmem:[%s13219_s10 + $0xc8] sm:$0xff] %v9084_v22  ;;  %v6185_v28 = vmul.f32 %v9084_v22, %v9084_v22 }
 0x341   : > { %6050 = vst [vmem:[%s13219_s10 + $0xc0] sm:$0xff] %v9085_v61  ;;  %v6113_v4 = vadd.f32 %v9085_v61, %v6112_v5  ;;  %v6184_v60 = vmul.f32 %v9085_v61, %v9085_v61  ;;  %v6246_v1 = vadd.f32 %v6245_v7, %v6183_v24  ;;  %v8701_v40 = vpop.f32.mrb[26].mxu0 }
 0x342   : > { %v9086_v10 = vadd.f32 %v8701_v40, %v13208_v25  ;;  %v5773_v48 = vpop.f32.mrb[27].mxu0 }
 0x343   : > { %v6247_v31 = vadd.f32 %v6246_v1, %v6184_v60  ;;  %v9087_v52 = vadd.f32 %v5773_v48, %v13210_v46  ;;  %v6114_v37 = vadd.f32 %v9084_v22, %v6113_v4 }
 0x344   : > { %6053 = vst [vmem:[%s13219_s10 + $0xd8] sm:$0xff] %v9086_v10  ;;  %v6187_v9 = vmul.f32 %v9086_v10, %v9086_v10 }
 0x345   : > { %6052 = vst [vmem:[%s13219_s10 + $0xd0] sm:$0xff] %v9087_v52  ;;  %v6115_v42 = vadd.f32 %v9087_v52, %v6114_v37  ;;  %v6186_v20 = vmul.f32 %v9087_v52, %v9087_v52  ;;  %v6248_v30 = vadd.f32 %v6247_v31, %v6185_v28  ;;  %v8704_v47 = vpop.f32.mrb[28].mxu0 }
 0x346   : > { %v9088_v6 = vadd.f32 %v8704_v47, %v13212_v19  ;;  %v5783_v0 = vpop.f32.mrb[29].mxu0 }
 0x347   : > { %v6249_v25 = vadd.f32 %v6248_v30, %v6186_v20  ;;  %v9089_v15 = vadd.f32 %v5783_v0, %v13214_v11  ;;  %v6116_v17 = vadd.f32 %v9086_v10, %v6115_v42 }
 0x348   : > { %6055 = vst [vmem:[%s13219_s10 + $0xe8] sm:$0xff] %v9088_v6  ;;  %v6189_v23 = vmul.f32 %v9088_v6, %v9088_v6 }
 0x349   : > { %6054 = vst [vmem:[%s13219_s10 + $0xe0] sm:$0xff] %v9089_v15  ;;  %v6117_v46 = vadd.f32 %v9089_v15, %v6116_v17  ;;  %v6188_v14 = vmul.f32 %v9089_v15, %v9089_v15  ;;  %v6250_v38 = vadd.f32 %v6249_v25, %v6187_v9  ;;  %v8707_v39 = vpop.f32.mrb[30].mxu0 }
 0x34a   : > { %v9090_v49 = vadd.f32 %v8707_v39, %v13221_v36  ;;  %v5793_v62 = vpop.f32.mrb[31].mxu0 }
 0x34b   : > { %v6251_v56 = vadd.f32 %v6250_v38, %v6188_v14  ;;  %v9091_v19 = vadd.f32 %v5793_v62, %v13223_v27  ;;  %v6118_v51 = vadd.f32 %v9088_v6, %v6117_v46 }
 0x34c   : > { %6057 = vst [vmem:[%s13219_s10 + $0xf8] sm:$0xff] %v9090_v49  ;;  %v6191_v43 = vmul.f32 %v9090_v49, %v9090_v49 }
 0x34d   : > { %6056 = vst [vmem:[%s13219_s10 + $0xf0] sm:$0xff] %v9091_v19  ;;  %v6119_v13 = vadd.f32 %v9091_v19, %v6118_v51  ;;  %v6190_v11 = vmul.f32 %v9091_v19, %v9091_v19  ;;  %v6252_v44 = vadd.f32 %v6251_v56, %v6189_v23  ;;  %v8710_v34 = vpop.f32.mrb[32].mxu0 }
 0x34e   : > { %v5803_v63 = vpop.f32.mrb[33].mxu0 }
 0x34f   : > { %v6253_v29 = vadd.f32 %v6252_v44, %v6190_v11  ;;  %v6120_v26 = vadd.f32 %v9090_v49, %v6119_v13 }
 0x351   : > { %v6254_v53 = vadd.f32 %v6253_v29, %v6191_v43  ;;  %v8713_v36 = vpop.f32.mrb[34].mxu0 }
 0x352   : > { %v5813_v18 = vpop.f32.mrb[35].mxu0 }
 0x353   : > { %v8198_v16 = vpop.f32.mrb[32].mxu1 }
 0x354   : > { %v9092_v59 = vadd.f32 %v8710_v34, %v8198_v16  ;;  %v3895_v12 = vpop.f32.mrb[33].mxu1 }
 0x355   : > { %v9093_v27 = vadd.f32 %v5803_v63, %v3895_v12  ;;  %v8716_v55 = vpop.f32.mrb[36].mxu0 }
 0x356   : > { %6059 = vst [vmem:[%s13219_s10 + $0x108] sm:$0xff] %v9092_v59  ;;  %v5823_v21 = vpop.f32.mrb[37].mxu0  ;;  %v6193_v58 = vmul.f32 %v9092_v59, %v9092_v59 }
 0x357   : > { %6058 = vst [vmem:[%s13219_s10 + $0x100] sm:$0xff] %v9093_v27  ;;  %v6121_v41 = vadd.f32 %v9093_v27, %v6120_v26  ;;  %v6192_v50 = vmul.f32 %v9093_v27, %v9093_v27  ;;  %v8201_v35 = vpop.f32.mrb[34].mxu1 }
 0x358   : > { %v9094_v32 = vadd.f32 %v8713_v36, %v8201_v35  ;;  %v3905_v54 = vpop.f32.mrb[35].mxu1 }
 0x359   : > { %v6255_v2 = vadd.f32 %v6254_v53, %v6192_v50  ;;  %v9095_v8 = vadd.f32 %v5813_v18, %v3905_v54  ;;  %v6122_v45 = vadd.f32 %v9092_v59, %v6121_v41  ;;  %v8719_v57 = vpop.f32.mrb[38].mxu0 }
 0x35a   : > { %6061 = vst [vmem:[%s13219_s10 + $0x118] sm:$0xff] %v9094_v32  ;;  %v5833_v3 = vpop.f32.mrb[39].mxu0  ;;  %v6195_v4 = vmul.f32 %v9094_v32, %v9094_v32 }
 0x35b   : > { %6060 = vst [vmem:[%s13219_s10 + $0x110] sm:$0xff] %v9095_v8  ;;  %v6123_v22 = vadd.f32 %v9095_v8, %v6122_v45  ;;  %v6194_v33 = vmul.f32 %v9095_v8, %v9095_v8  ;;  %v6256_v24 = vadd.f32 %v6255_v2, %v6193_v58  ;;  %v8204_v7 = vpop.f32.mrb[36].mxu1 }
 0x35c   : > { %v9096_v61 = vadd.f32 %v8716_v55, %v8204_v7  ;;  %v3915_v5 = vpop.f32.mrb[37].mxu1 }
 0x35d   : > { %v6257_v60 = vadd.f32 %v6256_v24, %v6194_v33  ;;  %v9097_v1 = vadd.f32 %v5823_v21, %v3915_v5  ;;  %v6124_v40 = vadd.f32 %v9094_v32, %v6123_v22  ;;  %v8722_v10 = vpop.f32.mrb[40].mxu0 }
 0x35e   : > { %6063 = vst [vmem:[%s13219_s10 + $0x128] sm:$0xff] %v9096_v61  ;;  %v5843_v48 = vpop.f32.mrb[41].mxu0  ;;  %v6197_v30 = vmul.f32 %v9096_v61, %v9096_v61 }
 0x35f   : > { %6062 = vst [vmem:[%s13219_s10 + $0x120] sm:$0xff] %v9097_v1  ;;  %v6125_v28 = vadd.f32 %v9097_v1, %v6124_v40  ;;  %v6196_v31 = vmul.f32 %v9097_v1, %v9097_v1  ;;  %v6258_v52 = vadd.f32 %v6257_v60, %v6195_v4  ;;  %v8207_v37 = vpop.f32.mrb[38].mxu1 }
 0x360   : > { %v9098_v42 = vadd.f32 %v8719_v57, %v8207_v37  ;;  %v3925_v20 = vpop.f32.mrb[39].mxu1 }
 0x361   : > { %v6259_v47 = vadd.f32 %v6258_v52, %v6196_v31  ;;  %v9099_v6 = vadd.f32 %v5833_v3, %v3925_v20  ;;  %v6126_v0 = vadd.f32 %v9096_v61, %v6125_v28  ;;  %v8725_v9 = vpop.f32.mrb[42].mxu0 }
 0x362   : > { %6065 = vst [vmem:[%s13219_s10 + $0x138] sm:$0xff] %v9098_v42  ;;  %v5853_v25 = vpop.f32.mrb[43].mxu0  ;;  %v6199_v49 = vmul.f32 %v9098_v42, %v9098_v42 }
 0x363   : > { %6064 = vst [vmem:[%s13219_s10 + $0x130] sm:$0xff] %v9099_v6  ;;  %v6127_v15 = vadd.f32 %v9099_v6, %v6126_v0  ;;  %v6198_v17 = vmul.f32 %v9099_v6, %v9099_v6  ;;  %v6260_v46 = vadd.f32 %v6259_v47, %v6197_v30  ;;  %v8210_v14 = vpop.f32.mrb[40].mxu1 }
 0x364   : > { %v9100_v38 = vadd.f32 %v8722_v10, %v8210_v14  ;;  %v3935_v39 = vpop.f32.mrb[41].mxu1 }
 0x365   : > { %v6261_v62 = vadd.f32 %v6260_v46, %v6198_v17  ;;  %v9101_v23 = vadd.f32 %v5843_v48, %v3935_v39  ;;  %v6128_v56 = vadd.f32 %v9098_v42, %v6127_v15  ;;  %v8728_v19 = vpop.f32.mrb[44].mxu0 }
 0x366   : > { %6067 = vst [vmem:[%s13219_s10 + $0x148] sm:$0xff] %v9100_v38  ;;  %v5863_v51 = vpop.f32.mrb[45].mxu0  ;;  %v6201_v29 = vmul.f32 %v9100_v38, %v9100_v38 }
 0x367   : > { %6066 = vst [vmem:[%s13219_s10 + $0x140] sm:$0xff] %v9101_v23  ;;  %v6129_v13 = vadd.f32 %v9101_v23, %v6128_v56  ;;  %v6200_v11 = vmul.f32 %v9101_v23, %v9101_v23  ;;  %v6262_v44 = vadd.f32 %v6261_v62, %v6199_v49  ;;  %v8213_v34 = vpop.f32.mrb[42].mxu1 }
 0x368   : > { %v9102_v63 = vadd.f32 %v8725_v9, %v8213_v34  ;;  %v3945_v43 = vpop.f32.mrb[43].mxu1 }
 0x369   : > { %v6263_v26 = vadd.f32 %v6262_v44, %v6200_v11  ;;  %v9103_v53 = vadd.f32 %v5853_v25, %v3945_v43  ;;  %v6130_v36 = vadd.f32 %v9100_v38, %v6129_v13  ;;  %v8731_v18 = vpop.f32.mrb[46].mxu0 }
 0x36a   : > { %6069 = vst [vmem:[%s13219_s10 + $0x158] sm:$0xff] %v9102_v63  ;;  %v5873_v16 = vpop.f32.mrb[47].mxu0  ;;  %v6203_v50 = vmul.f32 %v9102_v63, %v9102_v63 }
 0x36b   : > { %6068 = vst [vmem:[%s13219_s10 + $0x150] sm:$0xff] %v9103_v53  ;;  %v6131_v59 = vadd.f32 %v9103_v53, %v6130_v36  ;;  %v6202_v12 = vmul.f32 %v9103_v53, %v9103_v53  ;;  %v6264_v27 = vadd.f32 %v6263_v26, %v6201_v29  ;;  %v8216_v55 = vpop.f32.mrb[44].mxu1 }
 0x36c   : > { %v9104_v21 = vadd.f32 %v8728_v19, %v8216_v55  ;;  %v3955_v41 = vpop.f32.mrb[45].mxu1 }
 0x36d   : > { %v6265_v35 = vadd.f32 %v6264_v27, %v6202_v12  ;;  %v9105_v32 = vadd.f32 %v5863_v51, %v3955_v41  ;;  %v6132_v54 = vadd.f32 %v9102_v63, %v6131_v59  ;;  %v8734_v58 = vpop.f32.mrb[48].mxu0 }
 0x36e   : > { %6071 = vst [vmem:[%s13219_s10 + $0x168] sm:$0xff] %v9104_v21  ;;  %v5883_v2 = vpop.f32.mrb[49].mxu0  ;;  %v6205_v24 = vmul.f32 %v9104_v21, %v9104_v21 }
 0x36f   : > { %6070 = vst [vmem:[%s13219_s10 + $0x160] sm:$0xff] %v9105_v32  ;;  %v6133_v8 = vadd.f32 %v9105_v32, %v6132_v54  ;;  %v6204_v45 = vmul.f32 %v9105_v32, %v9105_v32  ;;  %v6266_v57 = vadd.f32 %v6265_v35, %v6203_v50  ;;  %v8219_v3 = vpop.f32.mrb[46].mxu1 }
 0x370   : > { %v9106_v22 = vadd.f32 %v8731_v18, %v8219_v3  ;;  %v3965_v33 = vpop.f32.mrb[47].mxu1 }
 0x371   : > { %v6267_v7 = vadd.f32 %v6266_v57, %v6204_v45  ;;  %v9107_v61 = vadd.f32 %v5873_v16, %v3965_v33  ;;  %v6134_v5 = vadd.f32 %v9104_v21, %v6133_v8  ;;  %v8737_v4 = vpop.f32.mrb[50].mxu0 }
 0x372   : > { %6073 = vst [vmem:[%s13219_s10 + $0x178] sm:$0xff] %v9106_v22  ;;  %v5893_v60 = vpop.f32.mrb[51].mxu0  ;;  %v6207_v52 = vmul.f32 %v9106_v22, %v9106_v22 }
 0x373   : > { %6072 = vst [vmem:[%s13219_s10 + $0x170] sm:$0xff] %v9107_v61  ;;  %v6135_v1 = vadd.f32 %v9107_v61, %v6134_v5  ;;  %v6206_v40 = vmul.f32 %v9107_v61, %v9107_v61  ;;  %v6268_v10 = vadd.f32 %v6267_v7, %v6205_v24  ;;  %v8222_v48 = vpop.f32.mrb[48].mxu1 }
 0x374   : > { %v9108_v28 = vadd.f32 %v8734_v58, %v8222_v48  ;;  %v3975_v31 = vpop.f32.mrb[49].mxu1 }
 0x375   : > { %v6269_v37 = vadd.f32 %v6268_v10, %v6206_v40  ;;  %v9109_v42 = vadd.f32 %v5883_v2, %v3975_v31  ;;  %v6136_v20 = vadd.f32 %v9106_v22, %v6135_v1  ;;  %v8740_v30 = vpop.f32.mrb[52].mxu0 }
 0x376   : > { %6075 = vst [vmem:[%s13219_s10 + $0x188] sm:$0xff] %v9108_v28  ;;  %v5903_v47 = vpop.f32.mrb[53].mxu0  ;;  %v6209_v46 = vmul.f32 %v9108_v28, %v9108_v28 }
 0x377   : > { %6074 = vst [vmem:[%s13219_s10 + $0x180] sm:$0xff] %v9109_v42  ;;  %v6137_v6 = vadd.f32 %v9109_v42, %v6136_v20  ;;  %v6208_v0 = vmul.f32 %v9109_v42, %v9109_v42  ;;  %v6270_v9 = vadd.f32 %v6269_v37, %v6207_v52  ;;  %v8225_v25 = vpop.f32.mrb[50].mxu1 }
 0x378   : > { %v9110_v15 = vadd.f32 %v8737_v4, %v8225_v25  ;;  %v3985_v17 = vpop.f32.mrb[51].mxu1 }
 0x379   : > { %v6271_v14 = vadd.f32 %v6270_v9, %v6208_v0  ;;  %v9111_v38 = vadd.f32 %v5893_v60, %v3985_v17  ;;  %v6138_v39 = vadd.f32 %v9108_v28, %v6137_v6  ;;  %v8743_v49 = vpop.f32.mrb[54].mxu0 }
 0x37a   : > { %6077 = vst [vmem:[%s13219_s10 + $0x198] sm:$0xff] %v9110_v15  ;;  %v5913_v62 = vpop.f32.mrb[55].mxu0  ;;  %v6211_v44 = vmul.f32 %v9110_v15, %v9110_v15 }
 0x37b   : > { %6076 = vst [vmem:[%s13219_s10 + $0x190] sm:$0xff] %v9111_v38  ;;  %v6139_v23 = vadd.f32 %v9111_v38, %v6138_v39  ;;  %v6210_v56 = vmul.f32 %v9111_v38, %v9111_v38  ;;  %v6272_v19 = vadd.f32 %v6271_v14, %v6209_v46  ;;  %v8228_v51 = vpop.f32.mrb[52].mxu1 }
 0x37c   : > { %v9112_v13 = vadd.f32 %v8740_v30, %v8228_v51  ;;  %v3995_v11 = vpop.f32.mrb[53].mxu1 }
 0x37d   : > { %v6273_v34 = vadd.f32 %v6272_v19, %v6210_v56  ;;  %v9113_v63 = vadd.f32 %v5903_v47, %v3995_v11  ;;  %v6140_v43 = vadd.f32 %v9110_v15, %v6139_v23  ;;  %v8746_v29 = vpop.f32.mrb[56].mxu0 }
 0x37e   : > { %6079 = vst [vmem:[%s13219_s10 + $0x1a8] sm:$0xff] %v9112_v13  ;;  %v5923_v26 = vpop.f32.mrb[57].mxu0  ;;  %v6213_v27 = vmul.f32 %v9112_v13, %v9112_v13 }
 0x37f   : > { %6078 = vst [vmem:[%s13219_s10 + $0x1a0] sm:$0xff] %v9113_v63  ;;  %v6141_v53 = vadd.f32 %v9113_v63, %v6140_v43  ;;  %v6212_v36 = vmul.f32 %v9113_v63, %v9113_v63  ;;  %v6274_v18 = vadd.f32 %v6273_v34, %v6211_v44  ;;  %v8231_v16 = vpop.f32.mrb[54].mxu1 }
 0x380   : > { %v9114_v59 = vadd.f32 %v8743_v49, %v8231_v16  ;;  %v4005_v12 = vpop.f32.mrb[55].mxu1 }
 0x381   : > { %v6275_v55 = vadd.f32 %v6274_v18, %v6212_v36  ;;  %v9115_v21 = vadd.f32 %v5913_v62, %v4005_v12  ;;  %v6142_v41 = vadd.f32 %v9112_v13, %v6141_v53  ;;  %v8749_v50 = vpop.f32.mrb[58].mxu0 }
 0x382   : > { %6081 = vst [vmem:[%s13219_s10 + $0x1b8] sm:$0xff] %v9114_v59  ;;  %v5933_v35 = vpop.f32.mrb[59].mxu0  ;;  %v6215_v57 = vmul.f32 %v9114_v59, %v9114_v59 }
 0x383   : > { %6080 = vst [vmem:[%s13219_s10 + $0x1b0] sm:$0xff] %v9115_v21  ;;  %v6143_v32 = vadd.f32 %v9115_v21, %v6142_v41  ;;  %v6214_v54 = vmul.f32 %v9115_v21, %v9115_v21  ;;  %v6276_v58 = vadd.f32 %v6275_v55, %v6213_v27  ;;  %v8234_v2 = vpop.f32.mrb[56].mxu1 }
 0x384   : > { %v9116_v8 = vadd.f32 %v8746_v29, %v8234_v2  ;;  %v4015_v45 = vpop.f32.mrb[57].mxu1 }
 0x385   : > { %v6277_v3 = vadd.f32 %v6276_v58, %v6214_v54  ;;  %v9117_v22 = vadd.f32 %v5923_v26, %v4015_v45  ;;  %v6144_v33 = vadd.f32 %v9114_v59, %v6143_v32  ;;  %v8752_v24 = vpop.f32.mrb[60].mxu0 }
 0x386   : > { %6083 = vst [vmem:[%s13219_s10 + $0x1c8] sm:$0xff] %v9116_v8  ;;  %v5943_v7 = vpop.f32.mrb[61].mxu0  ;;  %v6217_v10 = vmul.f32 %v9116_v8, %v9116_v8 }
 0x387   : > { %6082 = vst [vmem:[%s13219_s10 + $0x1c0] sm:$0xff] %v9117_v22  ;;  %v6145_v61 = vadd.f32 %v9117_v22, %v6144_v33  ;;  %v6216_v5 = vmul.f32 %v9117_v22, %v9117_v22  ;;  %v6278_v4 = vadd.f32 %v6277_v3, %v6215_v57  ;;  %v8237_v60 = vpop.f32.mrb[58].mxu1 }
 0x388   : > { %v9118_v1 = vadd.f32 %v8749_v50, %v8237_v60  ;;  %v4025_v40 = vpop.f32.mrb[59].mxu1 }
 0x389   : > { %v6279_v48 = vadd.f32 %v6278_v4, %v6216_v5  ;;  %v9119_v28 = vadd.f32 %v5933_v35, %v4025_v40  ;;  %v6146_v31 = vadd.f32 %v9116_v8, %v6145_v61  ;;  %v8755_v52 = vpop.f32.mrb[62].mxu0 }
 0x38a   : > { %6085 = vst [vmem:[%s13219_s10 + $0x1d8] sm:$0xff] %v9118_v1  ;;  %v5953_v37 = vpop.f32.mrb[63].mxu0  ;;  %v6219_v9 = vmul.f32 %v9118_v1, %v9118_v1 }
 0x38b   : > { %6084 = vst [vmem:[%s13219_s10 + $0x1d0] sm:$0xff] %v9119_v28  ;;  %v6147_v42 = vadd.f32 %v9119_v28, %v6146_v31  ;;  %v6218_v20 = vmul.f32 %v9119_v28, %v9119_v28  ;;  %v6280_v30 = vadd.f32 %v6279_v48, %v6217_v10  ;;  %v8240_v47 = vpop.f32.mrb[60].mxu1 }
 0x38c   : > { %v9120_v6 = vadd.f32 %v8752_v24, %v8240_v47  ;;  %v4035_v0 = vpop.f32.mrb[61].mxu1 }
 0x38d   : > { %v6281_v25 = vadd.f32 %v6280_v30, %v6218_v20  ;;  %v9121_v15 = vadd.f32 %v5943_v7, %v4035_v0  ;;  %v6148_v17 = vadd.f32 %v9118_v1, %v6147_v42 }
 0x38e   : > { %6087 = vst [vmem:[%s13219_s10 + $0x1e8] sm:$0xff] %v9120_v6  ;;  %v6221_v23 = vmul.f32 %v9120_v6, %v9120_v6 }
 0x38f   : > { %6086 = vst [vmem:[%s13219_s10 + $0x1e0] sm:$0xff] %v9121_v15  ;;  %v6149_v46 = vadd.f32 %v9121_v15, %v6148_v17  ;;  %v6220_v14 = vmul.f32 %v9121_v15, %v9121_v15  ;;  %v6282_v38 = vadd.f32 %v6281_v25, %v6219_v9  ;;  %v8243_v39 = vpop.f32.mrb[62].mxu1 }
 0x390   : > { %v9122_v49 = vadd.f32 %v8755_v52, %v8243_v39  ;;  %v4045_v62 = vpop.f32.mrb[63].mxu1 }
 0x391   : > { %v6283_v56 = vadd.f32 %v6282_v38, %v6220_v14  ;;  %v9123_v19 = vadd.f32 %v5953_v37, %v4045_v62  ;;  %v6150_v51 = vadd.f32 %v9120_v6, %v6149_v46 }
 0x392   : > { %6089 = vst [vmem:[%s13219_s10 + $0x1f8] sm:$0xff] %v9122_v49  ;;  %v6223_v34 = vmul.f32 %v9122_v49, %v9122_v49 }
 0x393   : > { %6088 = vst [vmem:[%s13219_s10 + $0x1f0] sm:$0xff] %v9123_v19  ;;  %v6151_v13 = vadd.f32 %v9123_v19, %v6150_v51  ;;  %v6222_v11 = vmul.f32 %v9123_v19, %v9123_v19  ;;  %v6284_v44 = vadd.f32 %v6283_v56, %v6221_v23 }
 0x395   : > { %v6152_v63 = vadd.f32 %v9122_v49, %v6151_v13  ;;  %v6285_v43 = vadd.f32 %v6284_v44, %v6222_v11 }
 0x397   : > { %v6153_v29 = vrot.slane %v6152_v63, 4  ;;  %v6286_v26 = vadd.f32 %v6285_v43, %v6223_v34 }
 0x399   : > { %v6154_v53 = vadd.f32 %v6153_v29, %v6152_v63  ;;  %v6287_v36 = vrot.slane %v6286_v26, 4 }
 0x39b   : > { %v6155_v18 = vrot.slane %v6154_v53, 2  ;;  %v6288_v16 = vadd.f32 %v6287_v36, %v6286_v26 }
 0x39d   : > { %v6156_v59 = vadd.f32 %v6155_v18, %v6154_v53  ;;  %v6289_v12 = vrot.slane %v6288_v16, 2 }
 0x39f   : > { %v6157_v27 = vrot.slane %v6156_v59, 1  ;;  %v6290_v55 = vadd.f32 %v6289_v12, %v6288_v16 }
 0x3a1   : > { %v6158_v21 = vadd.f32 %v6157_v27, %v6156_v59  ;;  %v6291_v41 = vrot.slane %v6290_v55, 1 }
 0x3a3   : > { %6159 = vst [vmem:[%s473_s17] sm:$0x1] %v6158_v21  ;;  %v6292_v50 = vadd.f32 %v6291_v41, %v6290_v55 }
 0x3a5   : > { %6293 = vst [vmem:[%s483_s21] sm:$0x1] %v6292_v50 }
 0x3a6 PF: > { %s18_s28 = sadd.s32 1, %s9659_s28   ;;  %s14780_s24 = smov %s9651_s26 }
 0x3a7   : > { %p15_p10 = scmp.ge.s32.totalorder %s18_s28, 6   ;;  %s14781_s25 = smov %s9655_s27 }
 0x3a8   : > { %s14782_s26 = smov %s14785_s29  ;;  %s14783_s27 = smov %s14789_s30 }
 0x3a9   :  { %17 = sbr.rel (!%p15_p10) target bundleno = 3 (0x3), region = 108 }

</bundles_post_ra>
